<compile_context>
chip_gen: v7x
topology: tpu7x:2x2x1
jax: 0.10.0
libtpu: 0.0.40
codegen_flags: <defaults>
</compile_context>

<pallas_src>
import jax
import jax.numpy as jnp
from jax import lax
from jax.experimental import pallas as pl
from jax.experimental.pallas import tpu as pltpu


# ------------------------------ tiling policy --------------------------------

def _pick_tile(H, W, max_pix=8192):
    """Grid block (TH, TW): TW a multiple of 128 (or = W), TH a multiple of 8
    (or = H), TH*TW as large as possible up to max_pix pixels per grid step."""
    if W % 128 == 0:
        TW = 128
        for k in range(min(W // 128, 8), 0, -1):
            if W % (128 * k) == 0:
                TW = 128 * k
                break
    else:
        TW = W
    if H % 8 == 0:
        TH = 8
        t = 8
        while t <= H:
            if H % t == 0 and t * TW <= max_pix:
                TH = t
            t += 8
    else:
        TH = H
    return TH, TW


def _sub_tile(TH, TW, target_pix=1024):
    """Register-blocking sub-slice inside a grid block (~1 vreg / channel plane)."""
    TWs = 128 if (TW % 128 == 0 and TW > 128) else TW
    if TH % 8 == 0:
        THs = 8
        t = 8
        while t <= TH:
            if TH % t == 0 and t * TWs <= target_pix:
                THs = t
            t += 8
    else:
        THs = TH
    if TW % 128 == 0:
        while TWs * 2 <= TW and TW % (TWs * 2) == 0 and THs * TWs * 2 <= target_pix:
            TWs *= 2
    return THs, TWs


# --------------------------------- kernel ------------------------------------

def _make_kernel(layer_meta, n_share, branch_layer_counts, c_in,
                 TH, TW, THs, TWs, end_activation):
    n_h = TH // THs
    n_w = TW // TWs
    n_sub = n_h * n_w

    def linear(w_ref, meta, hs):
        # y[o] = sum_c W[o,c] * h[c] + b[o]; weights are SMEM scalars, so every
        # term is a (scalar) x (THs, TWs plane) VPU op — no XLU splats.
        w_off, b_off, ci, co = meta
        outs = []
        for o in range(co):
            base = w_off + o * ci
            acc = hs[0] * w_ref[base]
            for c in range(1, ci):
                acc = acc + hs[c] * w_ref[base + c]
            outs.append(acc + w_ref[b_off + o])
        return outs

    def kernel(w_ref, x_ref, o_ref):
        def process(r0, c0):
            hs = [x_ref[0, c, pl.ds(r0, THs), pl.ds(c0, TWs)].astype(jnp.float32)
                  for c in range(c_in)]
            li = 0
            # Shared trunk: 1x1 conv + relu.
            for _ in range(n_share):
                hs = [jnp.maximum(v, 0.0) for v in linear(w_ref, layer_meta[li], hs)]
                li += 1
            x_shared = hs
            oc = 0
            # Multi-head branches.
            for n_layers in branch_layer_counts:
                feat = x_shared
                for j in range(n_layers):
                    feat = linear(w_ref, layer_meta[li], feat)
                    li += 1
                    if j < n_layers - 1:        # last conv of the head: no act
                        feat = [jnp.maximum(v, 0.0) for v in feat]
                    if j == n_layers - 2:       # residual after the activation
                        feat = [a + b for a, b in zip(feat, x_shared)]
                if end_activation == "tanh":
                    feat = [jnp.tanh(v) for v in feat]
                else:
                    feat = [jnp.maximum(v, 0.0) for v in feat]
                for k, v in enumerate(feat):    # channel-contiguous, lane-dense
                    o_ref[0, oc + k, pl.ds(r0, THs), pl.ds(c0, TWs)] = \
                        v.astype(o_ref.dtype)
                oc += len(feat)

        if n_sub == 1:
            process(0, 0)
        else:
            # Inner register-blocking loop (bounds vreg live ranges).
            def body(i, carry):
                if n_w == 1:
                    rb, cb = i, 0
                elif n_h == 1:
                    rb, cb = 0, i
                else:
                    rb, cb = i // n_w, i % n_w
                r0 = rb * THs if n_h > 1 else 0
                c0 = cb * TWs if n_w > 1 else 0
                if n_h > 1 and THs % 8 == 0:
                    r0 = pl.multiple_of(r0, THs)
                if n_w > 1 and TWs % 128 == 0:
                    c0 = pl.multiple_of(c0, TWs)
                process(r0, c0)
                return carry
            lax.fori_loop(0, n_sub, body, 0, unroll=2)

    return kernel


# --------------------------------- wrapper ------------------------------------

def netg_mlp_multihead_forward(x, share_params, branch_params, y=None,
                               end_activation="tanh"):
    """x: (B, C_in, H, W) NCHW.  Params as produced by init_netg_params."""
    B, c_in, H, W = x.shape
    n_share = len(share_params)
    branch_layer_counts = tuple(len(br) for br in branch_params)
    c_out_total = sum(int(br[-1][0].shape[0]) for br in branch_params)

    # Pack every weight/bias into one flat f32 vector -> a single SMEM operand.
    chunks, layer_meta = [], []
    off = 0

    def _add(Wm, bm):
        nonlocal off
        co, ci = Wm.shape
        layer_meta.append((off, off + co * ci, ci, co))
        chunks.append(jnp.asarray(Wm, jnp.float32).reshape(-1))
        chunks.append(jnp.asarray(bm, jnp.float32).reshape(-1))
        off += co * ci + co

    for (Wm, bm) in share_params:
        _add(Wm, bm)
    for branch in branch_params:
        for (Wm, bm) in branch:
            _add(Wm, bm)
    w_packed = jnp.concatenate(chunks)
    layer_meta = tuple(layer_meta)

    TH, TW = _pick_tile(H, W)
    THs, TWs = _sub_tile(TH, TW)
    grid = (B, H // TH, W // TW)

    in_specs = [
        pl.BlockSpec(memory_space=pltpu.MemorySpace.SMEM),            # params
        pl.BlockSpec((1, c_in, TH, TW), lambda b, i, j: (b, 0, i, j)),  # x (NCHW)
    ]
    out_spec = pl.BlockSpec((1, c_out_total, TH, TW), lambda b, i, j: (b, 0, i, j))

    # Advisory cost estimate for XLA's scheduler.
    macs_per_pixel = sum(int(Wm.size) for (Wm, _) in share_params)
    macs_per_pixel += sum(int(Wm.size) for br in branch_params for (Wm, _) in br)
    itemsize = jnp.dtype(x.dtype).itemsize
    cost = pl.CostEstimate(
        flops=2 * B * H * W * macs_per_pixel,
        transcendentals=B * H * W * c_out_total,
        bytes_accessed=int((x.size + B * c_out_total * H * W) * itemsize
                           + int(w_packed.size) * 4),
    )

    out = pl.pallas_call(
        _make_kernel(layer_meta, n_share, branch_layer_counts, c_in,
                     TH, TW, THs, TWs, end_activation),
        out_shape=jax.ShapeDtypeStruct((B, c_out_total, H, W), x.dtype),
        grid_spec=pltpu.PrefetchScalarGridSpec(
            num_scalar_prefetch=0,
            grid=grid,
            in_specs=in_specs,
            out_specs=out_spec,
        ),
        compiler_params=pltpu.CompilerParams(
            dimension_semantics=("parallel", "parallel", "parallel"),
        ),
        cost_estimate=cost,
    )(w_packed, x)

    if y is not None:
        out = out + y
    return out


# ------------------------- parameter init + reference -------------------------

def _conv_params(key, c_in, c_out, scale=0.2):
    kw, kb = jax.random.split(key)
    Wm = scale * jax.random.normal(kw, (c_out, c_in), dtype=jnp.float32)
    bm = scale * jax.random.normal(kb, (c_out,), dtype=jnp.float32)
    return Wm, bm


def init_netg_params(key, c_in, n_features, nf_out):
    """Mirrors netG_mlp_multihead.__init__ channel bookkeeping (1x1 convs)."""
    share, branches = [], []
    c = c_in
    for c_out in n_features:
        key, sub = jax.random.split(key)
        share.append(_conv_params(sub, c, c_out))
        c = c_out
    for _ in range(nf_out // 3):
        branch = []
        for c_out in n_features[:3]:
            key, sub = jax.random.split(key)
            branch.append(_conv_params(sub, c, c_out))
            c = c_out
        key, sub = jax.random.split(key)
        branch.append(_conv_params(sub, c, 3))  # c intentionally not set to 3
        branches.append(branch)
    return share, branches


def reference_forward(x, share_params, branch_params, y=None):
    hi = jax.lax.Precision.HIGHEST

    def conv1x1(h, Wm, bm):
        return (jnp.einsum("oc,bchw->bohw", Wm, h, precision=hi)
                + bm[None, :, None, None])

    h = x
    for (Wm, bm) in share_params:
        h = jax.nn.relu(conv1x1(h, Wm, bm))
    xs = []
    for branch in branch_params:
        feat = h
        n = len(branch)
        for j, (Wm, bm) in enumerate(branch):
            feat = conv1x1(feat, Wm, bm)
            if j < n - 1:
                feat = jax.nn.relu(feat)
            if j == n - 2:
                feat = feat + h
        xs.append(feat)
    out = jnp.tanh(jnp.concatenate(xs, axis=1))
    if y is not None:
        out = out + y
    return out


if __name__ == "__main__":
    # Config consistent with the module:
    # param = {'c_in': 4, 'c_out': 6, 'n_features': [8, 8, 8],
    #          'non_linearity': 'relu', 'bn': None}, dim=2, end_activation='tanh'
    B, C_IN = 2, 4
    N_FEATURES = [8, 8, 8]
    NF_OUT = 6  # 2 heads x 3 channels

    key = jax.random.PRNGKey(0)
    kx, kp = jax.random.split(key)
    share_params, branch_params = init_netg_params(kp, C_IN, N_FEATURES, NF_OUT)

    # Test 1: tiny spatial extent (single sub-tile path).
    x_small = jax.random.normal(kx, (B, C_IN, 16, 16), dtype=jnp.float32)
    y_out = jax.block_until_ready(
        netg_mlp_multihead_forward(x_small, share_params, branch_params))
    y_ref = reference_forward(x_small, share_params, branch_params)
    assert y_out.shape == (B, NF_OUT, 16, 16)
    err1 = float(jnp.max(jnp.abs(y_out - y_ref)))
    assert jnp.allclose(y_out, y_ref, atol=1e-4, rtol=1e-4), err1

    # Test 2: larger spatial extent (exercises the inner register-blocking loop).
    kx2, _ = jax.random.split(kx)
    x_big = jax.random.normal(kx2, (B, C_IN, 64, 64), dtype=jnp.float32)
    y_out2 = jax.block_until_ready(
        netg_mlp_multihead_forward(x_big, share_params, branch_params))
    y_ref2 = reference_forward(x_big, share_params, branch_params)
    assert y_out2.shape == (B, NF_OUT, 64, 64)
    err2 = float(jnp.max(jnp.abs(y_out2 - y_ref2)))
    assert jnp.allclose(y_out2, y_ref2, atol=1e-4, rtol=1e-4), err2

    print("KERNEL_OK")
</pallas_src>

<mosaic_0001>
module attributes {stable_mosaic.version = 11 : i64} {
  func.func @kernel(%arg0: i32, %arg1: i32, %arg2: i32, %arg3: memref<670xf32, #tpu.memory_space<smem>>, %arg4: memref<1x4x16x16xf32, #tpu.memory_space<vmem>>, %arg5: memref<1x6x16x16xf32, #tpu.memory_space<vmem>>) attributes {dimension_semantics = [#tpu.dimension_semantics<parallel>, #tpu.dimension_semantics<parallel>, #tpu.dimension_semantics<parallel>], iteration_bounds = array<i64: 2, 1, 1>, scalar_prefetch = 0 : i64, scratch_operands = 0 : i64, tpu.core_type = #tpu.core_type<tc>, window_params = [{transform_indices = @transform_0, window_bounds = array<i64: 670>}, {transform_indices = @transform_1, window_bounds = array<i64: 1, 4, 16, 16>}, {transform_indices = @transform_2, window_bounds = array<i64: 1, 6, 16, 16>}]} {
    %c0 = arith.constant 0 : index
    %c0_0 = arith.constant 0 : index
    %c0_1 = arith.constant 0 : index
    %c0_2 = arith.constant 0 : index
    %0 = vector.load %arg4[%c0, %c0_0, %c0_1, %c0_2] : memref<1x4x16x16xf32, #tpu.memory_space<vmem>>, vector<1x1x16x16xf32>
    %1 = vector.shape_cast %0 : vector<1x1x16x16xf32> to vector<16x16xf32>
    %c0_3 = arith.constant 0 : index
    %c1 = arith.constant 1 : index
    %c0_4 = arith.constant 0 : index
    %c0_5 = arith.constant 0 : index
    %2 = vector.load %arg4[%c0_3, %c1, %c0_4, %c0_5] : memref<1x4x16x16xf32, #tpu.memory_space<vmem>>, vector<1x1x16x16xf32>
    %3 = vector.shape_cast %2 : vector<1x1x16x16xf32> to vector<16x16xf32>
    %c0_6 = arith.constant 0 : index
    %c2 = arith.constant 2 : index
    %c0_7 = arith.constant 0 : index
    %c0_8 = arith.constant 0 : index
    %4 = vector.load %arg4[%c0_6, %c2, %c0_7, %c0_8] : memref<1x4x16x16xf32, #tpu.memory_space<vmem>>, vector<1x1x16x16xf32>
    %5 = vector.shape_cast %4 : vector<1x1x16x16xf32> to vector<16x16xf32>
    %c0_9 = arith.constant 0 : index
    %c3 = arith.constant 3 : index
    %c0_10 = arith.constant 0 : index
    %c0_11 = arith.constant 0 : index
    %6 = vector.load %arg4[%c0_9, %c3, %c0_10, %c0_11] : memref<1x4x16x16xf32, #tpu.memory_space<vmem>>, vector<1x1x16x16xf32>
    %7 = vector.shape_cast %6 : vector<1x1x16x16xf32> to vector<16x16xf32>
    %c0_12 = arith.constant 0 : index
    %8 = memref.load %arg3[%c0_12] : memref<670xf32, #tpu.memory_space<smem>>
    %9 = vector.broadcast %8 : f32 to vector<16x16xf32>
    %10 = arith.mulf %1, %9 : vector<16x16xf32>
    %c1_13 = arith.constant 1 : index
    %11 = memref.load %arg3[%c1_13] : memref<670xf32, #tpu.memory_space<smem>>
    %12 = vector.broadcast %11 : f32 to vector<16x16xf32>
    %13 = arith.mulf %3, %12 : vector<16x16xf32>
    %14 = arith.addf %10, %13 : vector<16x16xf32>
    %c2_14 = arith.constant 2 : index
    %15 = memref.load %arg3[%c2_14] : memref<670xf32, #tpu.memory_space<smem>>
    %16 = vector.broadcast %15 : f32 to vector<16x16xf32>
    %17 = arith.mulf %5, %16 : vector<16x16xf32>
    %18 = arith.addf %14, %17 : vector<16x16xf32>
    %c3_15 = arith.constant 3 : index
    %19 = memref.load %arg3[%c3_15] : memref<670xf32, #tpu.memory_space<smem>>
    %20 = vector.broadcast %19 : f32 to vector<16x16xf32>
    %21 = arith.mulf %7, %20 : vector<16x16xf32>
    %22 = arith.addf %18, %21 : vector<16x16xf32>
    %c32 = arith.constant 32 : index
    %23 = memref.load %arg3[%c32] : memref<670xf32, #tpu.memory_space<smem>>
    %24 = vector.broadcast %23 : f32 to vector<16x16xf32>
    %25 = arith.addf %22, %24 : vector<16x16xf32>
    %c4 = arith.constant 4 : index
    %26 = memref.load %arg3[%c4] : memref<670xf32, #tpu.memory_space<smem>>
    %27 = vector.broadcast %26 : f32 to vector<16x16xf32>
    %28 = arith.mulf %1, %27 : vector<16x16xf32>
    %c5 = arith.constant 5 : index
    %29 = memref.load %arg3[%c5] : memref<670xf32, #tpu.memory_space<smem>>
    %30 = vector.broadcast %29 : f32 to vector<16x16xf32>
    %31 = arith.mulf %3, %30 : vector<16x16xf32>
    %32 = arith.addf %28, %31 : vector<16x16xf32>
    %c6 = arith.constant 6 : index
    %33 = memref.load %arg3[%c6] : memref<670xf32, #tpu.memory_space<smem>>
    %34 = vector.broadcast %33 : f32 to vector<16x16xf32>
    %35 = arith.mulf %5, %34 : vector<16x16xf32>
    %36 = arith.addf %32, %35 : vector<16x16xf32>
    %c7 = arith.constant 7 : index
    %37 = memref.load %arg3[%c7] : memref<670xf32, #tpu.memory_space<smem>>
    %38 = vector.broadcast %37 : f32 to vector<16x16xf32>
    %39 = arith.mulf %7, %38 : vector<16x16xf32>
    %40 = arith.addf %36, %39 : vector<16x16xf32>
    %c33 = arith.constant 33 : index
    %41 = memref.load %arg3[%c33] : memref<670xf32, #tpu.memory_space<smem>>
    %42 = vector.broadcast %41 : f32 to vector<16x16xf32>
    %43 = arith.addf %40, %42 : vector<16x16xf32>
    %c8 = arith.constant 8 : index
    %44 = memref.load %arg3[%c8] : memref<670xf32, #tpu.memory_space<smem>>
    %45 = vector.broadcast %44 : f32 to vector<16x16xf32>
    %46 = arith.mulf %1, %45 : vector<16x16xf32>
    %c9 = arith.constant 9 : index
    %47 = memref.load %arg3[%c9] : memref<670xf32, #tpu.memory_space<smem>>
    %48 = vector.broadcast %47 : f32 to vector<16x16xf32>
    %49 = arith.mulf %3, %48 : vector<16x16xf32>
    %50 = arith.addf %46, %49 : vector<16x16xf32>
    %c10 = arith.constant 10 : index
    %51 = memref.load %arg3[%c10] : memref<670xf32, #tpu.memory_space<smem>>
    %52 = vector.broadcast %51 : f32 to vector<16x16xf32>
    %53 = arith.mulf %5, %52 : vector<16x16xf32>
    %54 = arith.addf %50, %53 : vector<16x16xf32>
    %c11 = arith.constant 11 : index
    %55 = memref.load %arg3[%c11] : memref<670xf32, #tpu.memory_space<smem>>
    %56 = vector.broadcast %55 : f32 to vector<16x16xf32>
    %57 = arith.mulf %7, %56 : vector<16x16xf32>
    %58 = arith.addf %54, %57 : vector<16x16xf32>
    %c34 = arith.constant 34 : index
    %59 = memref.load %arg3[%c34] : memref<670xf32, #tpu.memory_space<smem>>
    %60 = vector.broadcast %59 : f32 to vector<16x16xf32>
    %61 = arith.addf %58, %60 : vector<16x16xf32>
    %c12 = arith.constant 12 : index
    %62 = memref.load %arg3[%c12] : memref<670xf32, #tpu.memory_space<smem>>
    %63 = vector.broadcast %62 : f32 to vector<16x16xf32>
    %64 = arith.mulf %1, %63 : vector<16x16xf32>
    %c13 = arith.constant 13 : index
    %65 = memref.load %arg3[%c13] : memref<670xf32, #tpu.memory_space<smem>>
    %66 = vector.broadcast %65 : f32 to vector<16x16xf32>
    %67 = arith.mulf %3, %66 : vector<16x16xf32>
    %68 = arith.addf %64, %67 : vector<16x16xf32>
    %c14 = arith.constant 14 : index
    %69 = memref.load %arg3[%c14] : memref<670xf32, #tpu.memory_space<smem>>
    %70 = vector.broadcast %69 : f32 to vector<16x16xf32>
    %71 = arith.mulf %5, %70 : vector<16x16xf32>
    %72 = arith.addf %68, %71 : vector<16x16xf32>
    %c15 = arith.constant 15 : index
    %73 = memref.load %arg3[%c15] : memref<670xf32, #tpu.memory_space<smem>>
    %74 = vector.broadcast %73 : f32 to vector<16x16xf32>
    %75 = arith.mulf %7, %74 : vector<16x16xf32>
    %76 = arith.addf %72, %75 : vector<16x16xf32>
    %c35 = arith.constant 35 : index
    %77 = memref.load %arg3[%c35] : memref<670xf32, #tpu.memory_space<smem>>
    %78 = vector.broadcast %77 : f32 to vector<16x16xf32>
    %79 = arith.addf %76, %78 : vector<16x16xf32>
    %c16 = arith.constant 16 : index
    %80 = memref.load %arg3[%c16] : memref<670xf32, #tpu.memory_space<smem>>
    %81 = vector.broadcast %80 : f32 to vector<16x16xf32>
    %82 = arith.mulf %1, %81 : vector<16x16xf32>
    %c17 = arith.constant 17 : index
    %83 = memref.load %arg3[%c17] : memref<670xf32, #tpu.memory_space<smem>>
    %84 = vector.broadcast %83 : f32 to vector<16x16xf32>
    %85 = arith.mulf %3, %84 : vector<16x16xf32>
    %86 = arith.addf %82, %85 : vector<16x16xf32>
    %c18 = arith.constant 18 : index
    %87 = memref.load %arg3[%c18] : memref<670xf32, #tpu.memory_space<smem>>
    %88 = vector.broadcast %87 : f32 to vector<16x16xf32>
    %89 = arith.mulf %5, %88 : vector<16x16xf32>
    %90 = arith.addf %86, %89 : vector<16x16xf32>
    %c19 = arith.constant 19 : index
    %91 = memref.load %arg3[%c19] : memref<670xf32, #tpu.memory_space<smem>>
    %92 = vector.broadcast %91 : f32 to vector<16x16xf32>
    %93 = arith.mulf %7, %92 : vector<16x16xf32>
    %94 = arith.addf %90, %93 : vector<16x16xf32>
    %c36 = arith.constant 36 : index
    %95 = memref.load %arg3[%c36] : memref<670xf32, #tpu.memory_space<smem>>
    %96 = vector.broadcast %95 : f32 to vector<16x16xf32>
    %97 = arith.addf %94, %96 : vector<16x16xf32>
    %c20 = arith.constant 20 : index
    %98 = memref.load %arg3[%c20] : memref<670xf32, #tpu.memory_space<smem>>
    %99 = vector.broadcast %98 : f32 to vector<16x16xf32>
    %100 = arith.mulf %1, %99 : vector<16x16xf32>
    %c21 = arith.constant 21 : index
    %101 = memref.load %arg3[%c21] : memref<670xf32, #tpu.memory_space<smem>>
    %102 = vector.broadcast %101 : f32 to vector<16x16xf32>
    %103 = arith.mulf %3, %102 : vector<16x16xf32>
    %104 = arith.addf %100, %103 : vector<16x16xf32>
    %c22 = arith.constant 22 : index
    %105 = memref.load %arg3[%c22] : memref<670xf32, #tpu.memory_space<smem>>
    %106 = vector.broadcast %105 : f32 to vector<16x16xf32>
    %107 = arith.mulf %5, %106 : vector<16x16xf32>
    %108 = arith.addf %104, %107 : vector<16x16xf32>
    %c23 = arith.constant 23 : index
    %109 = memref.load %arg3[%c23] : memref<670xf32, #tpu.memory_space<smem>>
    %110 = vector.broadcast %109 : f32 to vector<16x16xf32>
    %111 = arith.mulf %7, %110 : vector<16x16xf32>
    %112 = arith.addf %108, %111 : vector<16x16xf32>
    %c37 = arith.constant 37 : index
    %113 = memref.load %arg3[%c37] : memref<670xf32, #tpu.memory_space<smem>>
    %114 = vector.broadcast %113 : f32 to vector<16x16xf32>
    %115 = arith.addf %112, %114 : vector<16x16xf32>
    %c24 = arith.constant 24 : index
    %116 = memref.load %arg3[%c24] : memref<670xf32, #tpu.memory_space<smem>>
    %117 = vector.broadcast %116 : f32 to vector<16x16xf32>
    %118 = arith.mulf %1, %117 : vector<16x16xf32>
    %c25 = arith.constant 25 : index
    %119 = memref.load %arg3[%c25] : memref<670xf32, #tpu.memory_space<smem>>
    %120 = vector.broadcast %119 : f32 to vector<16x16xf32>
    %121 = arith.mulf %3, %120 : vector<16x16xf32>
    %122 = arith.addf %118, %121 : vector<16x16xf32>
    %c26 = arith.constant 26 : index
    %123 = memref.load %arg3[%c26] : memref<670xf32, #tpu.memory_space<smem>>
    %124 = vector.broadcast %123 : f32 to vector<16x16xf32>
    %125 = arith.mulf %5, %124 : vector<16x16xf32>
    %126 = arith.addf %122, %125 : vector<16x16xf32>
    %c27 = arith.constant 27 : index
    %127 = memref.load %arg3[%c27] : memref<670xf32, #tpu.memory_space<smem>>
    %128 = vector.broadcast %127 : f32 to vector<16x16xf32>
    %129 = arith.mulf %7, %128 : vector<16x16xf32>
    %130 = arith.addf %126, %129 : vector<16x16xf32>
    %c38 = arith.constant 38 : index
    %131 = memref.load %arg3[%c38] : memref<670xf32, #tpu.memory_space<smem>>
    %132 = vector.broadcast %131 : f32 to vector<16x16xf32>
    %133 = arith.addf %130, %132 : vector<16x16xf32>
    %c28 = arith.constant 28 : index
    %134 = memref.load %arg3[%c28] : memref<670xf32, #tpu.memory_space<smem>>
    %135 = vector.broadcast %134 : f32 to vector<16x16xf32>
    %136 = arith.mulf %1, %135 : vector<16x16xf32>
    %c29 = arith.constant 29 : index
    %137 = memref.load %arg3[%c29] : memref<670xf32, #tpu.memory_space<smem>>
    %138 = vector.broadcast %137 : f32 to vector<16x16xf32>
    %139 = arith.mulf %3, %138 : vector<16x16xf32>
    %140 = arith.addf %136, %139 : vector<16x16xf32>
    %c30 = arith.constant 30 : index
    %141 = memref.load %arg3[%c30] : memref<670xf32, #tpu.memory_space<smem>>
    %142 = vector.broadcast %141 : f32 to vector<16x16xf32>
    %143 = arith.mulf %5, %142 : vector<16x16xf32>
    %144 = arith.addf %140, %143 : vector<16x16xf32>
    %c31 = arith.constant 31 : index
    %145 = memref.load %arg3[%c31] : memref<670xf32, #tpu.memory_space<smem>>
    %146 = vector.broadcast %145 : f32 to vector<16x16xf32>
    %147 = arith.mulf %7, %146 : vector<16x16xf32>
    %148 = arith.addf %144, %147 : vector<16x16xf32>
    %c39 = arith.constant 39 : index
    %149 = memref.load %arg3[%c39] : memref<670xf32, #tpu.memory_space<smem>>
    %150 = vector.broadcast %149 : f32 to vector<16x16xf32>
    %151 = arith.addf %148, %150 : vector<16x16xf32>
    %cst = arith.constant 0.000000e+00 : f32
    %152 = vector.broadcast %cst : f32 to vector<16x16xf32>
    %153 = arith.maximumf %25, %152 : vector<16x16xf32>
    %cst_16 = arith.constant 0.000000e+00 : f32
    %154 = vector.broadcast %cst_16 : f32 to vector<16x16xf32>
    %155 = arith.maximumf %43, %154 : vector<16x16xf32>
    %cst_17 = arith.constant 0.000000e+00 : f32
    %156 = vector.broadcast %cst_17 : f32 to vector<16x16xf32>
    %157 = arith.maximumf %61, %156 : vector<16x16xf32>
    %cst_18 = arith.constant 0.000000e+00 : f32
    %158 = vector.broadcast %cst_18 : f32 to vector<16x16xf32>
    %159 = arith.maximumf %79, %158 : vector<16x16xf32>
    %cst_19 = arith.constant 0.000000e+00 : f32
    %160 = vector.broadcast %cst_19 : f32 to vector<16x16xf32>
    %161 = arith.maximumf %97, %160 : vector<16x16xf32>
    %cst_20 = arith.constant 0.000000e+00 : f32
    %162 = vector.broadcast %cst_20 : f32 to vector<16x16xf32>
    %163 = arith.maximumf %115, %162 : vector<16x16xf32>
    %cst_21 = arith.constant 0.000000e+00 : f32
    %164 = vector.broadcast %cst_21 : f32 to vector<16x16xf32>
    %165 = arith.maximumf %133, %164 : vector<16x16xf32>
    %cst_22 = arith.constant 0.000000e+00 : f32
    %166 = vector.broadcast %cst_22 : f32 to vector<16x16xf32>
    %167 = arith.maximumf %151, %166 : vector<16x16xf32>
    %c40 = arith.constant 40 : index
    %168 = memref.load %arg3[%c40] : memref<670xf32, #tpu.memory_space<smem>>
    %169 = vector.broadcast %168 : f32 to vector<16x16xf32>
    %170 = arith.mulf %153, %169 : vector<16x16xf32>
    %c41 = arith.constant 41 : index
    %171 = memref.load %arg3[%c41] : memref<670xf32, #tpu.memory_space<smem>>
    %172 = vector.broadcast %171 : f32 to vector<16x16xf32>
    %173 = arith.mulf %155, %172 : vector<16x16xf32>
    %174 = arith.addf %170, %173 : vector<16x16xf32>
    %c42 = arith.constant 42 : index
    %175 = memref.load %arg3[%c42] : memref<670xf32, #tpu.memory_space<smem>>
    %176 = vector.broadcast %175 : f32 to vector<16x16xf32>
    %177 = arith.mulf %157, %176 : vector<16x16xf32>
    %178 = arith.addf %174, %177 : vector<16x16xf32>
    %c43 = arith.constant 43 : index
    %179 = memref.load %arg3[%c43] : memref<670xf32, #tpu.memory_space<smem>>
    %180 = vector.broadcast %179 : f32 to vector<16x16xf32>
    %181 = arith.mulf %159, %180 : vector<16x16xf32>
    %182 = arith.addf %178, %181 : vector<16x16xf32>
    %c44 = arith.constant 44 : index
    %183 = memref.load %arg3[%c44] : memref<670xf32, #tpu.memory_space<smem>>
    %184 = vector.broadcast %183 : f32 to vector<16x16xf32>
    %185 = arith.mulf %161, %184 : vector<16x16xf32>
    %186 = arith.addf %182, %185 : vector<16x16xf32>
    %c45 = arith.constant 45 : index
    %187 = memref.load %arg3[%c45] : memref<670xf32, #tpu.memory_space<smem>>
    %188 = vector.broadcast %187 : f32 to vector<16x16xf32>
    %189 = arith.mulf %163, %188 : vector<16x16xf32>
    %190 = arith.addf %186, %189 : vector<16x16xf32>
    %c46 = arith.constant 46 : index
    %191 = memref.load %arg3[%c46] : memref<670xf32, #tpu.memory_space<smem>>
    %192 = vector.broadcast %191 : f32 to vector<16x16xf32>
    %193 = arith.mulf %165, %192 : vector<16x16xf32>
    %194 = arith.addf %190, %193 : vector<16x16xf32>
    %c47 = arith.constant 47 : index
    %195 = memref.load %arg3[%c47] : memref<670xf32, #tpu.memory_space<smem>>
    %196 = vector.broadcast %195 : f32 to vector<16x16xf32>
    %197 = arith.mulf %167, %196 : vector<16x16xf32>
    %198 = arith.addf %194, %197 : vector<16x16xf32>
    %c104 = arith.constant 104 : index
    %199 = memref.load %arg3[%c104] : memref<670xf32, #tpu.memory_space<smem>>
    %200 = vector.broadcast %199 : f32 to vector<16x16xf32>
    %201 = arith.addf %198, %200 : vector<16x16xf32>
    %c48 = arith.constant 48 : index
    %202 = memref.load %arg3[%c48] : memref<670xf32, #tpu.memory_space<smem>>
    %203 = vector.broadcast %202 : f32 to vector<16x16xf32>
    %204 = arith.mulf %153, %203 : vector<16x16xf32>
    %c49 = arith.constant 49 : index
    %205 = memref.load %arg3[%c49] : memref<670xf32, #tpu.memory_space<smem>>
    %206 = vector.broadcast %205 : f32 to vector<16x16xf32>
    %207 = arith.mulf %155, %206 : vector<16x16xf32>
    %208 = arith.addf %204, %207 : vector<16x16xf32>
    %c50 = arith.constant 50 : index
    %209 = memref.load %arg3[%c50] : memref<670xf32, #tpu.memory_space<smem>>
    %210 = vector.broadcast %209 : f32 to vector<16x16xf32>
    %211 = arith.mulf %157, %210 : vector<16x16xf32>
    %212 = arith.addf %208, %211 : vector<16x16xf32>
    %c51 = arith.constant 51 : index
    %213 = memref.load %arg3[%c51] : memref<670xf32, #tpu.memory_space<smem>>
    %214 = vector.broadcast %213 : f32 to vector<16x16xf32>
    %215 = arith.mulf %159, %214 : vector<16x16xf32>
    %216 = arith.addf %212, %215 : vector<16x16xf32>
    %c52 = arith.constant 52 : index
    %217 = memref.load %arg3[%c52] : memref<670xf32, #tpu.memory_space<smem>>
    %218 = vector.broadcast %217 : f32 to vector<16x16xf32>
    %219 = arith.mulf %161, %218 : vector<16x16xf32>
    %220 = arith.addf %216, %219 : vector<16x16xf32>
    %c53 = arith.constant 53 : index
    %221 = memref.load %arg3[%c53] : memref<670xf32, #tpu.memory_space<smem>>
    %222 = vector.broadcast %221 : f32 to vector<16x16xf32>
    %223 = arith.mulf %163, %222 : vector<16x16xf32>
    %224 = arith.addf %220, %223 : vector<16x16xf32>
    %c54 = arith.constant 54 : index
    %225 = memref.load %arg3[%c54] : memref<670xf32, #tpu.memory_space<smem>>
    %226 = vector.broadcast %225 : f32 to vector<16x16xf32>
    %227 = arith.mulf %165, %226 : vector<16x16xf32>
    %228 = arith.addf %224, %227 : vector<16x16xf32>
    %c55 = arith.constant 55 : index
    %229 = memref.load %arg3[%c55] : memref<670xf32, #tpu.memory_space<smem>>
    %230 = vector.broadcast %229 : f32 to vector<16x16xf32>
    %231 = arith.mulf %167, %230 : vector<16x16xf32>
    %232 = arith.addf %228, %231 : vector<16x16xf32>
    %c105 = arith.constant 105 : index
    %233 = memref.load %arg3[%c105] : memref<670xf32, #tpu.memory_space<smem>>
    %234 = vector.broadcast %233 : f32 to vector<16x16xf32>
    %235 = arith.addf %232, %234 : vector<16x16xf32>
    %c56 = arith.constant 56 : index
    %236 = memref.load %arg3[%c56] : memref<670xf32, #tpu.memory_space<smem>>
    %237 = vector.broadcast %236 : f32 to vector<16x16xf32>
    %238 = arith.mulf %153, %237 : vector<16x16xf32>
    %c57 = arith.constant 57 : index
    %239 = memref.load %arg3[%c57] : memref<670xf32, #tpu.memory_space<smem>>
    %240 = vector.broadcast %239 : f32 to vector<16x16xf32>
    %241 = arith.mulf %155, %240 : vector<16x16xf32>
    %242 = arith.addf %238, %241 : vector<16x16xf32>
    %c58 = arith.constant 58 : index
    %243 = memref.load %arg3[%c58] : memref<670xf32, #tpu.memory_space<smem>>
    %244 = vector.broadcast %243 : f32 to vector<16x16xf32>
    %245 = arith.mulf %157, %244 : vector<16x16xf32>
    %246 = arith.addf %242, %245 : vector<16x16xf32>
    %c59 = arith.constant 59 : index
    %247 = memref.load %arg3[%c59] : memref<670xf32, #tpu.memory_space<smem>>
    %248 = vector.broadcast %247 : f32 to vector<16x16xf32>
    %249 = arith.mulf %159, %248 : vector<16x16xf32>
    %250 = arith.addf %246, %249 : vector<16x16xf32>
    %c60 = arith.constant 60 : index
    %251 = memref.load %arg3[%c60] : memref<670xf32, #tpu.memory_space<smem>>
    %252 = vector.broadcast %251 : f32 to vector<16x16xf32>
    %253 = arith.mulf %161, %252 : vector<16x16xf32>
    %254 = arith.addf %250, %253 : vector<16x16xf32>
    %c61 = arith.constant 61 : index
    %255 = memref.load %arg3[%c61] : memref<670xf32, #tpu.memory_space<smem>>
    %256 = vector.broadcast %255 : f32 to vector<16x16xf32>
    %257 = arith.mulf %163, %256 : vector<16x16xf32>
    %258 = arith.addf %254, %257 : vector<16x16xf32>
    %c62 = arith.constant 62 : index
    %259 = memref.load %arg3[%c62] : memref<670xf32, #tpu.memory_space<smem>>
    %260 = vector.broadcast %259 : f32 to vector<16x16xf32>
    %261 = arith.mulf %165, %260 : vector<16x16xf32>
    %262 = arith.addf %258, %261 : vector<16x16xf32>
    %c63 = arith.constant 63 : index
    %263 = memref.load %arg3[%c63] : memref<670xf32, #tpu.memory_space<smem>>
    %264 = vector.broadcast %263 : f32 to vector<16x16xf32>
    %265 = arith.mulf %167, %264 : vector<16x16xf32>
    %266 = arith.addf %262, %265 : vector<16x16xf32>
    %c106 = arith.constant 106 : index
    %267 = memref.load %arg3[%c106] : memref<670xf32, #tpu.memory_space<smem>>
    %268 = vector.broadcast %267 : f32 to vector<16x16xf32>
    %269 = arith.addf %266, %268 : vector<16x16xf32>
    %c64 = arith.constant 64 : index
    %270 = memref.load %arg3[%c64] : memref<670xf32, #tpu.memory_space<smem>>
    %271 = vector.broadcast %270 : f32 to vector<16x16xf32>
    %272 = arith.mulf %153, %271 : vector<16x16xf32>
    %c65 = arith.constant 65 : index
    %273 = memref.load %arg3[%c65] : memref<670xf32, #tpu.memory_space<smem>>
    %274 = vector.broadcast %273 : f32 to vector<16x16xf32>
    %275 = arith.mulf %155, %274 : vector<16x16xf32>
    %276 = arith.addf %272, %275 : vector<16x16xf32>
    %c66 = arith.constant 66 : index
    %277 = memref.load %arg3[%c66] : memref<670xf32, #tpu.memory_space<smem>>
    %278 = vector.broadcast %277 : f32 to vector<16x16xf32>
    %279 = arith.mulf %157, %278 : vector<16x16xf32>
    %280 = arith.addf %276, %279 : vector<16x16xf32>
    %c67 = arith.constant 67 : index
    %281 = memref.load %arg3[%c67] : memref<670xf32, #tpu.memory_space<smem>>
    %282 = vector.broadcast %281 : f32 to vector<16x16xf32>
    %283 = arith.mulf %159, %282 : vector<16x16xf32>
    %284 = arith.addf %280, %283 : vector<16x16xf32>
    %c68 = arith.constant 68 : index
    %285 = memref.load %arg3[%c68] : memref<670xf32, #tpu.memory_space<smem>>
    %286 = vector.broadcast %285 : f32 to vector<16x16xf32>
    %287 = arith.mulf %161, %286 : vector<16x16xf32>
    %288 = arith.addf %284, %287 : vector<16x16xf32>
    %c69 = arith.constant 69 : index
    %289 = memref.load %arg3[%c69] : memref<670xf32, #tpu.memory_space<smem>>
    %290 = vector.broadcast %289 : f32 to vector<16x16xf32>
    %291 = arith.mulf %163, %290 : vector<16x16xf32>
    %292 = arith.addf %288, %291 : vector<16x16xf32>
    %c70 = arith.constant 70 : index
    %293 = memref.load %arg3[%c70] : memref<670xf32, #tpu.memory_space<smem>>
    %294 = vector.broadcast %293 : f32 to vector<16x16xf32>
    %295 = arith.mulf %165, %294 : vector<16x16xf32>
    %296 = arith.addf %292, %295 : vector<16x16xf32>
    %c71 = arith.constant 71 : index
    %297 = memref.load %arg3[%c71] : memref<670xf32, #tpu.memory_space<smem>>
    %298 = vector.broadcast %297 : f32 to vector<16x16xf32>
    %299 = arith.mulf %167, %298 : vector<16x16xf32>
    %300 = arith.addf %296, %299 : vector<16x16xf32>
    %c107 = arith.constant 107 : index
    %301 = memref.load %arg3[%c107] : memref<670xf32, #tpu.memory_space<smem>>
    %302 = vector.broadcast %301 : f32 to vector<16x16xf32>
    %303 = arith.addf %300, %302 : vector<16x16xf32>
    %c72 = arith.constant 72 : index
    %304 = memref.load %arg3[%c72] : memref<670xf32, #tpu.memory_space<smem>>
    %305 = vector.broadcast %304 : f32 to vector<16x16xf32>
    %306 = arith.mulf %153, %305 : vector<16x16xf32>
    %c73 = arith.constant 73 : index
    %307 = memref.load %arg3[%c73] : memref<670xf32, #tpu.memory_space<smem>>
    %308 = vector.broadcast %307 : f32 to vector<16x16xf32>
    %309 = arith.mulf %155, %308 : vector<16x16xf32>
    %310 = arith.addf %306, %309 : vector<16x16xf32>
    %c74 = arith.constant 74 : index
    %311 = memref.load %arg3[%c74] : memref<670xf32, #tpu.memory_space<smem>>
    %312 = vector.broadcast %311 : f32 to vector<16x16xf32>
    %313 = arith.mulf %157, %312 : vector<16x16xf32>
    %314 = arith.addf %310, %313 : vector<16x16xf32>
    %c75 = arith.constant 75 : index
    %315 = memref.load %arg3[%c75] : memref<670xf32, #tpu.memory_space<smem>>
    %316 = vector.broadcast %315 : f32 to vector<16x16xf32>
    %317 = arith.mulf %159, %316 : vector<16x16xf32>
    %318 = arith.addf %314, %317 : vector<16x16xf32>
    %c76 = arith.constant 76 : index
    %319 = memref.load %arg3[%c76] : memref<670xf32, #tpu.memory_space<smem>>
    %320 = vector.broadcast %319 : f32 to vector<16x16xf32>
    %321 = arith.mulf %161, %320 : vector<16x16xf32>
    %322 = arith.addf %318, %321 : vector<16x16xf32>
    %c77 = arith.constant 77 : index
    %323 = memref.load %arg3[%c77] : memref<670xf32, #tpu.memory_space<smem>>
    %324 = vector.broadcast %323 : f32 to vector<16x16xf32>
    %325 = arith.mulf %163, %324 : vector<16x16xf32>
    %326 = arith.addf %322, %325 : vector<16x16xf32>
    %c78 = arith.constant 78 : index
    %327 = memref.load %arg3[%c78] : memref<670xf32, #tpu.memory_space<smem>>
    %328 = vector.broadcast %327 : f32 to vector<16x16xf32>
    %329 = arith.mulf %165, %328 : vector<16x16xf32>
    %330 = arith.addf %326, %329 : vector<16x16xf32>
    %c79 = arith.constant 79 : index
    %331 = memref.load %arg3[%c79] : memref<670xf32, #tpu.memory_space<smem>>
    %332 = vector.broadcast %331 : f32 to vector<16x16xf32>
    %333 = arith.mulf %167, %332 : vector<16x16xf32>
    %334 = arith.addf %330, %333 : vector<16x16xf32>
    %c108 = arith.constant 108 : index
    %335 = memref.load %arg3[%c108] : memref<670xf32, #tpu.memory_space<smem>>
    %336 = vector.broadcast %335 : f32 to vector<16x16xf32>
    %337 = arith.addf %334, %336 : vector<16x16xf32>
    %c80 = arith.constant 80 : index
    %338 = memref.load %arg3[%c80] : memref<670xf32, #tpu.memory_space<smem>>
    %339 = vector.broadcast %338 : f32 to vector<16x16xf32>
    %340 = arith.mulf %153, %339 : vector<16x16xf32>
    %c81 = arith.constant 81 : index
    %341 = memref.load %arg3[%c81] : memref<670xf32, #tpu.memory_space<smem>>
    %342 = vector.broadcast %341 : f32 to vector<16x16xf32>
    %343 = arith.mulf %155, %342 : vector<16x16xf32>
    %344 = arith.addf %340, %343 : vector<16x16xf32>
    %c82 = arith.constant 82 : index
    %345 = memref.load %arg3[%c82] : memref<670xf32, #tpu.memory_space<smem>>
    %346 = vector.broadcast %345 : f32 to vector<16x16xf32>
    %347 = arith.mulf %157, %346 : vector<16x16xf32>
    %348 = arith.addf %344, %347 : vector<16x16xf32>
    %c83 = arith.constant 83 : index
    %349 = memref.load %arg3[%c83] : memref<670xf32, #tpu.memory_space<smem>>
    %350 = vector.broadcast %349 : f32 to vector<16x16xf32>
    %351 = arith.mulf %159, %350 : vector<16x16xf32>
    %352 = arith.addf %348, %351 : vector<16x16xf32>
    %c84 = arith.constant 84 : index
    %353 = memref.load %arg3[%c84] : memref<670xf32, #tpu.memory_space<smem>>
    %354 = vector.broadcast %353 : f32 to vector<16x16xf32>
    %355 = arith.mulf %161, %354 : vector<16x16xf32>
    %356 = arith.addf %352, %355 : vector<16x16xf32>
    %c85 = arith.constant 85 : index
    %357 = memref.load %arg3[%c85] : memref<670xf32, #tpu.memory_space<smem>>
    %358 = vector.broadcast %357 : f32 to vector<16x16xf32>
    %359 = arith.mulf %163, %358 : vector<16x16xf32>
    %360 = arith.addf %356, %359 : vector<16x16xf32>
    %c86 = arith.constant 86 : index
    %361 = memref.load %arg3[%c86] : memref<670xf32, #tpu.memory_space<smem>>
    %362 = vector.broadcast %361 : f32 to vector<16x16xf32>
    %363 = arith.mulf %165, %362 : vector<16x16xf32>
    %364 = arith.addf %360, %363 : vector<16x16xf32>
    %c87 = arith.constant 87 : index
    %365 = memref.load %arg3[%c87] : memref<670xf32, #tpu.memory_space<smem>>
    %366 = vector.broadcast %365 : f32 to vector<16x16xf32>
    %367 = arith.mulf %167, %366 : vector<16x16xf32>
    %368 = arith.addf %364, %367 : vector<16x16xf32>
    %c109 = arith.constant 109 : index
    %369 = memref.load %arg3[%c109] : memref<670xf32, #tpu.memory_space<smem>>
    %370 = vector.broadcast %369 : f32 to vector<16x16xf32>
    %371 = arith.addf %368, %370 : vector<16x16xf32>
    %c88 = arith.constant 88 : index
    %372 = memref.load %arg3[%c88] : memref<670xf32, #tpu.memory_space<smem>>
    %373 = vector.broadcast %372 : f32 to vector<16x16xf32>
    %374 = arith.mulf %153, %373 : vector<16x16xf32>
    %c89 = arith.constant 89 : index
    %375 = memref.load %arg3[%c89] : memref<670xf32, #tpu.memory_space<smem>>
    %376 = vector.broadcast %375 : f32 to vector<16x16xf32>
    %377 = arith.mulf %155, %376 : vector<16x16xf32>
    %378 = arith.addf %374, %377 : vector<16x16xf32>
    %c90 = arith.constant 90 : index
    %379 = memref.load %arg3[%c90] : memref<670xf32, #tpu.memory_space<smem>>
    %380 = vector.broadcast %379 : f32 to vector<16x16xf32>
    %381 = arith.mulf %157, %380 : vector<16x16xf32>
    %382 = arith.addf %378, %381 : vector<16x16xf32>
    %c91 = arith.constant 91 : index
    %383 = memref.load %arg3[%c91] : memref<670xf32, #tpu.memory_space<smem>>
    %384 = vector.broadcast %383 : f32 to vector<16x16xf32>
    %385 = arith.mulf %159, %384 : vector<16x16xf32>
    %386 = arith.addf %382, %385 : vector<16x16xf32>
    %c92 = arith.constant 92 : index
    %387 = memref.load %arg3[%c92] : memref<670xf32, #tpu.memory_space<smem>>
    %388 = vector.broadcast %387 : f32 to vector<16x16xf32>
    %389 = arith.mulf %161, %388 : vector<16x16xf32>
    %390 = arith.addf %386, %389 : vector<16x16xf32>
    %c93 = arith.constant 93 : index
    %391 = memref.load %arg3[%c93] : memref<670xf32, #tpu.memory_space<smem>>
    %392 = vector.broadcast %391 : f32 to vector<16x16xf32>
    %393 = arith.mulf %163, %392 : vector<16x16xf32>
    %394 = arith.addf %390, %393 : vector<16x16xf32>
    %c94 = arith.constant 94 : index
    %395 = memref.load %arg3[%c94] : memref<670xf32, #tpu.memory_space<smem>>
    %396 = vector.broadcast %395 : f32 to vector<16x16xf32>
    %397 = arith.mulf %165, %396 : vector<16x16xf32>
    %398 = arith.addf %394, %397 : vector<16x16xf32>
    %c95 = arith.constant 95 : index
    %399 = memref.load %arg3[%c95] : memref<670xf32, #tpu.memory_space<smem>>
    %400 = vector.broadcast %399 : f32 to vector<16x16xf32>
    %401 = arith.mulf %167, %400 : vector<16x16xf32>
    %402 = arith.addf %398, %401 : vector<16x16xf32>
    %c110 = arith.constant 110 : index
    %403 = memref.load %arg3[%c110] : memref<670xf32, #tpu.memory_space<smem>>
    %404 = vector.broadcast %403 : f32 to vector<16x16xf32>
    %405 = arith.addf %402, %404 : vector<16x16xf32>
    %c96 = arith.constant 96 : index
    %406 = memref.load %arg3[%c96] : memref<670xf32, #tpu.memory_space<smem>>
    %407 = vector.broadcast %406 : f32 to vector<16x16xf32>
    %408 = arith.mulf %153, %407 : vector<16x16xf32>
    %c97 = arith.constant 97 : index
    %409 = memref.load %arg3[%c97] : memref<670xf32, #tpu.memory_space<smem>>
    %410 = vector.broadcast %409 : f32 to vector<16x16xf32>
    %411 = arith.mulf %155, %410 : vector<16x16xf32>
    %412 = arith.addf %408, %411 : vector<16x16xf32>
    %c98 = arith.constant 98 : index
    %413 = memref.load %arg3[%c98] : memref<670xf32, #tpu.memory_space<smem>>
    %414 = vector.broadcast %413 : f32 to vector<16x16xf32>
    %415 = arith.mulf %157, %414 : vector<16x16xf32>
    %416 = arith.addf %412, %415 : vector<16x16xf32>
    %c99 = arith.constant 99 : index
    %417 = memref.load %arg3[%c99] : memref<670xf32, #tpu.memory_space<smem>>
    %418 = vector.broadcast %417 : f32 to vector<16x16xf32>
    %419 = arith.mulf %159, %418 : vector<16x16xf32>
    %420 = arith.addf %416, %419 : vector<16x16xf32>
    %c100 = arith.constant 100 : index
    %421 = memref.load %arg3[%c100] : memref<670xf32, #tpu.memory_space<smem>>
    %422 = vector.broadcast %421 : f32 to vector<16x16xf32>
    %423 = arith.mulf %161, %422 : vector<16x16xf32>
    %424 = arith.addf %420, %423 : vector<16x16xf32>
    %c101 = arith.constant 101 : index
    %425 = memref.load %arg3[%c101] : memref<670xf32, #tpu.memory_space<smem>>
    %426 = vector.broadcast %425 : f32 to vector<16x16xf32>
    %427 = arith.mulf %163, %426 : vector<16x16xf32>
    %428 = arith.addf %424, %427 : vector<16x16xf32>
    %c102 = arith.constant 102 : index
    %429 = memref.load %arg3[%c102] : memref<670xf32, #tpu.memory_space<smem>>
    %430 = vector.broadcast %429 : f32 to vector<16x16xf32>
    %431 = arith.mulf %165, %430 : vector<16x16xf32>
    %432 = arith.addf %428, %431 : vector<16x16xf32>
    %c103 = arith.constant 103 : index
    %433 = memref.load %arg3[%c103] : memref<670xf32, #tpu.memory_space<smem>>
    %434 = vector.broadcast %433 : f32 to vector<16x16xf32>
    %435 = arith.mulf %167, %434 : vector<16x16xf32>
    %436 = arith.addf %432, %435 : vector<16x16xf32>
    %c111 = arith.constant 111 : index
    %437 = memref.load %arg3[%c111] : memref<670xf32, #tpu.memory_space<smem>>
    %438 = vector.broadcast %437 : f32 to vector<16x16xf32>
    %439 = arith.addf %436, %438 : vector<16x16xf32>
    %cst_23 = arith.constant 0.000000e+00 : f32
    %440 = vector.broadcast %cst_23 : f32 to vector<16x16xf32>
    %441 = arith.maximumf %201, %440 : vector<16x16xf32>
    %cst_24 = arith.constant 0.000000e+00 : f32
    %442 = vector.broadcast %cst_24 : f32 to vector<16x16xf32>
    %443 = arith.maximumf %235, %442 : vector<16x16xf32>
    %cst_25 = arith.constant 0.000000e+00 : f32
    %444 = vector.broadcast %cst_25 : f32 to vector<16x16xf32>
    %445 = arith.maximumf %269, %444 : vector<16x16xf32>
    %cst_26 = arith.constant 0.000000e+00 : f32
    %446 = vector.broadcast %cst_26 : f32 to vector<16x16xf32>
    %447 = arith.maximumf %303, %446 : vector<16x16xf32>
    %cst_27 = arith.constant 0.000000e+00 : f32
    %448 = vector.broadcast %cst_27 : f32 to vector<16x16xf32>
    %449 = arith.maximumf %337, %448 : vector<16x16xf32>
    %cst_28 = arith.constant 0.000000e+00 : f32
    %450 = vector.broadcast %cst_28 : f32 to vector<16x16xf32>
    %451 = arith.maximumf %371, %450 : vector<16x16xf32>
    %cst_29 = arith.constant 0.000000e+00 : f32
    %452 = vector.broadcast %cst_29 : f32 to vector<16x16xf32>
    %453 = arith.maximumf %405, %452 : vector<16x16xf32>
    %cst_30 = arith.constant 0.000000e+00 : f32
    %454 = vector.broadcast %cst_30 : f32 to vector<16x16xf32>
    %455 = arith.maximumf %439, %454 : vector<16x16xf32>
    %c112 = arith.constant 112 : index
    %456 = memref.load %arg3[%c112] : memref<670xf32, #tpu.memory_space<smem>>
    %457 = vector.broadcast %456 : f32 to vector<16x16xf32>
    %458 = arith.mulf %441, %457 : vector<16x16xf32>
    %c113 = arith.constant 113 : index
    %459 = memref.load %arg3[%c113] : memref<670xf32, #tpu.memory_space<smem>>
    %460 = vector.broadcast %459 : f32 to vector<16x16xf32>
    %461 = arith.mulf %443, %460 : vector<16x16xf32>
    %462 = arith.addf %458, %461 : vector<16x16xf32>
    %c114 = arith.constant 114 : index
    %463 = memref.load %arg3[%c114] : memref<670xf32, #tpu.memory_space<smem>>
    %464 = vector.broadcast %463 : f32 to vector<16x16xf32>
    %465 = arith.mulf %445, %464 : vector<16x16xf32>
    %466 = arith.addf %462, %465 : vector<16x16xf32>
    %c115 = arith.constant 115 : index
    %467 = memref.load %arg3[%c115] : memref<670xf32, #tpu.memory_space<smem>>
    %468 = vector.broadcast %467 : f32 to vector<16x16xf32>
    %469 = arith.mulf %447, %468 : vector<16x16xf32>
    %470 = arith.addf %466, %469 : vector<16x16xf32>
    %c116 = arith.constant 116 : index
    %471 = memref.load %arg3[%c116] : memref<670xf32, #tpu.memory_space<smem>>
    %472 = vector.broadcast %471 : f32 to vector<16x16xf32>
    %473 = arith.mulf %449, %472 : vector<16x16xf32>
    %474 = arith.addf %470, %473 : vector<16x16xf32>
    %c117 = arith.constant 117 : index
    %475 = memref.load %arg3[%c117] : memref<670xf32, #tpu.memory_space<smem>>
    %476 = vector.broadcast %475 : f32 to vector<16x16xf32>
    %477 = arith.mulf %451, %476 : vector<16x16xf32>
    %478 = arith.addf %474, %477 : vector<16x16xf32>
    %c118 = arith.constant 118 : index
    %479 = memref.load %arg3[%c118] : memref<670xf32, #tpu.memory_space<smem>>
    %480 = vector.broadcast %479 : f32 to vector<16x16xf32>
    %481 = arith.mulf %453, %480 : vector<16x16xf32>
    %482 = arith.addf %478, %481 : vector<16x16xf32>
    %c119 = arith.constant 119 : index
    %483 = memref.load %arg3[%c119] : memref<670xf32, #tpu.memory_space<smem>>
    %484 = vector.broadcast %483 : f32 to vector<16x16xf32>
    %485 = arith.mulf %455, %484 : vector<16x16xf32>
    %486 = arith.addf %482, %485 : vector<16x16xf32>
    %c176 = arith.constant 176 : index
    %487 = memref.load %arg3[%c176] : memref<670xf32, #tpu.memory_space<smem>>
    %488 = vector.broadcast %487 : f32 to vector<16x16xf32>
    %489 = arith.addf %486, %488 : vector<16x16xf32>
    %c120 = arith.constant 120 : index
    %490 = memref.load %arg3[%c120] : memref<670xf32, #tpu.memory_space<smem>>
    %491 = vector.broadcast %490 : f32 to vector<16x16xf32>
    %492 = arith.mulf %441, %491 : vector<16x16xf32>
    %c121 = arith.constant 121 : index
    %493 = memref.load %arg3[%c121] : memref<670xf32, #tpu.memory_space<smem>>
    %494 = vector.broadcast %493 : f32 to vector<16x16xf32>
    %495 = arith.mulf %443, %494 : vector<16x16xf32>
    %496 = arith.addf %492, %495 : vector<16x16xf32>
    %c122 = arith.constant 122 : index
    %497 = memref.load %arg3[%c122] : memref<670xf32, #tpu.memory_space<smem>>
    %498 = vector.broadcast %497 : f32 to vector<16x16xf32>
    %499 = arith.mulf %445, %498 : vector<16x16xf32>
    %500 = arith.addf %496, %499 : vector<16x16xf32>
    %c123 = arith.constant 123 : index
    %501 = memref.load %arg3[%c123] : memref<670xf32, #tpu.memory_space<smem>>
    %502 = vector.broadcast %501 : f32 to vector<16x16xf32>
    %503 = arith.mulf %447, %502 : vector<16x16xf32>
    %504 = arith.addf %500, %503 : vector<16x16xf32>
    %c124 = arith.constant 124 : index
    %505 = memref.load %arg3[%c124] : memref<670xf32, #tpu.memory_space<smem>>
    %506 = vector.broadcast %505 : f32 to vector<16x16xf32>
    %507 = arith.mulf %449, %506 : vector<16x16xf32>
    %508 = arith.addf %504, %507 : vector<16x16xf32>
    %c125 = arith.constant 125 : index
    %509 = memref.load %arg3[%c125] : memref<670xf32, #tpu.memory_space<smem>>
    %510 = vector.broadcast %509 : f32 to vector<16x16xf32>
    %511 = arith.mulf %451, %510 : vector<16x16xf32>
    %512 = arith.addf %508, %511 : vector<16x16xf32>
    %c126 = arith.constant 126 : index
    %513 = memref.load %arg3[%c126] : memref<670xf32, #tpu.memory_space<smem>>
    %514 = vector.broadcast %513 : f32 to vector<16x16xf32>
    %515 = arith.mulf %453, %514 : vector<16x16xf32>
    %516 = arith.addf %512, %515 : vector<16x16xf32>
    %c127 = arith.constant 127 : index
    %517 = memref.load %arg3[%c127] : memref<670xf32, #tpu.memory_space<smem>>
    %518 = vector.broadcast %517 : f32 to vector<16x16xf32>
    %519 = arith.mulf %455, %518 : vector<16x16xf32>
    %520 = arith.addf %516, %519 : vector<16x16xf32>
    %c177 = arith.constant 177 : index
    %521 = memref.load %arg3[%c177] : memref<670xf32, #tpu.memory_space<smem>>
    %522 = vector.broadcast %521 : f32 to vector<16x16xf32>
    %523 = arith.addf %520, %522 : vector<16x16xf32>
    %c128 = arith.constant 128 : index
    %524 = memref.load %arg3[%c128] : memref<670xf32, #tpu.memory_space<smem>>
    %525 = vector.broadcast %524 : f32 to vector<16x16xf32>
    %526 = arith.mulf %441, %525 : vector<16x16xf32>
    %c129 = arith.constant 129 : index
    %527 = memref.load %arg3[%c129] : memref<670xf32, #tpu.memory_space<smem>>
    %528 = vector.broadcast %527 : f32 to vector<16x16xf32>
    %529 = arith.mulf %443, %528 : vector<16x16xf32>
    %530 = arith.addf %526, %529 : vector<16x16xf32>
    %c130 = arith.constant 130 : index
    %531 = memref.load %arg3[%c130] : memref<670xf32, #tpu.memory_space<smem>>
    %532 = vector.broadcast %531 : f32 to vector<16x16xf32>
    %533 = arith.mulf %445, %532 : vector<16x16xf32>
    %534 = arith.addf %530, %533 : vector<16x16xf32>
    %c131 = arith.constant 131 : index
    %535 = memref.load %arg3[%c131] : memref<670xf32, #tpu.memory_space<smem>>
    %536 = vector.broadcast %535 : f32 to vector<16x16xf32>
    %537 = arith.mulf %447, %536 : vector<16x16xf32>
    %538 = arith.addf %534, %537 : vector<16x16xf32>
    %c132 = arith.constant 132 : index
    %539 = memref.load %arg3[%c132] : memref<670xf32, #tpu.memory_space<smem>>
    %540 = vector.broadcast %539 : f32 to vector<16x16xf32>
    %541 = arith.mulf %449, %540 : vector<16x16xf32>
    %542 = arith.addf %538, %541 : vector<16x16xf32>
    %c133 = arith.constant 133 : index
    %543 = memref.load %arg3[%c133] : memref<670xf32, #tpu.memory_space<smem>>
    %544 = vector.broadcast %543 : f32 to vector<16x16xf32>
    %545 = arith.mulf %451, %544 : vector<16x16xf32>
    %546 = arith.addf %542, %545 : vector<16x16xf32>
    %c134 = arith.constant 134 : index
    %547 = memref.load %arg3[%c134] : memref<670xf32, #tpu.memory_space<smem>>
    %548 = vector.broadcast %547 : f32 to vector<16x16xf32>
    %549 = arith.mulf %453, %548 : vector<16x16xf32>
    %550 = arith.addf %546, %549 : vector<16x16xf32>
    %c135 = arith.constant 135 : index
    %551 = memref.load %arg3[%c135] : memref<670xf32, #tpu.memory_space<smem>>
    %552 = vector.broadcast %551 : f32 to vector<16x16xf32>
    %553 = arith.mulf %455, %552 : vector<16x16xf32>
    %554 = arith.addf %550, %553 : vector<16x16xf32>
    %c178 = arith.constant 178 : index
    %555 = memref.load %arg3[%c178] : memref<670xf32, #tpu.memory_space<smem>>
    %556 = vector.broadcast %555 : f32 to vector<16x16xf32>
    %557 = arith.addf %554, %556 : vector<16x16xf32>
    %c136 = arith.constant 136 : index
    %558 = memref.load %arg3[%c136] : memref<670xf32, #tpu.memory_space<smem>>
    %559 = vector.broadcast %558 : f32 to vector<16x16xf32>
    %560 = arith.mulf %441, %559 : vector<16x16xf32>
    %c137 = arith.constant 137 : index
    %561 = memref.load %arg3[%c137] : memref<670xf32, #tpu.memory_space<smem>>
    %562 = vector.broadcast %561 : f32 to vector<16x16xf32>
    %563 = arith.mulf %443, %562 : vector<16x16xf32>
    %564 = arith.addf %560, %563 : vector<16x16xf32>
    %c138 = arith.constant 138 : index
    %565 = memref.load %arg3[%c138] : memref<670xf32, #tpu.memory_space<smem>>
    %566 = vector.broadcast %565 : f32 to vector<16x16xf32>
    %567 = arith.mulf %445, %566 : vector<16x16xf32>
    %568 = arith.addf %564, %567 : vector<16x16xf32>
    %c139 = arith.constant 139 : index
    %569 = memref.load %arg3[%c139] : memref<670xf32, #tpu.memory_space<smem>>
    %570 = vector.broadcast %569 : f32 to vector<16x16xf32>
    %571 = arith.mulf %447, %570 : vector<16x16xf32>
    %572 = arith.addf %568, %571 : vector<16x16xf32>
    %c140 = arith.constant 140 : index
    %573 = memref.load %arg3[%c140] : memref<670xf32, #tpu.memory_space<smem>>
    %574 = vector.broadcast %573 : f32 to vector<16x16xf32>
    %575 = arith.mulf %449, %574 : vector<16x16xf32>
    %576 = arith.addf %572, %575 : vector<16x16xf32>
    %c141 = arith.constant 141 : index
    %577 = memref.load %arg3[%c141] : memref<670xf32, #tpu.memory_space<smem>>
    %578 = vector.broadcast %577 : f32 to vector<16x16xf32>
    %579 = arith.mulf %451, %578 : vector<16x16xf32>
    %580 = arith.addf %576, %579 : vector<16x16xf32>
    %c142 = arith.constant 142 : index
    %581 = memref.load %arg3[%c142] : memref<670xf32, #tpu.memory_space<smem>>
    %582 = vector.broadcast %581 : f32 to vector<16x16xf32>
    %583 = arith.mulf %453, %582 : vector<16x16xf32>
    %584 = arith.addf %580, %583 : vector<16x16xf32>
    %c143 = arith.constant 143 : index
    %585 = memref.load %arg3[%c143] : memref<670xf32, #tpu.memory_space<smem>>
    %586 = vector.broadcast %585 : f32 to vector<16x16xf32>
    %587 = arith.mulf %455, %586 : vector<16x16xf32>
    %588 = arith.addf %584, %587 : vector<16x16xf32>
    %c179 = arith.constant 179 : index
    %589 = memref.load %arg3[%c179] : memref<670xf32, #tpu.memory_space<smem>>
    %590 = vector.broadcast %589 : f32 to vector<16x16xf32>
    %591 = arith.addf %588, %590 : vector<16x16xf32>
    %c144 = arith.constant 144 : index
    %592 = memref.load %arg3[%c144] : memref<670xf32, #tpu.memory_space<smem>>
    %593 = vector.broadcast %592 : f32 to vector<16x16xf32>
    %594 = arith.mulf %441, %593 : vector<16x16xf32>
    %c145 = arith.constant 145 : index
    %595 = memref.load %arg3[%c145] : memref<670xf32, #tpu.memory_space<smem>>
    %596 = vector.broadcast %595 : f32 to vector<16x16xf32>
    %597 = arith.mulf %443, %596 : vector<16x16xf32>
    %598 = arith.addf %594, %597 : vector<16x16xf32>
    %c146 = arith.constant 146 : index
    %599 = memref.load %arg3[%c146] : memref<670xf32, #tpu.memory_space<smem>>
    %600 = vector.broadcast %599 : f32 to vector<16x16xf32>
    %601 = arith.mulf %445, %600 : vector<16x16xf32>
    %602 = arith.addf %598, %601 : vector<16x16xf32>
    %c147 = arith.constant 147 : index
    %603 = memref.load %arg3[%c147] : memref<670xf32, #tpu.memory_space<smem>>
    %604 = vector.broadcast %603 : f32 to vector<16x16xf32>
    %605 = arith.mulf %447, %604 : vector<16x16xf32>
    %606 = arith.addf %602, %605 : vector<16x16xf32>
    %c148 = arith.constant 148 : index
    %607 = memref.load %arg3[%c148] : memref<670xf32, #tpu.memory_space<smem>>
    %608 = vector.broadcast %607 : f32 to vector<16x16xf32>
    %609 = arith.mulf %449, %608 : vector<16x16xf32>
    %610 = arith.addf %606, %609 : vector<16x16xf32>
    %c149 = arith.constant 149 : index
    %611 = memref.load %arg3[%c149] : memref<670xf32, #tpu.memory_space<smem>>
    %612 = vector.broadcast %611 : f32 to vector<16x16xf32>
    %613 = arith.mulf %451, %612 : vector<16x16xf32>
    %614 = arith.addf %610, %613 : vector<16x16xf32>
    %c150 = arith.constant 150 : index
    %615 = memref.load %arg3[%c150] : memref<670xf32, #tpu.memory_space<smem>>
    %616 = vector.broadcast %615 : f32 to vector<16x16xf32>
    %617 = arith.mulf %453, %616 : vector<16x16xf32>
    %618 = arith.addf %614, %617 : vector<16x16xf32>
    %c151 = arith.constant 151 : index
    %619 = memref.load %arg3[%c151] : memref<670xf32, #tpu.memory_space<smem>>
    %620 = vector.broadcast %619 : f32 to vector<16x16xf32>
    %621 = arith.mulf %455, %620 : vector<16x16xf32>
    %622 = arith.addf %618, %621 : vector<16x16xf32>
    %c180 = arith.constant 180 : index
    %623 = memref.load %arg3[%c180] : memref<670xf32, #tpu.memory_space<smem>>
    %624 = vector.broadcast %623 : f32 to vector<16x16xf32>
    %625 = arith.addf %622, %624 : vector<16x16xf32>
    %c152 = arith.constant 152 : index
    %626 = memref.load %arg3[%c152] : memref<670xf32, #tpu.memory_space<smem>>
    %627 = vector.broadcast %626 : f32 to vector<16x16xf32>
    %628 = arith.mulf %441, %627 : vector<16x16xf32>
    %c153 = arith.constant 153 : index
    %629 = memref.load %arg3[%c153] : memref<670xf32, #tpu.memory_space<smem>>
    %630 = vector.broadcast %629 : f32 to vector<16x16xf32>
    %631 = arith.mulf %443, %630 : vector<16x16xf32>
    %632 = arith.addf %628, %631 : vector<16x16xf32>
    %c154 = arith.constant 154 : index
    %633 = memref.load %arg3[%c154] : memref<670xf32, #tpu.memory_space<smem>>
    %634 = vector.broadcast %633 : f32 to vector<16x16xf32>
    %635 = arith.mulf %445, %634 : vector<16x16xf32>
    %636 = arith.addf %632, %635 : vector<16x16xf32>
    %c155 = arith.constant 155 : index
    %637 = memref.load %arg3[%c155] : memref<670xf32, #tpu.memory_space<smem>>
    %638 = vector.broadcast %637 : f32 to vector<16x16xf32>
    %639 = arith.mulf %447, %638 : vector<16x16xf32>
    %640 = arith.addf %636, %639 : vector<16x16xf32>
    %c156 = arith.constant 156 : index
    %641 = memref.load %arg3[%c156] : memref<670xf32, #tpu.memory_space<smem>>
    %642 = vector.broadcast %641 : f32 to vector<16x16xf32>
    %643 = arith.mulf %449, %642 : vector<16x16xf32>
    %644 = arith.addf %640, %643 : vector<16x16xf32>
    %c157 = arith.constant 157 : index
    %645 = memref.load %arg3[%c157] : memref<670xf32, #tpu.memory_space<smem>>
    %646 = vector.broadcast %645 : f32 to vector<16x16xf32>
    %647 = arith.mulf %451, %646 : vector<16x16xf32>
    %648 = arith.addf %644, %647 : vector<16x16xf32>
    %c158 = arith.constant 158 : index
    %649 = memref.load %arg3[%c158] : memref<670xf32, #tpu.memory_space<smem>>
    %650 = vector.broadcast %649 : f32 to vector<16x16xf32>
    %651 = arith.mulf %453, %650 : vector<16x16xf32>
    %652 = arith.addf %648, %651 : vector<16x16xf32>
    %c159 = arith.constant 159 : index
    %653 = memref.load %arg3[%c159] : memref<670xf32, #tpu.memory_space<smem>>
    %654 = vector.broadcast %653 : f32 to vector<16x16xf32>
    %655 = arith.mulf %455, %654 : vector<16x16xf32>
    %656 = arith.addf %652, %655 : vector<16x16xf32>
    %c181 = arith.constant 181 : index
    %657 = memref.load %arg3[%c181] : memref<670xf32, #tpu.memory_space<smem>>
    %658 = vector.broadcast %657 : f32 to vector<16x16xf32>
    %659 = arith.addf %656, %658 : vector<16x16xf32>
    %c160 = arith.constant 160 : index
    %660 = memref.load %arg3[%c160] : memref<670xf32, #tpu.memory_space<smem>>
    %661 = vector.broadcast %660 : f32 to vector<16x16xf32>
    %662 = arith.mulf %441, %661 : vector<16x16xf32>
    %c161 = arith.constant 161 : index
    %663 = memref.load %arg3[%c161] : memref<670xf32, #tpu.memory_space<smem>>
    %664 = vector.broadcast %663 : f32 to vector<16x16xf32>
    %665 = arith.mulf %443, %664 : vector<16x16xf32>
    %666 = arith.addf %662, %665 : vector<16x16xf32>
    %c162 = arith.constant 162 : index
    %667 = memref.load %arg3[%c162] : memref<670xf32, #tpu.memory_space<smem>>
    %668 = vector.broadcast %667 : f32 to vector<16x16xf32>
    %669 = arith.mulf %445, %668 : vector<16x16xf32>
    %670 = arith.addf %666, %669 : vector<16x16xf32>
    %c163 = arith.constant 163 : index
    %671 = memref.load %arg3[%c163] : memref<670xf32, #tpu.memory_space<smem>>
    %672 = vector.broadcast %671 : f32 to vector<16x16xf32>
    %673 = arith.mulf %447, %672 : vector<16x16xf32>
    %674 = arith.addf %670, %673 : vector<16x16xf32>
    %c164 = arith.constant 164 : index
    %675 = memref.load %arg3[%c164] : memref<670xf32, #tpu.memory_space<smem>>
    %676 = vector.broadcast %675 : f32 to vector<16x16xf32>
    %677 = arith.mulf %449, %676 : vector<16x16xf32>
    %678 = arith.addf %674, %677 : vector<16x16xf32>
    %c165 = arith.constant 165 : index
    %679 = memref.load %arg3[%c165] : memref<670xf32, #tpu.memory_space<smem>>
    %680 = vector.broadcast %679 : f32 to vector<16x16xf32>
    %681 = arith.mulf %451, %680 : vector<16x16xf32>
    %682 = arith.addf %678, %681 : vector<16x16xf32>
    %c166 = arith.constant 166 : index
    %683 = memref.load %arg3[%c166] : memref<670xf32, #tpu.memory_space<smem>>
    %684 = vector.broadcast %683 : f32 to vector<16x16xf32>
    %685 = arith.mulf %453, %684 : vector<16x16xf32>
    %686 = arith.addf %682, %685 : vector<16x16xf32>
    %c167 = arith.constant 167 : index
    %687 = memref.load %arg3[%c167] : memref<670xf32, #tpu.memory_space<smem>>
    %688 = vector.broadcast %687 : f32 to vector<16x16xf32>
    %689 = arith.mulf %455, %688 : vector<16x16xf32>
    %690 = arith.addf %686, %689 : vector<16x16xf32>
    %c182 = arith.constant 182 : index
    %691 = memref.load %arg3[%c182] : memref<670xf32, #tpu.memory_space<smem>>
    %692 = vector.broadcast %691 : f32 to vector<16x16xf32>
    %693 = arith.addf %690, %692 : vector<16x16xf32>
    %c168 = arith.constant 168 : index
    %694 = memref.load %arg3[%c168] : memref<670xf32, #tpu.memory_space<smem>>
    %695 = vector.broadcast %694 : f32 to vector<16x16xf32>
    %696 = arith.mulf %441, %695 : vector<16x16xf32>
    %c169 = arith.constant 169 : index
    %697 = memref.load %arg3[%c169] : memref<670xf32, #tpu.memory_space<smem>>
    %698 = vector.broadcast %697 : f32 to vector<16x16xf32>
    %699 = arith.mulf %443, %698 : vector<16x16xf32>
    %700 = arith.addf %696, %699 : vector<16x16xf32>
    %c170 = arith.constant 170 : index
    %701 = memref.load %arg3[%c170] : memref<670xf32, #tpu.memory_space<smem>>
    %702 = vector.broadcast %701 : f32 to vector<16x16xf32>
    %703 = arith.mulf %445, %702 : vector<16x16xf32>
    %704 = arith.addf %700, %703 : vector<16x16xf32>
    %c171 = arith.constant 171 : index
    %705 = memref.load %arg3[%c171] : memref<670xf32, #tpu.memory_space<smem>>
    %706 = vector.broadcast %705 : f32 to vector<16x16xf32>
    %707 = arith.mulf %447, %706 : vector<16x16xf32>
    %708 = arith.addf %704, %707 : vector<16x16xf32>
    %c172 = arith.constant 172 : index
    %709 = memref.load %arg3[%c172] : memref<670xf32, #tpu.memory_space<smem>>
    %710 = vector.broadcast %709 : f32 to vector<16x16xf32>
    %711 = arith.mulf %449, %710 : vector<16x16xf32>
    %712 = arith.addf %708, %711 : vector<16x16xf32>
    %c173 = arith.constant 173 : index
    %713 = memref.load %arg3[%c173] : memref<670xf32, #tpu.memory_space<smem>>
    %714 = vector.broadcast %713 : f32 to vector<16x16xf32>
    %715 = arith.mulf %451, %714 : vector<16x16xf32>
    %716 = arith.addf %712, %715 : vector<16x16xf32>
    %c174 = arith.constant 174 : index
    %717 = memref.load %arg3[%c174] : memref<670xf32, #tpu.memory_space<smem>>
    %718 = vector.broadcast %717 : f32 to vector<16x16xf32>
    %719 = arith.mulf %453, %718 : vector<16x16xf32>
    %720 = arith.addf %716, %719 : vector<16x16xf32>
    %c175 = arith.constant 175 : index
    %721 = memref.load %arg3[%c175] : memref<670xf32, #tpu.memory_space<smem>>
    %722 = vector.broadcast %721 : f32 to vector<16x16xf32>
    %723 = arith.mulf %455, %722 : vector<16x16xf32>
    %724 = arith.addf %720, %723 : vector<16x16xf32>
    %c183 = arith.constant 183 : index
    %725 = memref.load %arg3[%c183] : memref<670xf32, #tpu.memory_space<smem>>
    %726 = vector.broadcast %725 : f32 to vector<16x16xf32>
    %727 = arith.addf %724, %726 : vector<16x16xf32>
    %cst_31 = arith.constant 0.000000e+00 : f32
    %728 = vector.broadcast %cst_31 : f32 to vector<16x16xf32>
    %729 = arith.maximumf %489, %728 : vector<16x16xf32>
    %cst_32 = arith.constant 0.000000e+00 : f32
    %730 = vector.broadcast %cst_32 : f32 to vector<16x16xf32>
    %731 = arith.maximumf %523, %730 : vector<16x16xf32>
    %cst_33 = arith.constant 0.000000e+00 : f32
    %732 = vector.broadcast %cst_33 : f32 to vector<16x16xf32>
    %733 = arith.maximumf %557, %732 : vector<16x16xf32>
    %cst_34 = arith.constant 0.000000e+00 : f32
    %734 = vector.broadcast %cst_34 : f32 to vector<16x16xf32>
    %735 = arith.maximumf %591, %734 : vector<16x16xf32>
    %cst_35 = arith.constant 0.000000e+00 : f32
    %736 = vector.broadcast %cst_35 : f32 to vector<16x16xf32>
    %737 = arith.maximumf %625, %736 : vector<16x16xf32>
    %cst_36 = arith.constant 0.000000e+00 : f32
    %738 = vector.broadcast %cst_36 : f32 to vector<16x16xf32>
    %739 = arith.maximumf %659, %738 : vector<16x16xf32>
    %cst_37 = arith.constant 0.000000e+00 : f32
    %740 = vector.broadcast %cst_37 : f32 to vector<16x16xf32>
    %741 = arith.maximumf %693, %740 : vector<16x16xf32>
    %cst_38 = arith.constant 0.000000e+00 : f32
    %742 = vector.broadcast %cst_38 : f32 to vector<16x16xf32>
    %743 = arith.maximumf %727, %742 : vector<16x16xf32>
    %c184 = arith.constant 184 : index
    %744 = memref.load %arg3[%c184] : memref<670xf32, #tpu.memory_space<smem>>
    %745 = vector.broadcast %744 : f32 to vector<16x16xf32>
    %746 = arith.mulf %729, %745 : vector<16x16xf32>
    %c185 = arith.constant 185 : index
    %747 = memref.load %arg3[%c185] : memref<670xf32, #tpu.memory_space<smem>>
    %748 = vector.broadcast %747 : f32 to vector<16x16xf32>
    %749 = arith.mulf %731, %748 : vector<16x16xf32>
    %750 = arith.addf %746, %749 : vector<16x16xf32>
    %c186 = arith.constant 186 : index
    %751 = memref.load %arg3[%c186] : memref<670xf32, #tpu.memory_space<smem>>
    %752 = vector.broadcast %751 : f32 to vector<16x16xf32>
    %753 = arith.mulf %733, %752 : vector<16x16xf32>
    %754 = arith.addf %750, %753 : vector<16x16xf32>
    %c187 = arith.constant 187 : index
    %755 = memref.load %arg3[%c187] : memref<670xf32, #tpu.memory_space<smem>>
    %756 = vector.broadcast %755 : f32 to vector<16x16xf32>
    %757 = arith.mulf %735, %756 : vector<16x16xf32>
    %758 = arith.addf %754, %757 : vector<16x16xf32>
    %c188 = arith.constant 188 : index
    %759 = memref.load %arg3[%c188] : memref<670xf32, #tpu.memory_space<smem>>
    %760 = vector.broadcast %759 : f32 to vector<16x16xf32>
    %761 = arith.mulf %737, %760 : vector<16x16xf32>
    %762 = arith.addf %758, %761 : vector<16x16xf32>
    %c189 = arith.constant 189 : index
    %763 = memref.load %arg3[%c189] : memref<670xf32, #tpu.memory_space<smem>>
    %764 = vector.broadcast %763 : f32 to vector<16x16xf32>
    %765 = arith.mulf %739, %764 : vector<16x16xf32>
    %766 = arith.addf %762, %765 : vector<16x16xf32>
    %c190 = arith.constant 190 : index
    %767 = memref.load %arg3[%c190] : memref<670xf32, #tpu.memory_space<smem>>
    %768 = vector.broadcast %767 : f32 to vector<16x16xf32>
    %769 = arith.mulf %741, %768 : vector<16x16xf32>
    %770 = arith.addf %766, %769 : vector<16x16xf32>
    %c191 = arith.constant 191 : index
    %771 = memref.load %arg3[%c191] : memref<670xf32, #tpu.memory_space<smem>>
    %772 = vector.broadcast %771 : f32 to vector<16x16xf32>
    %773 = arith.mulf %743, %772 : vector<16x16xf32>
    %774 = arith.addf %770, %773 : vector<16x16xf32>
    %c248 = arith.constant 248 : index
    %775 = memref.load %arg3[%c248] : memref<670xf32, #tpu.memory_space<smem>>
    %776 = vector.broadcast %775 : f32 to vector<16x16xf32>
    %777 = arith.addf %774, %776 : vector<16x16xf32>
    %c192 = arith.constant 192 : index
    %778 = memref.load %arg3[%c192] : memref<670xf32, #tpu.memory_space<smem>>
    %779 = vector.broadcast %778 : f32 to vector<16x16xf32>
    %780 = arith.mulf %729, %779 : vector<16x16xf32>
    %c193 = arith.constant 193 : index
    %781 = memref.load %arg3[%c193] : memref<670xf32, #tpu.memory_space<smem>>
    %782 = vector.broadcast %781 : f32 to vector<16x16xf32>
    %783 = arith.mulf %731, %782 : vector<16x16xf32>
    %784 = arith.addf %780, %783 : vector<16x16xf32>
    %c194 = arith.constant 194 : index
    %785 = memref.load %arg3[%c194] : memref<670xf32, #tpu.memory_space<smem>>
    %786 = vector.broadcast %785 : f32 to vector<16x16xf32>
    %787 = arith.mulf %733, %786 : vector<16x16xf32>
    %788 = arith.addf %784, %787 : vector<16x16xf32>
    %c195 = arith.constant 195 : index
    %789 = memref.load %arg3[%c195] : memref<670xf32, #tpu.memory_space<smem>>
    %790 = vector.broadcast %789 : f32 to vector<16x16xf32>
    %791 = arith.mulf %735, %790 : vector<16x16xf32>
    %792 = arith.addf %788, %791 : vector<16x16xf32>
    %c196 = arith.constant 196 : index
    %793 = memref.load %arg3[%c196] : memref<670xf32, #tpu.memory_space<smem>>
    %794 = vector.broadcast %793 : f32 to vector<16x16xf32>
    %795 = arith.mulf %737, %794 : vector<16x16xf32>
    %796 = arith.addf %792, %795 : vector<16x16xf32>
    %c197 = arith.constant 197 : index
    %797 = memref.load %arg3[%c197] : memref<670xf32, #tpu.memory_space<smem>>
    %798 = vector.broadcast %797 : f32 to vector<16x16xf32>
    %799 = arith.mulf %739, %798 : vector<16x16xf32>
    %800 = arith.addf %796, %799 : vector<16x16xf32>
    %c198 = arith.constant 198 : index
    %801 = memref.load %arg3[%c198] : memref<670xf32, #tpu.memory_space<smem>>
    %802 = vector.broadcast %801 : f32 to vector<16x16xf32>
    %803 = arith.mulf %741, %802 : vector<16x16xf32>
    %804 = arith.addf %800, %803 : vector<16x16xf32>
    %c199 = arith.constant 199 : index
    %805 = memref.load %arg3[%c199] : memref<670xf32, #tpu.memory_space<smem>>
    %806 = vector.broadcast %805 : f32 to vector<16x16xf32>
    %807 = arith.mulf %743, %806 : vector<16x16xf32>
    %808 = arith.addf %804, %807 : vector<16x16xf32>
    %c249 = arith.constant 249 : index
    %809 = memref.load %arg3[%c249] : memref<670xf32, #tpu.memory_space<smem>>
    %810 = vector.broadcast %809 : f32 to vector<16x16xf32>
    %811 = arith.addf %808, %810 : vector<16x16xf32>
    %c200 = arith.constant 200 : index
    %812 = memref.load %arg3[%c200] : memref<670xf32, #tpu.memory_space<smem>>
    %813 = vector.broadcast %812 : f32 to vector<16x16xf32>
    %814 = arith.mulf %729, %813 : vector<16x16xf32>
    %c201 = arith.constant 201 : index
    %815 = memref.load %arg3[%c201] : memref<670xf32, #tpu.memory_space<smem>>
    %816 = vector.broadcast %815 : f32 to vector<16x16xf32>
    %817 = arith.mulf %731, %816 : vector<16x16xf32>
    %818 = arith.addf %814, %817 : vector<16x16xf32>
    %c202 = arith.constant 202 : index
    %819 = memref.load %arg3[%c202] : memref<670xf32, #tpu.memory_space<smem>>
    %820 = vector.broadcast %819 : f32 to vector<16x16xf32>
    %821 = arith.mulf %733, %820 : vector<16x16xf32>
    %822 = arith.addf %818, %821 : vector<16x16xf32>
    %c203 = arith.constant 203 : index
    %823 = memref.load %arg3[%c203] : memref<670xf32, #tpu.memory_space<smem>>
    %824 = vector.broadcast %823 : f32 to vector<16x16xf32>
    %825 = arith.mulf %735, %824 : vector<16x16xf32>
    %826 = arith.addf %822, %825 : vector<16x16xf32>
    %c204 = arith.constant 204 : index
    %827 = memref.load %arg3[%c204] : memref<670xf32, #tpu.memory_space<smem>>
    %828 = vector.broadcast %827 : f32 to vector<16x16xf32>
    %829 = arith.mulf %737, %828 : vector<16x16xf32>
    %830 = arith.addf %826, %829 : vector<16x16xf32>
    %c205 = arith.constant 205 : index
    %831 = memref.load %arg3[%c205] : memref<670xf32, #tpu.memory_space<smem>>
    %832 = vector.broadcast %831 : f32 to vector<16x16xf32>
    %833 = arith.mulf %739, %832 : vector<16x16xf32>
    %834 = arith.addf %830, %833 : vector<16x16xf32>
    %c206 = arith.constant 206 : index
    %835 = memref.load %arg3[%c206] : memref<670xf32, #tpu.memory_space<smem>>
    %836 = vector.broadcast %835 : f32 to vector<16x16xf32>
    %837 = arith.mulf %741, %836 : vector<16x16xf32>
    %838 = arith.addf %834, %837 : vector<16x16xf32>
    %c207 = arith.constant 207 : index
    %839 = memref.load %arg3[%c207] : memref<670xf32, #tpu.memory_space<smem>>
    %840 = vector.broadcast %839 : f32 to vector<16x16xf32>
    %841 = arith.mulf %743, %840 : vector<16x16xf32>
    %842 = arith.addf %838, %841 : vector<16x16xf32>
    %c250 = arith.constant 250 : index
    %843 = memref.load %arg3[%c250] : memref<670xf32, #tpu.memory_space<smem>>
    %844 = vector.broadcast %843 : f32 to vector<16x16xf32>
    %845 = arith.addf %842, %844 : vector<16x16xf32>
    %c208 = arith.constant 208 : index
    %846 = memref.load %arg3[%c208] : memref<670xf32, #tpu.memory_space<smem>>
    %847 = vector.broadcast %846 : f32 to vector<16x16xf32>
    %848 = arith.mulf %729, %847 : vector<16x16xf32>
    %c209 = arith.constant 209 : index
    %849 = memref.load %arg3[%c209] : memref<670xf32, #tpu.memory_space<smem>>
    %850 = vector.broadcast %849 : f32 to vector<16x16xf32>
    %851 = arith.mulf %731, %850 : vector<16x16xf32>
    %852 = arith.addf %848, %851 : vector<16x16xf32>
    %c210 = arith.constant 210 : index
    %853 = memref.load %arg3[%c210] : memref<670xf32, #tpu.memory_space<smem>>
    %854 = vector.broadcast %853 : f32 to vector<16x16xf32>
    %855 = arith.mulf %733, %854 : vector<16x16xf32>
    %856 = arith.addf %852, %855 : vector<16x16xf32>
    %c211 = arith.constant 211 : index
    %857 = memref.load %arg3[%c211] : memref<670xf32, #tpu.memory_space<smem>>
    %858 = vector.broadcast %857 : f32 to vector<16x16xf32>
    %859 = arith.mulf %735, %858 : vector<16x16xf32>
    %860 = arith.addf %856, %859 : vector<16x16xf32>
    %c212 = arith.constant 212 : index
    %861 = memref.load %arg3[%c212] : memref<670xf32, #tpu.memory_space<smem>>
    %862 = vector.broadcast %861 : f32 to vector<16x16xf32>
    %863 = arith.mulf %737, %862 : vector<16x16xf32>
    %864 = arith.addf %860, %863 : vector<16x16xf32>
    %c213 = arith.constant 213 : index
    %865 = memref.load %arg3[%c213] : memref<670xf32, #tpu.memory_space<smem>>
    %866 = vector.broadcast %865 : f32 to vector<16x16xf32>
    %867 = arith.mulf %739, %866 : vector<16x16xf32>
    %868 = arith.addf %864, %867 : vector<16x16xf32>
    %c214 = arith.constant 214 : index
    %869 = memref.load %arg3[%c214] : memref<670xf32, #tpu.memory_space<smem>>
    %870 = vector.broadcast %869 : f32 to vector<16x16xf32>
    %871 = arith.mulf %741, %870 : vector<16x16xf32>
    %872 = arith.addf %868, %871 : vector<16x16xf32>
    %c215 = arith.constant 215 : index
    %873 = memref.load %arg3[%c215] : memref<670xf32, #tpu.memory_space<smem>>
    %874 = vector.broadcast %873 : f32 to vector<16x16xf32>
    %875 = arith.mulf %743, %874 : vector<16x16xf32>
    %876 = arith.addf %872, %875 : vector<16x16xf32>
    %c251 = arith.constant 251 : index
    %877 = memref.load %arg3[%c251] : memref<670xf32, #tpu.memory_space<smem>>
    %878 = vector.broadcast %877 : f32 to vector<16x16xf32>
    %879 = arith.addf %876, %878 : vector<16x16xf32>
    %c216 = arith.constant 216 : index
    %880 = memref.load %arg3[%c216] : memref<670xf32, #tpu.memory_space<smem>>
    %881 = vector.broadcast %880 : f32 to vector<16x16xf32>
    %882 = arith.mulf %729, %881 : vector<16x16xf32>
    %c217 = arith.constant 217 : index
    %883 = memref.load %arg3[%c217] : memref<670xf32, #tpu.memory_space<smem>>
    %884 = vector.broadcast %883 : f32 to vector<16x16xf32>
    %885 = arith.mulf %731, %884 : vector<16x16xf32>
    %886 = arith.addf %882, %885 : vector<16x16xf32>
    %c218 = arith.constant 218 : index
    %887 = memref.load %arg3[%c218] : memref<670xf32, #tpu.memory_space<smem>>
    %888 = vector.broadcast %887 : f32 to vector<16x16xf32>
    %889 = arith.mulf %733, %888 : vector<16x16xf32>
    %890 = arith.addf %886, %889 : vector<16x16xf32>
    %c219 = arith.constant 219 : index
    %891 = memref.load %arg3[%c219] : memref<670xf32, #tpu.memory_space<smem>>
    %892 = vector.broadcast %891 : f32 to vector<16x16xf32>
    %893 = arith.mulf %735, %892 : vector<16x16xf32>
    %894 = arith.addf %890, %893 : vector<16x16xf32>
    %c220 = arith.constant 220 : index
    %895 = memref.load %arg3[%c220] : memref<670xf32, #tpu.memory_space<smem>>
    %896 = vector.broadcast %895 : f32 to vector<16x16xf32>
    %897 = arith.mulf %737, %896 : vector<16x16xf32>
    %898 = arith.addf %894, %897 : vector<16x16xf32>
    %c221 = arith.constant 221 : index
    %899 = memref.load %arg3[%c221] : memref<670xf32, #tpu.memory_space<smem>>
    %900 = vector.broadcast %899 : f32 to vector<16x16xf32>
    %901 = arith.mulf %739, %900 : vector<16x16xf32>
    %902 = arith.addf %898, %901 : vector<16x16xf32>
    %c222 = arith.constant 222 : index
    %903 = memref.load %arg3[%c222] : memref<670xf32, #tpu.memory_space<smem>>
    %904 = vector.broadcast %903 : f32 to vector<16x16xf32>
    %905 = arith.mulf %741, %904 : vector<16x16xf32>
    %906 = arith.addf %902, %905 : vector<16x16xf32>
    %c223 = arith.constant 223 : index
    %907 = memref.load %arg3[%c223] : memref<670xf32, #tpu.memory_space<smem>>
    %908 = vector.broadcast %907 : f32 to vector<16x16xf32>
    %909 = arith.mulf %743, %908 : vector<16x16xf32>
    %910 = arith.addf %906, %909 : vector<16x16xf32>
    %c252 = arith.constant 252 : index
    %911 = memref.load %arg3[%c252] : memref<670xf32, #tpu.memory_space<smem>>
    %912 = vector.broadcast %911 : f32 to vector<16x16xf32>
    %913 = arith.addf %910, %912 : vector<16x16xf32>
    %c224 = arith.constant 224 : index
    %914 = memref.load %arg3[%c224] : memref<670xf32, #tpu.memory_space<smem>>
    %915 = vector.broadcast %914 : f32 to vector<16x16xf32>
    %916 = arith.mulf %729, %915 : vector<16x16xf32>
    %c225 = arith.constant 225 : index
    %917 = memref.load %arg3[%c225] : memref<670xf32, #tpu.memory_space<smem>>
    %918 = vector.broadcast %917 : f32 to vector<16x16xf32>
    %919 = arith.mulf %731, %918 : vector<16x16xf32>
    %920 = arith.addf %916, %919 : vector<16x16xf32>
    %c226 = arith.constant 226 : index
    %921 = memref.load %arg3[%c226] : memref<670xf32, #tpu.memory_space<smem>>
    %922 = vector.broadcast %921 : f32 to vector<16x16xf32>
    %923 = arith.mulf %733, %922 : vector<16x16xf32>
    %924 = arith.addf %920, %923 : vector<16x16xf32>
    %c227 = arith.constant 227 : index
    %925 = memref.load %arg3[%c227] : memref<670xf32, #tpu.memory_space<smem>>
    %926 = vector.broadcast %925 : f32 to vector<16x16xf32>
    %927 = arith.mulf %735, %926 : vector<16x16xf32>
    %928 = arith.addf %924, %927 : vector<16x16xf32>
    %c228 = arith.constant 228 : index
    %929 = memref.load %arg3[%c228] : memref<670xf32, #tpu.memory_space<smem>>
    %930 = vector.broadcast %929 : f32 to vector<16x16xf32>
    %931 = arith.mulf %737, %930 : vector<16x16xf32>
    %932 = arith.addf %928, %931 : vector<16x16xf32>
    %c229 = arith.constant 229 : index
    %933 = memref.load %arg3[%c229] : memref<670xf32, #tpu.memory_space<smem>>
    %934 = vector.broadcast %933 : f32 to vector<16x16xf32>
    %935 = arith.mulf %739, %934 : vector<16x16xf32>
    %936 = arith.addf %932, %935 : vector<16x16xf32>
    %c230 = arith.constant 230 : index
    %937 = memref.load %arg3[%c230] : memref<670xf32, #tpu.memory_space<smem>>
    %938 = vector.broadcast %937 : f32 to vector<16x16xf32>
    %939 = arith.mulf %741, %938 : vector<16x16xf32>
    %940 = arith.addf %936, %939 : vector<16x16xf32>
    %c231 = arith.constant 231 : index
    %941 = memref.load %arg3[%c231] : memref<670xf32, #tpu.memory_space<smem>>
    %942 = vector.broadcast %941 : f32 to vector<16x16xf32>
    %943 = arith.mulf %743, %942 : vector<16x16xf32>
    %944 = arith.addf %940, %943 : vector<16x16xf32>
    %c253 = arith.constant 253 : index
    %945 = memref.load %arg3[%c253] : memref<670xf32, #tpu.memory_space<smem>>
    %946 = vector.broadcast %945 : f32 to vector<16x16xf32>
    %947 = arith.addf %944, %946 : vector<16x16xf32>
    %c232 = arith.constant 232 : index
    %948 = memref.load %arg3[%c232] : memref<670xf32, #tpu.memory_space<smem>>
    %949 = vector.broadcast %948 : f32 to vector<16x16xf32>
    %950 = arith.mulf %729, %949 : vector<16x16xf32>
    %c233 = arith.constant 233 : index
    %951 = memref.load %arg3[%c233] : memref<670xf32, #tpu.memory_space<smem>>
    %952 = vector.broadcast %951 : f32 to vector<16x16xf32>
    %953 = arith.mulf %731, %952 : vector<16x16xf32>
    %954 = arith.addf %950, %953 : vector<16x16xf32>
    %c234 = arith.constant 234 : index
    %955 = memref.load %arg3[%c234] : memref<670xf32, #tpu.memory_space<smem>>
    %956 = vector.broadcast %955 : f32 to vector<16x16xf32>
    %957 = arith.mulf %733, %956 : vector<16x16xf32>
    %958 = arith.addf %954, %957 : vector<16x16xf32>
    %c235 = arith.constant 235 : index
    %959 = memref.load %arg3[%c235] : memref<670xf32, #tpu.memory_space<smem>>
    %960 = vector.broadcast %959 : f32 to vector<16x16xf32>
    %961 = arith.mulf %735, %960 : vector<16x16xf32>
    %962 = arith.addf %958, %961 : vector<16x16xf32>
    %c236 = arith.constant 236 : index
    %963 = memref.load %arg3[%c236] : memref<670xf32, #tpu.memory_space<smem>>
    %964 = vector.broadcast %963 : f32 to vector<16x16xf32>
    %965 = arith.mulf %737, %964 : vector<16x16xf32>
    %966 = arith.addf %962, %965 : vector<16x16xf32>
    %c237 = arith.constant 237 : index
    %967 = memref.load %arg3[%c237] : memref<670xf32, #tpu.memory_space<smem>>
    %968 = vector.broadcast %967 : f32 to vector<16x16xf32>
    %969 = arith.mulf %739, %968 : vector<16x16xf32>
    %970 = arith.addf %966, %969 : vector<16x16xf32>
    %c238 = arith.constant 238 : index
    %971 = memref.load %arg3[%c238] : memref<670xf32, #tpu.memory_space<smem>>
    %972 = vector.broadcast %971 : f32 to vector<16x16xf32>
    %973 = arith.mulf %741, %972 : vector<16x16xf32>
    %974 = arith.addf %970, %973 : vector<16x16xf32>
    %c239 = arith.constant 239 : index
    %975 = memref.load %arg3[%c239] : memref<670xf32, #tpu.memory_space<smem>>
    %976 = vector.broadcast %975 : f32 to vector<16x16xf32>
    %977 = arith.mulf %743, %976 : vector<16x16xf32>
    %978 = arith.addf %974, %977 : vector<16x16xf32>
    %c254 = arith.constant 254 : index
    %979 = memref.load %arg3[%c254] : memref<670xf32, #tpu.memory_space<smem>>
    %980 = vector.broadcast %979 : f32 to vector<16x16xf32>
    %981 = arith.addf %978, %980 : vector<16x16xf32>
    %c240 = arith.constant 240 : index
    %982 = memref.load %arg3[%c240] : memref<670xf32, #tpu.memory_space<smem>>
    %983 = vector.broadcast %982 : f32 to vector<16x16xf32>
    %984 = arith.mulf %729, %983 : vector<16x16xf32>
    %c241 = arith.constant 241 : index
    %985 = memref.load %arg3[%c241] : memref<670xf32, #tpu.memory_space<smem>>
    %986 = vector.broadcast %985 : f32 to vector<16x16xf32>
    %987 = arith.mulf %731, %986 : vector<16x16xf32>
    %988 = arith.addf %984, %987 : vector<16x16xf32>
    %c242 = arith.constant 242 : index
    %989 = memref.load %arg3[%c242] : memref<670xf32, #tpu.memory_space<smem>>
    %990 = vector.broadcast %989 : f32 to vector<16x16xf32>
    %991 = arith.mulf %733, %990 : vector<16x16xf32>
    %992 = arith.addf %988, %991 : vector<16x16xf32>
    %c243 = arith.constant 243 : index
    %993 = memref.load %arg3[%c243] : memref<670xf32, #tpu.memory_space<smem>>
    %994 = vector.broadcast %993 : f32 to vector<16x16xf32>
    %995 = arith.mulf %735, %994 : vector<16x16xf32>
    %996 = arith.addf %992, %995 : vector<16x16xf32>
    %c244 = arith.constant 244 : index
    %997 = memref.load %arg3[%c244] : memref<670xf32, #tpu.memory_space<smem>>
    %998 = vector.broadcast %997 : f32 to vector<16x16xf32>
    %999 = arith.mulf %737, %998 : vector<16x16xf32>
    %1000 = arith.addf %996, %999 : vector<16x16xf32>
    %c245 = arith.constant 245 : index
    %1001 = memref.load %arg3[%c245] : memref<670xf32, #tpu.memory_space<smem>>
    %1002 = vector.broadcast %1001 : f32 to vector<16x16xf32>
    %1003 = arith.mulf %739, %1002 : vector<16x16xf32>
    %1004 = arith.addf %1000, %1003 : vector<16x16xf32>
    %c246 = arith.constant 246 : index
    %1005 = memref.load %arg3[%c246] : memref<670xf32, #tpu.memory_space<smem>>
    %1006 = vector.broadcast %1005 : f32 to vector<16x16xf32>
    %1007 = arith.mulf %741, %1006 : vector<16x16xf32>
    %1008 = arith.addf %1004, %1007 : vector<16x16xf32>
    %c247 = arith.constant 247 : index
    %1009 = memref.load %arg3[%c247] : memref<670xf32, #tpu.memory_space<smem>>
    %1010 = vector.broadcast %1009 : f32 to vector<16x16xf32>
    %1011 = arith.mulf %743, %1010 : vector<16x16xf32>
    %1012 = arith.addf %1008, %1011 : vector<16x16xf32>
    %c255 = arith.constant 255 : index
    %1013 = memref.load %arg3[%c255] : memref<670xf32, #tpu.memory_space<smem>>
    %1014 = vector.broadcast %1013 : f32 to vector<16x16xf32>
    %1015 = arith.addf %1012, %1014 : vector<16x16xf32>
    %cst_39 = arith.constant 0.000000e+00 : f32
    %1016 = vector.broadcast %cst_39 : f32 to vector<16x16xf32>
    %1017 = arith.maximumf %777, %1016 : vector<16x16xf32>
    %cst_40 = arith.constant 0.000000e+00 : f32
    %1018 = vector.broadcast %cst_40 : f32 to vector<16x16xf32>
    %1019 = arith.maximumf %811, %1018 : vector<16x16xf32>
    %cst_41 = arith.constant 0.000000e+00 : f32
    %1020 = vector.broadcast %cst_41 : f32 to vector<16x16xf32>
    %1021 = arith.maximumf %845, %1020 : vector<16x16xf32>
    %cst_42 = arith.constant 0.000000e+00 : f32
    %1022 = vector.broadcast %cst_42 : f32 to vector<16x16xf32>
    %1023 = arith.maximumf %879, %1022 : vector<16x16xf32>
    %cst_43 = arith.constant 0.000000e+00 : f32
    %1024 = vector.broadcast %cst_43 : f32 to vector<16x16xf32>
    %1025 = arith.maximumf %913, %1024 : vector<16x16xf32>
    %cst_44 = arith.constant 0.000000e+00 : f32
    %1026 = vector.broadcast %cst_44 : f32 to vector<16x16xf32>
    %1027 = arith.maximumf %947, %1026 : vector<16x16xf32>
    %cst_45 = arith.constant 0.000000e+00 : f32
    %1028 = vector.broadcast %cst_45 : f32 to vector<16x16xf32>
    %1029 = arith.maximumf %981, %1028 : vector<16x16xf32>
    %cst_46 = arith.constant 0.000000e+00 : f32
    %1030 = vector.broadcast %cst_46 : f32 to vector<16x16xf32>
    %1031 = arith.maximumf %1015, %1030 : vector<16x16xf32>
    %c256 = arith.constant 256 : index
    %1032 = memref.load %arg3[%c256] : memref<670xf32, #tpu.memory_space<smem>>
    %1033 = vector.broadcast %1032 : f32 to vector<16x16xf32>
    %1034 = arith.mulf %1017, %1033 : vector<16x16xf32>
    %c257 = arith.constant 257 : index
    %1035 = memref.load %arg3[%c257] : memref<670xf32, #tpu.memory_space<smem>>
    %1036 = vector.broadcast %1035 : f32 to vector<16x16xf32>
    %1037 = arith.mulf %1019, %1036 : vector<16x16xf32>
    %1038 = arith.addf %1034, %1037 : vector<16x16xf32>
    %c258 = arith.constant 258 : index
    %1039 = memref.load %arg3[%c258] : memref<670xf32, #tpu.memory_space<smem>>
    %1040 = vector.broadcast %1039 : f32 to vector<16x16xf32>
    %1041 = arith.mulf %1021, %1040 : vector<16x16xf32>
    %1042 = arith.addf %1038, %1041 : vector<16x16xf32>
    %c259 = arith.constant 259 : index
    %1043 = memref.load %arg3[%c259] : memref<670xf32, #tpu.memory_space<smem>>
    %1044 = vector.broadcast %1043 : f32 to vector<16x16xf32>
    %1045 = arith.mulf %1023, %1044 : vector<16x16xf32>
    %1046 = arith.addf %1042, %1045 : vector<16x16xf32>
    %c260 = arith.constant 260 : index
    %1047 = memref.load %arg3[%c260] : memref<670xf32, #tpu.memory_space<smem>>
    %1048 = vector.broadcast %1047 : f32 to vector<16x16xf32>
    %1049 = arith.mulf %1025, %1048 : vector<16x16xf32>
    %1050 = arith.addf %1046, %1049 : vector<16x16xf32>
    %c261 = arith.constant 261 : index
    %1051 = memref.load %arg3[%c261] : memref<670xf32, #tpu.memory_space<smem>>
    %1052 = vector.broadcast %1051 : f32 to vector<16x16xf32>
    %1053 = arith.mulf %1027, %1052 : vector<16x16xf32>
    %1054 = arith.addf %1050, %1053 : vector<16x16xf32>
    %c262 = arith.constant 262 : index
    %1055 = memref.load %arg3[%c262] : memref<670xf32, #tpu.memory_space<smem>>
    %1056 = vector.broadcast %1055 : f32 to vector<16x16xf32>
    %1057 = arith.mulf %1029, %1056 : vector<16x16xf32>
    %1058 = arith.addf %1054, %1057 : vector<16x16xf32>
    %c263 = arith.constant 263 : index
    %1059 = memref.load %arg3[%c263] : memref<670xf32, #tpu.memory_space<smem>>
    %1060 = vector.broadcast %1059 : f32 to vector<16x16xf32>
    %1061 = arith.mulf %1031, %1060 : vector<16x16xf32>
    %1062 = arith.addf %1058, %1061 : vector<16x16xf32>
    %c320 = arith.constant 320 : index
    %1063 = memref.load %arg3[%c320] : memref<670xf32, #tpu.memory_space<smem>>
    %1064 = vector.broadcast %1063 : f32 to vector<16x16xf32>
    %1065 = arith.addf %1062, %1064 : vector<16x16xf32>
    %c264 = arith.constant 264 : index
    %1066 = memref.load %arg3[%c264] : memref<670xf32, #tpu.memory_space<smem>>
    %1067 = vector.broadcast %1066 : f32 to vector<16x16xf32>
    %1068 = arith.mulf %1017, %1067 : vector<16x16xf32>
    %c265 = arith.constant 265 : index
    %1069 = memref.load %arg3[%c265] : memref<670xf32, #tpu.memory_space<smem>>
    %1070 = vector.broadcast %1069 : f32 to vector<16x16xf32>
    %1071 = arith.mulf %1019, %1070 : vector<16x16xf32>
    %1072 = arith.addf %1068, %1071 : vector<16x16xf32>
    %c266 = arith.constant 266 : index
    %1073 = memref.load %arg3[%c266] : memref<670xf32, #tpu.memory_space<smem>>
    %1074 = vector.broadcast %1073 : f32 to vector<16x16xf32>
    %1075 = arith.mulf %1021, %1074 : vector<16x16xf32>
    %1076 = arith.addf %1072, %1075 : vector<16x16xf32>
    %c267 = arith.constant 267 : index
    %1077 = memref.load %arg3[%c267] : memref<670xf32, #tpu.memory_space<smem>>
    %1078 = vector.broadcast %1077 : f32 to vector<16x16xf32>
    %1079 = arith.mulf %1023, %1078 : vector<16x16xf32>
    %1080 = arith.addf %1076, %1079 : vector<16x16xf32>
    %c268 = arith.constant 268 : index
    %1081 = memref.load %arg3[%c268] : memref<670xf32, #tpu.memory_space<smem>>
    %1082 = vector.broadcast %1081 : f32 to vector<16x16xf32>
    %1083 = arith.mulf %1025, %1082 : vector<16x16xf32>
    %1084 = arith.addf %1080, %1083 : vector<16x16xf32>
    %c269 = arith.constant 269 : index
    %1085 = memref.load %arg3[%c269] : memref<670xf32, #tpu.memory_space<smem>>
    %1086 = vector.broadcast %1085 : f32 to vector<16x16xf32>
    %1087 = arith.mulf %1027, %1086 : vector<16x16xf32>
    %1088 = arith.addf %1084, %1087 : vector<16x16xf32>
    %c270 = arith.constant 270 : index
    %1089 = memref.load %arg3[%c270] : memref<670xf32, #tpu.memory_space<smem>>
    %1090 = vector.broadcast %1089 : f32 to vector<16x16xf32>
    %1091 = arith.mulf %1029, %1090 : vector<16x16xf32>
    %1092 = arith.addf %1088, %1091 : vector<16x16xf32>
    %c271 = arith.constant 271 : index
    %1093 = memref.load %arg3[%c271] : memref<670xf32, #tpu.memory_space<smem>>
    %1094 = vector.broadcast %1093 : f32 to vector<16x16xf32>
    %1095 = arith.mulf %1031, %1094 : vector<16x16xf32>
    %1096 = arith.addf %1092, %1095 : vector<16x16xf32>
    %c321 = arith.constant 321 : index
    %1097 = memref.load %arg3[%c321] : memref<670xf32, #tpu.memory_space<smem>>
    %1098 = vector.broadcast %1097 : f32 to vector<16x16xf32>
    %1099 = arith.addf %1096, %1098 : vector<16x16xf32>
    %c272 = arith.constant 272 : index
    %1100 = memref.load %arg3[%c272] : memref<670xf32, #tpu.memory_space<smem>>
    %1101 = vector.broadcast %1100 : f32 to vector<16x16xf32>
    %1102 = arith.mulf %1017, %1101 : vector<16x16xf32>
    %c273 = arith.constant 273 : index
    %1103 = memref.load %arg3[%c273] : memref<670xf32, #tpu.memory_space<smem>>
    %1104 = vector.broadcast %1103 : f32 to vector<16x16xf32>
    %1105 = arith.mulf %1019, %1104 : vector<16x16xf32>
    %1106 = arith.addf %1102, %1105 : vector<16x16xf32>
    %c274 = arith.constant 274 : index
    %1107 = memref.load %arg3[%c274] : memref<670xf32, #tpu.memory_space<smem>>
    %1108 = vector.broadcast %1107 : f32 to vector<16x16xf32>
    %1109 = arith.mulf %1021, %1108 : vector<16x16xf32>
    %1110 = arith.addf %1106, %1109 : vector<16x16xf32>
    %c275 = arith.constant 275 : index
    %1111 = memref.load %arg3[%c275] : memref<670xf32, #tpu.memory_space<smem>>
    %1112 = vector.broadcast %1111 : f32 to vector<16x16xf32>
    %1113 = arith.mulf %1023, %1112 : vector<16x16xf32>
    %1114 = arith.addf %1110, %1113 : vector<16x16xf32>
    %c276 = arith.constant 276 : index
    %1115 = memref.load %arg3[%c276] : memref<670xf32, #tpu.memory_space<smem>>
    %1116 = vector.broadcast %1115 : f32 to vector<16x16xf32>
    %1117 = arith.mulf %1025, %1116 : vector<16x16xf32>
    %1118 = arith.addf %1114, %1117 : vector<16x16xf32>
    %c277 = arith.constant 277 : index
    %1119 = memref.load %arg3[%c277] : memref<670xf32, #tpu.memory_space<smem>>
    %1120 = vector.broadcast %1119 : f32 to vector<16x16xf32>
    %1121 = arith.mulf %1027, %1120 : vector<16x16xf32>
    %1122 = arith.addf %1118, %1121 : vector<16x16xf32>
    %c278 = arith.constant 278 : index
    %1123 = memref.load %arg3[%c278] : memref<670xf32, #tpu.memory_space<smem>>
    %1124 = vector.broadcast %1123 : f32 to vector<16x16xf32>
    %1125 = arith.mulf %1029, %1124 : vector<16x16xf32>
    %1126 = arith.addf %1122, %1125 : vector<16x16xf32>
    %c279 = arith.constant 279 : index
    %1127 = memref.load %arg3[%c279] : memref<670xf32, #tpu.memory_space<smem>>
    %1128 = vector.broadcast %1127 : f32 to vector<16x16xf32>
    %1129 = arith.mulf %1031, %1128 : vector<16x16xf32>
    %1130 = arith.addf %1126, %1129 : vector<16x16xf32>
    %c322 = arith.constant 322 : index
    %1131 = memref.load %arg3[%c322] : memref<670xf32, #tpu.memory_space<smem>>
    %1132 = vector.broadcast %1131 : f32 to vector<16x16xf32>
    %1133 = arith.addf %1130, %1132 : vector<16x16xf32>
    %c280 = arith.constant 280 : index
    %1134 = memref.load %arg3[%c280] : memref<670xf32, #tpu.memory_space<smem>>
    %1135 = vector.broadcast %1134 : f32 to vector<16x16xf32>
    %1136 = arith.mulf %1017, %1135 : vector<16x16xf32>
    %c281 = arith.constant 281 : index
    %1137 = memref.load %arg3[%c281] : memref<670xf32, #tpu.memory_space<smem>>
    %1138 = vector.broadcast %1137 : f32 to vector<16x16xf32>
    %1139 = arith.mulf %1019, %1138 : vector<16x16xf32>
    %1140 = arith.addf %1136, %1139 : vector<16x16xf32>
    %c282 = arith.constant 282 : index
    %1141 = memref.load %arg3[%c282] : memref<670xf32, #tpu.memory_space<smem>>
    %1142 = vector.broadcast %1141 : f32 to vector<16x16xf32>
    %1143 = arith.mulf %1021, %1142 : vector<16x16xf32>
    %1144 = arith.addf %1140, %1143 : vector<16x16xf32>
    %c283 = arith.constant 283 : index
    %1145 = memref.load %arg3[%c283] : memref<670xf32, #tpu.memory_space<smem>>
    %1146 = vector.broadcast %1145 : f32 to vector<16x16xf32>
    %1147 = arith.mulf %1023, %1146 : vector<16x16xf32>
    %1148 = arith.addf %1144, %1147 : vector<16x16xf32>
    %c284 = arith.constant 284 : index
    %1149 = memref.load %arg3[%c284] : memref<670xf32, #tpu.memory_space<smem>>
    %1150 = vector.broadcast %1149 : f32 to vector<16x16xf32>
    %1151 = arith.mulf %1025, %1150 : vector<16x16xf32>
    %1152 = arith.addf %1148, %1151 : vector<16x16xf32>
    %c285 = arith.constant 285 : index
    %1153 = memref.load %arg3[%c285] : memref<670xf32, #tpu.memory_space<smem>>
    %1154 = vector.broadcast %1153 : f32 to vector<16x16xf32>
    %1155 = arith.mulf %1027, %1154 : vector<16x16xf32>
    %1156 = arith.addf %1152, %1155 : vector<16x16xf32>
    %c286 = arith.constant 286 : index
    %1157 = memref.load %arg3[%c286] : memref<670xf32, #tpu.memory_space<smem>>
    %1158 = vector.broadcast %1157 : f32 to vector<16x16xf32>
    %1159 = arith.mulf %1029, %1158 : vector<16x16xf32>
    %1160 = arith.addf %1156, %1159 : vector<16x16xf32>
    %c287 = arith.constant 287 : index
    %1161 = memref.load %arg3[%c287] : memref<670xf32, #tpu.memory_space<smem>>
    %1162 = vector.broadcast %1161 : f32 to vector<16x16xf32>
    %1163 = arith.mulf %1031, %1162 : vector<16x16xf32>
    %1164 = arith.addf %1160, %1163 : vector<16x16xf32>
    %c323 = arith.constant 323 : index
    %1165 = memref.load %arg3[%c323] : memref<670xf32, #tpu.memory_space<smem>>
    %1166 = vector.broadcast %1165 : f32 to vector<16x16xf32>
    %1167 = arith.addf %1164, %1166 : vector<16x16xf32>
    %c288 = arith.constant 288 : index
    %1168 = memref.load %arg3[%c288] : memref<670xf32, #tpu.memory_space<smem>>
    %1169 = vector.broadcast %1168 : f32 to vector<16x16xf32>
    %1170 = arith.mulf %1017, %1169 : vector<16x16xf32>
    %c289 = arith.constant 289 : index
    %1171 = memref.load %arg3[%c289] : memref<670xf32, #tpu.memory_space<smem>>
    %1172 = vector.broadcast %1171 : f32 to vector<16x16xf32>
    %1173 = arith.mulf %1019, %1172 : vector<16x16xf32>
    %1174 = arith.addf %1170, %1173 : vector<16x16xf32>
    %c290 = arith.constant 290 : index
    %1175 = memref.load %arg3[%c290] : memref<670xf32, #tpu.memory_space<smem>>
    %1176 = vector.broadcast %1175 : f32 to vector<16x16xf32>
    %1177 = arith.mulf %1021, %1176 : vector<16x16xf32>
    %1178 = arith.addf %1174, %1177 : vector<16x16xf32>
    %c291 = arith.constant 291 : index
    %1179 = memref.load %arg3[%c291] : memref<670xf32, #tpu.memory_space<smem>>
    %1180 = vector.broadcast %1179 : f32 to vector<16x16xf32>
    %1181 = arith.mulf %1023, %1180 : vector<16x16xf32>
    %1182 = arith.addf %1178, %1181 : vector<16x16xf32>
    %c292 = arith.constant 292 : index
    %1183 = memref.load %arg3[%c292] : memref<670xf32, #tpu.memory_space<smem>>
    %1184 = vector.broadcast %1183 : f32 to vector<16x16xf32>
    %1185 = arith.mulf %1025, %1184 : vector<16x16xf32>
    %1186 = arith.addf %1182, %1185 : vector<16x16xf32>
    %c293 = arith.constant 293 : index
    %1187 = memref.load %arg3[%c293] : memref<670xf32, #tpu.memory_space<smem>>
    %1188 = vector.broadcast %1187 : f32 to vector<16x16xf32>
    %1189 = arith.mulf %1027, %1188 : vector<16x16xf32>
    %1190 = arith.addf %1186, %1189 : vector<16x16xf32>
    %c294 = arith.constant 294 : index
    %1191 = memref.load %arg3[%c294] : memref<670xf32, #tpu.memory_space<smem>>
    %1192 = vector.broadcast %1191 : f32 to vector<16x16xf32>
    %1193 = arith.mulf %1029, %1192 : vector<16x16xf32>
    %1194 = arith.addf %1190, %1193 : vector<16x16xf32>
    %c295 = arith.constant 295 : index
    %1195 = memref.load %arg3[%c295] : memref<670xf32, #tpu.memory_space<smem>>
    %1196 = vector.broadcast %1195 : f32 to vector<16x16xf32>
    %1197 = arith.mulf %1031, %1196 : vector<16x16xf32>
    %1198 = arith.addf %1194, %1197 : vector<16x16xf32>
    %c324 = arith.constant 324 : index
    %1199 = memref.load %arg3[%c324] : memref<670xf32, #tpu.memory_space<smem>>
    %1200 = vector.broadcast %1199 : f32 to vector<16x16xf32>
    %1201 = arith.addf %1198, %1200 : vector<16x16xf32>
    %c296 = arith.constant 296 : index
    %1202 = memref.load %arg3[%c296] : memref<670xf32, #tpu.memory_space<smem>>
    %1203 = vector.broadcast %1202 : f32 to vector<16x16xf32>
    %1204 = arith.mulf %1017, %1203 : vector<16x16xf32>
    %c297 = arith.constant 297 : index
    %1205 = memref.load %arg3[%c297] : memref<670xf32, #tpu.memory_space<smem>>
    %1206 = vector.broadcast %1205 : f32 to vector<16x16xf32>
    %1207 = arith.mulf %1019, %1206 : vector<16x16xf32>
    %1208 = arith.addf %1204, %1207 : vector<16x16xf32>
    %c298 = arith.constant 298 : index
    %1209 = memref.load %arg3[%c298] : memref<670xf32, #tpu.memory_space<smem>>
    %1210 = vector.broadcast %1209 : f32 to vector<16x16xf32>
    %1211 = arith.mulf %1021, %1210 : vector<16x16xf32>
    %1212 = arith.addf %1208, %1211 : vector<16x16xf32>
    %c299 = arith.constant 299 : index
    %1213 = memref.load %arg3[%c299] : memref<670xf32, #tpu.memory_space<smem>>
    %1214 = vector.broadcast %1213 : f32 to vector<16x16xf32>
    %1215 = arith.mulf %1023, %1214 : vector<16x16xf32>
    %1216 = arith.addf %1212, %1215 : vector<16x16xf32>
    %c300 = arith.constant 300 : index
    %1217 = memref.load %arg3[%c300] : memref<670xf32, #tpu.memory_space<smem>>
    %1218 = vector.broadcast %1217 : f32 to vector<16x16xf32>
    %1219 = arith.mulf %1025, %1218 : vector<16x16xf32>
    %1220 = arith.addf %1216, %1219 : vector<16x16xf32>
    %c301 = arith.constant 301 : index
    %1221 = memref.load %arg3[%c301] : memref<670xf32, #tpu.memory_space<smem>>
    %1222 = vector.broadcast %1221 : f32 to vector<16x16xf32>
    %1223 = arith.mulf %1027, %1222 : vector<16x16xf32>
    %1224 = arith.addf %1220, %1223 : vector<16x16xf32>
    %c302 = arith.constant 302 : index
    %1225 = memref.load %arg3[%c302] : memref<670xf32, #tpu.memory_space<smem>>
    %1226 = vector.broadcast %1225 : f32 to vector<16x16xf32>
    %1227 = arith.mulf %1029, %1226 : vector<16x16xf32>
    %1228 = arith.addf %1224, %1227 : vector<16x16xf32>
    %c303 = arith.constant 303 : index
    %1229 = memref.load %arg3[%c303] : memref<670xf32, #tpu.memory_space<smem>>
    %1230 = vector.broadcast %1229 : f32 to vector<16x16xf32>
    %1231 = arith.mulf %1031, %1230 : vector<16x16xf32>
    %1232 = arith.addf %1228, %1231 : vector<16x16xf32>
    %c325 = arith.constant 325 : index
    %1233 = memref.load %arg3[%c325] : memref<670xf32, #tpu.memory_space<smem>>
    %1234 = vector.broadcast %1233 : f32 to vector<16x16xf32>
    %1235 = arith.addf %1232, %1234 : vector<16x16xf32>
    %c304 = arith.constant 304 : index
    %1236 = memref.load %arg3[%c304] : memref<670xf32, #tpu.memory_space<smem>>
    %1237 = vector.broadcast %1236 : f32 to vector<16x16xf32>
    %1238 = arith.mulf %1017, %1237 : vector<16x16xf32>
    %c305 = arith.constant 305 : index
    %1239 = memref.load %arg3[%c305] : memref<670xf32, #tpu.memory_space<smem>>
    %1240 = vector.broadcast %1239 : f32 to vector<16x16xf32>
    %1241 = arith.mulf %1019, %1240 : vector<16x16xf32>
    %1242 = arith.addf %1238, %1241 : vector<16x16xf32>
    %c306 = arith.constant 306 : index
    %1243 = memref.load %arg3[%c306] : memref<670xf32, #tpu.memory_space<smem>>
    %1244 = vector.broadcast %1243 : f32 to vector<16x16xf32>
    %1245 = arith.mulf %1021, %1244 : vector<16x16xf32>
    %1246 = arith.addf %1242, %1245 : vector<16x16xf32>
    %c307 = arith.constant 307 : index
    %1247 = memref.load %arg3[%c307] : memref<670xf32, #tpu.memory_space<smem>>
    %1248 = vector.broadcast %1247 : f32 to vector<16x16xf32>
    %1249 = arith.mulf %1023, %1248 : vector<16x16xf32>
    %1250 = arith.addf %1246, %1249 : vector<16x16xf32>
    %c308 = arith.constant 308 : index
    %1251 = memref.load %arg3[%c308] : memref<670xf32, #tpu.memory_space<smem>>
    %1252 = vector.broadcast %1251 : f32 to vector<16x16xf32>
    %1253 = arith.mulf %1025, %1252 : vector<16x16xf32>
    %1254 = arith.addf %1250, %1253 : vector<16x16xf32>
    %c309 = arith.constant 309 : index
    %1255 = memref.load %arg3[%c309] : memref<670xf32, #tpu.memory_space<smem>>
    %1256 = vector.broadcast %1255 : f32 to vector<16x16xf32>
    %1257 = arith.mulf %1027, %1256 : vector<16x16xf32>
    %1258 = arith.addf %1254, %1257 : vector<16x16xf32>
    %c310 = arith.constant 310 : index
    %1259 = memref.load %arg3[%c310] : memref<670xf32, #tpu.memory_space<smem>>
    %1260 = vector.broadcast %1259 : f32 to vector<16x16xf32>
    %1261 = arith.mulf %1029, %1260 : vector<16x16xf32>
    %1262 = arith.addf %1258, %1261 : vector<16x16xf32>
    %c311 = arith.constant 311 : index
    %1263 = memref.load %arg3[%c311] : memref<670xf32, #tpu.memory_space<smem>>
    %1264 = vector.broadcast %1263 : f32 to vector<16x16xf32>
    %1265 = arith.mulf %1031, %1264 : vector<16x16xf32>
    %1266 = arith.addf %1262, %1265 : vector<16x16xf32>
    %c326 = arith.constant 326 : index
    %1267 = memref.load %arg3[%c326] : memref<670xf32, #tpu.memory_space<smem>>
    %1268 = vector.broadcast %1267 : f32 to vector<16x16xf32>
    %1269 = arith.addf %1266, %1268 : vector<16x16xf32>
    %c312 = arith.constant 312 : index
    %1270 = memref.load %arg3[%c312] : memref<670xf32, #tpu.memory_space<smem>>
    %1271 = vector.broadcast %1270 : f32 to vector<16x16xf32>
    %1272 = arith.mulf %1017, %1271 : vector<16x16xf32>
    %c313 = arith.constant 313 : index
    %1273 = memref.load %arg3[%c313] : memref<670xf32, #tpu.memory_space<smem>>
    %1274 = vector.broadcast %1273 : f32 to vector<16x16xf32>
    %1275 = arith.mulf %1019, %1274 : vector<16x16xf32>
    %1276 = arith.addf %1272, %1275 : vector<16x16xf32>
    %c314 = arith.constant 314 : index
    %1277 = memref.load %arg3[%c314] : memref<670xf32, #tpu.memory_space<smem>>
    %1278 = vector.broadcast %1277 : f32 to vector<16x16xf32>
    %1279 = arith.mulf %1021, %1278 : vector<16x16xf32>
    %1280 = arith.addf %1276, %1279 : vector<16x16xf32>
    %c315 = arith.constant 315 : index
    %1281 = memref.load %arg3[%c315] : memref<670xf32, #tpu.memory_space<smem>>
    %1282 = vector.broadcast %1281 : f32 to vector<16x16xf32>
    %1283 = arith.mulf %1023, %1282 : vector<16x16xf32>
    %1284 = arith.addf %1280, %1283 : vector<16x16xf32>
    %c316 = arith.constant 316 : index
    %1285 = memref.load %arg3[%c316] : memref<670xf32, #tpu.memory_space<smem>>
    %1286 = vector.broadcast %1285 : f32 to vector<16x16xf32>
    %1287 = arith.mulf %1025, %1286 : vector<16x16xf32>
    %1288 = arith.addf %1284, %1287 : vector<16x16xf32>
    %c317 = arith.constant 317 : index
    %1289 = memref.load %arg3[%c317] : memref<670xf32, #tpu.memory_space<smem>>
    %1290 = vector.broadcast %1289 : f32 to vector<16x16xf32>
    %1291 = arith.mulf %1027, %1290 : vector<16x16xf32>
    %1292 = arith.addf %1288, %1291 : vector<16x16xf32>
    %c318 = arith.constant 318 : index
    %1293 = memref.load %arg3[%c318] : memref<670xf32, #tpu.memory_space<smem>>
    %1294 = vector.broadcast %1293 : f32 to vector<16x16xf32>
    %1295 = arith.mulf %1029, %1294 : vector<16x16xf32>
    %1296 = arith.addf %1292, %1295 : vector<16x16xf32>
    %c319 = arith.constant 319 : index
    %1297 = memref.load %arg3[%c319] : memref<670xf32, #tpu.memory_space<smem>>
    %1298 = vector.broadcast %1297 : f32 to vector<16x16xf32>
    %1299 = arith.mulf %1031, %1298 : vector<16x16xf32>
    %1300 = arith.addf %1296, %1299 : vector<16x16xf32>
    %c327 = arith.constant 327 : index
    %1301 = memref.load %arg3[%c327] : memref<670xf32, #tpu.memory_space<smem>>
    %1302 = vector.broadcast %1301 : f32 to vector<16x16xf32>
    %1303 = arith.addf %1300, %1302 : vector<16x16xf32>
    %cst_47 = arith.constant 0.000000e+00 : f32
    %1304 = vector.broadcast %cst_47 : f32 to vector<16x16xf32>
    %1305 = arith.maximumf %1065, %1304 : vector<16x16xf32>
    %cst_48 = arith.constant 0.000000e+00 : f32
    %1306 = vector.broadcast %cst_48 : f32 to vector<16x16xf32>
    %1307 = arith.maximumf %1099, %1306 : vector<16x16xf32>
    %cst_49 = arith.constant 0.000000e+00 : f32
    %1308 = vector.broadcast %cst_49 : f32 to vector<16x16xf32>
    %1309 = arith.maximumf %1133, %1308 : vector<16x16xf32>
    %cst_50 = arith.constant 0.000000e+00 : f32
    %1310 = vector.broadcast %cst_50 : f32 to vector<16x16xf32>
    %1311 = arith.maximumf %1167, %1310 : vector<16x16xf32>
    %cst_51 = arith.constant 0.000000e+00 : f32
    %1312 = vector.broadcast %cst_51 : f32 to vector<16x16xf32>
    %1313 = arith.maximumf %1201, %1312 : vector<16x16xf32>
    %cst_52 = arith.constant 0.000000e+00 : f32
    %1314 = vector.broadcast %cst_52 : f32 to vector<16x16xf32>
    %1315 = arith.maximumf %1235, %1314 : vector<16x16xf32>
    %cst_53 = arith.constant 0.000000e+00 : f32
    %1316 = vector.broadcast %cst_53 : f32 to vector<16x16xf32>
    %1317 = arith.maximumf %1269, %1316 : vector<16x16xf32>
    %cst_54 = arith.constant 0.000000e+00 : f32
    %1318 = vector.broadcast %cst_54 : f32 to vector<16x16xf32>
    %1319 = arith.maximumf %1303, %1318 : vector<16x16xf32>
    %c328 = arith.constant 328 : index
    %1320 = memref.load %arg3[%c328] : memref<670xf32, #tpu.memory_space<smem>>
    %1321 = vector.broadcast %1320 : f32 to vector<16x16xf32>
    %1322 = arith.mulf %1305, %1321 : vector<16x16xf32>
    %c329 = arith.constant 329 : index
    %1323 = memref.load %arg3[%c329] : memref<670xf32, #tpu.memory_space<smem>>
    %1324 = vector.broadcast %1323 : f32 to vector<16x16xf32>
    %1325 = arith.mulf %1307, %1324 : vector<16x16xf32>
    %1326 = arith.addf %1322, %1325 : vector<16x16xf32>
    %c330 = arith.constant 330 : index
    %1327 = memref.load %arg3[%c330] : memref<670xf32, #tpu.memory_space<smem>>
    %1328 = vector.broadcast %1327 : f32 to vector<16x16xf32>
    %1329 = arith.mulf %1309, %1328 : vector<16x16xf32>
    %1330 = arith.addf %1326, %1329 : vector<16x16xf32>
    %c331 = arith.constant 331 : index
    %1331 = memref.load %arg3[%c331] : memref<670xf32, #tpu.memory_space<smem>>
    %1332 = vector.broadcast %1331 : f32 to vector<16x16xf32>
    %1333 = arith.mulf %1311, %1332 : vector<16x16xf32>
    %1334 = arith.addf %1330, %1333 : vector<16x16xf32>
    %c332 = arith.constant 332 : index
    %1335 = memref.load %arg3[%c332] : memref<670xf32, #tpu.memory_space<smem>>
    %1336 = vector.broadcast %1335 : f32 to vector<16x16xf32>
    %1337 = arith.mulf %1313, %1336 : vector<16x16xf32>
    %1338 = arith.addf %1334, %1337 : vector<16x16xf32>
    %c333 = arith.constant 333 : index
    %1339 = memref.load %arg3[%c333] : memref<670xf32, #tpu.memory_space<smem>>
    %1340 = vector.broadcast %1339 : f32 to vector<16x16xf32>
    %1341 = arith.mulf %1315, %1340 : vector<16x16xf32>
    %1342 = arith.addf %1338, %1341 : vector<16x16xf32>
    %c334 = arith.constant 334 : index
    %1343 = memref.load %arg3[%c334] : memref<670xf32, #tpu.memory_space<smem>>
    %1344 = vector.broadcast %1343 : f32 to vector<16x16xf32>
    %1345 = arith.mulf %1317, %1344 : vector<16x16xf32>
    %1346 = arith.addf %1342, %1345 : vector<16x16xf32>
    %c335 = arith.constant 335 : index
    %1347 = memref.load %arg3[%c335] : memref<670xf32, #tpu.memory_space<smem>>
    %1348 = vector.broadcast %1347 : f32 to vector<16x16xf32>
    %1349 = arith.mulf %1319, %1348 : vector<16x16xf32>
    %1350 = arith.addf %1346, %1349 : vector<16x16xf32>
    %c392 = arith.constant 392 : index
    %1351 = memref.load %arg3[%c392] : memref<670xf32, #tpu.memory_space<smem>>
    %1352 = vector.broadcast %1351 : f32 to vector<16x16xf32>
    %1353 = arith.addf %1350, %1352 : vector<16x16xf32>
    %c336 = arith.constant 336 : index
    %1354 = memref.load %arg3[%c336] : memref<670xf32, #tpu.memory_space<smem>>
    %1355 = vector.broadcast %1354 : f32 to vector<16x16xf32>
    %1356 = arith.mulf %1305, %1355 : vector<16x16xf32>
    %c337 = arith.constant 337 : index
    %1357 = memref.load %arg3[%c337] : memref<670xf32, #tpu.memory_space<smem>>
    %1358 = vector.broadcast %1357 : f32 to vector<16x16xf32>
    %1359 = arith.mulf %1307, %1358 : vector<16x16xf32>
    %1360 = arith.addf %1356, %1359 : vector<16x16xf32>
    %c338 = arith.constant 338 : index
    %1361 = memref.load %arg3[%c338] : memref<670xf32, #tpu.memory_space<smem>>
    %1362 = vector.broadcast %1361 : f32 to vector<16x16xf32>
    %1363 = arith.mulf %1309, %1362 : vector<16x16xf32>
    %1364 = arith.addf %1360, %1363 : vector<16x16xf32>
    %c339 = arith.constant 339 : index
    %1365 = memref.load %arg3[%c339] : memref<670xf32, #tpu.memory_space<smem>>
    %1366 = vector.broadcast %1365 : f32 to vector<16x16xf32>
    %1367 = arith.mulf %1311, %1366 : vector<16x16xf32>
    %1368 = arith.addf %1364, %1367 : vector<16x16xf32>
    %c340 = arith.constant 340 : index
    %1369 = memref.load %arg3[%c340] : memref<670xf32, #tpu.memory_space<smem>>
    %1370 = vector.broadcast %1369 : f32 to vector<16x16xf32>
    %1371 = arith.mulf %1313, %1370 : vector<16x16xf32>
    %1372 = arith.addf %1368, %1371 : vector<16x16xf32>
    %c341 = arith.constant 341 : index
    %1373 = memref.load %arg3[%c341] : memref<670xf32, #tpu.memory_space<smem>>
    %1374 = vector.broadcast %1373 : f32 to vector<16x16xf32>
    %1375 = arith.mulf %1315, %1374 : vector<16x16xf32>
    %1376 = arith.addf %1372, %1375 : vector<16x16xf32>
    %c342 = arith.constant 342 : index
    %1377 = memref.load %arg3[%c342] : memref<670xf32, #tpu.memory_space<smem>>
    %1378 = vector.broadcast %1377 : f32 to vector<16x16xf32>
    %1379 = arith.mulf %1317, %1378 : vector<16x16xf32>
    %1380 = arith.addf %1376, %1379 : vector<16x16xf32>
    %c343 = arith.constant 343 : index
    %1381 = memref.load %arg3[%c343] : memref<670xf32, #tpu.memory_space<smem>>
    %1382 = vector.broadcast %1381 : f32 to vector<16x16xf32>
    %1383 = arith.mulf %1319, %1382 : vector<16x16xf32>
    %1384 = arith.addf %1380, %1383 : vector<16x16xf32>
    %c393 = arith.constant 393 : index
    %1385 = memref.load %arg3[%c393] : memref<670xf32, #tpu.memory_space<smem>>
    %1386 = vector.broadcast %1385 : f32 to vector<16x16xf32>
    %1387 = arith.addf %1384, %1386 : vector<16x16xf32>
    %c344 = arith.constant 344 : index
    %1388 = memref.load %arg3[%c344] : memref<670xf32, #tpu.memory_space<smem>>
    %1389 = vector.broadcast %1388 : f32 to vector<16x16xf32>
    %1390 = arith.mulf %1305, %1389 : vector<16x16xf32>
    %c345 = arith.constant 345 : index
    %1391 = memref.load %arg3[%c345] : memref<670xf32, #tpu.memory_space<smem>>
    %1392 = vector.broadcast %1391 : f32 to vector<16x16xf32>
    %1393 = arith.mulf %1307, %1392 : vector<16x16xf32>
    %1394 = arith.addf %1390, %1393 : vector<16x16xf32>
    %c346 = arith.constant 346 : index
    %1395 = memref.load %arg3[%c346] : memref<670xf32, #tpu.memory_space<smem>>
    %1396 = vector.broadcast %1395 : f32 to vector<16x16xf32>
    %1397 = arith.mulf %1309, %1396 : vector<16x16xf32>
    %1398 = arith.addf %1394, %1397 : vector<16x16xf32>
    %c347 = arith.constant 347 : index
    %1399 = memref.load %arg3[%c347] : memref<670xf32, #tpu.memory_space<smem>>
    %1400 = vector.broadcast %1399 : f32 to vector<16x16xf32>
    %1401 = arith.mulf %1311, %1400 : vector<16x16xf32>
    %1402 = arith.addf %1398, %1401 : vector<16x16xf32>
    %c348 = arith.constant 348 : index
    %1403 = memref.load %arg3[%c348] : memref<670xf32, #tpu.memory_space<smem>>
    %1404 = vector.broadcast %1403 : f32 to vector<16x16xf32>
    %1405 = arith.mulf %1313, %1404 : vector<16x16xf32>
    %1406 = arith.addf %1402, %1405 : vector<16x16xf32>
    %c349 = arith.constant 349 : index
    %1407 = memref.load %arg3[%c349] : memref<670xf32, #tpu.memory_space<smem>>
    %1408 = vector.broadcast %1407 : f32 to vector<16x16xf32>
    %1409 = arith.mulf %1315, %1408 : vector<16x16xf32>
    %1410 = arith.addf %1406, %1409 : vector<16x16xf32>
    %c350 = arith.constant 350 : index
    %1411 = memref.load %arg3[%c350] : memref<670xf32, #tpu.memory_space<smem>>
    %1412 = vector.broadcast %1411 : f32 to vector<16x16xf32>
    %1413 = arith.mulf %1317, %1412 : vector<16x16xf32>
    %1414 = arith.addf %1410, %1413 : vector<16x16xf32>
    %c351 = arith.constant 351 : index
    %1415 = memref.load %arg3[%c351] : memref<670xf32, #tpu.memory_space<smem>>
    %1416 = vector.broadcast %1415 : f32 to vector<16x16xf32>
    %1417 = arith.mulf %1319, %1416 : vector<16x16xf32>
    %1418 = arith.addf %1414, %1417 : vector<16x16xf32>
    %c394 = arith.constant 394 : index
    %1419 = memref.load %arg3[%c394] : memref<670xf32, #tpu.memory_space<smem>>
    %1420 = vector.broadcast %1419 : f32 to vector<16x16xf32>
    %1421 = arith.addf %1418, %1420 : vector<16x16xf32>
    %c352 = arith.constant 352 : index
    %1422 = memref.load %arg3[%c352] : memref<670xf32, #tpu.memory_space<smem>>
    %1423 = vector.broadcast %1422 : f32 to vector<16x16xf32>
    %1424 = arith.mulf %1305, %1423 : vector<16x16xf32>
    %c353 = arith.constant 353 : index
    %1425 = memref.load %arg3[%c353] : memref<670xf32, #tpu.memory_space<smem>>
    %1426 = vector.broadcast %1425 : f32 to vector<16x16xf32>
    %1427 = arith.mulf %1307, %1426 : vector<16x16xf32>
    %1428 = arith.addf %1424, %1427 : vector<16x16xf32>
    %c354 = arith.constant 354 : index
    %1429 = memref.load %arg3[%c354] : memref<670xf32, #tpu.memory_space<smem>>
    %1430 = vector.broadcast %1429 : f32 to vector<16x16xf32>
    %1431 = arith.mulf %1309, %1430 : vector<16x16xf32>
    %1432 = arith.addf %1428, %1431 : vector<16x16xf32>
    %c355 = arith.constant 355 : index
    %1433 = memref.load %arg3[%c355] : memref<670xf32, #tpu.memory_space<smem>>
    %1434 = vector.broadcast %1433 : f32 to vector<16x16xf32>
    %1435 = arith.mulf %1311, %1434 : vector<16x16xf32>
    %1436 = arith.addf %1432, %1435 : vector<16x16xf32>
    %c356 = arith.constant 356 : index
    %1437 = memref.load %arg3[%c356] : memref<670xf32, #tpu.memory_space<smem>>
    %1438 = vector.broadcast %1437 : f32 to vector<16x16xf32>
    %1439 = arith.mulf %1313, %1438 : vector<16x16xf32>
    %1440 = arith.addf %1436, %1439 : vector<16x16xf32>
    %c357 = arith.constant 357 : index
    %1441 = memref.load %arg3[%c357] : memref<670xf32, #tpu.memory_space<smem>>
    %1442 = vector.broadcast %1441 : f32 to vector<16x16xf32>
    %1443 = arith.mulf %1315, %1442 : vector<16x16xf32>
    %1444 = arith.addf %1440, %1443 : vector<16x16xf32>
    %c358 = arith.constant 358 : index
    %1445 = memref.load %arg3[%c358] : memref<670xf32, #tpu.memory_space<smem>>
    %1446 = vector.broadcast %1445 : f32 to vector<16x16xf32>
    %1447 = arith.mulf %1317, %1446 : vector<16x16xf32>
    %1448 = arith.addf %1444, %1447 : vector<16x16xf32>
    %c359 = arith.constant 359 : index
    %1449 = memref.load %arg3[%c359] : memref<670xf32, #tpu.memory_space<smem>>
    %1450 = vector.broadcast %1449 : f32 to vector<16x16xf32>
    %1451 = arith.mulf %1319, %1450 : vector<16x16xf32>
    %1452 = arith.addf %1448, %1451 : vector<16x16xf32>
    %c395 = arith.constant 395 : index
    %1453 = memref.load %arg3[%c395] : memref<670xf32, #tpu.memory_space<smem>>
    %1454 = vector.broadcast %1453 : f32 to vector<16x16xf32>
    %1455 = arith.addf %1452, %1454 : vector<16x16xf32>
    %c360 = arith.constant 360 : index
    %1456 = memref.load %arg3[%c360] : memref<670xf32, #tpu.memory_space<smem>>
    %1457 = vector.broadcast %1456 : f32 to vector<16x16xf32>
    %1458 = arith.mulf %1305, %1457 : vector<16x16xf32>
    %c361 = arith.constant 361 : index
    %1459 = memref.load %arg3[%c361] : memref<670xf32, #tpu.memory_space<smem>>
    %1460 = vector.broadcast %1459 : f32 to vector<16x16xf32>
    %1461 = arith.mulf %1307, %1460 : vector<16x16xf32>
    %1462 = arith.addf %1458, %1461 : vector<16x16xf32>
    %c362 = arith.constant 362 : index
    %1463 = memref.load %arg3[%c362] : memref<670xf32, #tpu.memory_space<smem>>
    %1464 = vector.broadcast %1463 : f32 to vector<16x16xf32>
    %1465 = arith.mulf %1309, %1464 : vector<16x16xf32>
    %1466 = arith.addf %1462, %1465 : vector<16x16xf32>
    %c363 = arith.constant 363 : index
    %1467 = memref.load %arg3[%c363] : memref<670xf32, #tpu.memory_space<smem>>
    %1468 = vector.broadcast %1467 : f32 to vector<16x16xf32>
    %1469 = arith.mulf %1311, %1468 : vector<16x16xf32>
    %1470 = arith.addf %1466, %1469 : vector<16x16xf32>
    %c364 = arith.constant 364 : index
    %1471 = memref.load %arg3[%c364] : memref<670xf32, #tpu.memory_space<smem>>
    %1472 = vector.broadcast %1471 : f32 to vector<16x16xf32>
    %1473 = arith.mulf %1313, %1472 : vector<16x16xf32>
    %1474 = arith.addf %1470, %1473 : vector<16x16xf32>
    %c365 = arith.constant 365 : index
    %1475 = memref.load %arg3[%c365] : memref<670xf32, #tpu.memory_space<smem>>
    %1476 = vector.broadcast %1475 : f32 to vector<16x16xf32>
    %1477 = arith.mulf %1315, %1476 : vector<16x16xf32>
    %1478 = arith.addf %1474, %1477 : vector<16x16xf32>
    %c366 = arith.constant 366 : index
    %1479 = memref.load %arg3[%c366] : memref<670xf32, #tpu.memory_space<smem>>
    %1480 = vector.broadcast %1479 : f32 to vector<16x16xf32>
    %1481 = arith.mulf %1317, %1480 : vector<16x16xf32>
    %1482 = arith.addf %1478, %1481 : vector<16x16xf32>
    %c367 = arith.constant 367 : index
    %1483 = memref.load %arg3[%c367] : memref<670xf32, #tpu.memory_space<smem>>
    %1484 = vector.broadcast %1483 : f32 to vector<16x16xf32>
    %1485 = arith.mulf %1319, %1484 : vector<16x16xf32>
    %1486 = arith.addf %1482, %1485 : vector<16x16xf32>
    %c396 = arith.constant 396 : index
    %1487 = memref.load %arg3[%c396] : memref<670xf32, #tpu.memory_space<smem>>
    %1488 = vector.broadcast %1487 : f32 to vector<16x16xf32>
    %1489 = arith.addf %1486, %1488 : vector<16x16xf32>
    %c368 = arith.constant 368 : index
    %1490 = memref.load %arg3[%c368] : memref<670xf32, #tpu.memory_space<smem>>
    %1491 = vector.broadcast %1490 : f32 to vector<16x16xf32>
    %1492 = arith.mulf %1305, %1491 : vector<16x16xf32>
    %c369 = arith.constant 369 : index
    %1493 = memref.load %arg3[%c369] : memref<670xf32, #tpu.memory_space<smem>>
    %1494 = vector.broadcast %1493 : f32 to vector<16x16xf32>
    %1495 = arith.mulf %1307, %1494 : vector<16x16xf32>
    %1496 = arith.addf %1492, %1495 : vector<16x16xf32>
    %c370 = arith.constant 370 : index
    %1497 = memref.load %arg3[%c370] : memref<670xf32, #tpu.memory_space<smem>>
    %1498 = vector.broadcast %1497 : f32 to vector<16x16xf32>
    %1499 = arith.mulf %1309, %1498 : vector<16x16xf32>
    %1500 = arith.addf %1496, %1499 : vector<16x16xf32>
    %c371 = arith.constant 371 : index
    %1501 = memref.load %arg3[%c371] : memref<670xf32, #tpu.memory_space<smem>>
    %1502 = vector.broadcast %1501 : f32 to vector<16x16xf32>
    %1503 = arith.mulf %1311, %1502 : vector<16x16xf32>
    %1504 = arith.addf %1500, %1503 : vector<16x16xf32>
    %c372 = arith.constant 372 : index
    %1505 = memref.load %arg3[%c372] : memref<670xf32, #tpu.memory_space<smem>>
    %1506 = vector.broadcast %1505 : f32 to vector<16x16xf32>
    %1507 = arith.mulf %1313, %1506 : vector<16x16xf32>
    %1508 = arith.addf %1504, %1507 : vector<16x16xf32>
    %c373 = arith.constant 373 : index
    %1509 = memref.load %arg3[%c373] : memref<670xf32, #tpu.memory_space<smem>>
    %1510 = vector.broadcast %1509 : f32 to vector<16x16xf32>
    %1511 = arith.mulf %1315, %1510 : vector<16x16xf32>
    %1512 = arith.addf %1508, %1511 : vector<16x16xf32>
    %c374 = arith.constant 374 : index
    %1513 = memref.load %arg3[%c374] : memref<670xf32, #tpu.memory_space<smem>>
    %1514 = vector.broadcast %1513 : f32 to vector<16x16xf32>
    %1515 = arith.mulf %1317, %1514 : vector<16x16xf32>
    %1516 = arith.addf %1512, %1515 : vector<16x16xf32>
    %c375 = arith.constant 375 : index
    %1517 = memref.load %arg3[%c375] : memref<670xf32, #tpu.memory_space<smem>>
    %1518 = vector.broadcast %1517 : f32 to vector<16x16xf32>
    %1519 = arith.mulf %1319, %1518 : vector<16x16xf32>
    %1520 = arith.addf %1516, %1519 : vector<16x16xf32>
    %c397 = arith.constant 397 : index
    %1521 = memref.load %arg3[%c397] : memref<670xf32, #tpu.memory_space<smem>>
    %1522 = vector.broadcast %1521 : f32 to vector<16x16xf32>
    %1523 = arith.addf %1520, %1522 : vector<16x16xf32>
    %c376 = arith.constant 376 : index
    %1524 = memref.load %arg3[%c376] : memref<670xf32, #tpu.memory_space<smem>>
    %1525 = vector.broadcast %1524 : f32 to vector<16x16xf32>
    %1526 = arith.mulf %1305, %1525 : vector<16x16xf32>
    %c377 = arith.constant 377 : index
    %1527 = memref.load %arg3[%c377] : memref<670xf32, #tpu.memory_space<smem>>
    %1528 = vector.broadcast %1527 : f32 to vector<16x16xf32>
    %1529 = arith.mulf %1307, %1528 : vector<16x16xf32>
    %1530 = arith.addf %1526, %1529 : vector<16x16xf32>
    %c378 = arith.constant 378 : index
    %1531 = memref.load %arg3[%c378] : memref<670xf32, #tpu.memory_space<smem>>
    %1532 = vector.broadcast %1531 : f32 to vector<16x16xf32>
    %1533 = arith.mulf %1309, %1532 : vector<16x16xf32>
    %1534 = arith.addf %1530, %1533 : vector<16x16xf32>
    %c379 = arith.constant 379 : index
    %1535 = memref.load %arg3[%c379] : memref<670xf32, #tpu.memory_space<smem>>
    %1536 = vector.broadcast %1535 : f32 to vector<16x16xf32>
    %1537 = arith.mulf %1311, %1536 : vector<16x16xf32>
    %1538 = arith.addf %1534, %1537 : vector<16x16xf32>
    %c380 = arith.constant 380 : index
    %1539 = memref.load %arg3[%c380] : memref<670xf32, #tpu.memory_space<smem>>
    %1540 = vector.broadcast %1539 : f32 to vector<16x16xf32>
    %1541 = arith.mulf %1313, %1540 : vector<16x16xf32>
    %1542 = arith.addf %1538, %1541 : vector<16x16xf32>
    %c381 = arith.constant 381 : index
    %1543 = memref.load %arg3[%c381] : memref<670xf32, #tpu.memory_space<smem>>
    %1544 = vector.broadcast %1543 : f32 to vector<16x16xf32>
    %1545 = arith.mulf %1315, %1544 : vector<16x16xf32>
    %1546 = arith.addf %1542, %1545 : vector<16x16xf32>
    %c382 = arith.constant 382 : index
    %1547 = memref.load %arg3[%c382] : memref<670xf32, #tpu.memory_space<smem>>
    %1548 = vector.broadcast %1547 : f32 to vector<16x16xf32>
    %1549 = arith.mulf %1317, %1548 : vector<16x16xf32>
    %1550 = arith.addf %1546, %1549 : vector<16x16xf32>
    %c383 = arith.constant 383 : index
    %1551 = memref.load %arg3[%c383] : memref<670xf32, #tpu.memory_space<smem>>
    %1552 = vector.broadcast %1551 : f32 to vector<16x16xf32>
    %1553 = arith.mulf %1319, %1552 : vector<16x16xf32>
    %1554 = arith.addf %1550, %1553 : vector<16x16xf32>
    %c398 = arith.constant 398 : index
    %1555 = memref.load %arg3[%c398] : memref<670xf32, #tpu.memory_space<smem>>
    %1556 = vector.broadcast %1555 : f32 to vector<16x16xf32>
    %1557 = arith.addf %1554, %1556 : vector<16x16xf32>
    %c384 = arith.constant 384 : index
    %1558 = memref.load %arg3[%c384] : memref<670xf32, #tpu.memory_space<smem>>
    %1559 = vector.broadcast %1558 : f32 to vector<16x16xf32>
    %1560 = arith.mulf %1305, %1559 : vector<16x16xf32>
    %c385 = arith.constant 385 : index
    %1561 = memref.load %arg3[%c385] : memref<670xf32, #tpu.memory_space<smem>>
    %1562 = vector.broadcast %1561 : f32 to vector<16x16xf32>
    %1563 = arith.mulf %1307, %1562 : vector<16x16xf32>
    %1564 = arith.addf %1560, %1563 : vector<16x16xf32>
    %c386 = arith.constant 386 : index
    %1565 = memref.load %arg3[%c386] : memref<670xf32, #tpu.memory_space<smem>>
    %1566 = vector.broadcast %1565 : f32 to vector<16x16xf32>
    %1567 = arith.mulf %1309, %1566 : vector<16x16xf32>
    %1568 = arith.addf %1564, %1567 : vector<16x16xf32>
    %c387 = arith.constant 387 : index
    %1569 = memref.load %arg3[%c387] : memref<670xf32, #tpu.memory_space<smem>>
    %1570 = vector.broadcast %1569 : f32 to vector<16x16xf32>
    %1571 = arith.mulf %1311, %1570 : vector<16x16xf32>
    %1572 = arith.addf %1568, %1571 : vector<16x16xf32>
    %c388 = arith.constant 388 : index
    %1573 = memref.load %arg3[%c388] : memref<670xf32, #tpu.memory_space<smem>>
    %1574 = vector.broadcast %1573 : f32 to vector<16x16xf32>
    %1575 = arith.mulf %1313, %1574 : vector<16x16xf32>
    %1576 = arith.addf %1572, %1575 : vector<16x16xf32>
    %c389 = arith.constant 389 : index
    %1577 = memref.load %arg3[%c389] : memref<670xf32, #tpu.memory_space<smem>>
    %1578 = vector.broadcast %1577 : f32 to vector<16x16xf32>
    %1579 = arith.mulf %1315, %1578 : vector<16x16xf32>
    %1580 = arith.addf %1576, %1579 : vector<16x16xf32>
    %c390 = arith.constant 390 : index
    %1581 = memref.load %arg3[%c390] : memref<670xf32, #tpu.memory_space<smem>>
    %1582 = vector.broadcast %1581 : f32 to vector<16x16xf32>
    %1583 = arith.mulf %1317, %1582 : vector<16x16xf32>
    %1584 = arith.addf %1580, %1583 : vector<16x16xf32>
    %c391 = arith.constant 391 : index
    %1585 = memref.load %arg3[%c391] : memref<670xf32, #tpu.memory_space<smem>>
    %1586 = vector.broadcast %1585 : f32 to vector<16x16xf32>
    %1587 = arith.mulf %1319, %1586 : vector<16x16xf32>
    %1588 = arith.addf %1584, %1587 : vector<16x16xf32>
    %c399 = arith.constant 399 : index
    %1589 = memref.load %arg3[%c399] : memref<670xf32, #tpu.memory_space<smem>>
    %1590 = vector.broadcast %1589 : f32 to vector<16x16xf32>
    %1591 = arith.addf %1588, %1590 : vector<16x16xf32>
    %cst_55 = arith.constant 0.000000e+00 : f32
    %1592 = vector.broadcast %cst_55 : f32 to vector<16x16xf32>
    %1593 = arith.maximumf %1353, %1592 : vector<16x16xf32>
    %cst_56 = arith.constant 0.000000e+00 : f32
    %1594 = vector.broadcast %cst_56 : f32 to vector<16x16xf32>
    %1595 = arith.maximumf %1387, %1594 : vector<16x16xf32>
    %cst_57 = arith.constant 0.000000e+00 : f32
    %1596 = vector.broadcast %cst_57 : f32 to vector<16x16xf32>
    %1597 = arith.maximumf %1421, %1596 : vector<16x16xf32>
    %cst_58 = arith.constant 0.000000e+00 : f32
    %1598 = vector.broadcast %cst_58 : f32 to vector<16x16xf32>
    %1599 = arith.maximumf %1455, %1598 : vector<16x16xf32>
    %cst_59 = arith.constant 0.000000e+00 : f32
    %1600 = vector.broadcast %cst_59 : f32 to vector<16x16xf32>
    %1601 = arith.maximumf %1489, %1600 : vector<16x16xf32>
    %cst_60 = arith.constant 0.000000e+00 : f32
    %1602 = vector.broadcast %cst_60 : f32 to vector<16x16xf32>
    %1603 = arith.maximumf %1523, %1602 : vector<16x16xf32>
    %cst_61 = arith.constant 0.000000e+00 : f32
    %1604 = vector.broadcast %cst_61 : f32 to vector<16x16xf32>
    %1605 = arith.maximumf %1557, %1604 : vector<16x16xf32>
    %cst_62 = arith.constant 0.000000e+00 : f32
    %1606 = vector.broadcast %cst_62 : f32 to vector<16x16xf32>
    %1607 = arith.maximumf %1591, %1606 : vector<16x16xf32>
    %1608 = arith.addf %1593, %729 : vector<16x16xf32>
    %1609 = arith.addf %1595, %731 : vector<16x16xf32>
    %1610 = arith.addf %1597, %733 : vector<16x16xf32>
    %1611 = arith.addf %1599, %735 : vector<16x16xf32>
    %1612 = arith.addf %1601, %737 : vector<16x16xf32>
    %1613 = arith.addf %1603, %739 : vector<16x16xf32>
    %1614 = arith.addf %1605, %741 : vector<16x16xf32>
    %1615 = arith.addf %1607, %743 : vector<16x16xf32>
    %c400 = arith.constant 400 : index
    %1616 = memref.load %arg3[%c400] : memref<670xf32, #tpu.memory_space<smem>>
    %1617 = vector.broadcast %1616 : f32 to vector<16x16xf32>
    %1618 = arith.mulf %1608, %1617 : vector<16x16xf32>
    %c401 = arith.constant 401 : index
    %1619 = memref.load %arg3[%c401] : memref<670xf32, #tpu.memory_space<smem>>
    %1620 = vector.broadcast %1619 : f32 to vector<16x16xf32>
    %1621 = arith.mulf %1609, %1620 : vector<16x16xf32>
    %1622 = arith.addf %1618, %1621 : vector<16x16xf32>
    %c402 = arith.constant 402 : index
    %1623 = memref.load %arg3[%c402] : memref<670xf32, #tpu.memory_space<smem>>
    %1624 = vector.broadcast %1623 : f32 to vector<16x16xf32>
    %1625 = arith.mulf %1610, %1624 : vector<16x16xf32>
    %1626 = arith.addf %1622, %1625 : vector<16x16xf32>
    %c403 = arith.constant 403 : index
    %1627 = memref.load %arg3[%c403] : memref<670xf32, #tpu.memory_space<smem>>
    %1628 = vector.broadcast %1627 : f32 to vector<16x16xf32>
    %1629 = arith.mulf %1611, %1628 : vector<16x16xf32>
    %1630 = arith.addf %1626, %1629 : vector<16x16xf32>
    %c404 = arith.constant 404 : index
    %1631 = memref.load %arg3[%c404] : memref<670xf32, #tpu.memory_space<smem>>
    %1632 = vector.broadcast %1631 : f32 to vector<16x16xf32>
    %1633 = arith.mulf %1612, %1632 : vector<16x16xf32>
    %1634 = arith.addf %1630, %1633 : vector<16x16xf32>
    %c405 = arith.constant 405 : index
    %1635 = memref.load %arg3[%c405] : memref<670xf32, #tpu.memory_space<smem>>
    %1636 = vector.broadcast %1635 : f32 to vector<16x16xf32>
    %1637 = arith.mulf %1613, %1636 : vector<16x16xf32>
    %1638 = arith.addf %1634, %1637 : vector<16x16xf32>
    %c406 = arith.constant 406 : index
    %1639 = memref.load %arg3[%c406] : memref<670xf32, #tpu.memory_space<smem>>
    %1640 = vector.broadcast %1639 : f32 to vector<16x16xf32>
    %1641 = arith.mulf %1614, %1640 : vector<16x16xf32>
    %1642 = arith.addf %1638, %1641 : vector<16x16xf32>
    %c407 = arith.constant 407 : index
    %1643 = memref.load %arg3[%c407] : memref<670xf32, #tpu.memory_space<smem>>
    %1644 = vector.broadcast %1643 : f32 to vector<16x16xf32>
    %1645 = arith.mulf %1615, %1644 : vector<16x16xf32>
    %1646 = arith.addf %1642, %1645 : vector<16x16xf32>
    %c424 = arith.constant 424 : index
    %1647 = memref.load %arg3[%c424] : memref<670xf32, #tpu.memory_space<smem>>
    %1648 = vector.broadcast %1647 : f32 to vector<16x16xf32>
    %1649 = arith.addf %1646, %1648 : vector<16x16xf32>
    %c408 = arith.constant 408 : index
    %1650 = memref.load %arg3[%c408] : memref<670xf32, #tpu.memory_space<smem>>
    %1651 = vector.broadcast %1650 : f32 to vector<16x16xf32>
    %1652 = arith.mulf %1608, %1651 : vector<16x16xf32>
    %c409 = arith.constant 409 : index
    %1653 = memref.load %arg3[%c409] : memref<670xf32, #tpu.memory_space<smem>>
    %1654 = vector.broadcast %1653 : f32 to vector<16x16xf32>
    %1655 = arith.mulf %1609, %1654 : vector<16x16xf32>
    %1656 = arith.addf %1652, %1655 : vector<16x16xf32>
    %c410 = arith.constant 410 : index
    %1657 = memref.load %arg3[%c410] : memref<670xf32, #tpu.memory_space<smem>>
    %1658 = vector.broadcast %1657 : f32 to vector<16x16xf32>
    %1659 = arith.mulf %1610, %1658 : vector<16x16xf32>
    %1660 = arith.addf %1656, %1659 : vector<16x16xf32>
    %c411 = arith.constant 411 : index
    %1661 = memref.load %arg3[%c411] : memref<670xf32, #tpu.memory_space<smem>>
    %1662 = vector.broadcast %1661 : f32 to vector<16x16xf32>
    %1663 = arith.mulf %1611, %1662 : vector<16x16xf32>
    %1664 = arith.addf %1660, %1663 : vector<16x16xf32>
    %c412 = arith.constant 412 : index
    %1665 = memref.load %arg3[%c412] : memref<670xf32, #tpu.memory_space<smem>>
    %1666 = vector.broadcast %1665 : f32 to vector<16x16xf32>
    %1667 = arith.mulf %1612, %1666 : vector<16x16xf32>
    %1668 = arith.addf %1664, %1667 : vector<16x16xf32>
    %c413 = arith.constant 413 : index
    %1669 = memref.load %arg3[%c413] : memref<670xf32, #tpu.memory_space<smem>>
    %1670 = vector.broadcast %1669 : f32 to vector<16x16xf32>
    %1671 = arith.mulf %1613, %1670 : vector<16x16xf32>
    %1672 = arith.addf %1668, %1671 : vector<16x16xf32>
    %c414 = arith.constant 414 : index
    %1673 = memref.load %arg3[%c414] : memref<670xf32, #tpu.memory_space<smem>>
    %1674 = vector.broadcast %1673 : f32 to vector<16x16xf32>
    %1675 = arith.mulf %1614, %1674 : vector<16x16xf32>
    %1676 = arith.addf %1672, %1675 : vector<16x16xf32>
    %c415 = arith.constant 415 : index
    %1677 = memref.load %arg3[%c415] : memref<670xf32, #tpu.memory_space<smem>>
    %1678 = vector.broadcast %1677 : f32 to vector<16x16xf32>
    %1679 = arith.mulf %1615, %1678 : vector<16x16xf32>
    %1680 = arith.addf %1676, %1679 : vector<16x16xf32>
    %c425 = arith.constant 425 : index
    %1681 = memref.load %arg3[%c425] : memref<670xf32, #tpu.memory_space<smem>>
    %1682 = vector.broadcast %1681 : f32 to vector<16x16xf32>
    %1683 = arith.addf %1680, %1682 : vector<16x16xf32>
    %c416 = arith.constant 416 : index
    %1684 = memref.load %arg3[%c416] : memref<670xf32, #tpu.memory_space<smem>>
    %1685 = vector.broadcast %1684 : f32 to vector<16x16xf32>
    %1686 = arith.mulf %1608, %1685 : vector<16x16xf32>
    %c417 = arith.constant 417 : index
    %1687 = memref.load %arg3[%c417] : memref<670xf32, #tpu.memory_space<smem>>
    %1688 = vector.broadcast %1687 : f32 to vector<16x16xf32>
    %1689 = arith.mulf %1609, %1688 : vector<16x16xf32>
    %1690 = arith.addf %1686, %1689 : vector<16x16xf32>
    %c418 = arith.constant 418 : index
    %1691 = memref.load %arg3[%c418] : memref<670xf32, #tpu.memory_space<smem>>
    %1692 = vector.broadcast %1691 : f32 to vector<16x16xf32>
    %1693 = arith.mulf %1610, %1692 : vector<16x16xf32>
    %1694 = arith.addf %1690, %1693 : vector<16x16xf32>
    %c419 = arith.constant 419 : index
    %1695 = memref.load %arg3[%c419] : memref<670xf32, #tpu.memory_space<smem>>
    %1696 = vector.broadcast %1695 : f32 to vector<16x16xf32>
    %1697 = arith.mulf %1611, %1696 : vector<16x16xf32>
    %1698 = arith.addf %1694, %1697 : vector<16x16xf32>
    %c420 = arith.constant 420 : index
    %1699 = memref.load %arg3[%c420] : memref<670xf32, #tpu.memory_space<smem>>
    %1700 = vector.broadcast %1699 : f32 to vector<16x16xf32>
    %1701 = arith.mulf %1612, %1700 : vector<16x16xf32>
    %1702 = arith.addf %1698, %1701 : vector<16x16xf32>
    %c421 = arith.constant 421 : index
    %1703 = memref.load %arg3[%c421] : memref<670xf32, #tpu.memory_space<smem>>
    %1704 = vector.broadcast %1703 : f32 to vector<16x16xf32>
    %1705 = arith.mulf %1613, %1704 : vector<16x16xf32>
    %1706 = arith.addf %1702, %1705 : vector<16x16xf32>
    %c422 = arith.constant 422 : index
    %1707 = memref.load %arg3[%c422] : memref<670xf32, #tpu.memory_space<smem>>
    %1708 = vector.broadcast %1707 : f32 to vector<16x16xf32>
    %1709 = arith.mulf %1614, %1708 : vector<16x16xf32>
    %1710 = arith.addf %1706, %1709 : vector<16x16xf32>
    %c423 = arith.constant 423 : index
    %1711 = memref.load %arg3[%c423] : memref<670xf32, #tpu.memory_space<smem>>
    %1712 = vector.broadcast %1711 : f32 to vector<16x16xf32>
    %1713 = arith.mulf %1615, %1712 : vector<16x16xf32>
    %1714 = arith.addf %1710, %1713 : vector<16x16xf32>
    %c426 = arith.constant 426 : index
    %1715 = memref.load %arg3[%c426] : memref<670xf32, #tpu.memory_space<smem>>
    %1716 = vector.broadcast %1715 : f32 to vector<16x16xf32>
    %1717 = arith.addf %1714, %1716 : vector<16x16xf32>
    %1718 = math.tanh %1649 : vector<16x16xf32>
    %1719 = math.tanh %1683 : vector<16x16xf32>
    %1720 = math.tanh %1717 : vector<16x16xf32>
    %c0_63 = arith.constant 0 : index
    %c0_64 = arith.constant 0 : index
    %c0_65 = arith.constant 0 : index
    %c0_66 = arith.constant 0 : index
    %1721 = vector.load %arg5[%c0_63, %c0_64, %c0_65, %c0_66] : memref<1x6x16x16xf32, #tpu.memory_space<vmem>>, vector<1x1x16x16xf32>
    %1722 = vector.shape_cast %1721 : vector<1x1x16x16xf32> to vector<16x16xf32>
    %1723 = vector.shape_cast %1718 : vector<16x16xf32> to vector<1x1x16x16xf32>
    tpu.vector_store %arg5[%c0_63, %c0_64, %c0_65, %c0_66], %1723 {strides = array<i32>} : memref<1x6x16x16xf32, #tpu.memory_space<vmem>>, vector<1x1x16x16xf32>,
    %c0_67 = arith.constant 0 : index
    %c1_68 = arith.constant 1 : index
    %c0_69 = arith.constant 0 : index
    %c0_70 = arith.constant 0 : index
    %1724 = vector.load %arg5[%c0_67, %c1_68, %c0_69, %c0_70] : memref<1x6x16x16xf32, #tpu.memory_space<vmem>>, vector<1x1x16x16xf32>
    %1725 = vector.shape_cast %1724 : vector<1x1x16x16xf32> to vector<16x16xf32>
    %1726 = vector.shape_cast %1719 : vector<16x16xf32> to vector<1x1x16x16xf32>
    tpu.vector_store %arg5[%c0_67, %c1_68, %c0_69, %c0_70], %1726 {strides = array<i32>} : memref<1x6x16x16xf32, #tpu.memory_space<vmem>>, vector<1x1x16x16xf32>,
    %c0_71 = arith.constant 0 : index
    %c2_72 = arith.constant 2 : index
    %c0_73 = arith.constant 0 : index
    %c0_74 = arith.constant 0 : index
    %1727 = vector.load %arg5[%c0_71, %c2_72, %c0_73, %c0_74] : memref<1x6x16x16xf32, #tpu.memory_space<vmem>>, vector<1x1x16x16xf32>
    %1728 = vector.shape_cast %1727 : vector<1x1x16x16xf32> to vector<16x16xf32>
    %1729 = vector.shape_cast %1720 : vector<16x16xf32> to vector<1x1x16x16xf32>
    tpu.vector_store %arg5[%c0_71, %c2_72, %c0_73, %c0_74], %1729 {strides = array<i32>} : memref<1x6x16x16xf32, #tpu.memory_space<vmem>>, vector<1x1x16x16xf32>,
    %c427 = arith.constant 427 : index
    %1730 = memref.load %arg3[%c427] : memref<670xf32, #tpu.memory_space<smem>>
    %1731 = vector.broadcast %1730 : f32 to vector<16x16xf32>
    %1732 = arith.mulf %729, %1731 : vector<16x16xf32>
    %c428 = arith.constant 428 : index
    %1733 = memref.load %arg3[%c428] : memref<670xf32, #tpu.memory_space<smem>>
    %1734 = vector.broadcast %1733 : f32 to vector<16x16xf32>
    %1735 = arith.mulf %731, %1734 : vector<16x16xf32>
    %1736 = arith.addf %1732, %1735 : vector<16x16xf32>
    %c429 = arith.constant 429 : index
    %1737 = memref.load %arg3[%c429] : memref<670xf32, #tpu.memory_space<smem>>
    %1738 = vector.broadcast %1737 : f32 to vector<16x16xf32>
    %1739 = arith.mulf %733, %1738 : vector<16x16xf32>
    %1740 = arith.addf %1736, %1739 : vector<16x16xf32>
    %c430 = arith.constant 430 : index
    %1741 = memref.load %arg3[%c430] : memref<670xf32, #tpu.memory_space<smem>>
    %1742 = vector.broadcast %1741 : f32 to vector<16x16xf32>
    %1743 = arith.mulf %735, %1742 : vector<16x16xf32>
    %1744 = arith.addf %1740, %1743 : vector<16x16xf32>
    %c431 = arith.constant 431 : index
    %1745 = memref.load %arg3[%c431] : memref<670xf32, #tpu.memory_space<smem>>
    %1746 = vector.broadcast %1745 : f32 to vector<16x16xf32>
    %1747 = arith.mulf %737, %1746 : vector<16x16xf32>
    %1748 = arith.addf %1744, %1747 : vector<16x16xf32>
    %c432 = arith.constant 432 : index
    %1749 = memref.load %arg3[%c432] : memref<670xf32, #tpu.memory_space<smem>>
    %1750 = vector.broadcast %1749 : f32 to vector<16x16xf32>
    %1751 = arith.mulf %739, %1750 : vector<16x16xf32>
    %1752 = arith.addf %1748, %1751 : vector<16x16xf32>
    %c433 = arith.constant 433 : index
    %1753 = memref.load %arg3[%c433] : memref<670xf32, #tpu.memory_space<smem>>
    %1754 = vector.broadcast %1753 : f32 to vector<16x16xf32>
    %1755 = arith.mulf %741, %1754 : vector<16x16xf32>
    %1756 = arith.addf %1752, %1755 : vector<16x16xf32>
    %c434 = arith.constant 434 : index
    %1757 = memref.load %arg3[%c434] : memref<670xf32, #tpu.memory_space<smem>>
    %1758 = vector.broadcast %1757 : f32 to vector<16x16xf32>
    %1759 = arith.mulf %743, %1758 : vector<16x16xf32>
    %1760 = arith.addf %1756, %1759 : vector<16x16xf32>
    %c491 = arith.constant 491 : index
    %1761 = memref.load %arg3[%c491] : memref<670xf32, #tpu.memory_space<smem>>
    %1762 = vector.broadcast %1761 : f32 to vector<16x16xf32>
    %1763 = arith.addf %1760, %1762 : vector<16x16xf32>
    %c435 = arith.constant 435 : index
    %1764 = memref.load %arg3[%c435] : memref<670xf32, #tpu.memory_space<smem>>
    %1765 = vector.broadcast %1764 : f32 to vector<16x16xf32>
    %1766 = arith.mulf %729, %1765 : vector<16x16xf32>
    %c436 = arith.constant 436 : index
    %1767 = memref.load %arg3[%c436] : memref<670xf32, #tpu.memory_space<smem>>
    %1768 = vector.broadcast %1767 : f32 to vector<16x16xf32>
    %1769 = arith.mulf %731, %1768 : vector<16x16xf32>
    %1770 = arith.addf %1766, %1769 : vector<16x16xf32>
    %c437 = arith.constant 437 : index
    %1771 = memref.load %arg3[%c437] : memref<670xf32, #tpu.memory_space<smem>>
    %1772 = vector.broadcast %1771 : f32 to vector<16x16xf32>
    %1773 = arith.mulf %733, %1772 : vector<16x16xf32>
    %1774 = arith.addf %1770, %1773 : vector<16x16xf32>
    %c438 = arith.constant 438 : index
    %1775 = memref.load %arg3[%c438] : memref<670xf32, #tpu.memory_space<smem>>
    %1776 = vector.broadcast %1775 : f32 to vector<16x16xf32>
    %1777 = arith.mulf %735, %1776 : vector<16x16xf32>
    %1778 = arith.addf %1774, %1777 : vector<16x16xf32>
    %c439 = arith.constant 439 : index
    %1779 = memref.load %arg3[%c439] : memref<670xf32, #tpu.memory_space<smem>>
    %1780 = vector.broadcast %1779 : f32 to vector<16x16xf32>
    %1781 = arith.mulf %737, %1780 : vector<16x16xf32>
    %1782 = arith.addf %1778, %1781 : vector<16x16xf32>
    %c440 = arith.constant 440 : index
    %1783 = memref.load %arg3[%c440] : memref<670xf32, #tpu.memory_space<smem>>
    %1784 = vector.broadcast %1783 : f32 to vector<16x16xf32>
    %1785 = arith.mulf %739, %1784 : vector<16x16xf32>
    %1786 = arith.addf %1782, %1785 : vector<16x16xf32>
    %c441 = arith.constant 441 : index
    %1787 = memref.load %arg3[%c441] : memref<670xf32, #tpu.memory_space<smem>>
    %1788 = vector.broadcast %1787 : f32 to vector<16x16xf32>
    %1789 = arith.mulf %741, %1788 : vector<16x16xf32>
    %1790 = arith.addf %1786, %1789 : vector<16x16xf32>
    %c442 = arith.constant 442 : index
    %1791 = memref.load %arg3[%c442] : memref<670xf32, #tpu.memory_space<smem>>
    %1792 = vector.broadcast %1791 : f32 to vector<16x16xf32>
    %1793 = arith.mulf %743, %1792 : vector<16x16xf32>
    %1794 = arith.addf %1790, %1793 : vector<16x16xf32>
    %c492 = arith.constant 492 : index
    %1795 = memref.load %arg3[%c492] : memref<670xf32, #tpu.memory_space<smem>>
    %1796 = vector.broadcast %1795 : f32 to vector<16x16xf32>
    %1797 = arith.addf %1794, %1796 : vector<16x16xf32>
    %c443 = arith.constant 443 : index
    %1798 = memref.load %arg3[%c443] : memref<670xf32, #tpu.memory_space<smem>>
    %1799 = vector.broadcast %1798 : f32 to vector<16x16xf32>
    %1800 = arith.mulf %729, %1799 : vector<16x16xf32>
    %c444 = arith.constant 444 : index
    %1801 = memref.load %arg3[%c444] : memref<670xf32, #tpu.memory_space<smem>>
    %1802 = vector.broadcast %1801 : f32 to vector<16x16xf32>
    %1803 = arith.mulf %731, %1802 : vector<16x16xf32>
    %1804 = arith.addf %1800, %1803 : vector<16x16xf32>
    %c445 = arith.constant 445 : index
    %1805 = memref.load %arg3[%c445] : memref<670xf32, #tpu.memory_space<smem>>
    %1806 = vector.broadcast %1805 : f32 to vector<16x16xf32>
    %1807 = arith.mulf %733, %1806 : vector<16x16xf32>
    %1808 = arith.addf %1804, %1807 : vector<16x16xf32>
    %c446 = arith.constant 446 : index
    %1809 = memref.load %arg3[%c446] : memref<670xf32, #tpu.memory_space<smem>>
    %1810 = vector.broadcast %1809 : f32 to vector<16x16xf32>
    %1811 = arith.mulf %735, %1810 : vector<16x16xf32>
    %1812 = arith.addf %1808, %1811 : vector<16x16xf32>
    %c447 = arith.constant 447 : index
    %1813 = memref.load %arg3[%c447] : memref<670xf32, #tpu.memory_space<smem>>
    %1814 = vector.broadcast %1813 : f32 to vector<16x16xf32>
    %1815 = arith.mulf %737, %1814 : vector<16x16xf32>
    %1816 = arith.addf %1812, %1815 : vector<16x16xf32>
    %c448 = arith.constant 448 : index
    %1817 = memref.load %arg3[%c448] : memref<670xf32, #tpu.memory_space<smem>>
    %1818 = vector.broadcast %1817 : f32 to vector<16x16xf32>
    %1819 = arith.mulf %739, %1818 : vector<16x16xf32>
    %1820 = arith.addf %1816, %1819 : vector<16x16xf32>
    %c449 = arith.constant 449 : index
    %1821 = memref.load %arg3[%c449] : memref<670xf32, #tpu.memory_space<smem>>
    %1822 = vector.broadcast %1821 : f32 to vector<16x16xf32>
    %1823 = arith.mulf %741, %1822 : vector<16x16xf32>
    %1824 = arith.addf %1820, %1823 : vector<16x16xf32>
    %c450 = arith.constant 450 : index
    %1825 = memref.load %arg3[%c450] : memref<670xf32, #tpu.memory_space<smem>>
    %1826 = vector.broadcast %1825 : f32 to vector<16x16xf32>
    %1827 = arith.mulf %743, %1826 : vector<16x16xf32>
    %1828 = arith.addf %1824, %1827 : vector<16x16xf32>
    %c493 = arith.constant 493 : index
    %1829 = memref.load %arg3[%c493] : memref<670xf32, #tpu.memory_space<smem>>
    %1830 = vector.broadcast %1829 : f32 to vector<16x16xf32>
    %1831 = arith.addf %1828, %1830 : vector<16x16xf32>
    %c451 = arith.constant 451 : index
    %1832 = memref.load %arg3[%c451] : memref<670xf32, #tpu.memory_space<smem>>
    %1833 = vector.broadcast %1832 : f32 to vector<16x16xf32>
    %1834 = arith.mulf %729, %1833 : vector<16x16xf32>
    %c452 = arith.constant 452 : index
    %1835 = memref.load %arg3[%c452] : memref<670xf32, #tpu.memory_space<smem>>
    %1836 = vector.broadcast %1835 : f32 to vector<16x16xf32>
    %1837 = arith.mulf %731, %1836 : vector<16x16xf32>
    %1838 = arith.addf %1834, %1837 : vector<16x16xf32>
    %c453 = arith.constant 453 : index
    %1839 = memref.load %arg3[%c453] : memref<670xf32, #tpu.memory_space<smem>>
    %1840 = vector.broadcast %1839 : f32 to vector<16x16xf32>
    %1841 = arith.mulf %733, %1840 : vector<16x16xf32>
    %1842 = arith.addf %1838, %1841 : vector<16x16xf32>
    %c454 = arith.constant 454 : index
    %1843 = memref.load %arg3[%c454] : memref<670xf32, #tpu.memory_space<smem>>
    %1844 = vector.broadcast %1843 : f32 to vector<16x16xf32>
    %1845 = arith.mulf %735, %1844 : vector<16x16xf32>
    %1846 = arith.addf %1842, %1845 : vector<16x16xf32>
    %c455 = arith.constant 455 : index
    %1847 = memref.load %arg3[%c455] : memref<670xf32, #tpu.memory_space<smem>>
    %1848 = vector.broadcast %1847 : f32 to vector<16x16xf32>
    %1849 = arith.mulf %737, %1848 : vector<16x16xf32>
    %1850 = arith.addf %1846, %1849 : vector<16x16xf32>
    %c456 = arith.constant 456 : index
    %1851 = memref.load %arg3[%c456] : memref<670xf32, #tpu.memory_space<smem>>
    %1852 = vector.broadcast %1851 : f32 to vector<16x16xf32>
    %1853 = arith.mulf %739, %1852 : vector<16x16xf32>
    %1854 = arith.addf %1850, %1853 : vector<16x16xf32>
    %c457 = arith.constant 457 : index
    %1855 = memref.load %arg3[%c457] : memref<670xf32, #tpu.memory_space<smem>>
    %1856 = vector.broadcast %1855 : f32 to vector<16x16xf32>
    %1857 = arith.mulf %741, %1856 : vector<16x16xf32>
    %1858 = arith.addf %1854, %1857 : vector<16x16xf32>
    %c458 = arith.constant 458 : index
    %1859 = memref.load %arg3[%c458] : memref<670xf32, #tpu.memory_space<smem>>
    %1860 = vector.broadcast %1859 : f32 to vector<16x16xf32>
    %1861 = arith.mulf %743, %1860 : vector<16x16xf32>
    %1862 = arith.addf %1858, %1861 : vector<16x16xf32>
    %c494 = arith.constant 494 : index
    %1863 = memref.load %arg3[%c494] : memref<670xf32, #tpu.memory_space<smem>>
    %1864 = vector.broadcast %1863 : f32 to vector<16x16xf32>
    %1865 = arith.addf %1862, %1864 : vector<16x16xf32>
    %c459 = arith.constant 459 : index
    %1866 = memref.load %arg3[%c459] : memref<670xf32, #tpu.memory_space<smem>>
    %1867 = vector.broadcast %1866 : f32 to vector<16x16xf32>
    %1868 = arith.mulf %729, %1867 : vector<16x16xf32>
    %c460 = arith.constant 460 : index
    %1869 = memref.load %arg3[%c460] : memref<670xf32, #tpu.memory_space<smem>>
    %1870 = vector.broadcast %1869 : f32 to vector<16x16xf32>
    %1871 = arith.mulf %731, %1870 : vector<16x16xf32>
    %1872 = arith.addf %1868, %1871 : vector<16x16xf32>
    %c461 = arith.constant 461 : index
    %1873 = memref.load %arg3[%c461] : memref<670xf32, #tpu.memory_space<smem>>
    %1874 = vector.broadcast %1873 : f32 to vector<16x16xf32>
    %1875 = arith.mulf %733, %1874 : vector<16x16xf32>
    %1876 = arith.addf %1872, %1875 : vector<16x16xf32>
    %c462 = arith.constant 462 : index
    %1877 = memref.load %arg3[%c462] : memref<670xf32, #tpu.memory_space<smem>>
    %1878 = vector.broadcast %1877 : f32 to vector<16x16xf32>
    %1879 = arith.mulf %735, %1878 : vector<16x16xf32>
    %1880 = arith.addf %1876, %1879 : vector<16x16xf32>
    %c463 = arith.constant 463 : index
    %1881 = memref.load %arg3[%c463] : memref<670xf32, #tpu.memory_space<smem>>
    %1882 = vector.broadcast %1881 : f32 to vector<16x16xf32>
    %1883 = arith.mulf %737, %1882 : vector<16x16xf32>
    %1884 = arith.addf %1880, %1883 : vector<16x16xf32>
    %c464 = arith.constant 464 : index
    %1885 = memref.load %arg3[%c464] : memref<670xf32, #tpu.memory_space<smem>>
    %1886 = vector.broadcast %1885 : f32 to vector<16x16xf32>
    %1887 = arith.mulf %739, %1886 : vector<16x16xf32>
    %1888 = arith.addf %1884, %1887 : vector<16x16xf32>
    %c465 = arith.constant 465 : index
    %1889 = memref.load %arg3[%c465] : memref<670xf32, #tpu.memory_space<smem>>
    %1890 = vector.broadcast %1889 : f32 to vector<16x16xf32>
    %1891 = arith.mulf %741, %1890 : vector<16x16xf32>
    %1892 = arith.addf %1888, %1891 : vector<16x16xf32>
    %c466 = arith.constant 466 : index
    %1893 = memref.load %arg3[%c466] : memref<670xf32, #tpu.memory_space<smem>>
    %1894 = vector.broadcast %1893 : f32 to vector<16x16xf32>
    %1895 = arith.mulf %743, %1894 : vector<16x16xf32>
    %1896 = arith.addf %1892, %1895 : vector<16x16xf32>
    %c495 = arith.constant 495 : index
    %1897 = memref.load %arg3[%c495] : memref<670xf32, #tpu.memory_space<smem>>
    %1898 = vector.broadcast %1897 : f32 to vector<16x16xf32>
    %1899 = arith.addf %1896, %1898 : vector<16x16xf32>
    %c467 = arith.constant 467 : index
    %1900 = memref.load %arg3[%c467] : memref<670xf32, #tpu.memory_space<smem>>
    %1901 = vector.broadcast %1900 : f32 to vector<16x16xf32>
    %1902 = arith.mulf %729, %1901 : vector<16x16xf32>
    %c468 = arith.constant 468 : index
    %1903 = memref.load %arg3[%c468] : memref<670xf32, #tpu.memory_space<smem>>
    %1904 = vector.broadcast %1903 : f32 to vector<16x16xf32>
    %1905 = arith.mulf %731, %1904 : vector<16x16xf32>
    %1906 = arith.addf %1902, %1905 : vector<16x16xf32>
    %c469 = arith.constant 469 : index
    %1907 = memref.load %arg3[%c469] : memref<670xf32, #tpu.memory_space<smem>>
    %1908 = vector.broadcast %1907 : f32 to vector<16x16xf32>
    %1909 = arith.mulf %733, %1908 : vector<16x16xf32>
    %1910 = arith.addf %1906, %1909 : vector<16x16xf32>
    %c470 = arith.constant 470 : index
    %1911 = memref.load %arg3[%c470] : memref<670xf32, #tpu.memory_space<smem>>
    %1912 = vector.broadcast %1911 : f32 to vector<16x16xf32>
    %1913 = arith.mulf %735, %1912 : vector<16x16xf32>
    %1914 = arith.addf %1910, %1913 : vector<16x16xf32>
    %c471 = arith.constant 471 : index
    %1915 = memref.load %arg3[%c471] : memref<670xf32, #tpu.memory_space<smem>>
    %1916 = vector.broadcast %1915 : f32 to vector<16x16xf32>
    %1917 = arith.mulf %737, %1916 : vector<16x16xf32>
    %1918 = arith.addf %1914, %1917 : vector<16x16xf32>
    %c472 = arith.constant 472 : index
    %1919 = memref.load %arg3[%c472] : memref<670xf32, #tpu.memory_space<smem>>
    %1920 = vector.broadcast %1919 : f32 to vector<16x16xf32>
    %1921 = arith.mulf %739, %1920 : vector<16x16xf32>
    %1922 = arith.addf %1918, %1921 : vector<16x16xf32>
    %c473 = arith.constant 473 : index
    %1923 = memref.load %arg3[%c473] : memref<670xf32, #tpu.memory_space<smem>>
    %1924 = vector.broadcast %1923 : f32 to vector<16x16xf32>
    %1925 = arith.mulf %741, %1924 : vector<16x16xf32>
    %1926 = arith.addf %1922, %1925 : vector<16x16xf32>
    %c474 = arith.constant 474 : index
    %1927 = memref.load %arg3[%c474] : memref<670xf32, #tpu.memory_space<smem>>
    %1928 = vector.broadcast %1927 : f32 to vector<16x16xf32>
    %1929 = arith.mulf %743, %1928 : vector<16x16xf32>
    %1930 = arith.addf %1926, %1929 : vector<16x16xf32>
    %c496 = arith.constant 496 : index
    %1931 = memref.load %arg3[%c496] : memref<670xf32, #tpu.memory_space<smem>>
    %1932 = vector.broadcast %1931 : f32 to vector<16x16xf32>
    %1933 = arith.addf %1930, %1932 : vector<16x16xf32>
    %c475 = arith.constant 475 : index
    %1934 = memref.load %arg3[%c475] : memref<670xf32, #tpu.memory_space<smem>>
    %1935 = vector.broadcast %1934 : f32 to vector<16x16xf32>
    %1936 = arith.mulf %729, %1935 : vector<16x16xf32>
    %c476 = arith.constant 476 : index
    %1937 = memref.load %arg3[%c476] : memref<670xf32, #tpu.memory_space<smem>>
    %1938 = vector.broadcast %1937 : f32 to vector<16x16xf32>
    %1939 = arith.mulf %731, %1938 : vector<16x16xf32>
    %1940 = arith.addf %1936, %1939 : vector<16x16xf32>
    %c477 = arith.constant 477 : index
    %1941 = memref.load %arg3[%c477] : memref<670xf32, #tpu.memory_space<smem>>
    %1942 = vector.broadcast %1941 : f32 to vector<16x16xf32>
    %1943 = arith.mulf %733, %1942 : vector<16x16xf32>
    %1944 = arith.addf %1940, %1943 : vector<16x16xf32>
    %c478 = arith.constant 478 : index
    %1945 = memref.load %arg3[%c478] : memref<670xf32, #tpu.memory_space<smem>>
    %1946 = vector.broadcast %1945 : f32 to vector<16x16xf32>
    %1947 = arith.mulf %735, %1946 : vector<16x16xf32>
    %1948 = arith.addf %1944, %1947 : vector<16x16xf32>
    %c479 = arith.constant 479 : index
    %1949 = memref.load %arg3[%c479] : memref<670xf32, #tpu.memory_space<smem>>
    %1950 = vector.broadcast %1949 : f32 to vector<16x16xf32>
    %1951 = arith.mulf %737, %1950 : vector<16x16xf32>
    %1952 = arith.addf %1948, %1951 : vector<16x16xf32>
    %c480 = arith.constant 480 : index
    %1953 = memref.load %arg3[%c480] : memref<670xf32, #tpu.memory_space<smem>>
    %1954 = vector.broadcast %1953 : f32 to vector<16x16xf32>
    %1955 = arith.mulf %739, %1954 : vector<16x16xf32>
    %1956 = arith.addf %1952, %1955 : vector<16x16xf32>
    %c481 = arith.constant 481 : index
    %1957 = memref.load %arg3[%c481] : memref<670xf32, #tpu.memory_space<smem>>
    %1958 = vector.broadcast %1957 : f32 to vector<16x16xf32>
    %1959 = arith.mulf %741, %1958 : vector<16x16xf32>
    %1960 = arith.addf %1956, %1959 : vector<16x16xf32>
    %c482 = arith.constant 482 : index
    %1961 = memref.load %arg3[%c482] : memref<670xf32, #tpu.memory_space<smem>>
    %1962 = vector.broadcast %1961 : f32 to vector<16x16xf32>
    %1963 = arith.mulf %743, %1962 : vector<16x16xf32>
    %1964 = arith.addf %1960, %1963 : vector<16x16xf32>
    %c497 = arith.constant 497 : index
    %1965 = memref.load %arg3[%c497] : memref<670xf32, #tpu.memory_space<smem>>
    %1966 = vector.broadcast %1965 : f32 to vector<16x16xf32>
    %1967 = arith.addf %1964, %1966 : vector<16x16xf32>
    %c483 = arith.constant 483 : index
    %1968 = memref.load %arg3[%c483] : memref<670xf32, #tpu.memory_space<smem>>
    %1969 = vector.broadcast %1968 : f32 to vector<16x16xf32>
    %1970 = arith.mulf %729, %1969 : vector<16x16xf32>
    %c484 = arith.constant 484 : index
    %1971 = memref.load %arg3[%c484] : memref<670xf32, #tpu.memory_space<smem>>
    %1972 = vector.broadcast %1971 : f32 to vector<16x16xf32>
    %1973 = arith.mulf %731, %1972 : vector<16x16xf32>
    %1974 = arith.addf %1970, %1973 : vector<16x16xf32>
    %c485 = arith.constant 485 : index
    %1975 = memref.load %arg3[%c485] : memref<670xf32, #tpu.memory_space<smem>>
    %1976 = vector.broadcast %1975 : f32 to vector<16x16xf32>
    %1977 = arith.mulf %733, %1976 : vector<16x16xf32>
    %1978 = arith.addf %1974, %1977 : vector<16x16xf32>
    %c486 = arith.constant 486 : index
    %1979 = memref.load %arg3[%c486] : memref<670xf32, #tpu.memory_space<smem>>
    %1980 = vector.broadcast %1979 : f32 to vector<16x16xf32>
    %1981 = arith.mulf %735, %1980 : vector<16x16xf32>
    %1982 = arith.addf %1978, %1981 : vector<16x16xf32>
    %c487 = arith.constant 487 : index
    %1983 = memref.load %arg3[%c487] : memref<670xf32, #tpu.memory_space<smem>>
    %1984 = vector.broadcast %1983 : f32 to vector<16x16xf32>
    %1985 = arith.mulf %737, %1984 : vector<16x16xf32>
    %1986 = arith.addf %1982, %1985 : vector<16x16xf32>
    %c488 = arith.constant 488 : index
    %1987 = memref.load %arg3[%c488] : memref<670xf32, #tpu.memory_space<smem>>
    %1988 = vector.broadcast %1987 : f32 to vector<16x16xf32>
    %1989 = arith.mulf %739, %1988 : vector<16x16xf32>
    %1990 = arith.addf %1986, %1989 : vector<16x16xf32>
    %c489 = arith.constant 489 : index
    %1991 = memref.load %arg3[%c489] : memref<670xf32, #tpu.memory_space<smem>>
    %1992 = vector.broadcast %1991 : f32 to vector<16x16xf32>
    %1993 = arith.mulf %741, %1992 : vector<16x16xf32>
    %1994 = arith.addf %1990, %1993 : vector<16x16xf32>
    %c490 = arith.constant 490 : index
    %1995 = memref.load %arg3[%c490] : memref<670xf32, #tpu.memory_space<smem>>
    %1996 = vector.broadcast %1995 : f32 to vector<16x16xf32>
    %1997 = arith.mulf %743, %1996 : vector<16x16xf32>
    %1998 = arith.addf %1994, %1997 : vector<16x16xf32>
    %c498 = arith.constant 498 : index
    %1999 = memref.load %arg3[%c498] : memref<670xf32, #tpu.memory_space<smem>>
    %2000 = vector.broadcast %1999 : f32 to vector<16x16xf32>
    %2001 = arith.addf %1998, %2000 : vector<16x16xf32>
    %cst_75 = arith.constant 0.000000e+00 : f32
    %2002 = vector.broadcast %cst_75 : f32 to vector<16x16xf32>
    %2003 = arith.maximumf %1763, %2002 : vector<16x16xf32>
    %cst_76 = arith.constant 0.000000e+00 : f32
    %2004 = vector.broadcast %cst_76 : f32 to vector<16x16xf32>
    %2005 = arith.maximumf %1797, %2004 : vector<16x16xf32>
    %cst_77 = arith.constant 0.000000e+00 : f32
    %2006 = vector.broadcast %cst_77 : f32 to vector<16x16xf32>
    %2007 = arith.maximumf %1831, %2006 : vector<16x16xf32>
    %cst_78 = arith.constant 0.000000e+00 : f32
    %2008 = vector.broadcast %cst_78 : f32 to vector<16x16xf32>
    %2009 = arith.maximumf %1865, %2008 : vector<16x16xf32>
    %cst_79 = arith.constant 0.000000e+00 : f32
    %2010 = vector.broadcast %cst_79 : f32 to vector<16x16xf32>
    %2011 = arith.maximumf %1899, %2010 : vector<16x16xf32>
    %cst_80 = arith.constant 0.000000e+00 : f32
    %2012 = vector.broadcast %cst_80 : f32 to vector<16x16xf32>
    %2013 = arith.maximumf %1933, %2012 : vector<16x16xf32>
    %cst_81 = arith.constant 0.000000e+00 : f32
    %2014 = vector.broadcast %cst_81 : f32 to vector<16x16xf32>
    %2015 = arith.maximumf %1967, %2014 : vector<16x16xf32>
    %cst_82 = arith.constant 0.000000e+00 : f32
    %2016 = vector.broadcast %cst_82 : f32 to vector<16x16xf32>
    %2017 = arith.maximumf %2001, %2016 : vector<16x16xf32>
    %c499 = arith.constant 499 : index
    %2018 = memref.load %arg3[%c499] : memref<670xf32, #tpu.memory_space<smem>>
    %2019 = vector.broadcast %2018 : f32 to vector<16x16xf32>
    %2020 = arith.mulf %2003, %2019 : vector<16x16xf32>
    %c500 = arith.constant 500 : index
    %2021 = memref.load %arg3[%c500] : memref<670xf32, #tpu.memory_space<smem>>
    %2022 = vector.broadcast %2021 : f32 to vector<16x16xf32>
    %2023 = arith.mulf %2005, %2022 : vector<16x16xf32>
    %2024 = arith.addf %2020, %2023 : vector<16x16xf32>
    %c501 = arith.constant 501 : index
    %2025 = memref.load %arg3[%c501] : memref<670xf32, #tpu.memory_space<smem>>
    %2026 = vector.broadcast %2025 : f32 to vector<16x16xf32>
    %2027 = arith.mulf %2007, %2026 : vector<16x16xf32>
    %2028 = arith.addf %2024, %2027 : vector<16x16xf32>
    %c502 = arith.constant 502 : index
    %2029 = memref.load %arg3[%c502] : memref<670xf32, #tpu.memory_space<smem>>
    %2030 = vector.broadcast %2029 : f32 to vector<16x16xf32>
    %2031 = arith.mulf %2009, %2030 : vector<16x16xf32>
    %2032 = arith.addf %2028, %2031 : vector<16x16xf32>
    %c503 = arith.constant 503 : index
    %2033 = memref.load %arg3[%c503] : memref<670xf32, #tpu.memory_space<smem>>
    %2034 = vector.broadcast %2033 : f32 to vector<16x16xf32>
    %2035 = arith.mulf %2011, %2034 : vector<16x16xf32>
    %2036 = arith.addf %2032, %2035 : vector<16x16xf32>
    %c504 = arith.constant 504 : index
    %2037 = memref.load %arg3[%c504] : memref<670xf32, #tpu.memory_space<smem>>
    %2038 = vector.broadcast %2037 : f32 to vector<16x16xf32>
    %2039 = arith.mulf %2013, %2038 : vector<16x16xf32>
    %2040 = arith.addf %2036, %2039 : vector<16x16xf32>
    %c505 = arith.constant 505 : index
    %2041 = memref.load %arg3[%c505] : memref<670xf32, #tpu.memory_space<smem>>
    %2042 = vector.broadcast %2041 : f32 to vector<16x16xf32>
    %2043 = arith.mulf %2015, %2042 : vector<16x16xf32>
    %2044 = arith.addf %2040, %2043 : vector<16x16xf32>
    %c506 = arith.constant 506 : index
    %2045 = memref.load %arg3[%c506] : memref<670xf32, #tpu.memory_space<smem>>
    %2046 = vector.broadcast %2045 : f32 to vector<16x16xf32>
    %2047 = arith.mulf %2017, %2046 : vector<16x16xf32>
    %2048 = arith.addf %2044, %2047 : vector<16x16xf32>
    %c563 = arith.constant 563 : index
    %2049 = memref.load %arg3[%c563] : memref<670xf32, #tpu.memory_space<smem>>
    %2050 = vector.broadcast %2049 : f32 to vector<16x16xf32>
    %2051 = arith.addf %2048, %2050 : vector<16x16xf32>
    %c507 = arith.constant 507 : index
    %2052 = memref.load %arg3[%c507] : memref<670xf32, #tpu.memory_space<smem>>
    %2053 = vector.broadcast %2052 : f32 to vector<16x16xf32>
    %2054 = arith.mulf %2003, %2053 : vector<16x16xf32>
    %c508 = arith.constant 508 : index
    %2055 = memref.load %arg3[%c508] : memref<670xf32, #tpu.memory_space<smem>>
    %2056 = vector.broadcast %2055 : f32 to vector<16x16xf32>
    %2057 = arith.mulf %2005, %2056 : vector<16x16xf32>
    %2058 = arith.addf %2054, %2057 : vector<16x16xf32>
    %c509 = arith.constant 509 : index
    %2059 = memref.load %arg3[%c509] : memref<670xf32, #tpu.memory_space<smem>>
    %2060 = vector.broadcast %2059 : f32 to vector<16x16xf32>
    %2061 = arith.mulf %2007, %2060 : vector<16x16xf32>
    %2062 = arith.addf %2058, %2061 : vector<16x16xf32>
    %c510 = arith.constant 510 : index
    %2063 = memref.load %arg3[%c510] : memref<670xf32, #tpu.memory_space<smem>>
    %2064 = vector.broadcast %2063 : f32 to vector<16x16xf32>
    %2065 = arith.mulf %2009, %2064 : vector<16x16xf32>
    %2066 = arith.addf %2062, %2065 : vector<16x16xf32>
    %c511 = arith.constant 511 : index
    %2067 = memref.load %arg3[%c511] : memref<670xf32, #tpu.memory_space<smem>>
    %2068 = vector.broadcast %2067 : f32 to vector<16x16xf32>
    %2069 = arith.mulf %2011, %2068 : vector<16x16xf32>
    %2070 = arith.addf %2066, %2069 : vector<16x16xf32>
    %c512 = arith.constant 512 : index
    %2071 = memref.load %arg3[%c512] : memref<670xf32, #tpu.memory_space<smem>>
    %2072 = vector.broadcast %2071 : f32 to vector<16x16xf32>
    %2073 = arith.mulf %2013, %2072 : vector<16x16xf32>
    %2074 = arith.addf %2070, %2073 : vector<16x16xf32>
    %c513 = arith.constant 513 : index
    %2075 = memref.load %arg3[%c513] : memref<670xf32, #tpu.memory_space<smem>>
    %2076 = vector.broadcast %2075 : f32 to vector<16x16xf32>
    %2077 = arith.mulf %2015, %2076 : vector<16x16xf32>
    %2078 = arith.addf %2074, %2077 : vector<16x16xf32>
    %c514 = arith.constant 514 : index
    %2079 = memref.load %arg3[%c514] : memref<670xf32, #tpu.memory_space<smem>>
    %2080 = vector.broadcast %2079 : f32 to vector<16x16xf32>
    %2081 = arith.mulf %2017, %2080 : vector<16x16xf32>
    %2082 = arith.addf %2078, %2081 : vector<16x16xf32>
    %c564 = arith.constant 564 : index
    %2083 = memref.load %arg3[%c564] : memref<670xf32, #tpu.memory_space<smem>>
    %2084 = vector.broadcast %2083 : f32 to vector<16x16xf32>
    %2085 = arith.addf %2082, %2084 : vector<16x16xf32>
    %c515 = arith.constant 515 : index
    %2086 = memref.load %arg3[%c515] : memref<670xf32, #tpu.memory_space<smem>>
    %2087 = vector.broadcast %2086 : f32 to vector<16x16xf32>
    %2088 = arith.mulf %2003, %2087 : vector<16x16xf32>
    %c516 = arith.constant 516 : index
    %2089 = memref.load %arg3[%c516] : memref<670xf32, #tpu.memory_space<smem>>
    %2090 = vector.broadcast %2089 : f32 to vector<16x16xf32>
    %2091 = arith.mulf %2005, %2090 : vector<16x16xf32>
    %2092 = arith.addf %2088, %2091 : vector<16x16xf32>
    %c517 = arith.constant 517 : index
    %2093 = memref.load %arg3[%c517] : memref<670xf32, #tpu.memory_space<smem>>
    %2094 = vector.broadcast %2093 : f32 to vector<16x16xf32>
    %2095 = arith.mulf %2007, %2094 : vector<16x16xf32>
    %2096 = arith.addf %2092, %2095 : vector<16x16xf32>
    %c518 = arith.constant 518 : index
    %2097 = memref.load %arg3[%c518] : memref<670xf32, #tpu.memory_space<smem>>
    %2098 = vector.broadcast %2097 : f32 to vector<16x16xf32>
    %2099 = arith.mulf %2009, %2098 : vector<16x16xf32>
    %2100 = arith.addf %2096, %2099 : vector<16x16xf32>
    %c519 = arith.constant 519 : index
    %2101 = memref.load %arg3[%c519] : memref<670xf32, #tpu.memory_space<smem>>
    %2102 = vector.broadcast %2101 : f32 to vector<16x16xf32>
    %2103 = arith.mulf %2011, %2102 : vector<16x16xf32>
    %2104 = arith.addf %2100, %2103 : vector<16x16xf32>
    %c520 = arith.constant 520 : index
    %2105 = memref.load %arg3[%c520] : memref<670xf32, #tpu.memory_space<smem>>
    %2106 = vector.broadcast %2105 : f32 to vector<16x16xf32>
    %2107 = arith.mulf %2013, %2106 : vector<16x16xf32>
    %2108 = arith.addf %2104, %2107 : vector<16x16xf32>
    %c521 = arith.constant 521 : index
    %2109 = memref.load %arg3[%c521] : memref<670xf32, #tpu.memory_space<smem>>
    %2110 = vector.broadcast %2109 : f32 to vector<16x16xf32>
    %2111 = arith.mulf %2015, %2110 : vector<16x16xf32>
    %2112 = arith.addf %2108, %2111 : vector<16x16xf32>
    %c522 = arith.constant 522 : index
    %2113 = memref.load %arg3[%c522] : memref<670xf32, #tpu.memory_space<smem>>
    %2114 = vector.broadcast %2113 : f32 to vector<16x16xf32>
    %2115 = arith.mulf %2017, %2114 : vector<16x16xf32>
    %2116 = arith.addf %2112, %2115 : vector<16x16xf32>
    %c565 = arith.constant 565 : index
    %2117 = memref.load %arg3[%c565] : memref<670xf32, #tpu.memory_space<smem>>
    %2118 = vector.broadcast %2117 : f32 to vector<16x16xf32>
    %2119 = arith.addf %2116, %2118 : vector<16x16xf32>
    %c523 = arith.constant 523 : index
    %2120 = memref.load %arg3[%c523] : memref<670xf32, #tpu.memory_space<smem>>
    %2121 = vector.broadcast %2120 : f32 to vector<16x16xf32>
    %2122 = arith.mulf %2003, %2121 : vector<16x16xf32>
    %c524 = arith.constant 524 : index
    %2123 = memref.load %arg3[%c524] : memref<670xf32, #tpu.memory_space<smem>>
    %2124 = vector.broadcast %2123 : f32 to vector<16x16xf32>
    %2125 = arith.mulf %2005, %2124 : vector<16x16xf32>
    %2126 = arith.addf %2122, %2125 : vector<16x16xf32>
    %c525 = arith.constant 525 : index
    %2127 = memref.load %arg3[%c525] : memref<670xf32, #tpu.memory_space<smem>>
    %2128 = vector.broadcast %2127 : f32 to vector<16x16xf32>
    %2129 = arith.mulf %2007, %2128 : vector<16x16xf32>
    %2130 = arith.addf %2126, %2129 : vector<16x16xf32>
    %c526 = arith.constant 526 : index
    %2131 = memref.load %arg3[%c526] : memref<670xf32, #tpu.memory_space<smem>>
    %2132 = vector.broadcast %2131 : f32 to vector<16x16xf32>
    %2133 = arith.mulf %2009, %2132 : vector<16x16xf32>
    %2134 = arith.addf %2130, %2133 : vector<16x16xf32>
    %c527 = arith.constant 527 : index
    %2135 = memref.load %arg3[%c527] : memref<670xf32, #tpu.memory_space<smem>>
    %2136 = vector.broadcast %2135 : f32 to vector<16x16xf32>
    %2137 = arith.mulf %2011, %2136 : vector<16x16xf32>
    %2138 = arith.addf %2134, %2137 : vector<16x16xf32>
    %c528 = arith.constant 528 : index
    %2139 = memref.load %arg3[%c528] : memref<670xf32, #tpu.memory_space<smem>>
    %2140 = vector.broadcast %2139 : f32 to vector<16x16xf32>
    %2141 = arith.mulf %2013, %2140 : vector<16x16xf32>
    %2142 = arith.addf %2138, %2141 : vector<16x16xf32>
    %c529 = arith.constant 529 : index
    %2143 = memref.load %arg3[%c529] : memref<670xf32, #tpu.memory_space<smem>>
    %2144 = vector.broadcast %2143 : f32 to vector<16x16xf32>
    %2145 = arith.mulf %2015, %2144 : vector<16x16xf32>
    %2146 = arith.addf %2142, %2145 : vector<16x16xf32>
    %c530 = arith.constant 530 : index
    %2147 = memref.load %arg3[%c530] : memref<670xf32, #tpu.memory_space<smem>>
    %2148 = vector.broadcast %2147 : f32 to vector<16x16xf32>
    %2149 = arith.mulf %2017, %2148 : vector<16x16xf32>
    %2150 = arith.addf %2146, %2149 : vector<16x16xf32>
    %c566 = arith.constant 566 : index
    %2151 = memref.load %arg3[%c566] : memref<670xf32, #tpu.memory_space<smem>>
    %2152 = vector.broadcast %2151 : f32 to vector<16x16xf32>
    %2153 = arith.addf %2150, %2152 : vector<16x16xf32>
    %c531 = arith.constant 531 : index
    %2154 = memref.load %arg3[%c531] : memref<670xf32, #tpu.memory_space<smem>>
    %2155 = vector.broadcast %2154 : f32 to vector<16x16xf32>
    %2156 = arith.mulf %2003, %2155 : vector<16x16xf32>
    %c532 = arith.constant 532 : index
    %2157 = memref.load %arg3[%c532] : memref<670xf32, #tpu.memory_space<smem>>
    %2158 = vector.broadcast %2157 : f32 to vector<16x16xf32>
    %2159 = arith.mulf %2005, %2158 : vector<16x16xf32>
    %2160 = arith.addf %2156, %2159 : vector<16x16xf32>
    %c533 = arith.constant 533 : index
    %2161 = memref.load %arg3[%c533] : memref<670xf32, #tpu.memory_space<smem>>
    %2162 = vector.broadcast %2161 : f32 to vector<16x16xf32>
    %2163 = arith.mulf %2007, %2162 : vector<16x16xf32>
    %2164 = arith.addf %2160, %2163 : vector<16x16xf32>
    %c534 = arith.constant 534 : index
    %2165 = memref.load %arg3[%c534] : memref<670xf32, #tpu.memory_space<smem>>
    %2166 = vector.broadcast %2165 : f32 to vector<16x16xf32>
    %2167 = arith.mulf %2009, %2166 : vector<16x16xf32>
    %2168 = arith.addf %2164, %2167 : vector<16x16xf32>
    %c535 = arith.constant 535 : index
    %2169 = memref.load %arg3[%c535] : memref<670xf32, #tpu.memory_space<smem>>
    %2170 = vector.broadcast %2169 : f32 to vector<16x16xf32>
    %2171 = arith.mulf %2011, %2170 : vector<16x16xf32>
    %2172 = arith.addf %2168, %2171 : vector<16x16xf32>
    %c536 = arith.constant 536 : index
    %2173 = memref.load %arg3[%c536] : memref<670xf32, #tpu.memory_space<smem>>
    %2174 = vector.broadcast %2173 : f32 to vector<16x16xf32>
    %2175 = arith.mulf %2013, %2174 : vector<16x16xf32>
    %2176 = arith.addf %2172, %2175 : vector<16x16xf32>
    %c537 = arith.constant 537 : index
    %2177 = memref.load %arg3[%c537] : memref<670xf32, #tpu.memory_space<smem>>
    %2178 = vector.broadcast %2177 : f32 to vector<16x16xf32>
    %2179 = arith.mulf %2015, %2178 : vector<16x16xf32>
    %2180 = arith.addf %2176, %2179 : vector<16x16xf32>
    %c538 = arith.constant 538 : index
    %2181 = memref.load %arg3[%c538] : memref<670xf32, #tpu.memory_space<smem>>
    %2182 = vector.broadcast %2181 : f32 to vector<16x16xf32>
    %2183 = arith.mulf %2017, %2182 : vector<16x16xf32>
    %2184 = arith.addf %2180, %2183 : vector<16x16xf32>
    %c567 = arith.constant 567 : index
    %2185 = memref.load %arg3[%c567] : memref<670xf32, #tpu.memory_space<smem>>
    %2186 = vector.broadcast %2185 : f32 to vector<16x16xf32>
    %2187 = arith.addf %2184, %2186 : vector<16x16xf32>
    %c539 = arith.constant 539 : index
    %2188 = memref.load %arg3[%c539] : memref<670xf32, #tpu.memory_space<smem>>
    %2189 = vector.broadcast %2188 : f32 to vector<16x16xf32>
    %2190 = arith.mulf %2003, %2189 : vector<16x16xf32>
    %c540 = arith.constant 540 : index
    %2191 = memref.load %arg3[%c540] : memref<670xf32, #tpu.memory_space<smem>>
    %2192 = vector.broadcast %2191 : f32 to vector<16x16xf32>
    %2193 = arith.mulf %2005, %2192 : vector<16x16xf32>
    %2194 = arith.addf %2190, %2193 : vector<16x16xf32>
    %c541 = arith.constant 541 : index
    %2195 = memref.load %arg3[%c541] : memref<670xf32, #tpu.memory_space<smem>>
    %2196 = vector.broadcast %2195 : f32 to vector<16x16xf32>
    %2197 = arith.mulf %2007, %2196 : vector<16x16xf32>
    %2198 = arith.addf %2194, %2197 : vector<16x16xf32>
    %c542 = arith.constant 542 : index
    %2199 = memref.load %arg3[%c542] : memref<670xf32, #tpu.memory_space<smem>>
    %2200 = vector.broadcast %2199 : f32 to vector<16x16xf32>
    %2201 = arith.mulf %2009, %2200 : vector<16x16xf32>
    %2202 = arith.addf %2198, %2201 : vector<16x16xf32>
    %c543 = arith.constant 543 : index
    %2203 = memref.load %arg3[%c543] : memref<670xf32, #tpu.memory_space<smem>>
    %2204 = vector.broadcast %2203 : f32 to vector<16x16xf32>
    %2205 = arith.mulf %2011, %2204 : vector<16x16xf32>
    %2206 = arith.addf %2202, %2205 : vector<16x16xf32>
    %c544 = arith.constant 544 : index
    %2207 = memref.load %arg3[%c544] : memref<670xf32, #tpu.memory_space<smem>>
    %2208 = vector.broadcast %2207 : f32 to vector<16x16xf32>
    %2209 = arith.mulf %2013, %2208 : vector<16x16xf32>
    %2210 = arith.addf %2206, %2209 : vector<16x16xf32>
    %c545 = arith.constant 545 : index
    %2211 = memref.load %arg3[%c545] : memref<670xf32, #tpu.memory_space<smem>>
    %2212 = vector.broadcast %2211 : f32 to vector<16x16xf32>
    %2213 = arith.mulf %2015, %2212 : vector<16x16xf32>
    %2214 = arith.addf %2210, %2213 : vector<16x16xf32>
    %c546 = arith.constant 546 : index
    %2215 = memref.load %arg3[%c546] : memref<670xf32, #tpu.memory_space<smem>>
    %2216 = vector.broadcast %2215 : f32 to vector<16x16xf32>
    %2217 = arith.mulf %2017, %2216 : vector<16x16xf32>
    %2218 = arith.addf %2214, %2217 : vector<16x16xf32>
    %c568 = arith.constant 568 : index
    %2219 = memref.load %arg3[%c568] : memref<670xf32, #tpu.memory_space<smem>>
    %2220 = vector.broadcast %2219 : f32 to vector<16x16xf32>
    %2221 = arith.addf %2218, %2220 : vector<16x16xf32>
    %c547 = arith.constant 547 : index
    %2222 = memref.load %arg3[%c547] : memref<670xf32, #tpu.memory_space<smem>>
    %2223 = vector.broadcast %2222 : f32 to vector<16x16xf32>
    %2224 = arith.mulf %2003, %2223 : vector<16x16xf32>
    %c548 = arith.constant 548 : index
    %2225 = memref.load %arg3[%c548] : memref<670xf32, #tpu.memory_space<smem>>
    %2226 = vector.broadcast %2225 : f32 to vector<16x16xf32>
    %2227 = arith.mulf %2005, %2226 : vector<16x16xf32>
    %2228 = arith.addf %2224, %2227 : vector<16x16xf32>
    %c549 = arith.constant 549 : index
    %2229 = memref.load %arg3[%c549] : memref<670xf32, #tpu.memory_space<smem>>
    %2230 = vector.broadcast %2229 : f32 to vector<16x16xf32>
    %2231 = arith.mulf %2007, %2230 : vector<16x16xf32>
    %2232 = arith.addf %2228, %2231 : vector<16x16xf32>
    %c550 = arith.constant 550 : index
    %2233 = memref.load %arg3[%c550] : memref<670xf32, #tpu.memory_space<smem>>
    %2234 = vector.broadcast %2233 : f32 to vector<16x16xf32>
    %2235 = arith.mulf %2009, %2234 : vector<16x16xf32>
    %2236 = arith.addf %2232, %2235 : vector<16x16xf32>
    %c551 = arith.constant 551 : index
    %2237 = memref.load %arg3[%c551] : memref<670xf32, #tpu.memory_space<smem>>
    %2238 = vector.broadcast %2237 : f32 to vector<16x16xf32>
    %2239 = arith.mulf %2011, %2238 : vector<16x16xf32>
    %2240 = arith.addf %2236, %2239 : vector<16x16xf32>
    %c552 = arith.constant 552 : index
    %2241 = memref.load %arg3[%c552] : memref<670xf32, #tpu.memory_space<smem>>
    %2242 = vector.broadcast %2241 : f32 to vector<16x16xf32>
    %2243 = arith.mulf %2013, %2242 : vector<16x16xf32>
    %2244 = arith.addf %2240, %2243 : vector<16x16xf32>
    %c553 = arith.constant 553 : index
    %2245 = memref.load %arg3[%c553] : memref<670xf32, #tpu.memory_space<smem>>
    %2246 = vector.broadcast %2245 : f32 to vector<16x16xf32>
    %2247 = arith.mulf %2015, %2246 : vector<16x16xf32>
    %2248 = arith.addf %2244, %2247 : vector<16x16xf32>
    %c554 = arith.constant 554 : index
    %2249 = memref.load %arg3[%c554] : memref<670xf32, #tpu.memory_space<smem>>
    %2250 = vector.broadcast %2249 : f32 to vector<16x16xf32>
    %2251 = arith.mulf %2017, %2250 : vector<16x16xf32>
    %2252 = arith.addf %2248, %2251 : vector<16x16xf32>
    %c569 = arith.constant 569 : index
    %2253 = memref.load %arg3[%c569] : memref<670xf32, #tpu.memory_space<smem>>
    %2254 = vector.broadcast %2253 : f32 to vector<16x16xf32>
    %2255 = arith.addf %2252, %2254 : vector<16x16xf32>
    %c555 = arith.constant 555 : index
    %2256 = memref.load %arg3[%c555] : memref<670xf32, #tpu.memory_space<smem>>
    %2257 = vector.broadcast %2256 : f32 to vector<16x16xf32>
    %2258 = arith.mulf %2003, %2257 : vector<16x16xf32>
    %c556 = arith.constant 556 : index
    %2259 = memref.load %arg3[%c556] : memref<670xf32, #tpu.memory_space<smem>>
    %2260 = vector.broadcast %2259 : f32 to vector<16x16xf32>
    %2261 = arith.mulf %2005, %2260 : vector<16x16xf32>
    %2262 = arith.addf %2258, %2261 : vector<16x16xf32>
    %c557 = arith.constant 557 : index
    %2263 = memref.load %arg3[%c557] : memref<670xf32, #tpu.memory_space<smem>>
    %2264 = vector.broadcast %2263 : f32 to vector<16x16xf32>
    %2265 = arith.mulf %2007, %2264 : vector<16x16xf32>
    %2266 = arith.addf %2262, %2265 : vector<16x16xf32>
    %c558 = arith.constant 558 : index
    %2267 = memref.load %arg3[%c558] : memref<670xf32, #tpu.memory_space<smem>>
    %2268 = vector.broadcast %2267 : f32 to vector<16x16xf32>
    %2269 = arith.mulf %2009, %2268 : vector<16x16xf32>
    %2270 = arith.addf %2266, %2269 : vector<16x16xf32>
    %c559 = arith.constant 559 : index
    %2271 = memref.load %arg3[%c559] : memref<670xf32, #tpu.memory_space<smem>>
    %2272 = vector.broadcast %2271 : f32 to vector<16x16xf32>
    %2273 = arith.mulf %2011, %2272 : vector<16x16xf32>
    %2274 = arith.addf %2270, %2273 : vector<16x16xf32>
    %c560 = arith.constant 560 : index
    %2275 = memref.load %arg3[%c560] : memref<670xf32, #tpu.memory_space<smem>>
    %2276 = vector.broadcast %2275 : f32 to vector<16x16xf32>
    %2277 = arith.mulf %2013, %2276 : vector<16x16xf32>
    %2278 = arith.addf %2274, %2277 : vector<16x16xf32>
    %c561 = arith.constant 561 : index
    %2279 = memref.load %arg3[%c561] : memref<670xf32, #tpu.memory_space<smem>>
    %2280 = vector.broadcast %2279 : f32 to vector<16x16xf32>
    %2281 = arith.mulf %2015, %2280 : vector<16x16xf32>
    %2282 = arith.addf %2278, %2281 : vector<16x16xf32>
    %c562 = arith.constant 562 : index
    %2283 = memref.load %arg3[%c562] : memref<670xf32, #tpu.memory_space<smem>>
    %2284 = vector.broadcast %2283 : f32 to vector<16x16xf32>
    %2285 = arith.mulf %2017, %2284 : vector<16x16xf32>
    %2286 = arith.addf %2282, %2285 : vector<16x16xf32>
    %c570 = arith.constant 570 : index
    %2287 = memref.load %arg3[%c570] : memref<670xf32, #tpu.memory_space<smem>>
    %2288 = vector.broadcast %2287 : f32 to vector<16x16xf32>
    %2289 = arith.addf %2286, %2288 : vector<16x16xf32>
    %cst_83 = arith.constant 0.000000e+00 : f32
    %2290 = vector.broadcast %cst_83 : f32 to vector<16x16xf32>
    %2291 = arith.maximumf %2051, %2290 : vector<16x16xf32>
    %cst_84 = arith.constant 0.000000e+00 : f32
    %2292 = vector.broadcast %cst_84 : f32 to vector<16x16xf32>
    %2293 = arith.maximumf %2085, %2292 : vector<16x16xf32>
    %cst_85 = arith.constant 0.000000e+00 : f32
    %2294 = vector.broadcast %cst_85 : f32 to vector<16x16xf32>
    %2295 = arith.maximumf %2119, %2294 : vector<16x16xf32>
    %cst_86 = arith.constant 0.000000e+00 : f32
    %2296 = vector.broadcast %cst_86 : f32 to vector<16x16xf32>
    %2297 = arith.maximumf %2153, %2296 : vector<16x16xf32>
    %cst_87 = arith.constant 0.000000e+00 : f32
    %2298 = vector.broadcast %cst_87 : f32 to vector<16x16xf32>
    %2299 = arith.maximumf %2187, %2298 : vector<16x16xf32>
    %cst_88 = arith.constant 0.000000e+00 : f32
    %2300 = vector.broadcast %cst_88 : f32 to vector<16x16xf32>
    %2301 = arith.maximumf %2221, %2300 : vector<16x16xf32>
    %cst_89 = arith.constant 0.000000e+00 : f32
    %2302 = vector.broadcast %cst_89 : f32 to vector<16x16xf32>
    %2303 = arith.maximumf %2255, %2302 : vector<16x16xf32>
    %cst_90 = arith.constant 0.000000e+00 : f32
    %2304 = vector.broadcast %cst_90 : f32 to vector<16x16xf32>
    %2305 = arith.maximumf %2289, %2304 : vector<16x16xf32>
    %c571 = arith.constant 571 : index
    %2306 = memref.load %arg3[%c571] : memref<670xf32, #tpu.memory_space<smem>>
    %2307 = vector.broadcast %2306 : f32 to vector<16x16xf32>
    %2308 = arith.mulf %2291, %2307 : vector<16x16xf32>
    %c572 = arith.constant 572 : index
    %2309 = memref.load %arg3[%c572] : memref<670xf32, #tpu.memory_space<smem>>
    %2310 = vector.broadcast %2309 : f32 to vector<16x16xf32>
    %2311 = arith.mulf %2293, %2310 : vector<16x16xf32>
    %2312 = arith.addf %2308, %2311 : vector<16x16xf32>
    %c573 = arith.constant 573 : index
    %2313 = memref.load %arg3[%c573] : memref<670xf32, #tpu.memory_space<smem>>
    %2314 = vector.broadcast %2313 : f32 to vector<16x16xf32>
    %2315 = arith.mulf %2295, %2314 : vector<16x16xf32>
    %2316 = arith.addf %2312, %2315 : vector<16x16xf32>
    %c574 = arith.constant 574 : index
    %2317 = memref.load %arg3[%c574] : memref<670xf32, #tpu.memory_space<smem>>
    %2318 = vector.broadcast %2317 : f32 to vector<16x16xf32>
    %2319 = arith.mulf %2297, %2318 : vector<16x16xf32>
    %2320 = arith.addf %2316, %2319 : vector<16x16xf32>
    %c575 = arith.constant 575 : index
    %2321 = memref.load %arg3[%c575] : memref<670xf32, #tpu.memory_space<smem>>
    %2322 = vector.broadcast %2321 : f32 to vector<16x16xf32>
    %2323 = arith.mulf %2299, %2322 : vector<16x16xf32>
    %2324 = arith.addf %2320, %2323 : vector<16x16xf32>
    %c576 = arith.constant 576 : index
    %2325 = memref.load %arg3[%c576] : memref<670xf32, #tpu.memory_space<smem>>
    %2326 = vector.broadcast %2325 : f32 to vector<16x16xf32>
    %2327 = arith.mulf %2301, %2326 : vector<16x16xf32>
    %2328 = arith.addf %2324, %2327 : vector<16x16xf32>
    %c577 = arith.constant 577 : index
    %2329 = memref.load %arg3[%c577] : memref<670xf32, #tpu.memory_space<smem>>
    %2330 = vector.broadcast %2329 : f32 to vector<16x16xf32>
    %2331 = arith.mulf %2303, %2330 : vector<16x16xf32>
    %2332 = arith.addf %2328, %2331 : vector<16x16xf32>
    %c578 = arith.constant 578 : index
    %2333 = memref.load %arg3[%c578] : memref<670xf32, #tpu.memory_space<smem>>
    %2334 = vector.broadcast %2333 : f32 to vector<16x16xf32>
    %2335 = arith.mulf %2305, %2334 : vector<16x16xf32>
    %2336 = arith.addf %2332, %2335 : vector<16x16xf32>
    %c635 = arith.constant 635 : index
    %2337 = memref.load %arg3[%c635] : memref<670xf32, #tpu.memory_space<smem>>
    %2338 = vector.broadcast %2337 : f32 to vector<16x16xf32>
    %2339 = arith.addf %2336, %2338 : vector<16x16xf32>
    %c579 = arith.constant 579 : index
    %2340 = memref.load %arg3[%c579] : memref<670xf32, #tpu.memory_space<smem>>
    %2341 = vector.broadcast %2340 : f32 to vector<16x16xf32>
    %2342 = arith.mulf %2291, %2341 : vector<16x16xf32>
    %c580 = arith.constant 580 : index
    %2343 = memref.load %arg3[%c580] : memref<670xf32, #tpu.memory_space<smem>>
    %2344 = vector.broadcast %2343 : f32 to vector<16x16xf32>
    %2345 = arith.mulf %2293, %2344 : vector<16x16xf32>
    %2346 = arith.addf %2342, %2345 : vector<16x16xf32>
    %c581 = arith.constant 581 : index
    %2347 = memref.load %arg3[%c581] : memref<670xf32, #tpu.memory_space<smem>>
    %2348 = vector.broadcast %2347 : f32 to vector<16x16xf32>
    %2349 = arith.mulf %2295, %2348 : vector<16x16xf32>
    %2350 = arith.addf %2346, %2349 : vector<16x16xf32>
    %c582 = arith.constant 582 : index
    %2351 = memref.load %arg3[%c582] : memref<670xf32, #tpu.memory_space<smem>>
    %2352 = vector.broadcast %2351 : f32 to vector<16x16xf32>
    %2353 = arith.mulf %2297, %2352 : vector<16x16xf32>
    %2354 = arith.addf %2350, %2353 : vector<16x16xf32>
    %c583 = arith.constant 583 : index
    %2355 = memref.load %arg3[%c583] : memref<670xf32, #tpu.memory_space<smem>>
    %2356 = vector.broadcast %2355 : f32 to vector<16x16xf32>
    %2357 = arith.mulf %2299, %2356 : vector<16x16xf32>
    %2358 = arith.addf %2354, %2357 : vector<16x16xf32>
    %c584 = arith.constant 584 : index
    %2359 = memref.load %arg3[%c584] : memref<670xf32, #tpu.memory_space<smem>>
    %2360 = vector.broadcast %2359 : f32 to vector<16x16xf32>
    %2361 = arith.mulf %2301, %2360 : vector<16x16xf32>
    %2362 = arith.addf %2358, %2361 : vector<16x16xf32>
    %c585 = arith.constant 585 : index
    %2363 = memref.load %arg3[%c585] : memref<670xf32, #tpu.memory_space<smem>>
    %2364 = vector.broadcast %2363 : f32 to vector<16x16xf32>
    %2365 = arith.mulf %2303, %2364 : vector<16x16xf32>
    %2366 = arith.addf %2362, %2365 : vector<16x16xf32>
    %c586 = arith.constant 586 : index
    %2367 = memref.load %arg3[%c586] : memref<670xf32, #tpu.memory_space<smem>>
    %2368 = vector.broadcast %2367 : f32 to vector<16x16xf32>
    %2369 = arith.mulf %2305, %2368 : vector<16x16xf32>
    %2370 = arith.addf %2366, %2369 : vector<16x16xf32>
    %c636 = arith.constant 636 : index
    %2371 = memref.load %arg3[%c636] : memref<670xf32, #tpu.memory_space<smem>>
    %2372 = vector.broadcast %2371 : f32 to vector<16x16xf32>
    %2373 = arith.addf %2370, %2372 : vector<16x16xf32>
    %c587 = arith.constant 587 : index
    %2374 = memref.load %arg3[%c587] : memref<670xf32, #tpu.memory_space<smem>>
    %2375 = vector.broadcast %2374 : f32 to vector<16x16xf32>
    %2376 = arith.mulf %2291, %2375 : vector<16x16xf32>
    %c588 = arith.constant 588 : index
    %2377 = memref.load %arg3[%c588] : memref<670xf32, #tpu.memory_space<smem>>
    %2378 = vector.broadcast %2377 : f32 to vector<16x16xf32>
    %2379 = arith.mulf %2293, %2378 : vector<16x16xf32>
    %2380 = arith.addf %2376, %2379 : vector<16x16xf32>
    %c589 = arith.constant 589 : index
    %2381 = memref.load %arg3[%c589] : memref<670xf32, #tpu.memory_space<smem>>
    %2382 = vector.broadcast %2381 : f32 to vector<16x16xf32>
    %2383 = arith.mulf %2295, %2382 : vector<16x16xf32>
    %2384 = arith.addf %2380, %2383 : vector<16x16xf32>
    %c590 = arith.constant 590 : index
    %2385 = memref.load %arg3[%c590] : memref<670xf32, #tpu.memory_space<smem>>
    %2386 = vector.broadcast %2385 : f32 to vector<16x16xf32>
    %2387 = arith.mulf %2297, %2386 : vector<16x16xf32>
    %2388 = arith.addf %2384, %2387 : vector<16x16xf32>
    %c591 = arith.constant 591 : index
    %2389 = memref.load %arg3[%c591] : memref<670xf32, #tpu.memory_space<smem>>
    %2390 = vector.broadcast %2389 : f32 to vector<16x16xf32>
    %2391 = arith.mulf %2299, %2390 : vector<16x16xf32>
    %2392 = arith.addf %2388, %2391 : vector<16x16xf32>
    %c592 = arith.constant 592 : index
    %2393 = memref.load %arg3[%c592] : memref<670xf32, #tpu.memory_space<smem>>
    %2394 = vector.broadcast %2393 : f32 to vector<16x16xf32>
    %2395 = arith.mulf %2301, %2394 : vector<16x16xf32>
    %2396 = arith.addf %2392, %2395 : vector<16x16xf32>
    %c593 = arith.constant 593 : index
    %2397 = memref.load %arg3[%c593] : memref<670xf32, #tpu.memory_space<smem>>
    %2398 = vector.broadcast %2397 : f32 to vector<16x16xf32>
    %2399 = arith.mulf %2303, %2398 : vector<16x16xf32>
    %2400 = arith.addf %2396, %2399 : vector<16x16xf32>
    %c594 = arith.constant 594 : index
    %2401 = memref.load %arg3[%c594] : memref<670xf32, #tpu.memory_space<smem>>
    %2402 = vector.broadcast %2401 : f32 to vector<16x16xf32>
    %2403 = arith.mulf %2305, %2402 : vector<16x16xf32>
    %2404 = arith.addf %2400, %2403 : vector<16x16xf32>
    %c637 = arith.constant 637 : index
    %2405 = memref.load %arg3[%c637] : memref<670xf32, #tpu.memory_space<smem>>
    %2406 = vector.broadcast %2405 : f32 to vector<16x16xf32>
    %2407 = arith.addf %2404, %2406 : vector<16x16xf32>
    %c595 = arith.constant 595 : index
    %2408 = memref.load %arg3[%c595] : memref<670xf32, #tpu.memory_space<smem>>
    %2409 = vector.broadcast %2408 : f32 to vector<16x16xf32>
    %2410 = arith.mulf %2291, %2409 : vector<16x16xf32>
    %c596 = arith.constant 596 : index
    %2411 = memref.load %arg3[%c596] : memref<670xf32, #tpu.memory_space<smem>>
    %2412 = vector.broadcast %2411 : f32 to vector<16x16xf32>
    %2413 = arith.mulf %2293, %2412 : vector<16x16xf32>
    %2414 = arith.addf %2410, %2413 : vector<16x16xf32>
    %c597 = arith.constant 597 : index
    %2415 = memref.load %arg3[%c597] : memref<670xf32, #tpu.memory_space<smem>>
    %2416 = vector.broadcast %2415 : f32 to vector<16x16xf32>
    %2417 = arith.mulf %2295, %2416 : vector<16x16xf32>
    %2418 = arith.addf %2414, %2417 : vector<16x16xf32>
    %c598 = arith.constant 598 : index
    %2419 = memref.load %arg3[%c598] : memref<670xf32, #tpu.memory_space<smem>>
    %2420 = vector.broadcast %2419 : f32 to vector<16x16xf32>
    %2421 = arith.mulf %2297, %2420 : vector<16x16xf32>
    %2422 = arith.addf %2418, %2421 : vector<16x16xf32>
    %c599 = arith.constant 599 : index
    %2423 = memref.load %arg3[%c599] : memref<670xf32, #tpu.memory_space<smem>>
    %2424 = vector.broadcast %2423 : f32 to vector<16x16xf32>
    %2425 = arith.mulf %2299, %2424 : vector<16x16xf32>
    %2426 = arith.addf %2422, %2425 : vector<16x16xf32>
    %c600 = arith.constant 600 : index
    %2427 = memref.load %arg3[%c600] : memref<670xf32, #tpu.memory_space<smem>>
    %2428 = vector.broadcast %2427 : f32 to vector<16x16xf32>
    %2429 = arith.mulf %2301, %2428 : vector<16x16xf32>
    %2430 = arith.addf %2426, %2429 : vector<16x16xf32>
    %c601 = arith.constant 601 : index
    %2431 = memref.load %arg3[%c601] : memref<670xf32, #tpu.memory_space<smem>>
    %2432 = vector.broadcast %2431 : f32 to vector<16x16xf32>
    %2433 = arith.mulf %2303, %2432 : vector<16x16xf32>
    %2434 = arith.addf %2430, %2433 : vector<16x16xf32>
    %c602 = arith.constant 602 : index
    %2435 = memref.load %arg3[%c602] : memref<670xf32, #tpu.memory_space<smem>>
    %2436 = vector.broadcast %2435 : f32 to vector<16x16xf32>
    %2437 = arith.mulf %2305, %2436 : vector<16x16xf32>
    %2438 = arith.addf %2434, %2437 : vector<16x16xf32>
    %c638 = arith.constant 638 : index
    %2439 = memref.load %arg3[%c638] : memref<670xf32, #tpu.memory_space<smem>>
    %2440 = vector.broadcast %2439 : f32 to vector<16x16xf32>
    %2441 = arith.addf %2438, %2440 : vector<16x16xf32>
    %c603 = arith.constant 603 : index
    %2442 = memref.load %arg3[%c603] : memref<670xf32, #tpu.memory_space<smem>>
    %2443 = vector.broadcast %2442 : f32 to vector<16x16xf32>
    %2444 = arith.mulf %2291, %2443 : vector<16x16xf32>
    %c604 = arith.constant 604 : index
    %2445 = memref.load %arg3[%c604] : memref<670xf32, #tpu.memory_space<smem>>
    %2446 = vector.broadcast %2445 : f32 to vector<16x16xf32>
    %2447 = arith.mulf %2293, %2446 : vector<16x16xf32>
    %2448 = arith.addf %2444, %2447 : vector<16x16xf32>
    %c605 = arith.constant 605 : index
    %2449 = memref.load %arg3[%c605] : memref<670xf32, #tpu.memory_space<smem>>
    %2450 = vector.broadcast %2449 : f32 to vector<16x16xf32>
    %2451 = arith.mulf %2295, %2450 : vector<16x16xf32>
    %2452 = arith.addf %2448, %2451 : vector<16x16xf32>
    %c606 = arith.constant 606 : index
    %2453 = memref.load %arg3[%c606] : memref<670xf32, #tpu.memory_space<smem>>
    %2454 = vector.broadcast %2453 : f32 to vector<16x16xf32>
    %2455 = arith.mulf %2297, %2454 : vector<16x16xf32>
    %2456 = arith.addf %2452, %2455 : vector<16x16xf32>
    %c607 = arith.constant 607 : index
    %2457 = memref.load %arg3[%c607] : memref<670xf32, #tpu.memory_space<smem>>
    %2458 = vector.broadcast %2457 : f32 to vector<16x16xf32>
    %2459 = arith.mulf %2299, %2458 : vector<16x16xf32>
    %2460 = arith.addf %2456, %2459 : vector<16x16xf32>
    %c608 = arith.constant 608 : index
    %2461 = memref.load %arg3[%c608] : memref<670xf32, #tpu.memory_space<smem>>
    %2462 = vector.broadcast %2461 : f32 to vector<16x16xf32>
    %2463 = arith.mulf %2301, %2462 : vector<16x16xf32>
    %2464 = arith.addf %2460, %2463 : vector<16x16xf32>
    %c609 = arith.constant 609 : index
    %2465 = memref.load %arg3[%c609] : memref<670xf32, #tpu.memory_space<smem>>
    %2466 = vector.broadcast %2465 : f32 to vector<16x16xf32>
    %2467 = arith.mulf %2303, %2466 : vector<16x16xf32>
    %2468 = arith.addf %2464, %2467 : vector<16x16xf32>
    %c610 = arith.constant 610 : index
    %2469 = memref.load %arg3[%c610] : memref<670xf32, #tpu.memory_space<smem>>
    %2470 = vector.broadcast %2469 : f32 to vector<16x16xf32>
    %2471 = arith.mulf %2305, %2470 : vector<16x16xf32>
    %2472 = arith.addf %2468, %2471 : vector<16x16xf32>
    %c639 = arith.constant 639 : index
    %2473 = memref.load %arg3[%c639] : memref<670xf32, #tpu.memory_space<smem>>
    %2474 = vector.broadcast %2473 : f32 to vector<16x16xf32>
    %2475 = arith.addf %2472, %2474 : vector<16x16xf32>
    %c611 = arith.constant 611 : index
    %2476 = memref.load %arg3[%c611] : memref<670xf32, #tpu.memory_space<smem>>
    %2477 = vector.broadcast %2476 : f32 to vector<16x16xf32>
    %2478 = arith.mulf %2291, %2477 : vector<16x16xf32>
    %c612 = arith.constant 612 : index
    %2479 = memref.load %arg3[%c612] : memref<670xf32, #tpu.memory_space<smem>>
    %2480 = vector.broadcast %2479 : f32 to vector<16x16xf32>
    %2481 = arith.mulf %2293, %2480 : vector<16x16xf32>
    %2482 = arith.addf %2478, %2481 : vector<16x16xf32>
    %c613 = arith.constant 613 : index
    %2483 = memref.load %arg3[%c613] : memref<670xf32, #tpu.memory_space<smem>>
    %2484 = vector.broadcast %2483 : f32 to vector<16x16xf32>
    %2485 = arith.mulf %2295, %2484 : vector<16x16xf32>
    %2486 = arith.addf %2482, %2485 : vector<16x16xf32>
    %c614 = arith.constant 614 : index
    %2487 = memref.load %arg3[%c614] : memref<670xf32, #tpu.memory_space<smem>>
    %2488 = vector.broadcast %2487 : f32 to vector<16x16xf32>
    %2489 = arith.mulf %2297, %2488 : vector<16x16xf32>
    %2490 = arith.addf %2486, %2489 : vector<16x16xf32>
    %c615 = arith.constant 615 : index
    %2491 = memref.load %arg3[%c615] : memref<670xf32, #tpu.memory_space<smem>>
    %2492 = vector.broadcast %2491 : f32 to vector<16x16xf32>
    %2493 = arith.mulf %2299, %2492 : vector<16x16xf32>
    %2494 = arith.addf %2490, %2493 : vector<16x16xf32>
    %c616 = arith.constant 616 : index
    %2495 = memref.load %arg3[%c616] : memref<670xf32, #tpu.memory_space<smem>>
    %2496 = vector.broadcast %2495 : f32 to vector<16x16xf32>
    %2497 = arith.mulf %2301, %2496 : vector<16x16xf32>
    %2498 = arith.addf %2494, %2497 : vector<16x16xf32>
    %c617 = arith.constant 617 : index
    %2499 = memref.load %arg3[%c617] : memref<670xf32, #tpu.memory_space<smem>>
    %2500 = vector.broadcast %2499 : f32 to vector<16x16xf32>
    %2501 = arith.mulf %2303, %2500 : vector<16x16xf32>
    %2502 = arith.addf %2498, %2501 : vector<16x16xf32>
    %c618 = arith.constant 618 : index
    %2503 = memref.load %arg3[%c618] : memref<670xf32, #tpu.memory_space<smem>>
    %2504 = vector.broadcast %2503 : f32 to vector<16x16xf32>
    %2505 = arith.mulf %2305, %2504 : vector<16x16xf32>
    %2506 = arith.addf %2502, %2505 : vector<16x16xf32>
    %c640 = arith.constant 640 : index
    %2507 = memref.load %arg3[%c640] : memref<670xf32, #tpu.memory_space<smem>>
    %2508 = vector.broadcast %2507 : f32 to vector<16x16xf32>
    %2509 = arith.addf %2506, %2508 : vector<16x16xf32>
    %c619 = arith.constant 619 : index
    %2510 = memref.load %arg3[%c619] : memref<670xf32, #tpu.memory_space<smem>>
    %2511 = vector.broadcast %2510 : f32 to vector<16x16xf32>
    %2512 = arith.mulf %2291, %2511 : vector<16x16xf32>
    %c620 = arith.constant 620 : index
    %2513 = memref.load %arg3[%c620] : memref<670xf32, #tpu.memory_space<smem>>
    %2514 = vector.broadcast %2513 : f32 to vector<16x16xf32>
    %2515 = arith.mulf %2293, %2514 : vector<16x16xf32>
    %2516 = arith.addf %2512, %2515 : vector<16x16xf32>
    %c621 = arith.constant 621 : index
    %2517 = memref.load %arg3[%c621] : memref<670xf32, #tpu.memory_space<smem>>
    %2518 = vector.broadcast %2517 : f32 to vector<16x16xf32>
    %2519 = arith.mulf %2295, %2518 : vector<16x16xf32>
    %2520 = arith.addf %2516, %2519 : vector<16x16xf32>
    %c622 = arith.constant 622 : index
    %2521 = memref.load %arg3[%c622] : memref<670xf32, #tpu.memory_space<smem>>
    %2522 = vector.broadcast %2521 : f32 to vector<16x16xf32>
    %2523 = arith.mulf %2297, %2522 : vector<16x16xf32>
    %2524 = arith.addf %2520, %2523 : vector<16x16xf32>
    %c623 = arith.constant 623 : index
    %2525 = memref.load %arg3[%c623] : memref<670xf32, #tpu.memory_space<smem>>
    %2526 = vector.broadcast %2525 : f32 to vector<16x16xf32>
    %2527 = arith.mulf %2299, %2526 : vector<16x16xf32>
    %2528 = arith.addf %2524, %2527 : vector<16x16xf32>
    %c624 = arith.constant 624 : index
    %2529 = memref.load %arg3[%c624] : memref<670xf32, #tpu.memory_space<smem>>
    %2530 = vector.broadcast %2529 : f32 to vector<16x16xf32>
    %2531 = arith.mulf %2301, %2530 : vector<16x16xf32>
    %2532 = arith.addf %2528, %2531 : vector<16x16xf32>
    %c625 = arith.constant 625 : index
    %2533 = memref.load %arg3[%c625] : memref<670xf32, #tpu.memory_space<smem>>
    %2534 = vector.broadcast %2533 : f32 to vector<16x16xf32>
    %2535 = arith.mulf %2303, %2534 : vector<16x16xf32>
    %2536 = arith.addf %2532, %2535 : vector<16x16xf32>
    %c626 = arith.constant 626 : index
    %2537 = memref.load %arg3[%c626] : memref<670xf32, #tpu.memory_space<smem>>
    %2538 = vector.broadcast %2537 : f32 to vector<16x16xf32>
    %2539 = arith.mulf %2305, %2538 : vector<16x16xf32>
    %2540 = arith.addf %2536, %2539 : vector<16x16xf32>
    %c641 = arith.constant 641 : index
    %2541 = memref.load %arg3[%c641] : memref<670xf32, #tpu.memory_space<smem>>
    %2542 = vector.broadcast %2541 : f32 to vector<16x16xf32>
    %2543 = arith.addf %2540, %2542 : vector<16x16xf32>
    %c627 = arith.constant 627 : index
    %2544 = memref.load %arg3[%c627] : memref<670xf32, #tpu.memory_space<smem>>
    %2545 = vector.broadcast %2544 : f32 to vector<16x16xf32>
    %2546 = arith.mulf %2291, %2545 : vector<16x16xf32>
    %c628 = arith.constant 628 : index
    %2547 = memref.load %arg3[%c628] : memref<670xf32, #tpu.memory_space<smem>>
    %2548 = vector.broadcast %2547 : f32 to vector<16x16xf32>
    %2549 = arith.mulf %2293, %2548 : vector<16x16xf32>
    %2550 = arith.addf %2546, %2549 : vector<16x16xf32>
    %c629 = arith.constant 629 : index
    %2551 = memref.load %arg3[%c629] : memref<670xf32, #tpu.memory_space<smem>>
    %2552 = vector.broadcast %2551 : f32 to vector<16x16xf32>
    %2553 = arith.mulf %2295, %2552 : vector<16x16xf32>
    %2554 = arith.addf %2550, %2553 : vector<16x16xf32>
    %c630 = arith.constant 630 : index
    %2555 = memref.load %arg3[%c630] : memref<670xf32, #tpu.memory_space<smem>>
    %2556 = vector.broadcast %2555 : f32 to vector<16x16xf32>
    %2557 = arith.mulf %2297, %2556 : vector<16x16xf32>
    %2558 = arith.addf %2554, %2557 : vector<16x16xf32>
    %c631 = arith.constant 631 : index
    %2559 = memref.load %arg3[%c631] : memref<670xf32, #tpu.memory_space<smem>>
    %2560 = vector.broadcast %2559 : f32 to vector<16x16xf32>
    %2561 = arith.mulf %2299, %2560 : vector<16x16xf32>
    %2562 = arith.addf %2558, %2561 : vector<16x16xf32>
    %c632 = arith.constant 632 : index
    %2563 = memref.load %arg3[%c632] : memref<670xf32, #tpu.memory_space<smem>>
    %2564 = vector.broadcast %2563 : f32 to vector<16x16xf32>
    %2565 = arith.mulf %2301, %2564 : vector<16x16xf32>
    %2566 = arith.addf %2562, %2565 : vector<16x16xf32>
    %c633 = arith.constant 633 : index
    %2567 = memref.load %arg3[%c633] : memref<670xf32, #tpu.memory_space<smem>>
    %2568 = vector.broadcast %2567 : f32 to vector<16x16xf32>
    %2569 = arith.mulf %2303, %2568 : vector<16x16xf32>
    %2570 = arith.addf %2566, %2569 : vector<16x16xf32>
    %c634 = arith.constant 634 : index
    %2571 = memref.load %arg3[%c634] : memref<670xf32, #tpu.memory_space<smem>>
    %2572 = vector.broadcast %2571 : f32 to vector<16x16xf32>
    %2573 = arith.mulf %2305, %2572 : vector<16x16xf32>
    %2574 = arith.addf %2570, %2573 : vector<16x16xf32>
    %c642 = arith.constant 642 : index
    %2575 = memref.load %arg3[%c642] : memref<670xf32, #tpu.memory_space<smem>>
    %2576 = vector.broadcast %2575 : f32 to vector<16x16xf32>
    %2577 = arith.addf %2574, %2576 : vector<16x16xf32>
    %cst_91 = arith.constant 0.000000e+00 : f32
    %2578 = vector.broadcast %cst_91 : f32 to vector<16x16xf32>
    %2579 = arith.maximumf %2339, %2578 : vector<16x16xf32>
    %cst_92 = arith.constant 0.000000e+00 : f32
    %2580 = vector.broadcast %cst_92 : f32 to vector<16x16xf32>
    %2581 = arith.maximumf %2373, %2580 : vector<16x16xf32>
    %cst_93 = arith.constant 0.000000e+00 : f32
    %2582 = vector.broadcast %cst_93 : f32 to vector<16x16xf32>
    %2583 = arith.maximumf %2407, %2582 : vector<16x16xf32>
    %cst_94 = arith.constant 0.000000e+00 : f32
    %2584 = vector.broadcast %cst_94 : f32 to vector<16x16xf32>
    %2585 = arith.maximumf %2441, %2584 : vector<16x16xf32>
    %cst_95 = arith.constant 0.000000e+00 : f32
    %2586 = vector.broadcast %cst_95 : f32 to vector<16x16xf32>
    %2587 = arith.maximumf %2475, %2586 : vector<16x16xf32>
    %cst_96 = arith.constant 0.000000e+00 : f32
    %2588 = vector.broadcast %cst_96 : f32 to vector<16x16xf32>
    %2589 = arith.maximumf %2509, %2588 : vector<16x16xf32>
    %cst_97 = arith.constant 0.000000e+00 : f32
    %2590 = vector.broadcast %cst_97 : f32 to vector<16x16xf32>
    %2591 = arith.maximumf %2543, %2590 : vector<16x16xf32>
    %cst_98 = arith.constant 0.000000e+00 : f32
    %2592 = vector.broadcast %cst_98 : f32 to vector<16x16xf32>
    %2593 = arith.maximumf %2577, %2592 : vector<16x16xf32>
    %2594 = arith.addf %2579, %729 : vector<16x16xf32>
    %2595 = arith.addf %2581, %731 : vector<16x16xf32>
    %2596 = arith.addf %2583, %733 : vector<16x16xf32>
    %2597 = arith.addf %2585, %735 : vector<16x16xf32>
    %2598 = arith.addf %2587, %737 : vector<16x16xf32>
    %2599 = arith.addf %2589, %739 : vector<16x16xf32>
    %2600 = arith.addf %2591, %741 : vector<16x16xf32>
    %2601 = arith.addf %2593, %743 : vector<16x16xf32>
    %c643 = arith.constant 643 : index
    %2602 = memref.load %arg3[%c643] : memref<670xf32, #tpu.memory_space<smem>>
    %2603 = vector.broadcast %2602 : f32 to vector<16x16xf32>
    %2604 = arith.mulf %2594, %2603 : vector<16x16xf32>
    %c644 = arith.constant 644 : index
    %2605 = memref.load %arg3[%c644] : memref<670xf32, #tpu.memory_space<smem>>
    %2606 = vector.broadcast %2605 : f32 to vector<16x16xf32>
    %2607 = arith.mulf %2595, %2606 : vector<16x16xf32>
    %2608 = arith.addf %2604, %2607 : vector<16x16xf32>
    %c645 = arith.constant 645 : index
    %2609 = memref.load %arg3[%c645] : memref<670xf32, #tpu.memory_space<smem>>
    %2610 = vector.broadcast %2609 : f32 to vector<16x16xf32>
    %2611 = arith.mulf %2596, %2610 : vector<16x16xf32>
    %2612 = arith.addf %2608, %2611 : vector<16x16xf32>
    %c646 = arith.constant 646 : index
    %2613 = memref.load %arg3[%c646] : memref<670xf32, #tpu.memory_space<smem>>
    %2614 = vector.broadcast %2613 : f32 to vector<16x16xf32>
    %2615 = arith.mulf %2597, %2614 : vector<16x16xf32>
    %2616 = arith.addf %2612, %2615 : vector<16x16xf32>
    %c647 = arith.constant 647 : index
    %2617 = memref.load %arg3[%c647] : memref<670xf32, #tpu.memory_space<smem>>
    %2618 = vector.broadcast %2617 : f32 to vector<16x16xf32>
    %2619 = arith.mulf %2598, %2618 : vector<16x16xf32>
    %2620 = arith.addf %2616, %2619 : vector<16x16xf32>
    %c648 = arith.constant 648 : index
    %2621 = memref.load %arg3[%c648] : memref<670xf32, #tpu.memory_space<smem>>
    %2622 = vector.broadcast %2621 : f32 to vector<16x16xf32>
    %2623 = arith.mulf %2599, %2622 : vector<16x16xf32>
    %2624 = arith.addf %2620, %2623 : vector<16x16xf32>
    %c649 = arith.constant 649 : index
    %2625 = memref.load %arg3[%c649] : memref<670xf32, #tpu.memory_space<smem>>
    %2626 = vector.broadcast %2625 : f32 to vector<16x16xf32>
    %2627 = arith.mulf %2600, %2626 : vector<16x16xf32>
    %2628 = arith.addf %2624, %2627 : vector<16x16xf32>
    %c650 = arith.constant 650 : index
    %2629 = memref.load %arg3[%c650] : memref<670xf32, #tpu.memory_space<smem>>
    %2630 = vector.broadcast %2629 : f32 to vector<16x16xf32>
    %2631 = arith.mulf %2601, %2630 : vector<16x16xf32>
    %2632 = arith.addf %2628, %2631 : vector<16x16xf32>
    %c667 = arith.constant 667 : index
    %2633 = memref.load %arg3[%c667] : memref<670xf32, #tpu.memory_space<smem>>
    %2634 = vector.broadcast %2633 : f32 to vector<16x16xf32>
    %2635 = arith.addf %2632, %2634 : vector<16x16xf32>
    %c651 = arith.constant 651 : index
    %2636 = memref.load %arg3[%c651] : memref<670xf32, #tpu.memory_space<smem>>
    %2637 = vector.broadcast %2636 : f32 to vector<16x16xf32>
    %2638 = arith.mulf %2594, %2637 : vector<16x16xf32>
    %c652 = arith.constant 652 : index
    %2639 = memref.load %arg3[%c652] : memref<670xf32, #tpu.memory_space<smem>>
    %2640 = vector.broadcast %2639 : f32 to vector<16x16xf32>
    %2641 = arith.mulf %2595, %2640 : vector<16x16xf32>
    %2642 = arith.addf %2638, %2641 : vector<16x16xf32>
    %c653 = arith.constant 653 : index
    %2643 = memref.load %arg3[%c653] : memref<670xf32, #tpu.memory_space<smem>>
    %2644 = vector.broadcast %2643 : f32 to vector<16x16xf32>
    %2645 = arith.mulf %2596, %2644 : vector<16x16xf32>
    %2646 = arith.addf %2642, %2645 : vector<16x16xf32>
    %c654 = arith.constant 654 : index
    %2647 = memref.load %arg3[%c654] : memref<670xf32, #tpu.memory_space<smem>>
    %2648 = vector.broadcast %2647 : f32 to vector<16x16xf32>
    %2649 = arith.mulf %2597, %2648 : vector<16x16xf32>
    %2650 = arith.addf %2646, %2649 : vector<16x16xf32>
    %c655 = arith.constant 655 : index
    %2651 = memref.load %arg3[%c655] : memref<670xf32, #tpu.memory_space<smem>>
    %2652 = vector.broadcast %2651 : f32 to vector<16x16xf32>
    %2653 = arith.mulf %2598, %2652 : vector<16x16xf32>
    %2654 = arith.addf %2650, %2653 : vector<16x16xf32>
    %c656 = arith.constant 656 : index
    %2655 = memref.load %arg3[%c656] : memref<670xf32, #tpu.memory_space<smem>>
    %2656 = vector.broadcast %2655 : f32 to vector<16x16xf32>
    %2657 = arith.mulf %2599, %2656 : vector<16x16xf32>
    %2658 = arith.addf %2654, %2657 : vector<16x16xf32>
    %c657 = arith.constant 657 : index
    %2659 = memref.load %arg3[%c657] : memref<670xf32, #tpu.memory_space<smem>>
    %2660 = vector.broadcast %2659 : f32 to vector<16x16xf32>
    %2661 = arith.mulf %2600, %2660 : vector<16x16xf32>
    %2662 = arith.addf %2658, %2661 : vector<16x16xf32>
    %c658 = arith.constant 658 : index
    %2663 = memref.load %arg3[%c658] : memref<670xf32, #tpu.memory_space<smem>>
    %2664 = vector.broadcast %2663 : f32 to vector<16x16xf32>
    %2665 = arith.mulf %2601, %2664 : vector<16x16xf32>
    %2666 = arith.addf %2662, %2665 : vector<16x16xf32>
    %c668 = arith.constant 668 : index
    %2667 = memref.load %arg3[%c668] : memref<670xf32, #tpu.memory_space<smem>>
    %2668 = vector.broadcast %2667 : f32 to vector<16x16xf32>
    %2669 = arith.addf %2666, %2668 : vector<16x16xf32>
    %c659 = arith.constant 659 : index
    %2670 = memref.load %arg3[%c659] : memref<670xf32, #tpu.memory_space<smem>>
    %2671 = vector.broadcast %2670 : f32 to vector<16x16xf32>
    %2672 = arith.mulf %2594, %2671 : vector<16x16xf32>
    %c660 = arith.constant 660 : index
    %2673 = memref.load %arg3[%c660] : memref<670xf32, #tpu.memory_space<smem>>
    %2674 = vector.broadcast %2673 : f32 to vector<16x16xf32>
    %2675 = arith.mulf %2595, %2674 : vector<16x16xf32>
    %2676 = arith.addf %2672, %2675 : vector<16x16xf32>
    %c661 = arith.constant 661 : index
    %2677 = memref.load %arg3[%c661] : memref<670xf32, #tpu.memory_space<smem>>
    %2678 = vector.broadcast %2677 : f32 to vector<16x16xf32>
    %2679 = arith.mulf %2596, %2678 : vector<16x16xf32>
    %2680 = arith.addf %2676, %2679 : vector<16x16xf32>
    %c662 = arith.constant 662 : index
    %2681 = memref.load %arg3[%c662] : memref<670xf32, #tpu.memory_space<smem>>
    %2682 = vector.broadcast %2681 : f32 to vector<16x16xf32>
    %2683 = arith.mulf %2597, %2682 : vector<16x16xf32>
    %2684 = arith.addf %2680, %2683 : vector<16x16xf32>
    %c663 = arith.constant 663 : index
    %2685 = memref.load %arg3[%c663] : memref<670xf32, #tpu.memory_space<smem>>
    %2686 = vector.broadcast %2685 : f32 to vector<16x16xf32>
    %2687 = arith.mulf %2598, %2686 : vector<16x16xf32>
    %2688 = arith.addf %2684, %2687 : vector<16x16xf32>
    %c664 = arith.constant 664 : index
    %2689 = memref.load %arg3[%c664] : memref<670xf32, #tpu.memory_space<smem>>
    %2690 = vector.broadcast %2689 : f32 to vector<16x16xf32>
    %2691 = arith.mulf %2599, %2690 : vector<16x16xf32>
    %2692 = arith.addf %2688, %2691 : vector<16x16xf32>
    %c665 = arith.constant 665 : index
    %2693 = memref.load %arg3[%c665] : memref<670xf32, #tpu.memory_space<smem>>
    %2694 = vector.broadcast %2693 : f32 to vector<16x16xf32>
    %2695 = arith.mulf %2600, %2694 : vector<16x16xf32>
    %2696 = arith.addf %2692, %2695 : vector<16x16xf32>
    %c666 = arith.constant 666 : index
    %2697 = memref.load %arg3[%c666] : memref<670xf32, #tpu.memory_space<smem>>
    %2698 = vector.broadcast %2697 : f32 to vector<16x16xf32>
    %2699 = arith.mulf %2601, %2698 : vector<16x16xf32>
    %2700 = arith.addf %2696, %2699 : vector<16x16xf32>
    %c669 = arith.constant 669 : index
    %2701 = memref.load %arg3[%c669] : memref<670xf32, #tpu.memory_space<smem>>
    %2702 = vector.broadcast %2701 : f32 to vector<16x16xf32>
    %2703 = arith.addf %2700, %2702 : vector<16x16xf32>
    %2704 = math.tanh %2635 : vector<16x16xf32>
    %2705 = math.tanh %2669 : vector<16x16xf32>
    %2706 = math.tanh %2703 : vector<16x16xf32>
    %c0_99 = arith.constant 0 : index
    %c3_100 = arith.constant 3 : index
    %c0_101 = arith.constant 0 : index
    %c0_102 = arith.constant 0 : index
    %2707 = vector.load %arg5[%c0_99, %c3_100, %c0_101, %c0_102] : memref<1x6x16x16xf32, #tpu.memory_space<vmem>>, vector<1x1x16x16xf32>
    %2708 = vector.shape_cast %2707 : vector<1x1x16x16xf32> to vector<16x16xf32>
    %2709 = vector.shape_cast %2704 : vector<16x16xf32> to vector<1x1x16x16xf32>
    tpu.vector_store %arg5[%c0_99, %c3_100, %c0_101, %c0_102], %2709 {strides = array<i32>} : memref<1x6x16x16xf32, #tpu.memory_space<vmem>>, vector<1x1x16x16xf32>,
    %c0_103 = arith.constant 0 : index
    %c4_104 = arith.constant 4 : index
    %c0_105 = arith.constant 0 : index
    %c0_106 = arith.constant 0 : index
    %2710 = vector.load %arg5[%c0_103, %c4_104, %c0_105, %c0_106] : memref<1x6x16x16xf32, #tpu.memory_space<vmem>>, vector<1x1x16x16xf32>
    %2711 = vector.shape_cast %2710 : vector<1x1x16x16xf32> to vector<16x16xf32>
    %2712 = vector.shape_cast %2705 : vector<16x16xf32> to vector<1x1x16x16xf32>
    tpu.vector_store %arg5[%c0_103, %c4_104, %c0_105, %c0_106], %2712 {strides = array<i32>} : memref<1x6x16x16xf32, #tpu.memory_space<vmem>>, vector<1x1x16x16xf32>,
    %c0_107 = arith.constant 0 : index
    %c5_108 = arith.constant 5 : index
    %c0_109 = arith.constant 0 : index
    %c0_110 = arith.constant 0 : index
    %2713 = vector.load %arg5[%c0_107, %c5_108, %c0_109, %c0_110] : memref<1x6x16x16xf32, #tpu.memory_space<vmem>>, vector<1x1x16x16xf32>
    %2714 = vector.shape_cast %2713 : vector<1x1x16x16xf32> to vector<16x16xf32>
    %2715 = vector.shape_cast %2706 : vector<16x16xf32> to vector<1x1x16x16xf32>
    tpu.vector_store %arg5[%c0_107, %c5_108, %c0_109, %c0_110], %2715 {strides = array<i32>} : memref<1x6x16x16xf32, #tpu.memory_space<vmem>>, vector<1x1x16x16xf32>,
    return
  }
  func.func @transform_0(%arg0: i32, %arg1: i32, %arg2: i32) -> i32 {
    %c0_i32 = arith.constant 0 : i32
    %c0_i32_0 = arith.constant 0 : i32
    return %c0_i32 : i32
  }
  func.func @transform_1(%arg0: i32, %arg1: i32, %arg2: i32) -> (i32, i32, i32, i32) {
    %c0_i32 = arith.constant 0 : i32
    %c0_i32_0 = arith.constant 0 : i32
    return %arg0, %c0_i32, %arg1, %arg2 : i32, i32, i32, i32
  }
  func.func @transform_2(%arg0: i32, %arg1: i32, %arg2: i32) -> (i32, i32, i32, i32) {
    %c0_i32 = arith.constant 0 : i32
    %c0_i32_0 = arith.constant 0 : i32
    return %arg0, %c0_i32, %arg1, %arg2 : i32, i32, i32, i32
  }
}

</mosaic_0001>

<bundles_post_ra>
// kernel: tpu_custom_call.1
= control target key start
LH: loop header
LB: loop body
LE: loop exit
PB: predicated region body
PF: predicated region fallthrough
CT: control target
= control target key end

     0   :  { %7 = vsyncpa [#allocation5], 0  ;;  %s9297_s0 = inlined_call_operand.hbm [shape: f32[670], index: 0, kind: input, shape index: {}]   ;;  %s9298_s1 = inlined_call_operand.hbm [shape: f32[2,4,16,16], index: 1, kind: input, shape index: {}]   ;;  %s9299_s2 = inlined_call_operand.hbm [shape: f32[2,6,16,16], index: 2, kind: output, shape index: {}]  }
   0x1   :  { %8 = vsyncpa [#allocation3], 0 }
   0x2   :  { %10 = vsyncpa [#allocation3 + $0x1], 0 }
   0x3   :  { %11 = vsyncpa [#allocation4], 0 }
   0x4   :  { %13 = vsyncpa [#allocation4 + $0x1], 0  ;;  %s5208_s9 = smov 0   ;;  %s5210_s10 = smov 0  }
   0x5   :  { %s5212_s11 = smov 0   ;;  %s5214_s12 = smov 0  }
   0x6   :  { %s5216_s13 = smov 0   ;;  %s5218_s14 = smov 0  }
   0x7 LB: > { %s4252_s15 = sadd.s32 4294967295, %s5184_s14   ;;  %s4253_s16 = sadd.s32 4294967294, %s5184_s14   ;;  %s5184_s14 = sphi %s5218_s14, %s19_s14   ;;  %s5180_s13 = sphi %s5216_s13, %s9347_s13   ;;  %s5176_s12 = sphi %s5214_s12, %s9346_s12   ;;  %s5172_s11 = sphi %s5212_s11, %s9345_s11   ;;  %s5168_s10 = sphi %s5210_s10, %s9344_s10   ;;  %s5164_s9 = sphi %s5208_s9, %s9343_s9  }
   0x8   : > { %s70_s17 = sadd.s32 1, %s5172_s11  ;;  %p77_p0 = scmp.ne.s32.totalorder %s5172_s11, %s5168_s10 }
   0x9   : > { %p78_p1 = scmp.eq.s32.totalorder %s5184_s14, 0  ;;  %p83_p2 = scmp.ne.s32.totalorder %s5168_s10, %s5164_s9 }
   0xa   : > { %p5246_p3 = scmp.eq.s32.totalorder %s4252_s15, 0  ;;  %p111_p4 = scmp.eq.s32.totalorder %s4252_s15, 1 }
   0xb   : > { %p79_p5 = por %p78_p1, %p77_p0  ;;  %p117_p6 = scmp.eq.s32.totalorder %s4253_s16, 1 }
   0xc   : > { %s9317_s18 = scalar_select %p5246_p3, 1, 0 }
   0xd   : > { %p5252_p7 = por %p5246_p3, %p83_p2  ;;  %p5256_p8 = por %p111_p4, %p77_p0 }
   0xe   : > { %p5260_p9 = por %p117_p6, %p83_p2  ;;  %p4254_p10 = scmp.ge.s32.totalorder %s5184_s14, 1 }
   0xf   : > { %s9318_s19 = scalar_select %p5252_p7, 1, 0 }
  0x10   : > { %s9319_s20 = scalar_select %p5256_p8, 1, 0 }
  0x11   : > { %s9320_s21 = scalar_select %p5260_p9, 1, 0 }
  0x12   : > { %p124_p11 = scmp.lt.s32.totalorder %s5184_s14, 3  ;;  %p4975_p1 = scmp.lt.s32.totalorder %s5184_s14, 2 }
  0x13   : > { %s146_s23 = sand.u32 1, %s5172_s11   ;;  %s38_s26 = sadd.s32 1, %s5180_s13 }
  0x14   : > { %p5267_p13 = pnand %p4254_p10, %p124_p11  ;;  %p5275_p0 = pnand %p4975_p1, %p79_p5 }
  0x15   : > { %s4257_s27 = sshll.u32 %s146_s23, 6  ;;  %p5288_p4 = scmp.ge.s32.totalorder %s38_s26, 2 }
  0x16   : > { %p4962_p7 = pneg %p5267_p13  ;;  %s5055_s3 = scalar_lea.hbm %s9297_s0, 96 }
  0x17   : > { %p5056_p5 = scmp.ne.s32.totalorder %s9297_s0, %s5055_s3  ;;  %s5060_s8 = scalar_lea.hbm %s9297_s0, 128 }
  0x18   : > { %p5281_p2 = pnand %p4962_p7, %p5246_p3  ;;  %p5061_p11 = scmp.lt.u32.totalorder %s5060_s8, %s5055_s3 }
  0x19   : > { %p5062_p1 = scmp.lt.u32.totalorder %s5055_s3, %s9297_s0 }
  0x1a   : > { %p5057_p6 = pneg %p5281_p2 }
  0x1b   : > { %p5063_p12 = por %p5062_p1, %p5061_p11 }
  0x1c   : > { %p5058_p7 = pnand %p5057_p6, %p5056_p5 }
  0x1e   : > { %p5059_p10 = pneg %p5058_p7 }
  0x20   : > { %p5064_p9 = pnand %p5063_p12, %p5059_p10 }
  0x22   : > { %5067 = shalt.err (!%p5064_p9)
}
  0x23   : > { %s5186_s29 = smov [#allocation2]   ;;  %s9349_s26 = smov (%p5288_p4, %s38_s26), 0 }
  0x24   : > { %4965 = dma.hbm_to_smem (!%p5281_p2), %s9297_s0, 96, %s5186_s29, [#allocation5]  }
  0x25   : > { %s4951_s3 = sshll.u32 %s5180_s13, 10  ;;  %s63_s5 = ssub.s32 %s5180_s13, %s9349_s26 }
  0x26   : > { %s5321_s7 = scalar_lea.hbm %s9298_s1, %s4951_s3  ;;  %p68_p9 = scmp.eq.s32.totalorder %s63_s5, 0 }
  0x27   : > { %s150_s8 = scalar_lea.vmem [#allocation6], %s4257_s27  ;;  %s5332_s16 = scalar_lea.sflag [#allocation3], %s146_s23 }
  0x28   : > { %s160_s15 = sshll.u32 %s150_s8, 4  ;;  %s5068_s29 = scalar_lea.hbm %s5321_s7, 1024  ;;  %s5323_s15 = int_to_ptr.vmem [resolvable:$true] %s160_s15 }
  0x29   : > { %s5328_s28 = scalar_select %p68_p9, %s5172_s11, %s70_s17  }
  0x2a   : > { %p5069_p12 = scmp.ne.s32.totalorder %s5321_s7, %s5068_s29  ;;  %p5070_p2 = pneg %p5275_p0 }
  0x2b   : > { %s5073_s27 = scalar_lea.hbm %s9298_s1, 2048  ;;  %p5074_p6 = scmp.lt.u32.totalorder %s5321_s7, %s9298_s1 }
  0x2c   : > { %p5071_p4 = pnand %p5070_p2, %p5069_p12  ;;  %p5075_p7 = scmp.lt.u32.totalorder %s5073_s27, %s5068_s29 }
  0x2d   : > { %p5077_p11 = scmp.lt.u32.totalorder %s5068_s29, %s5321_s7 }
  0x2e   : > { %p5072_p5 = pneg %p5071_p4  ;;  %p5076_p10 = por %p5075_p7, %p5074_p6 }
  0x30   : > { %p5078_p1 = por %p5077_p11, %p5076_p10 }
  0x32   : > { %p5079_p9 = pnand %p5078_p1, %p5072_p5 }
  0x34   : > { %5082 = shalt.err (!%p5079_p9)
}
  0x35   : > { %s5083_s17 = scalar_lea.vmem %s5323_s15, 1024  ;;  %s5187_s23 = smov [#allocation6]  }
  0x36   : > { %p5084_p12 = scmp.ne.s32.totalorder %s5323_s15, %s5083_s17  ;;  %s5088_s6 = sshll.u32 %s5187_s23, 4  ;;  %s5089_s6 = int_to_ptr.vmem [resolvable:$false] %s5088_s6 }
  0x37   : > { %s5090_s25 = scalar_lea.vmem %s5089_s6, 2048  ;;  %p5091_p3 = scmp.lt.s32.totalorder %s5323_s15, %s5089_s6 }
  0x38   : > { %p5086_p4 = pnand %p5084_p12, %p5070_p2  ;;  %p5092_p6 = scmp.lt.s32.totalorder %s5090_s25, %s5083_s17 }
  0x3a   : > { %p5087_p8 = pneg %p5086_p4  ;;  %p5093_p7 = por %p5092_p6, %p5091_p3 }
  0x3c   : > { %p5094_p10 = pnand %p5093_p7, %p5087_p8 }
  0x3e   : > { %5097 = shalt.err (!%p5094_p10)
}
  0x3f   : > { %s5188_s8 = smov 128   ;;  %s5189_s29 = smov 8  }
  0x40   : > { %4969 = dma.hbm_to_vmem [thread:$0]  (!%p5275_p0), %s5321_s7, 1024, %s5323_s15, %s5332_s16, %s5188_s8, %s5188_s8, %s5189_s29  }
  0x41   : > { %172 = sbr.rel (%p5267_p13) target bundleno = 927 (0x39f), region = 28 }
  0x48   : > { %p9325_p2 = scmp.ne.s32.totalorder %s9317_s18, 0 }
  0x4a   : > { %5151 = dma.done.wait (%p9325_p2), [#allocation5], 96  }
  0x4b   : > { %5153 = vsyncadd (%p9325_p2), [#allocation5], 4294967200  ;;  %s5367_s30 = sand.u32 1, %s5168_s10   ;;  %p9326_p3 = scmp.ne.s32.totalorder %s9318_s19, 0 }
  0x4c   : > { %s4262_s4 = sshll.u32 %s5367_s30, 6  ;;  %s179_s27 = scalar_lea.sflag [#allocation3], %s5367_s30 }
  0x4d   : > { %s182_s3 = scalar_lea.vmem [#allocation6], %s4262_s4 }
  0x4e   : > { %5155 = dma.done.wait (%p9326_p3), %s179_s27, 1024  }
  0x4f   : > { %5157 = vsyncadd (%p9326_p3), %s179_s27, 4294966272 }
  0x50   : > { %187 = sfence }
  0x51   : > { %s217_s22 = sld [smem:[#allocation2]]  ;;  %s4269_s24 = sld [smem:[#allocation2 + $0x1]]  ;;  %v5379_v0 = vld [vmem:[%s182_s3] sm:$0xff]  ;;  %v5381_v1 = vld [vmem:[%s182_s3 + $0x8] sm:$0xff]  ;;  %v5387_v2 = vld [vmem:[%s182_s3 + $0x10] sm:$0xff]  ;;  %vm2693_vm0 = vcmask 130048  }
  0x52   : > { %s4270_s7 = sld [smem:[#allocation2 + $0x2]]  ;;  %s5375_s18 = sld [smem:[#allocation2 + $0x3]]  ;;  %v5389_v3 = vld [vmem:[%s182_s3 + $0x18] sm:$0xff]  ;;  %v5395_v4 = vld [vmem:[%s182_s3 + $0x20] sm:$0xff]  ;;  %v5397_v5 = vld [vmem:[%s182_s3 + $0x28] sm:$0xff] }
  0x53   : > { %s5377_s15 = sld [smem:[#allocation2 + $0x20]]  ;;  %s5383_s16 = sld [smem:[#allocation2 + $0x4]]  ;;  %v5399_v7 = vld [vmem:[%s182_s3 + $0x30] sm:$0xff]  ;;  %v5401_v8 = vld [vmem:[%s182_s3 + $0x38] sm:$0xff] }
  0x54   : > { %s5385_s5 = sld [smem:[#allocation2 + $0x5]]  ;;  %s5391_s19 = sld [smem:[#allocation2 + $0x6]] }
  0x55   : > { %s5393_s17 = sld [smem:[#allocation2 + $0x7]]  ;;  %s5405_s23 = sld [smem:[#allocation2 + $0x21]] }
  0x56   : > { %s5407_s6 = sld [smem:[#allocation2 + $0x8]]  ;;  %s5415_s25 = sld [smem:[#allocation2 + $0x9]] }
  0x57   : > { %v218_v6 = vstv %s217_s22  ;;  %v222_v11 = vstv %s4269_s24  ;;  %s5417_s8 = sld [smem:[#allocation2 + $0xa]]  ;;  %s5425_s29 = sld [smem:[#allocation2 + $0xb]] }
  0x58   : > { %v219_v9 = vmul.f32 %v218_v6, %v5379_v0  ;;  %v220_v10 = vmul.f32 %v218_v6, %v5381_v1  ;;  %v223_v12 = vmul.f32 %v5387_v2, %v222_v11  ;;  %v224_v13 = vmul.f32 %v5389_v3, %v222_v11  ;;  %s5427_s4 = sld [smem:[#allocation2 + $0x22]]  ;;  %s5435_s27 = sld [smem:[#allocation2 + $0xc]] }
  0x59   : > { %v228_v14 = vstv %s4270_s7  ;;  %v234_v17 = vstv %s5375_s18  ;;  %v240_v18 = vstv %s5377_s15  ;;  %v244_v23 = vstv %s5383_s16  ;;  %s5437_s3 = sld [smem:[#allocation2 + $0xd]]  ;;  %s5443_s22 = sld [smem:[#allocation2 + $0xe]] }
  0x5a   : > { %v229_v15 = vmul.f32 %v5395_v4, %v228_v14  ;;  %v230_v16 = vmul.f32 %v5397_v5, %v228_v14  ;;  %v225_v19 = vadd.f32 %v223_v12, %v219_v9  ;;  %v226_v20 = vadd.f32 %v224_v13, %v220_v10  ;;  %s5445_s24 = sld [smem:[#allocation2 + $0xf]]  ;;  %s5459_s7 = sld [smem:[#allocation2 + $0x23]] }
  0x5b   : > { %v235_v21 = vmul.f32 %v5399_v7, %v234_v17  ;;  %v236_v22 = vmul.f32 %v5401_v8, %v234_v17  ;;  %v248_v24 = vstv %s5385_s5  ;;  %v254_v25 = vstv %s5391_s19  ;;  %s5461_s18 = sld [smem:[#allocation2 + $0x10]]  ;;  %s5465_s15 = sld [smem:[#allocation2 + $0x11]] }
  0x5c   : > { %v260_v26 = vstv %s5393_s17  ;;  %v231_v27 = vadd.f32 %v229_v15, %v225_v19  ;;  %v232_v28 = vadd.f32 %v230_v16, %v226_v20  ;;  %v245_v29 = vmul.f32 %v244_v23, %v5379_v0  ;;  %s5467_s16 = sld [smem:[#allocation2 + $0x12]]  ;;  %s5471_s5 = sld [smem:[#allocation2 + $0x13]] }
  0x5d   : > { %v246_v30 = vmul.f32 %v244_v23, %v5381_v1  ;;  %v249_v31 = vmul.f32 %v5387_v2, %v248_v24  ;;  %v250_v32 = vmul.f32 %v5389_v3, %v248_v24  ;;  %v255_v33 = vmul.f32 %v5395_v4, %v254_v25  ;;  %s5473_s19 = sld [smem:[#allocation2 + $0x24]]  ;;  %p9340_p13 = scmp.ne.s32.totalorder %s9319_s20, 0 }
  0x5e   : > { %v256_v34 = vmul.f32 %v5397_v5, %v254_v25  ;;  %v237_v35 = vadd.f32 %v235_v21, %v231_v27  ;;  %v238_v36 = vadd.f32 %v236_v22, %v232_v28  ;;  %v261_v37 = vmul.f32 %v5399_v7, %v260_v26  ;;  %s5487_s17 = sld [smem:[#allocation2 + $0x14]] }
  0x5f   : > { %v262_v38 = vmul.f32 %v5401_v8, %v260_v26  ;;  %v251_v39 = vadd.f32 %v249_v31, %v245_v29  ;;  %v252_v40 = vadd.f32 %v250_v32, %v246_v30  ;;  %v266_v41 = vstv %s5405_s23  ;;  %s5489_s23 = sld [smem:[#allocation2 + $0x15]] }
  0x60   : > { %v270_v42 = vstv %s5407_s6  ;;  %v5447_v43 = vadd.f32 %v240_v18, %v237_v35  ;;  %v5449_v44 = vadd.f32 %v240_v18, %v238_v36  ;;  %v274_v49 = vstv %s5415_s25  ;;  %s5493_s6 = sld [smem:[#allocation2 + $0x16]]  ;;  %s5495_s25 = sld [smem:[#allocation2 + $0x17]] }
  0x61   : > { %v271_v45 = vmul.f32 %v270_v42, %v5379_v0  ;;  %v272_v46 = vmul.f32 %v270_v42, %v5381_v1  ;;  %v257_v47 = vadd.f32 %v255_v33, %v251_v39  ;;  %v258_v48 = vadd.f32 %v256_v34, %v252_v40 }
  0x62   : > { %v280_v50 = vstv %s5417_s8  ;;  %v275_v51 = vmul.f32 %v5387_v2, %v274_v49  ;;  %v276_v52 = vmul.f32 %v5389_v3, %v274_v49  ;;  %v286_v57 = vstv %s5425_s29  ;;  %s5511_s8 = sld [smem:[#allocation2 + $0x25]]  ;;  %s5513_s29 = sld [smem:[#allocation2 + $0x18]] }
  0x63   : > { %v281_v53 = vmul.f32 %v5395_v4, %v280_v50  ;;  %v282_v54 = vmul.f32 %v5397_v5, %v280_v50  ;;  %v263_v55 = vadd.f32 %v261_v37, %v257_v47  ;;  %v264_v56 = vadd.f32 %v262_v38, %v258_v48 }
  0x64   : > { %v292_v58 = vstv %s5427_s4  ;;  %v277_v59 = vadd.f32 %v275_v51, %v271_v45  ;;  %v278_v60 = vadd.f32 %v276_v52, %v272_v46  ;;  %v287_v61 = vmul.f32 %v5399_v7, %v286_v57  ;;  %s5521_s4 = sld [smem:[#allocation2 + $0x19]] }
  0x65   : > { %v288_v62 = vmul.f32 %v5401_v8, %v286_v57  ;;  %v5475_v63 = vadd.f32 %v266_v41, %v263_v55  ;;  %v5477_v6 = vadd.f32 %v266_v41, %v264_v56  ;;  %v296_v9 = vstv %s5435_s27  ;;  %s5523_s27 = sld [smem:[#allocation2 + $0x1a]] }
  0x66   : > { %v300_v10 = vstv %s5437_s3  ;;  %v283_v11 = vadd.f32 %v281_v53, %v277_v59  ;;  %v284_v12 = vadd.f32 %v282_v54, %v278_v60  ;;  %v297_v13 = vmul.f32 %v296_v9, %v5379_v0  ;;  %s5533_s3 = sld [smem:[#allocation2 + $0x1b]] }
  0x67   : > { %v298_v14 = vmul.f32 %v296_v9, %v5381_v1  ;;  %v301_v15 = vmul.f32 %v5387_v2, %v300_v10  ;;  %v302_v16 = vmul.f32 %v5389_v3, %v300_v10  ;;  %v306_v17 = vstv %s5443_s22  ;;  %s5535_s22 = sld [smem:[#allocation2 + $0x26]] }
  0x68   : > { %v312_v18 = vstv %s5445_s24  ;;  %v289_v19 = vadd.f32 %v287_v61, %v283_v11  ;;  %v290_v20 = vadd.f32 %v288_v62, %v284_v12  ;;  %v307_v21 = vmul.f32 %v5395_v4, %v306_v17  ;;  %s5543_s24 = sld [smem:[#allocation2 + $0x1c]] }
  0x69   : > { %v308_v22 = vmul.f32 %v5397_v5, %v306_v17  ;;  %v303_v23 = vadd.f32 %v301_v15, %v297_v13  ;;  %v304_v24 = vadd.f32 %v302_v16, %v298_v14  ;;  %v313_v25 = vmul.f32 %v5399_v7, %v312_v18 }
  0x6a   : > { %v314_v26 = vmul.f32 %v5401_v8, %v312_v18  ;;  %v5499_v27 = vadd.f32 %v292_v58, %v289_v19  ;;  %v5501_v28 = vadd.f32 %v292_v58, %v290_v20  ;;  %v318_v29 = vstv %s5459_s7  ;;  %s5545_s7 = sld [smem:[#allocation2 + $0x1d]] }
  0x6b   : > { %v322_v30 = vstv %s5461_s18  ;;  %v309_v31 = vadd.f32 %v307_v21, %v303_v23  ;;  %v310_v32 = vadd.f32 %v308_v22, %v304_v24  ;;  %v326_v35 = vstv %s5465_s15  ;;  %s5551_s18 = sld [smem:[#allocation2 + $0x1e]]  ;;  %s5553_s15 = sld [smem:[#allocation2 + $0x1f]] }
  0x6c   : > { %v323_v33 = vmul.f32 %v322_v30, %v5379_v0  ;;  %v324_v34 = vmul.f32 %v322_v30, %v5381_v1  ;;  %v332_v36 = vstv %s5467_s16  ;;  %v338_v37 = vstv %s5471_s5  ;;  %s5565_s16 = sld [smem:[#allocation2 + $0x27]]  ;;  %s5579_s5 = sld [smem:[#allocation2 + $0x28]] }
  0x6d   : > { %v344_v38 = vstv %s5473_s19  ;;  %v315_v39 = vadd.f32 %v313_v25, %v309_v31  ;;  %v316_v40 = vadd.f32 %v314_v26, %v310_v32  ;;  %v327_v41 = vmul.f32 %v5387_v2, %v326_v35  ;;  %s5583_s19 = sld [smem:[#allocation2 + $0x29]] }
  0x6e   : > { %v328_v42 = vmul.f32 %v5389_v3, %v326_v35  ;;  %v333_v45 = vmul.f32 %v5395_v4, %v332_v36  ;;  %v334_v46 = vmul.f32 %v5397_v5, %v332_v36  ;;  %v339_v47 = vmul.f32 %v5399_v7, %v338_v37 }
  0x6f   : > { %v340_v48 = vmul.f32 %v5401_v8, %v338_v37  ;;  %v5525_v49 = vadd.f32 %v318_v29, %v315_v39  ;;  %v5527_v50 = vadd.f32 %v318_v29, %v316_v40  ;;  %v329_v51 = vadd.f32 %v327_v41, %v323_v33 }
  0x70   : > { %v330_v52 = vadd.f32 %v328_v42, %v324_v34  ;;  %v348_v53 = vstv %s5487_s17  ;;  %v352_v54 = vstv %s5489_s23  ;;  %v358_v55 = vstv %s5493_s6  ;;  %s5585_s17 = sld [smem:[#allocation2 + $0x2a]]  ;;  %s5593_s23 = sld [smem:[#allocation2 + $0x2b]] }
  0x71   : > { %v364_v56 = vstv %s5495_s25  ;;  %v335_v57 = vadd.f32 %v333_v45, %v329_v51  ;;  %v349_v59 = vmul.f32 %v348_v53, %v5379_v0  ;;  %v350_v60 = vmul.f32 %v348_v53, %v5381_v1  ;;  %s5595_s6 = sld [smem:[#allocation2 + $0x2c]]  ;;  %s5603_s25 = sld [smem:[#allocation2 + $0x2d]] }
  0x72   : > { %v336_v58 = vadd.f32 %v334_v46, %v330_v52  ;;  %v353_v61 = vmul.f32 %v5387_v2, %v352_v54  ;;  %v354_v62 = vmul.f32 %v5389_v3, %v352_v54  ;;  %v359_v9 = vmul.f32 %v5395_v4, %v358_v55 }
  0x73   : > { %v360_v10 = vmul.f32 %v5397_v5, %v358_v55  ;;  %v341_v11 = vadd.f32 %v339_v47, %v335_v57  ;;  %v365_v13 = vmul.f32 %v5399_v7, %v364_v56  ;;  %v366_v14 = vmul.f32 %v5401_v8, %v364_v56 }
  0x74   : > { %v342_v12 = vadd.f32 %v340_v48, %v336_v58  ;;  %v355_v15 = vadd.f32 %v353_v61, %v349_v59  ;;  %v356_v16 = vadd.f32 %v354_v62, %v350_v60  ;;  %v370_v17 = vstv %s5511_s8  ;;  %s5617_s8 = sld [smem:[#allocation2 + $0x2e]] }
  0x75   : > { %v374_v18 = vstv %s5513_s29  ;;  %v345_v19 = vadd.f32 %v344_v38, %v341_v11  ;;  %v378_v25 = vstv %s5521_s4  ;;  %v384_v26 = vstv %s5523_s27  ;;  %s5624_s29 = sld [smem:[#allocation2 + $0x2f]]  ;;  %s5635_s4 = sld [smem:[#allocation2 + $0x68]] }
  0x76   : > { %v5555_v20 = vadd.f32 %v344_v38, %v342_v12  ;;  %v375_v21 = vmul.f32 %v374_v18, %v5379_v0  ;;  %v376_v22 = vmul.f32 %v374_v18, %v5381_v1  ;;  %v361_v23 = vadd.f32 %v359_v9, %v355_v15  ;;  %s5640_s27 = sld [smem:[#allocation2 + $0x30]] }
  0x77   : > { %v362_v24 = vadd.f32 %v360_v10, %v356_v16  ;;  %v379_v29 = vmul.f32 %v5387_v2, %v378_v25  ;;  %v380_v30 = vmul.f32 %v5389_v3, %v378_v25  ;;  %v385_v31 = vmul.f32 %v5395_v4, %v384_v26 }
  0x78   : > { %v386_v32 = vmul.f32 %v5397_v5, %v384_v26  ;;  %v367_v33 = vadd.f32 %v365_v13, %v361_v23  ;;  %v390_v35 = vstv %s5533_s3  ;;  %v396_v36 = vstv %s5535_s22  ;;  %s5642_s3 = sld [smem:[#allocation2 + $0x31]]  ;;  %s5648_s22 = sld [smem:[#allocation2 + $0x32]] }
  0x79   : > { %v368_v34 = vadd.f32 %v366_v14, %v362_v24  ;;  %v381_v37 = vadd.f32 %v379_v29, %v375_v21  ;;  %v382_v38 = vadd.f32 %v380_v30, %v376_v22  ;;  %v391_v39 = vmul.f32 %v5399_v7, %v390_v35 }
  0x7a   : > { %v392_v40 = vmul.f32 %v5401_v8, %v390_v35  ;;  %v371_v41 = vadd.f32 %v370_v17, %v367_v33  ;;  %v400_v45 = vstv %s5543_s24  ;;  %v404_v46 = vstv %s5545_s7  ;;  %s5650_s24 = sld [smem:[#allocation2 + $0x33]]  ;;  %s5668_s7 = sld [smem:[#allocation2 + $0x34]] }
  0x7b   : > { %v372_v42 = vadd.f32 %v370_v17, %v368_v34  ;;  %v387_v47 = vadd.f32 %v385_v31, %v381_v37  ;;  %v388_v48 = vadd.f32 %v386_v32, %v382_v38  ;;  %v401_v51 = vmul.f32 %v400_v45, %v5379_v0 }
  0x7c   : > { %v402_v52 = vmul.f32 %v400_v45, %v5381_v1  ;;  %v405_v53 = vmul.f32 %v5387_v2, %v404_v46  ;;  %v406_v54 = vmul.f32 %v5389_v3, %v404_v46  ;;  %v410_v55 = vstv %s5551_s18  ;;  %s5670_s18 = sld [smem:[#allocation2 + $0x35]] }
  0x7d   : > { %v416_v56 = vstv %s5553_s15  ;;  %v393_v57 = vadd.f32 %v391_v39, %v387_v47  ;;  %v394_v58 = vadd.f32 %v392_v40, %v388_v48  ;;  %v411_v59 = vmul.f32 %v5395_v4, %v410_v55  ;;  %s5680_s15 = sld [smem:[#allocation2 + $0x36]] }
  0x7e   : > { %v412_v60 = vmul.f32 %v5397_v5, %v410_v55  ;;  %v407_v0 = vadd.f32 %v405_v53, %v401_v51  ;;  %v408_v1 = vadd.f32 %v406_v54, %v402_v52  ;;  %v417_v2 = vmul.f32 %v5399_v7, %v416_v56 }
  0x7f   : > { %v418_v3 = vmul.f32 %v5401_v8, %v416_v56  ;;  %v397_v61 = vadd.f32 %v396_v36, %v393_v57  ;;  %v398_v62 = vadd.f32 %v396_v36, %v394_v58  ;;  %v422_v9 = vstv %s5565_s16  ;;  %s5682_s16 = sld [smem:[#allocation2 + $0x37]] }
  0x80   : > { %v5591_v10 = vmax.f32 %v5447_v43, 0.0  ;;  %v413_v4 = vadd.f32 %v411_v59, %v407_v0  ;;  %v414_v5 = vadd.f32 %v412_v60, %v408_v1  ;;  %v5598_v11 = vmax.f32 %v5449_v44, 0.0 }
  0x81   : > { %v5601_v12 = vmax.f32 %v5475_v63, 0.0  ;;  %v5606_v7 = vmax.f32 %v5477_v6, 0.0  ;;  %v5609_v8 = vmax.f32 %v5499_v27, 0.0  ;;  %v5612_v43 = vmax.f32 %v5501_v28, 0.0 }
  0x82   : > { %v5615_v13 = vmax.f32 %v5525_v49, 0.0  ;;  %v419_v44 = vadd.f32 %v417_v2, %v413_v4  ;;  %v420_v63 = vadd.f32 %v418_v3, %v414_v5  ;;  %v5620_v14 = vmax.f32 %v5527_v50, 0.0 }
  0x83   : > { %v5622_v6 = vmax.f32 %v345_v19, 0.0  ;;  %v5627_v27 = vmax.f32 %v5555_v20, 0.0  ;;  %v5629_v28 = vmax.f32 %v371_v41, 0.0  ;;  %v5631_v49 = vmax.f32 %v372_v42, 0.0 }
  0x84   : > { %v5633_v15 = vmax.f32 %v397_v61, 0.0  ;;  %v423_v16 = vadd.f32 %v422_v9, %v419_v44  ;;  %v424_v50 = vadd.f32 %v422_v9, %v420_v63  ;;  %v5637_v17 = vmax.f32 %v398_v62, 0.0 }
  0x85   : > { %v442_v18 = vstv %s5579_s5  ;;  %v446_v21 = vstv %s5583_s19  ;;  %v452_v22 = vstv %s5585_s17  ;;  %v458_v31 = vstv %s5593_s23  ;;  %s5694_s5 = sld [smem:[#allocation2 + $0x69]]  ;;  %s5696_s19 = sld [smem:[#allocation2 + $0x38]] }
  0x86   : > { %v443_v19 = vmul.f32 %v442_v18, %v5591_v10  ;;  %v444_v20 = vmul.f32 %v442_v18, %v5598_v11  ;;  %v5652_v23 = vmax.f32 %v423_v16, 0.0  ;;  %v5654_v24 = vmax.f32 %v424_v50, 0.0  ;;  %s5700_s17 = sld [smem:[#allocation2 + $0x39]]  ;;  %s5702_s23 = sld [smem:[#allocation2 + $0x3a]] }
  0x87   : > { %v447_v25 = vmul.f32 %v446_v21, %v5601_v12  ;;  %v448_v26 = vmul.f32 %v446_v21, %v5606_v7  ;;  %v453_v29 = vmul.f32 %v452_v22, %v5609_v8  ;;  %v454_v30 = vmul.f32 %v452_v22, %v5612_v43 }
  0x88   : > { %v464_v32 = vstv %s5595_s6  ;;  %v459_v35 = vmul.f32 %v458_v31, %v5615_v13  ;;  %v460_v36 = vmul.f32 %v458_v31, %v5620_v14  ;;  %v470_v39 = vstv %s5603_s25  ;;  %s5708_s6 = sld [smem:[#allocation2 + $0x3b]]  ;;  %s5710_s25 = sld [smem:[#allocation2 + $0x3c]] }
  0x89   : > { %v449_v33 = vadd.f32 %v447_v25, %v443_v19  ;;  %v450_v34 = vadd.f32 %v448_v26, %v444_v20  ;;  %v465_v37 = vmul.f32 %v464_v32, %v5622_v6  ;;  %v466_v38 = vmul.f32 %v464_v32, %v5627_v27 }
  0x8a   : > { %v476_v40 = vstv %s5617_s8  ;;  %v471_v45 = vmul.f32 %v470_v39, %v5629_v28  ;;  %v472_v46 = vmul.f32 %v470_v39, %v5631_v49  ;;  %v482_v51 = vstv %s5624_s29  ;;  %s5718_s8 = sld [smem:[#allocation2 + $0x3d]]  ;;  %s5720_s29 = sld [smem:[#allocation2 + $0x3e]] }
  0x8b   : > { %v455_v41 = vadd.f32 %v453_v29, %v449_v33  ;;  %v456_v42 = vadd.f32 %v454_v30, %v450_v34  ;;  %v477_v47 = vmul.f32 %v476_v40, %v5633_v15  ;;  %v478_v48 = vmul.f32 %v476_v40, %v5637_v17 }
  0x8c   : > { %v488_v52 = vstv %s5635_s4  ;;  %v483_v55 = vmul.f32 %v482_v51, %v5652_v23  ;;  %v484_v56 = vmul.f32 %v482_v51, %v5654_v24  ;;  %v492_v57 = vstv %s5640_s27  ;;  %s5728_s4 = sld [smem:[#allocation2 + $0x3f]]  ;;  %s5730_s27 = sld [smem:[#allocation2 + $0x6a]] }
  0x8d   : > { %v461_v53 = vadd.f32 %v459_v35, %v455_v41  ;;  %v462_v54 = vadd.f32 %v460_v36, %v456_v42  ;;  %v496_v58 = vstv %s5642_s3  ;;  %v502_v59 = vstv %s5648_s22  ;;  %s5740_s3 = sld [smem:[#allocation2 + $0x40]]  ;;  %s5742_s22 = sld [smem:[#allocation2 + $0x41]] }
  0x8e   : > { %v508_v60 = vstv %s5650_s24  ;;  %v493_v2 = vmul.f32 %v492_v57, %v5591_v10  ;;  %v494_v3 = vmul.f32 %v492_v57, %v5598_v11  ;;  %v497_v61 = vmul.f32 %v496_v58, %v5601_v12  ;;  %s5748_s24 = sld [smem:[#allocation2 + $0x42]] }
  0x8f   : > { %v467_v0 = vadd.f32 %v465_v37, %v461_v53  ;;  %v468_v1 = vadd.f32 %v466_v38, %v462_v54  ;;  %v498_v62 = vmul.f32 %v496_v58, %v5606_v7  ;;  %v503_v9 = vmul.f32 %v502_v59, %v5609_v8 }
  0x90   : > { %v504_v4 = vmul.f32 %v502_v59, %v5612_v43  ;;  %v509_v63 = vmul.f32 %v508_v60, %v5615_v13  ;;  %v510_v16 = vmul.f32 %v508_v60, %v5620_v14  ;;  %v499_v50 = vadd.f32 %v497_v61, %v493_v2 }
  0x91   : > { %v473_v5 = vadd.f32 %v471_v45, %v467_v0  ;;  %v474_v44 = vadd.f32 %v472_v46, %v468_v1  ;;  %v500_v18 = vadd.f32 %v498_v62, %v494_v3  ;;  %v514_v19 = vstv %s5668_s7  ;;  %s5750_s7 = sld [smem:[#allocation2 + $0x43]] }
  0x92   : > { %v520_v20 = vstv %s5670_s18  ;;  %v515_v25 = vmul.f32 %v514_v19, %v5622_v6  ;;  %v516_v26 = vmul.f32 %v514_v19, %v5627_v27  ;;  %v505_v29 = vadd.f32 %v503_v9, %v499_v50  ;;  %s5760_s18 = sld [smem:[#allocation2 + $0x44]] }
  0x93   : > { %v479_v21 = vadd.f32 %v477_v47, %v473_v5  ;;  %v480_v22 = vadd.f32 %v478_v48, %v474_v44  ;;  %v506_v30 = vadd.f32 %v504_v4, %v500_v18  ;;  %v521_v31 = vmul.f32 %v520_v20, %v5629_v28 }
  0x94   : > { %v522_v32 = vmul.f32 %v520_v20, %v5631_v49  ;;  %v526_v35 = vstv %s5680_s15  ;;  %v532_v36 = vstv %s5682_s16  ;;  %v511_v37 = vadd.f32 %v509_v63, %v505_v29  ;;  %s5762_s15 = sld [smem:[#allocation2 + $0x45]]  ;;  %s5774_s16 = sld [smem:[#allocation2 + $0x46]] }
  0x95   : > { %v485_v33 = vadd.f32 %v483_v55, %v479_v21  ;;  %v486_v34 = vadd.f32 %v484_v56, %v480_v22  ;;  %v512_v38 = vadd.f32 %v510_v16, %v506_v30  ;;  %v527_v39 = vmul.f32 %v526_v35, %v5633_v15 }
  0x96   : > { %v528_v40 = vmul.f32 %v526_v35, %v5637_v17  ;;  %v533_v45 = vmul.f32 %v532_v36, %v5652_v23  ;;  %v534_v46 = vmul.f32 %v532_v36, %v5654_v24  ;;  %v517_v47 = vadd.f32 %v515_v25, %v511_v37 }
  0x97   : > { %v5722_v41 = vadd.f32 %v488_v52, %v485_v33  ;;  %v5724_v42 = vadd.f32 %v488_v52, %v486_v34  ;;  %v518_v48 = vadd.f32 %v516_v26, %v512_v38  ;;  %v538_v51 = vstv %s5694_s5  ;;  %s5776_s5 = sld [smem:[#allocation2 + $0x47]] }
  0x98   : > { %v542_v53 = vstv %s5696_s19  ;;  %v546_v52 = vstv %s5700_s17  ;;  %v552_v56 = vstv %s5702_s23  ;;  %v523_v57 = vadd.f32 %v521_v31, %v517_v47  ;;  %s5784_s19 = sld [smem:[#allocation2 + $0x6b]]  ;;  %s5786_s17 = sld [smem:[#allocation2 + $0x48]] }
  0x99   : > { %v543_v54 = vmul.f32 %v542_v53, %v5591_v10  ;;  %v544_v55 = vmul.f32 %v542_v53, %v5598_v11  ;;  %v524_v58 = vadd.f32 %v522_v32, %v518_v48  ;;  %v547_v59 = vmul.f32 %v546_v52, %v5601_v12  ;;  %s5792_s23 = sld [smem:[#allocation2 + $0x49]] }
  0x9a   : > { %v548_v60 = vmul.f32 %v546_v52, %v5606_v7  ;;  %v553_v0 = vmul.f32 %v552_v56, %v5609_v8  ;;  %v554_v1 = vmul.f32 %v552_v56, %v5612_v43  ;;  %v558_v2 = vstv %s5708_s6  ;;  %s5794_s6 = sld [smem:[#allocation2 + $0x4a]] }
  0x9b   : > { %v564_v3 = vstv %s5710_s25  ;;  %v529_v61 = vadd.f32 %v527_v39, %v523_v57  ;;  %v530_v62 = vadd.f32 %v528_v40, %v524_v58  ;;  %v549_v9 = vadd.f32 %v547_v59, %v543_v54  ;;  %s5798_s25 = sld [smem:[#allocation2 + $0x4b]] }
  0x9c   : > { %v550_v4 = vadd.f32 %v548_v60, %v544_v55  ;;  %v559_v5 = vmul.f32 %v558_v2, %v5615_v13  ;;  %v560_v44 = vmul.f32 %v558_v2, %v5620_v14  ;;  %v565_v63 = vmul.f32 %v564_v3, %v5622_v6 }
  0x9d   : > { %v566_v16 = vmul.f32 %v564_v3, %v5627_v27  ;;  %v535_v50 = vadd.f32 %v533_v45, %v529_v61  ;;  %v536_v18 = vadd.f32 %v534_v46, %v530_v62  ;;  %v555_v19 = vadd.f32 %v553_v0, %v549_v9 }
  0x9e   : > { %v556_v20 = vadd.f32 %v554_v1, %v550_v4  ;;  %v570_v21 = vstv %s5718_s8  ;;  %v576_v22 = vstv %s5720_s29  ;;  %v582_v25 = vstv %s5728_s4  ;;  %s5800_s8 = sld [smem:[#allocation2 + $0x4c]]  ;;  %s5814_s29 = sld [smem:[#allocation2 + $0x4d]] }
  0x9f   : > { %v588_v26 = vstv %s5730_s27  ;;  %v5764_v29 = vadd.f32 %v538_v51, %v535_v50  ;;  %v5766_v30 = vadd.f32 %v538_v51, %v536_v18  ;;  %v561_v31 = vadd.f32 %v559_v5, %v555_v19  ;;  %s5816_s4 = sld [smem:[#allocation2 + $0x4e]]  ;;  %s5826_s27 = sld [smem:[#allocation2 + $0x4f]] }
  0xa0   : > { %v562_v32 = vadd.f32 %v560_v44, %v556_v20  ;;  %v571_v33 = vmul.f32 %v570_v21, %v5629_v28  ;;  %v572_v34 = vmul.f32 %v570_v21, %v5631_v49  ;;  %v577_v35 = vmul.f32 %v576_v22, %v5633_v15 }
  0xa1   : > { %v578_v36 = vmul.f32 %v576_v22, %v5637_v17  ;;  %v567_v37 = vadd.f32 %v565_v63, %v561_v31  ;;  %v583_v39 = vmul.f32 %v582_v25, %v5652_v23  ;;  %v584_v40 = vmul.f32 %v582_v25, %v5654_v24 }
  0xa2   : > { %v568_v38 = vadd.f32 %v566_v16, %v562_v32  ;;  %v592_v45 = vstv %s5740_s3  ;;  %v596_v46 = vstv %s5742_s22  ;;  %v602_v47 = vstv %s5748_s24  ;;  %s5828_s3 = sld [smem:[#allocation2 + $0x6c]]  ;;  %s5834_s22 = sld [smem:[#allocation2 + $0x50]] }
  0xa3   : > { %v608_v48 = vstv %s5750_s7  ;;  %v573_v51 = vadd.f32 %v571_v33, %v567_v37  ;;  %v593_v54 = vmul.f32 %v592_v45, %v5591_v10  ;;  %v594_v55 = vmul.f32 %v592_v45, %v5598_v11  ;;  %s5836_s24 = sld [smem:[#allocation2 + $0x51]]  ;;  %s5844_s7 = sld [smem:[#allocation2 + $0x52]] }
  0xa4   : > { %v574_v53 = vadd.f32 %v572_v34, %v568_v38  ;;  %v597_v52 = vmul.f32 %v596_v46, %v5601_v12  ;;  %v598_v56 = vmul.f32 %v596_v46, %v5606_v7  ;;  %v603_v57 = vmul.f32 %v602_v47, %v5609_v8 }
  0xa5   : > { %v604_v58 = vmul.f32 %v602_v47, %v5612_v43  ;;  %v579_v59 = vadd.f32 %v577_v35, %v573_v51  ;;  %v609_v0 = vmul.f32 %v608_v48, %v5615_v13  ;;  %v610_v1 = vmul.f32 %v608_v48, %v5620_v14 }
  0xa6   : > { %v580_v60 = vadd.f32 %v578_v36, %v574_v53  ;;  %v599_v2 = vadd.f32 %v597_v52, %v593_v54  ;;  %v600_v3 = vadd.f32 %v598_v56, %v594_v55  ;;  %v614_v61 = vstv %s5760_s18  ;;  %s5846_s18 = sld [smem:[#allocation2 + $0x53]] }
  0xa7   : > { %v620_v62 = vstv %s5762_s15  ;;  %v585_v9 = vadd.f32 %v583_v39, %v579_v59  ;;  %v615_v5 = vmul.f32 %v614_v61, %v5622_v6  ;;  %v616_v44 = vmul.f32 %v614_v61, %v5627_v27  ;;  %s5856_s15 = sld [smem:[#allocation2 + $0x54]] }
  0xa8   : > { %v586_v4 = vadd.f32 %v584_v40, %v580_v60  ;;  %v605_v63 = vadd.f32 %v603_v57, %v599_v2  ;;  %v606_v16 = vadd.f32 %v604_v58, %v600_v3  ;;  %v621_v50 = vmul.f32 %v620_v62, %v5629_v28 }
  0xa9   : > { %v622_v18 = vmul.f32 %v620_v62, %v5631_v49  ;;  %v5808_v19 = vadd.f32 %v588_v26, %v585_v9  ;;  %v626_v21 = vstv %s5774_s16  ;;  %v632_v22 = vstv %s5776_s5  ;;  %s5858_s16 = sld [smem:[#allocation2 + $0x55]]  ;;  %s5870_s5 = sld [smem:[#allocation2 + $0x56]] }
  0xaa   : > { %v5810_v20 = vadd.f32 %v588_v26, %v586_v4  ;;  %v611_v25 = vadd.f32 %v609_v0, %v605_v63  ;;  %v612_v31 = vadd.f32 %v610_v1, %v606_v16  ;;  %v627_v32 = vmul.f32 %v626_v21, %v5633_v15 }
  0xab   : > { %v628_v33 = vmul.f32 %v626_v21, %v5637_v17  ;;  %v633_v34 = vmul.f32 %v632_v22, %v5652_v23  ;;  %v634_v26 = vmul.f32 %v632_v22, %v5654_v24  ;;  %v638_v35 = vstv %s5784_s19  ;;  %s5872_s19 = sld [smem:[#allocation2 + $0x57]] }
  0xac   : > { %v642_v36 = vstv %s5786_s17  ;;  %v617_v37 = vadd.f32 %v615_v5, %v611_v25  ;;  %v618_v38 = vadd.f32 %v616_v44, %v612_v31  ;;  %v646_v45 = vstv %s5792_s23  ;;  %s5880_s17 = sld [smem:[#allocation2 + $0x6d]]  ;;  %s5882_s23 = sld [smem:[#allocation2 + $0x58]] }
  0xad   : > { %v643_v39 = vmul.f32 %v642_v36, %v5591_v10  ;;  %v644_v40 = vmul.f32 %v642_v36, %v5598_v11  ;;  %v652_v46 = vstv %s5794_s6  ;;  %v658_v47 = vstv %s5798_s25  ;;  %s5886_s6 = sld [smem:[#allocation2 + $0x59]]  ;;  %s5888_s25 = sld [smem:[#allocation2 + $0x5a]] }
  0xae   : > { %v664_v48 = vstv %s5800_s8  ;;  %v623_v51 = vadd.f32 %v621_v50, %v617_v37  ;;  %v624_v53 = vadd.f32 %v622_v18, %v618_v38  ;;  %v647_v54 = vmul.f32 %v646_v45, %v5601_v12  ;;  %s5892_s8 = sld [smem:[#allocation2 + $0x5b]] }
  0xaf   : > { %v648_v55 = vmul.f32 %v646_v45, %v5606_v7  ;;  %v653_v52 = vmul.f32 %v652_v46, %v5609_v8  ;;  %v654_v56 = vmul.f32 %v652_v46, %v5612_v43  ;;  %v659_v57 = vmul.f32 %v658_v47, %v5615_v13 }
  0xb0   : > { %v660_v58 = vmul.f32 %v658_v47, %v5620_v14  ;;  %v629_v59 = vadd.f32 %v627_v32, %v623_v51  ;;  %v630_v60 = vadd.f32 %v628_v33, %v624_v53  ;;  %v649_v0 = vadd.f32 %v647_v54, %v643_v39 }
  0xb1   : > { %v650_v1 = vadd.f32 %v648_v55, %v644_v40  ;;  %v665_v2 = vmul.f32 %v664_v48, %v5622_v6  ;;  %v666_v3 = vmul.f32 %v664_v48, %v5627_v27  ;;  %v670_v61 = vstv %s5814_s29  ;;  %s5894_s29 = sld [smem:[#allocation2 + $0x5c]] }
  0xb2   : > { %v676_v62 = vstv %s5816_s4  ;;  %v635_v9 = vadd.f32 %v633_v34, %v629_v59  ;;  %v636_v4 = vadd.f32 %v634_v26, %v630_v60  ;;  %v655_v5 = vadd.f32 %v653_v52, %v649_v0  ;;  %s5908_s4 = sld [smem:[#allocation2 + $0x5d]] }
  0xb3   : > { %v656_v44 = vadd.f32 %v654_v56, %v650_v1  ;;  %v671_v63 = vmul.f32 %v670_v61, %v5629_v28  ;;  %v672_v16 = vmul.f32 %v670_v61, %v5631_v49  ;;  %v677_v50 = vmul.f32 %v676_v62, %v5633_v15 }
  0xb4   : > { %v678_v18 = vmul.f32 %v676_v62, %v5637_v17  ;;  %v5860_v21 = vadd.f32 %v638_v35, %v635_v9  ;;  %v5862_v22 = vadd.f32 %v638_v35, %v636_v4  ;;  %v661_v25 = vadd.f32 %v659_v57, %v655_v5 }
  0xb5   : > { %v662_v31 = vadd.f32 %v660_v58, %v656_v44  ;;  %v682_v32 = vstv %s5826_s27  ;;  %v688_v33 = vstv %s5828_s3  ;;  %v692_v34 = vstv %s5834_s22  ;;  %s5910_s27 = sld [smem:[#allocation2 + $0x5e]]  ;;  %s5920_s3 = sld [smem:[#allocation2 + $0x5f]] }
  0xb6   : > { %v696_v26 = vstv %s5836_s24  ;;  %v667_v36 = vadd.f32 %v665_v2, %v661_v25  ;;  %v683_v38 = vmul.f32 %v682_v32, %v5652_v23  ;;  %v684_v39 = vmul.f32 %v682_v32, %v5654_v24  ;;  %s5922_s22 = sld [smem:[#allocation2 + $0x6e]]  ;;  %s5928_s24 = sld [smem:[#allocation2 + $0x60]] }
  0xb7   : > { %v668_v37 = vadd.f32 %v666_v3, %v662_v31  ;;  %v693_v35 = vmul.f32 %v692_v34, %v5591_v10  ;;  %v694_v40 = vmul.f32 %v692_v34, %v5598_v11  ;;  %v697_v45 = vmul.f32 %v696_v26, %v5601_v12 }
  0xb8   : > { %v698_v46 = vmul.f32 %v696_v26, %v5606_v7  ;;  %v673_v47 = vadd.f32 %v671_v63, %v667_v36  ;;  %v702_v51 = vstv %s5844_s7  ;;  %v708_v53 = vstv %s5846_s18  ;;  %s5930_s7 = sld [smem:[#allocation2 + $0x61]]  ;;  %s5938_s18 = sld [smem:[#allocation2 + $0x62]] }
  0xb9   : > { %v674_v48 = vadd.f32 %v672_v16, %v668_v37  ;;  %v699_v54 = vadd.f32 %v697_v45, %v693_v35  ;;  %v703_v52 = vmul.f32 %v702_v51, %v5609_v8  ;;  %v704_v56 = vmul.f32 %v702_v51, %v5612_v43 }
  0xba   : > { %v700_v55 = vadd.f32 %v698_v46, %v694_v40  ;;  %v679_v57 = vadd.f32 %v677_v50, %v673_v47  ;;  %v709_v59 = vmul.f32 %v708_v53, %v5615_v13  ;;  %v710_v60 = vmul.f32 %v708_v53, %v5620_v14 }
  0xbb   : > { %v680_v58 = vadd.f32 %v678_v18, %v674_v48  ;;  %v705_v0 = vadd.f32 %v703_v52, %v699_v54  ;;  %v714_v2 = vstv %s5856_s15  ;;  %v720_v3 = vstv %s5858_s16  ;;  %s5940_s15 = sld [smem:[#allocation2 + $0x63]]  ;;  %s5950_s16 = sld [smem:[#allocation2 + $0x64]] }
  0xbc   : > { %v706_v1 = vadd.f32 %v704_v56, %v700_v55  ;;  %v685_v61 = vadd.f32 %v683_v38, %v679_v57  ;;  %v715_v9 = vmul.f32 %v714_v2, %v5622_v6  ;;  %v716_v4 = vmul.f32 %v714_v2, %v5627_v27 }
  0xbd   : > { %v686_v62 = vadd.f32 %v684_v39, %v680_v58  ;;  %v711_v5 = vadd.f32 %v709_v59, %v705_v0  ;;  %v721_v63 = vmul.f32 %v720_v3, %v5629_v28  ;;  %v722_v16 = vmul.f32 %v720_v3, %v5631_v49 }
  0xbe   : > { %v712_v44 = vadd.f32 %v710_v60, %v706_v1  ;;  %v5902_v50 = vadd.f32 %v688_v33, %v685_v61  ;;  %v726_v25 = vstv %s5870_s5  ;;  %v732_v31 = vstv %s5872_s19  ;;  %s5952_s5 = sld [smem:[#allocation2 + $0x65]]  ;;  %s5964_s19 = sld [smem:[#allocation2 + $0x66]] }
  0xbf   : > { %v5904_v18 = vadd.f32 %v688_v33, %v686_v62  ;;  %v717_v32 = vadd.f32 %v715_v9, %v711_v5  ;;  %v727_v26 = vmul.f32 %v726_v25, %v5633_v15  ;;  %v728_v36 = vmul.f32 %v726_v25, %v5637_v17 }
  0xc0   : > { %v718_v34 = vadd.f32 %v716_v4, %v712_v44  ;;  %v733_v37 = vmul.f32 %v732_v31, %v5652_v23  ;;  %v734_v33 = vmul.f32 %v732_v31, %v5654_v24  ;;  %v738_v38 = vstv %s5880_s17  ;;  %s5966_s17 = sld [smem:[#allocation2 + $0x67]] }
  0xc1   : > { %v742_v39 = vstv %s5882_s23  ;;  %v723_v35 = vadd.f32 %v721_v63, %v717_v32  ;;  %v746_v47 = vstv %s5886_s6  ;;  %v752_v48 = vstv %s5888_s25  ;;  %s5976_s23 = sld [smem:[#allocation2 + $0x6f]]  ;;  %s5986_s6 = sld [smem:[#allocation2 + $0x70]] }
  0xc2   : > { %v724_v40 = vadd.f32 %v722_v16, %v718_v34  ;;  %v743_v45 = vmul.f32 %v742_v39, %v5591_v10  ;;  %v744_v46 = vmul.f32 %v742_v39, %v5598_v11  ;;  %v758_v51 = vstv %s5892_s8  ;;  %s5990_s25 = sld [smem:[#allocation2 + $0x71]]  ;;  %s5992_s8 = sld [smem:[#allocation2 + $0x72]] }
  0xc3   : > { %v764_v53 = vstv %s5894_s29  ;;  %v729_v54 = vadd.f32 %v727_v26, %v723_v35  ;;  %v747_v52 = vmul.f32 %v746_v47, %v5601_v12  ;;  %v748_v56 = vmul.f32 %v746_v47, %v5606_v7  ;;  %s5996_s29 = sld [smem:[#allocation2 + $0x73]] }
  0xc4   : > { %v730_v55 = vadd.f32 %v728_v36, %v724_v40  ;;  %v753_v57 = vmul.f32 %v752_v48, %v5609_v8  ;;  %v754_v58 = vmul.f32 %v752_v48, %v5612_v43  ;;  %v759_v59 = vmul.f32 %v758_v51, %v5615_v13 }
  0xc5   : > { %v760_v60 = vmul.f32 %v758_v51, %v5620_v14  ;;  %v735_v0 = vadd.f32 %v733_v37, %v729_v54  ;;  %v749_v2 = vadd.f32 %v747_v52, %v743_v45  ;;  %v750_v3 = vadd.f32 %v748_v56, %v744_v46 }
  0xc6   : > { %v736_v1 = vadd.f32 %v734_v33, %v730_v55  ;;  %v765_v61 = vmul.f32 %v764_v53, %v5622_v6  ;;  %v766_v62 = vmul.f32 %v764_v53, %v5627_v27  ;;  %v770_v9 = vstv %s5908_s4  ;;  %s5998_s4 = sld [smem:[#allocation2 + $0x74]] }
  0xc7   : > { %v776_v4 = vstv %s5910_s27  ;;  %v5946_v5 = vadd.f32 %v738_v38, %v735_v0  ;;  %v755_v63 = vadd.f32 %v753_v57, %v749_v2  ;;  %v756_v16 = vadd.f32 %v754_v58, %v750_v3  ;;  %s6018_s27 = sld [smem:[#allocation2 + $0x75]] }
  0xc8   : > { %v5948_v44 = vadd.f32 %v738_v38, %v736_v1  ;;  %v771_v25 = vmul.f32 %v770_v9, %v5629_v28  ;;  %v772_v31 = vmul.f32 %v770_v9, %v5631_v49  ;;  %v777_v32 = vmul.f32 %v776_v4, %v5633_v15 }
  0xc9   : > { %v778_v34 = vmul.f32 %v776_v4, %v5637_v17  ;;  %v761_v26 = vadd.f32 %v759_v59, %v755_v63  ;;  %v762_v36 = vadd.f32 %v760_v60, %v756_v16  ;;  %v782_v37 = vstv %s5920_s3  ;;  %s6032_s3 = sld [smem:[#allocation2 + $0x76]] }
  0xca   : > { %v788_v33 = vstv %s5922_s22  ;;  %v783_v38 = vmul.f32 %v782_v37, %v5652_v23  ;;  %v784_v39 = vmul.f32 %v782_v37, %v5654_v24  ;;  %v792_v35 = vstv %s5928_s24  ;;  %s6040_s22 = sld [smem:[#allocation2 + $0x77]]  ;;  %s6050_s24 = sld [smem:[#allocation2 + $0xb0]] }
  0xcb   : > { %v796_v40 = vstv %s5930_s7  ;;  %v767_v45 = vadd.f32 %v765_v61, %v761_v26  ;;  %v768_v46 = vadd.f32 %v766_v62, %v762_v36  ;;  %v793_v47 = vmul.f32 %v792_v35, %v5591_v10  ;;  %s6054_s7 = sld [smem:[#allocation2 + $0x78]] }
  0xcc   : > { %v794_v48 = vmul.f32 %v792_v35, %v5598_v11  ;;  %v797_v51 = vmul.f32 %v796_v40, %v5601_v12  ;;  %v798_v53 = vmul.f32 %v796_v40, %v5606_v7  ;;  %v802_v54 = vstv %s5938_s18  ;;  %s6056_s18 = sld [smem:[#allocation2 + $0x79]] }
  0xcd   : > { %v808_v55 = vstv %s5940_s15  ;;  %v773_v52 = vadd.f32 %v771_v25, %v767_v45  ;;  %v774_v56 = vadd.f32 %v772_v31, %v768_v46  ;;  %v803_v57 = vmul.f32 %v802_v54, %v5609_v8  ;;  %s6062_s15 = sld [smem:[#allocation2 + $0x7a]] }
  0xce   : > { %v804_v58 = vmul.f32 %v802_v54, %v5612_v43  ;;  %v799_v59 = vadd.f32 %v797_v51, %v793_v47  ;;  %v800_v10 = vadd.f32 %v798_v53, %v794_v48  ;;  %v809_v11 = vmul.f32 %v808_v55, %v5615_v13 }
  0xcf   : > { %v810_v60 = vmul.f32 %v808_v55, %v5620_v14  ;;  %v779_v12 = vadd.f32 %v777_v32, %v773_v52  ;;  %v780_v7 = vadd.f32 %v778_v34, %v774_v56  ;;  %v814_v0 = vstv %s5950_s16  ;;  %s6064_s16 = sld [smem:[#allocation2 + $0x7b]] }
  0xd0   : > { %v820_v1 = vstv %s5952_s5  ;;  %v805_v2 = vadd.f32 %v803_v57, %v799_v59  ;;  %v806_v3 = vadd.f32 %v804_v58, %v800_v10  ;;  %v815_v8 = vmul.f32 %v814_v0, %v5622_v6  ;;  %s6080_s5 = sld [smem:[#allocation2 + $0x7c]] }
  0xd1   : > { %v816_v43 = vmul.f32 %v814_v0, %v5627_v27  ;;  %v785_v61 = vadd.f32 %v783_v38, %v779_v12  ;;  %v786_v62 = vadd.f32 %v784_v39, %v780_v7  ;;  %v821_v9 = vmul.f32 %v820_v1, %v5629_v28 }
  0xd2   : > { %v822_v13 = vmul.f32 %v820_v1, %v5631_v49  ;;  %v811_v14 = vadd.f32 %v809_v11, %v805_v2  ;;  %v812_v4 = vadd.f32 %v810_v60, %v806_v3  ;;  %v826_v63 = vstv %s5964_s19  ;;  %s6082_s19 = sld [smem:[#allocation2 + $0x7d]] }
  0xd3   : > { %v832_v16 = vstv %s5966_s17  ;;  %v789_v6 = vadd.f32 %v788_v33, %v785_v61  ;;  %v790_v25 = vadd.f32 %v788_v33, %v786_v62  ;;  %v827_v27 = vmul.f32 %v826_v63, %v5633_v15  ;;  %s6092_s17 = sld [smem:[#allocation2 + $0x7e]] }
  0xd4   : > { %v828_v31 = vmul.f32 %v826_v63, %v5637_v17  ;;  %v817_v28 = vadd.f32 %v815_v8, %v811_v14  ;;  %v818_v49 = vadd.f32 %v816_v43, %v812_v4  ;;  %v833_v32 = vmul.f32 %v832_v16, %v5652_v23 }
  0xd5   : > { %v834_v34 = vmul.f32 %v832_v16, %v5654_v24  ;;  %v838_v26 = vstv %s5976_s23  ;;  %v6004_v36 = vmax.f32 %v5722_v41, 0.0  ;;  %v6007_v37 = vmax.f32 %v5724_v42, 0.0  ;;  %s6094_s23 = sld [smem:[#allocation2 + $0x7f]] }
  0xd6   : > { %v6010_v15 = vmax.f32 %v5764_v29, 0.0  ;;  %v823_v17 = vadd.f32 %v821_v9, %v817_v28  ;;  %v824_v33 = vadd.f32 %v822_v13, %v818_v49  ;;  %v6013_v38 = vmax.f32 %v5766_v30, 0.0 }
  0xd7   : > { %v6016_v23 = vmax.f32 %v5808_v19, 0.0  ;;  %v6021_v24 = vmax.f32 %v5810_v20, 0.0  ;;  %v6024_v41 = vmax.f32 %v5860_v21, 0.0  ;;  %v6027_v42 = vmax.f32 %v5862_v22, 0.0 }
  0xd8   : > { %v6030_v29 = vmax.f32 %v5902_v50, 0.0  ;;  %v829_v30 = vadd.f32 %v827_v27, %v823_v17  ;;  %v830_v19 = vadd.f32 %v828_v31, %v824_v33  ;;  %v6035_v39 = vmax.f32 %v5904_v18, 0.0 }
  0xd9   : > { %v6038_v20 = vmax.f32 %v5946_v5, 0.0  ;;  %v6043_v21 = vmax.f32 %v5948_v44, 0.0  ;;  %v6045_v22 = vmax.f32 %v789_v6, 0.0  ;;  %v6047_v50 = vmax.f32 %v790_v25, 0.0 }
  0xda   : > { %v858_v35 = vstv %s5986_s6  ;;  %v835_v40 = vadd.f32 %v833_v32, %v829_v30  ;;  %v836_v18 = vadd.f32 %v834_v34, %v830_v19  ;;  %v862_v46 = vstv %s5990_s25  ;;  %s6106_s6 = sld [smem:[#allocation2 + $0xb1]]  ;;  %s6108_s25 = sld [smem:[#allocation2 + $0x80]] }
  0xdb   : > { %v859_v45 = vmul.f32 %v858_v35, %v6004_v36  ;;  %v860_v5 = vmul.f32 %v858_v35, %v6007_v37  ;;  %v868_v44 = vstv %s5992_s8  ;;  %v874_v47 = vstv %s5996_s29  ;;  %s6112_s8 = sld [smem:[#allocation2 + $0x81]]  ;;  %s6114_s29 = sld [smem:[#allocation2 + $0x82]] }
  0xdc   : > { %v880_v48 = vstv %s5998_s4  ;;  %v839_v51 = vadd.f32 %v838_v26, %v835_v40  ;;  %v840_v53 = vadd.f32 %v838_v26, %v836_v18  ;;  %v863_v54 = vmul.f32 %v862_v46, %v6010_v15  ;;  %s6120_s4 = sld [smem:[#allocation2 + $0x83]] }
  0xdd   : > { %v864_v55 = vmul.f32 %v862_v46, %v6013_v38  ;;  %v869_v52 = vmul.f32 %v868_v44, %v6016_v23  ;;  %v870_v56 = vmul.f32 %v868_v44, %v6021_v24  ;;  %v875_v57 = vmul.f32 %v874_v47, %v6024_v41 }
  0xde   : > { %v876_v58 = vmul.f32 %v874_v47, %v6027_v42  ;;  %v6072_v59 = vmax.f32 %v839_v51, 0.0  ;;  %v6074_v10 = vmax.f32 %v840_v53, 0.0  ;;  %v865_v11 = vadd.f32 %v863_v54, %v859_v45 }
  0xdf   : > { %v866_v60 = vadd.f32 %v864_v55, %v860_v5  ;;  %v881_v12 = vmul.f32 %v880_v48, %v6030_v29  ;;  %v882_v7 = vmul.f32 %v880_v48, %v6035_v39  ;;  %v886_v0 = vstv %s6018_s27  ;;  %s6122_s27 = sld [smem:[#allocation2 + $0x84]] }
  0xe0   : > { %v892_v1 = vstv %s6032_s3  ;;  %v871_v2 = vadd.f32 %v869_v52, %v865_v11  ;;  %v887_v8 = vmul.f32 %v886_v0, %v6038_v20  ;;  %v888_v43 = vmul.f32 %v886_v0, %v6043_v21  ;;  %s6130_s3 = sld [smem:[#allocation2 + $0x85]] }
  0xe1   : > { %v872_v3 = vadd.f32 %v870_v56, %v866_v60  ;;  %v893_v61 = vmul.f32 %v892_v1, %v6045_v22  ;;  %v894_v62 = vmul.f32 %v892_v1, %v6047_v50  ;;  %v898_v9 = vstv %s6040_s22  ;;  %s6132_s22 = sld [smem:[#allocation2 + $0x86]] }
  0xe2   : > { %v904_v13 = vstv %s6050_s24  ;;  %v877_v14 = vadd.f32 %v875_v57, %v871_v2  ;;  %v899_v63 = vmul.f32 %v898_v9, %v6072_v59  ;;  %v900_v16 = vmul.f32 %v898_v9, %v6074_v10  ;;  %s6140_s24 = sld [smem:[#allocation2 + $0x87]] }
  0xe3   : > { %v878_v4 = vadd.f32 %v876_v58, %v872_v3  ;;  %v908_v6 = vstv %s6054_s7  ;;  %v912_v25 = vstv %s6056_s18  ;;  %v918_v27 = vstv %s6062_s15  ;;  %s6142_s7 = sld [smem:[#allocation2 + $0xb2]]  ;;  %s6152_s18 = sld [smem:[#allocation2 + $0x88]] }
  0xe4   : > { %v924_v31 = vstv %s6064_s16  ;;  %v883_v28 = vadd.f32 %v881_v12, %v877_v14  ;;  %v909_v32 = vmul.f32 %v908_v6, %v6004_v36  ;;  %v910_v34 = vmul.f32 %v908_v6, %v6007_v37  ;;  %s6154_s15 = sld [smem:[#allocation2 + $0x89]]  ;;  %s6160_s16 = sld [smem:[#allocation2 + $0x8a]] }
  0xe5   : > { %v884_v49 = vadd.f32 %v882_v7, %v878_v4  ;;  %v913_v26 = vmul.f32 %v912_v25, %v6010_v15  ;;  %v914_v17 = vmul.f32 %v912_v25, %v6013_v38  ;;  %v919_v33 = vmul.f32 %v918_v27, %v6016_v23 }
  0xe6   : > { %v920_v30 = vmul.f32 %v918_v27, %v6021_v24  ;;  %v889_v19 = vadd.f32 %v887_v8, %v883_v28  ;;  %v925_v40 = vmul.f32 %v924_v31, %v6024_v41  ;;  %v926_v18 = vmul.f32 %v924_v31, %v6027_v42 }
  0xe7   : > { %v890_v35 = vadd.f32 %v888_v43, %v884_v49  ;;  %v915_v45 = vadd.f32 %v913_v26, %v909_v32  ;;  %v916_v5 = vadd.f32 %v914_v17, %v910_v34  ;;  %v930_v46 = vstv %s6080_s5  ;;  %s6162_s5 = sld [smem:[#allocation2 + $0x8b]] }
  0xe8   : > { %v936_v44 = vstv %s6082_s19  ;;  %v895_v47 = vadd.f32 %v893_v61, %v889_v19  ;;  %v931_v51 = vmul.f32 %v930_v46, %v6030_v29  ;;  %v932_v53 = vmul.f32 %v930_v46, %v6035_v39  ;;  %s6172_s19 = sld [smem:[#allocation2 + $0x8c]] }
  0xe9   : > { %v896_v48 = vadd.f32 %v894_v62, %v890_v35  ;;  %v921_v54 = vadd.f32 %v919_v33, %v915_v45  ;;  %v922_v55 = vadd.f32 %v920_v30, %v916_v5  ;;  %v937_v52 = vmul.f32 %v936_v44, %v6038_v20 }
  0xea   : > { %v938_v56 = vmul.f32 %v936_v44, %v6043_v21  ;;  %v901_v57 = vadd.f32 %v899_v63, %v895_v47  ;;  %v942_v11 = vstv %s6092_s17  ;;  %v948_v60 = vstv %s6094_s23  ;;  %s6174_s17 = sld [smem:[#allocation2 + $0x8d]]  ;;  %s6186_s23 = sld [smem:[#allocation2 + $0x8e]] }
  0xeb   : > { %v902_v58 = vadd.f32 %v900_v16, %v896_v48  ;;  %v927_v12 = vadd.f32 %v925_v40, %v921_v54  ;;  %v928_v7 = vadd.f32 %v926_v18, %v922_v55  ;;  %v943_v0 = vmul.f32 %v942_v11, %v6045_v22 }
  0xec   : > { %v944_v1 = vmul.f32 %v942_v11, %v6047_v50  ;;  %v6134_v2 = vadd.f32 %v904_v13, %v901_v57  ;;  %v949_v8 = vmul.f32 %v948_v60, %v6072_v59  ;;  %v950_v43 = vmul.f32 %v948_v60, %v6074_v10 }
  0xed   : > { %v6136_v3 = vadd.f32 %v904_v13, %v902_v58  ;;  %v933_v61 = vadd.f32 %v931_v51, %v927_v12  ;;  %v934_v62 = vadd.f32 %v932_v53, %v928_v7  ;;  %v954_v9 = vstv %s6106_s6  ;;  %s6188_s6 = sld [smem:[#allocation2 + $0x8f]] }
  0xee   : > { %v958_v14 = vstv %s6108_s25  ;;  %v962_v13 = vstv %s6112_s8  ;;  %v968_v16 = vstv %s6114_s29  ;;  %v974_v32 = vstv %s6120_s4  ;;  %s6196_s25 = sld [smem:[#allocation2 + $0xb3]]  ;;  %s6198_s8 = sld [smem:[#allocation2 + $0x90]] }
  0xef   : > { %v959_v4 = vmul.f32 %v958_v14, %v6004_v36  ;;  %v960_v63 = vmul.f32 %v958_v14, %v6007_v37  ;;  %v939_v6 = vadd.f32 %v937_v52, %v933_v61  ;;  %v940_v25 = vadd.f32 %v938_v56, %v934_v62  ;;  %s6204_s29 = sld [smem:[#allocation2 + $0x91]]  ;;  %s6206_s4 = sld [smem:[#allocation2 + $0x92]] }
  0xf0   : > { %v963_v27 = vmul.f32 %v962_v13, %v6010_v15  ;;  %v964_v31 = vmul.f32 %v962_v13, %v6013_v38  ;;  %v969_v28 = vmul.f32 %v968_v16, %v6016_v23  ;;  %v970_v49 = vmul.f32 %v968_v16, %v6021_v24 }
  0xf1   : > { %v980_v34 = vstv %s6122_s27  ;;  %v945_v26 = vadd.f32 %v943_v0, %v939_v6  ;;  %v946_v17 = vadd.f32 %v944_v1, %v940_v25  ;;  %v975_v19 = vmul.f32 %v974_v32, %v6024_v41  ;;  %s6210_s27 = sld [smem:[#allocation2 + $0x93]] }
  0xf2   : > { %v965_v33 = vadd.f32 %v963_v27, %v959_v4  ;;  %v966_v30 = vadd.f32 %v964_v31, %v960_v63  ;;  %v976_v35 = vmul.f32 %v974_v32, %v6027_v42  ;;  %v981_v40 = vmul.f32 %v980_v34, %v6030_v29 }
  0xf3   : > { %v982_v18 = vmul.f32 %v980_v34, %v6035_v39  ;;  %v951_v45 = vadd.f32 %v949_v8, %v945_v26  ;;  %v952_v5 = vadd.f32 %v950_v43, %v946_v17  ;;  %v986_v47 = vstv %s6130_s3  ;;  %s6212_s3 = sld [smem:[#allocation2 + $0x94]] }
  0xf4   : > { %v971_v46 = vadd.f32 %v969_v28, %v965_v33  ;;  %v972_v44 = vadd.f32 %v970_v49, %v966_v30  ;;  %v992_v48 = vstv %s6132_s22  ;;  %v998_v51 = vstv %s6140_s24  ;;  %s6226_s22 = sld [smem:[#allocation2 + $0x95]]  ;;  %s6228_s24 = sld [smem:[#allocation2 + $0x96]] }
  0xf5   : > { %v1004_v53 = vstv %s6142_s7  ;;  %v6176_v54 = vadd.f32 %v954_v9, %v951_v45  ;;  %v6178_v55 = vadd.f32 %v954_v9, %v952_v5  ;;  %v987_v57 = vmul.f32 %v986_v47, %v6038_v20  ;;  %s6238_s7 = sld [smem:[#allocation2 + $0x97]] }
  0xf6   : > { %v977_v52 = vadd.f32 %v975_v19, %v971_v46  ;;  %v978_v56 = vadd.f32 %v976_v35, %v972_v44  ;;  %v988_v58 = vmul.f32 %v986_v47, %v6043_v21  ;;  %v993_v11 = vmul.f32 %v992_v48, %v6045_v22 }
  0xf7   : > { %v994_v60 = vmul.f32 %v992_v48, %v6047_v50  ;;  %v999_v0 = vmul.f32 %v998_v51, %v6072_v59  ;;  %v1000_v1 = vmul.f32 %v998_v51, %v6074_v10  ;;  %v1008_v8 = vstv %s6152_s18  ;;  %s6240_s18 = sld [smem:[#allocation2 + $0xb4]] }
  0xf8   : > { %v983_v12 = vadd.f32 %v981_v40, %v977_v52  ;;  %v984_v7 = vadd.f32 %v982_v18, %v978_v56  ;;  %v1012_v43 = vstv %s6154_s15  ;;  %v1018_v61 = vstv %s6160_s16  ;;  %s6246_s15 = sld [smem:[#allocation2 + $0x98]]  ;;  %s6248_s16 = sld [smem:[#allocation2 + $0x99]] }
  0xf9   : > { %v1024_v62 = vstv %s6162_s5  ;;  %v1009_v4 = vmul.f32 %v1008_v8, %v6004_v36  ;;  %v1010_v63 = vmul.f32 %v1008_v8, %v6007_v37  ;;  %v1013_v13 = vmul.f32 %v1012_v43, %v6010_v15  ;;  %s6256_s5 = sld [smem:[#allocation2 + $0x9a]] }
  0xfa   : > { %v989_v9 = vadd.f32 %v987_v57, %v983_v12  ;;  %v990_v14 = vadd.f32 %v988_v58, %v984_v7  ;;  %v1014_v16 = vmul.f32 %v1012_v43, %v6013_v38  ;;  %v1019_v6 = vmul.f32 %v1018_v61, %v6016_v23 }
  0xfb   : > { %v1020_v25 = vmul.f32 %v1018_v61, %v6021_v24  ;;  %v1025_v28 = vmul.f32 %v1024_v62, %v6024_v41  ;;  %v1026_v49 = vmul.f32 %v1024_v62, %v6027_v42  ;;  %v1015_v32 = vadd.f32 %v1013_v13, %v1009_v4 }
  0xfc   : > { %v995_v27 = vadd.f32 %v993_v11, %v989_v9  ;;  %v996_v31 = vadd.f32 %v994_v60, %v990_v14  ;;  %v1016_v34 = vadd.f32 %v1014_v16, %v1010_v63  ;;  %v1030_v26 = vstv %s6172_s19  ;;  %s6258_s19 = sld [smem:[#allocation2 + $0x9b]] }
  0xfd   : > { %v1036_v17 = vstv %s6174_s17  ;;  %v1031_v19 = vmul.f32 %v1030_v26, %v6030_v29  ;;  %v1032_v35 = vmul.f32 %v1030_v26, %v6035_v39  ;;  %v1021_v40 = vadd.f32 %v1019_v6, %v1015_v32  ;;  %s6268_s17 = sld [smem:[#allocation2 + $0x9c]] }
  0xfe   : > { %v1001_v33 = vadd.f32 %v999_v0, %v995_v27  ;;  %v1002_v30 = vadd.f32 %v1000_v1, %v996_v31  ;;  %v1022_v18 = vadd.f32 %v1020_v25, %v1016_v34  ;;  %v1037_v45 = vmul.f32 %v1036_v17, %v6038_v20 }
  0xff   : > { %v1038_v5 = vmul.f32 %v1036_v17, %v6043_v21  ;;  %v1042_v47 = vstv %s6186_s23  ;;  %v1048_v48 = vstv %s6188_s6  ;;  %v1027_v51 = vadd.f32 %v1025_v28, %v1021_v40  ;;  %s6270_s23 = sld [smem:[#allocation2 + $0x9d]]  ;;  %s6282_s6 = sld [smem:[#allocation2 + $0x9e]] }
 0x100   : > { %v6220_v46 = vadd.f32 %v1004_v53, %v1001_v33  ;;  %v6222_v44 = vadd.f32 %v1004_v53, %v1002_v30  ;;  %v1028_v52 = vadd.f32 %v1026_v49, %v1022_v18  ;;  %v1043_v56 = vmul.f32 %v1042_v47, %v6045_v22 }
 0x101   : > { %v1044_v57 = vmul.f32 %v1042_v47, %v6047_v50  ;;  %v1049_v58 = vmul.f32 %v1048_v48, %v6072_v59  ;;  %v1050_v53 = vmul.f32 %v1048_v48, %v6074_v10  ;;  %v1054_v11 = vstv %s6196_s25  ;;  %s6284_s25 = sld [smem:[#allocation2 + $0x9f]] }
 0x102   : > { %v1058_v60 = vstv %s6198_s8  ;;  %v1033_v12 = vadd.f32 %v1031_v19, %v1027_v51  ;;  %v1034_v7 = vadd.f32 %v1032_v35, %v1028_v52  ;;  %v1062_v8 = vstv %s6204_s29  ;;  %s6292_s8 = sld [smem:[#allocation2 + $0xb5]]  ;;  %s6294_s29 = sld [smem:[#allocation2 + $0xa0]] }
 0x103   : > { %v1059_v0 = vmul.f32 %v1058_v60, %v6004_v36  ;;  %v1060_v1 = vmul.f32 %v1058_v60, %v6007_v37  ;;  %v1068_v43 = vstv %s6206_s4  ;;  %v1074_v61 = vstv %s6210_s27  ;;  %s6298_s4 = sld [smem:[#allocation2 + $0xa1]]  ;;  %s6300_s27 = sld [smem:[#allocation2 + $0xa2]] }
 0x104   : > { %v1080_v62 = vstv %s6212_s3  ;;  %v1039_v9 = vadd.f32 %v1037_v45, %v1033_v12  ;;  %v1040_v14 = vadd.f32 %v1038_v5, %v1034_v7  ;;  %v1063_v4 = vmul.f32 %v1062_v8, %v6010_v15  ;;  %s6304_s3 = sld [smem:[#allocation2 + $0xa3]] }
 0x105   : > { %v1064_v63 = vmul.f32 %v1062_v8, %v6013_v38  ;;  %v1069_v13 = vmul.f32 %v1068_v43, %v6016_v23  ;;  %v1070_v16 = vmul.f32 %v1068_v43, %v6021_v24  ;;  %v1075_v6 = vmul.f32 %v1074_v61, %v6024_v41 }
 0x106   : > { %v1076_v25 = vmul.f32 %v1074_v61, %v6027_v42  ;;  %v1045_v27 = vadd.f32 %v1043_v56, %v1039_v9  ;;  %v1046_v31 = vadd.f32 %v1044_v57, %v1040_v14  ;;  %v1065_v28 = vadd.f32 %v1063_v4, %v1059_v0 }
 0x107   : > { %v1066_v49 = vadd.f32 %v1064_v63, %v1060_v1  ;;  %v1081_v32 = vmul.f32 %v1080_v62, %v6030_v29  ;;  %v1082_v34 = vmul.f32 %v1080_v62, %v6035_v39  ;;  %v1086_v26 = vstv %s6226_s22  ;;  %s6306_s22 = sld [smem:[#allocation2 + $0xa4]] }
 0x108   : > { %v1092_v17 = vstv %s6228_s24  ;;  %v1051_v33 = vadd.f32 %v1049_v58, %v1045_v27  ;;  %v1052_v30 = vadd.f32 %v1050_v53, %v1046_v31  ;;  %v1071_v19 = vadd.f32 %v1069_v13, %v1065_v28  ;;  %s6320_s24 = sld [smem:[#allocation2 + $0xa5]] }
 0x109   : > { %v1072_v35 = vadd.f32 %v1070_v16, %v1066_v49  ;;  %v1087_v40 = vmul.f32 %v1086_v26, %v6038_v20  ;;  %v1088_v18 = vmul.f32 %v1086_v26, %v6043_v21  ;;  %v1093_v45 = vmul.f32 %v1092_v17, %v6045_v22 }
 0x10a   : > { %v1094_v5 = vmul.f32 %v1092_v17, %v6047_v50  ;;  %v6272_v47 = vadd.f32 %v1054_v11, %v1051_v33  ;;  %v6274_v48 = vadd.f32 %v1054_v11, %v1052_v30  ;;  %v1077_v51 = vadd.f32 %v1075_v6, %v1071_v19 }
 0x10b   : > { %v1078_v52 = vadd.f32 %v1076_v25, %v1072_v35  ;;  %v1098_v56 = vstv %s6238_s7  ;;  %v1104_v57 = vstv %s6240_s18  ;;  %v1108_v58 = vstv %s6246_s15  ;;  %s6322_s7 = sld [smem:[#allocation2 + $0xa6]]  ;;  %s6332_s18 = sld [smem:[#allocation2 + $0xa7]] }
 0x10c   : > { %v1112_v53 = vstv %s6248_s16  ;;  %v1083_v60 = vadd.f32 %v1081_v32, %v1077_v51  ;;  %v1099_v7 = vmul.f32 %v1098_v56, %v6072_v59  ;;  %v1100_v0 = vmul.f32 %v1098_v56, %v6074_v10  ;;  %s6334_s15 = sld [smem:[#allocation2 + $0xb6]]  ;;  %s6340_s16 = sld [smem:[#allocation2 + $0xa8]] }
 0x10d   : > { %v1084_v12 = vadd.f32 %v1082_v34, %v1078_v52  ;;  %v1109_v11 = vmul.f32 %v1108_v58, %v6004_v36  ;;  %v1110_v1 = vmul.f32 %v1108_v58, %v6007_v37  ;;  %v1113_v8 = vmul.f32 %v1112_v53, %v6010_v15 }
 0x10e   : > { %v1114_v43 = vmul.f32 %v1112_v53, %v6013_v38  ;;  %v1089_v61 = vadd.f32 %v1087_v40, %v1083_v60  ;;  %v1118_v9 = vstv %s6256_s5  ;;  %v1124_v14 = vstv %s6258_s19  ;;  %s6342_s5 = sld [smem:[#allocation2 + $0xa9]]  ;;  %s6350_s19 = sld [smem:[#allocation2 + $0xaa]] }
 0x10f   : > { %v1090_v62 = vadd.f32 %v1088_v18, %v1084_v12  ;;  %v1115_v4 = vadd.f32 %v1113_v8, %v1109_v11  ;;  %v1119_v13 = vmul.f32 %v1118_v9, %v6016_v23  ;;  %v1120_v16 = vmul.f32 %v1118_v9, %v6021_v24 }
 0x110   : > { %v1116_v63 = vadd.f32 %v1114_v43, %v1110_v1  ;;  %v1095_v6 = vadd.f32 %v1093_v45, %v1089_v61  ;;  %v1125_v27 = vmul.f32 %v1124_v14, %v6024_v41  ;;  %v1126_v31 = vmul.f32 %v1124_v14, %v6027_v42 }
 0x111   : > { %v1096_v25 = vadd.f32 %v1094_v5, %v1090_v62  ;;  %v1121_v28 = vadd.f32 %v1119_v13, %v1115_v4  ;;  %v1130_v32 = vstv %s6268_s17  ;;  %v1136_v34 = vstv %s6270_s23  ;;  %s6352_s17 = sld [smem:[#allocation2 + $0xab]]  ;;  %s6362_s23 = sld [smem:[#allocation2 + $0xac]] }
 0x112   : > { %v1122_v49 = vadd.f32 %v1120_v16, %v1116_v63  ;;  %v1101_v26 = vadd.f32 %v1099_v7, %v1095_v6  ;;  %v1131_v33 = vmul.f32 %v1130_v32, %v6030_v29  ;;  %v1132_v30 = vmul.f32 %v1130_v32, %v6035_v39 }
 0x113   : > { %v1102_v17 = vadd.f32 %v1100_v0, %v1096_v25  ;;  %v1127_v19 = vadd.f32 %v1125_v27, %v1121_v28  ;;  %v1137_v40 = vmul.f32 %v1136_v34, %v6038_v20  ;;  %v1138_v18 = vmul.f32 %v1136_v34, %v6043_v21 }
 0x114   : > { %v1128_v35 = vadd.f32 %v1126_v31, %v1122_v49  ;;  %v6314_v45 = vadd.f32 %v1104_v57, %v1101_v26  ;;  %v1142_v51 = vstv %s6282_s6  ;;  %v1148_v52 = vstv %s6284_s25  ;;  %s6364_s6 = sld [smem:[#allocation2 + $0xad]]  ;;  %s6376_s25 = sld [smem:[#allocation2 + $0xae]] }
 0x115   : > { %v6316_v5 = vadd.f32 %v1104_v57, %v1102_v17  ;;  %v1133_v56 = vadd.f32 %v1131_v33, %v1127_v19  ;;  %v1143_v53 = vmul.f32 %v1142_v51, %v6045_v22  ;;  %v1144_v60 = vmul.f32 %v1142_v51, %v6047_v50 }
 0x116   : > { %v1134_v58 = vadd.f32 %v1132_v30, %v1128_v35  ;;  %v1149_v12 = vmul.f32 %v1148_v52, %v6072_v59  ;;  %v1150_v57 = vmul.f32 %v1148_v52, %v6074_v10  ;;  %v1154_v7 = vstv %s6292_s8  ;;  %s6378_s8 = sld [smem:[#allocation2 + $0xaf]] }
 0x117   : > { %v1158_v0 = vstv %s6294_s29  ;;  %v1139_v11 = vadd.f32 %v1137_v40, %v1133_v56  ;;  %v1162_v61 = vstv %s6298_s4  ;;  %v1168_v62 = vstv %s6300_s27  ;;  %s6388_s29 = sld [smem:[#allocation2 + $0xb7]]  ;;  %s6398_s4 = sld [smem:[#allocation2 + $0xb8]] }
 0x118   : > { %v1140_v1 = vadd.f32 %v1138_v18, %v1134_v58  ;;  %v1159_v8 = vmul.f32 %v1158_v0, %v6004_v36  ;;  %v1160_v43 = vmul.f32 %v1158_v0, %v6007_v37  ;;  %v1174_v9 = vstv %s6304_s3  ;;  %s6402_s27 = sld [smem:[#allocation2 + $0xb9]]  ;;  %s6404_s3 = sld [smem:[#allocation2 + $0xba]] }
 0x119   : > { %v1180_v14 = vstv %s6306_s22  ;;  %v1145_v4 = vadd.f32 %v1143_v53, %v1139_v11  ;;  %v1163_v13 = vmul.f32 %v1162_v61, %v6010_v15  ;;  %v1164_v16 = vmul.f32 %v1162_v61, %v6013_v38  ;;  %s6408_s22 = sld [smem:[#allocation2 + $0xbb]] }
 0x11a   : > { %v1146_v63 = vadd.f32 %v1144_v60, %v1140_v1  ;;  %v1169_v6 = vmul.f32 %v1168_v62, %v6016_v23  ;;  %v1170_v25 = vmul.f32 %v1168_v62, %v6021_v24  ;;  %v1175_v27 = vmul.f32 %v1174_v9, %v6024_v41 }
 0x11b   : > { %v1176_v31 = vmul.f32 %v1174_v9, %v6027_v42  ;;  %v1151_v28 = vadd.f32 %v1149_v12, %v1145_v4  ;;  %v1165_v32 = vadd.f32 %v1163_v13, %v1159_v8  ;;  %v1166_v34 = vadd.f32 %v1164_v16, %v1160_v43 }
 0x11c   : > { %v1152_v49 = vadd.f32 %v1150_v57, %v1146_v63  ;;  %v1181_v26 = vmul.f32 %v1180_v14, %v6030_v29  ;;  %v1182_v17 = vmul.f32 %v1180_v14, %v6035_v39  ;;  %v1186_v33 = vstv %s6320_s24  ;;  %s6410_s24 = sld [smem:[#allocation2 + $0xbc]] }
 0x11d   : > { %v1192_v30 = vstv %s6322_s7  ;;  %v6358_v19 = vadd.f32 %v1154_v7, %v1151_v28  ;;  %v1171_v40 = vadd.f32 %v1169_v6, %v1165_v32  ;;  %v1172_v18 = vadd.f32 %v1170_v25, %v1166_v34  ;;  %s6430_s7 = sld [smem:[#allocation2 + $0xbd]] }
 0x11e   : > { %v6360_v35 = vadd.f32 %v1154_v7, %v1152_v49  ;;  %v1187_v51 = vmul.f32 %v1186_v33, %v6038_v20  ;;  %v1188_v52 = vmul.f32 %v1186_v33, %v6043_v21  ;;  %v1193_v56 = vmul.f32 %v1192_v30, %v6045_v22 }
 0x11f   : > { %v1194_v58 = vmul.f32 %v1192_v30, %v6047_v50  ;;  %v1177_v53 = vadd.f32 %v1175_v27, %v1171_v40  ;;  %v1178_v60 = vadd.f32 %v1176_v31, %v1172_v18  ;;  %v1198_v12 = vstv %s6332_s18  ;;  %s6444_s18 = sld [smem:[#allocation2 + $0xbe]] }
 0x120   : > { %v1204_v57 = vstv %s6334_s15  ;;  %v1199_v7 = vmul.f32 %v1198_v12, %v6072_v59  ;;  %v1200_v0 = vmul.f32 %v1198_v12, %v6074_v10  ;;  %v1208_v11 = vstv %s6340_s16  ;;  %s6452_s15 = sld [smem:[#allocation2 + $0xbf]]  ;;  %s6462_s16 = sld [smem:[#allocation2 + $0xf8]] }
 0x121   : > { %v1212_v1 = vstv %s6342_s5  ;;  %v1183_v8 = vadd.f32 %v1181_v26, %v1177_v53  ;;  %v1184_v43 = vadd.f32 %v1182_v17, %v1178_v60  ;;  %v1209_v61 = vmul.f32 %v1208_v11, %v6004_v36  ;;  %s6466_s5 = sld [smem:[#allocation2 + $0xc0]] }
 0x122   : > { %v1210_v62 = vmul.f32 %v1208_v11, %v6007_v37  ;;  %v1213_v9 = vmul.f32 %v1212_v1, %v6010_v15  ;;  %v1214_v14 = vmul.f32 %v1212_v1, %v6013_v38  ;;  %v1218_v4 = vstv %s6350_s19  ;;  %s6468_s19 = sld [smem:[#allocation2 + $0xc1]] }
 0x123   : > { %v1224_v63 = vstv %s6352_s17  ;;  %v1189_v13 = vadd.f32 %v1187_v51, %v1183_v8  ;;  %v1190_v16 = vadd.f32 %v1188_v52, %v1184_v43  ;;  %v1219_v6 = vmul.f32 %v1218_v4, %v6016_v23  ;;  %s6474_s17 = sld [smem:[#allocation2 + $0xc2]] }
 0x124   : > { %v1220_v25 = vmul.f32 %v1218_v4, %v6021_v24  ;;  %v1215_v27 = vadd.f32 %v1213_v9, %v1209_v61  ;;  %v1216_v36 = vadd.f32 %v1214_v14, %v1210_v62  ;;  %v1225_v37 = vmul.f32 %v1224_v63, %v6024_v41 }
 0x125   : > { %v1226_v31 = vmul.f32 %v1224_v63, %v6027_v42  ;;  %v1195_v15 = vadd.f32 %v1193_v56, %v1189_v13  ;;  %v1196_v38 = vadd.f32 %v1194_v58, %v1190_v16  ;;  %v1230_v28 = vstv %s6362_s23  ;;  %s6476_s23 = sld [smem:[#allocation2 + $0xc3]] }
 0x126   : > { %v1236_v49 = vstv %s6364_s6  ;;  %v1221_v32 = vadd.f32 %v1219_v6, %v1215_v27  ;;  %v1222_v34 = vadd.f32 %v1220_v25, %v1216_v36  ;;  %v1231_v23 = vmul.f32 %v1230_v28, %v6030_v29  ;;  %s6492_s6 = sld [smem:[#allocation2 + $0xc4]] }
 0x127   : > { %v1232_v24 = vmul.f32 %v1230_v28, %v6035_v39  ;;  %v1201_v26 = vadd.f32 %v1199_v7, %v1195_v15  ;;  %v1202_v17 = vadd.f32 %v1200_v0, %v1196_v38  ;;  %v1237_v33 = vmul.f32 %v1236_v49, %v6038_v20 }
 0x128   : > { %v1238_v41 = vmul.f32 %v1236_v49, %v6043_v21  ;;  %v1227_v42 = vadd.f32 %v1225_v37, %v1221_v32  ;;  %v1228_v30 = vadd.f32 %v1226_v31, %v1222_v34  ;;  %v1242_v40 = vstv %s6376_s25  ;;  %s6494_s25 = sld [smem:[#allocation2 + $0xc5]] }
 0x129   : > { %v1248_v18 = vstv %s6378_s8  ;;  %v1205_v29 = vadd.f32 %v1204_v57, %v1201_v26  ;;  %v1206_v51 = vadd.f32 %v1204_v57, %v1202_v17  ;;  %v1243_v39 = vmul.f32 %v1242_v40, %v6045_v22  ;;  %s6504_s8 = sld [smem:[#allocation2 + $0xc6]] }
 0x12a   : > { %v1244_v52 = vmul.f32 %v1242_v40, %v6047_v50  ;;  %v1233_v20 = vadd.f32 %v1231_v23, %v1227_v42  ;;  %v1234_v21 = vadd.f32 %v1232_v24, %v1228_v30  ;;  %v1249_v56 = vmul.f32 %v1248_v18, %v6072_v59 }
 0x12b   : > { %v1250_v58 = vmul.f32 %v1248_v18, %v6074_v10  ;;  %v1254_v53 = vstv %s6388_s29  ;;  %v6416_v60 = vmax.f32 %v6134_v2, 0.0  ;;  %v6419_v12 = vmax.f32 %v6136_v3, 0.0  ;;  %s6506_s29 = sld [smem:[#allocation2 + $0xc7]] }
 0x12c   : > { %v6422_v22 = vmax.f32 %v6176_v54, 0.0  ;;  %v1239_v50 = vadd.f32 %v1237_v33, %v1233_v20  ;;  %v1240_v57 = vadd.f32 %v1238_v41, %v1234_v21  ;;  %v6425_v7 = vmax.f32 %v6178_v55, 0.0 }
 0x12d   : > { %v6428_v59 = vmax.f32 %v6220_v46, 0.0  ;;  %v6433_v10 = vmax.f32 %v6222_v44, 0.0  ;;  %v6436_v2 = vmax.f32 %v6272_v47, 0.0  ;;  %v6439_v3 = vmax.f32 %v6274_v48, 0.0 }
 0x12e   : > { %v6442_v54 = vmax.f32 %v6314_v45, 0.0  ;;  %v1245_v55 = vadd.f32 %v1243_v39, %v1239_v50  ;;  %v1246_v46 = vadd.f32 %v1244_v52, %v1240_v57  ;;  %v6447_v0 = vmax.f32 %v6316_v5, 0.0 }
 0x12f   : > { %v6450_v44 = vmax.f32 %v6358_v19, 0.0  ;;  %v6455_v47 = vmax.f32 %v6360_v35, 0.0  ;;  %v6457_v48 = vmax.f32 %v1205_v29, 0.0  ;;  %v6459_v45 = vmax.f32 %v1206_v51, 0.0 }
 0x130   : > { %v1274_v11 = vstv %s6398_s4  ;;  %v1251_v1 = vadd.f32 %v1249_v56, %v1245_v55  ;;  %v1252_v5 = vadd.f32 %v1250_v58, %v1246_v46  ;;  %v1278_v43 = vstv %s6402_s27  ;;  %s6518_s4 = sld [smem:[#allocation2 + $0xf9]]  ;;  %s6520_s27 = sld [smem:[#allocation2 + $0xc8]] }
 0x131   : > { %9327 = vst [vmem:[#allocation11_spill] sm:$0xff] %v6455_v47  ;;  %9328 = vst [vmem:[#allocation12_spill] sm:$0xff] %v6457_v48  ;;  %v1275_v8 = vmul.f32 %v1274_v11, %v6416_v60  ;;  %v1276_v19 = vmul.f32 %v1274_v11, %v6419_v12  ;;  %v1284_v35 = vstv %s6404_s3  ;;  %v1290_v61 = vstv %s6408_s22  ;;  %s6524_s3 = sld [smem:[#allocation2 + $0xc9]]  ;;  %s6526_s22 = sld [smem:[#allocation2 + $0xca]] }
 0x132   : > { %9329 = vst [vmem:[#allocation13_spill] sm:$0xff] %v6459_v45  ;;  %v1296_v62 = vstv %s6410_s24  ;;  %v1255_v9 = vadd.f32 %v1254_v53, %v1251_v1  ;;  %v1256_v14 = vadd.f32 %v1254_v53, %v1252_v5  ;;  %v1279_v4 = vmul.f32 %v1278_v43, %v6422_v22  ;;  %s6532_s24 = sld [smem:[#allocation2 + $0xcb]] }
 0x133   : > { %v1280_v63 = vmul.f32 %v1278_v43, %v6425_v7  ;;  %v1285_v13 = vmul.f32 %v1284_v35, %v6428_v59  ;;  %v1286_v16 = vmul.f32 %v1284_v35, %v6433_v10  ;;  %v1291_v6 = vmul.f32 %v1290_v61, %v6436_v2 }
 0x134   : > { %v1292_v25 = vmul.f32 %v1290_v61, %v6439_v3  ;;  %v6484_v27 = vmax.f32 %v1255_v9, 0.0  ;;  %v6486_v36 = vmax.f32 %v1256_v14, 0.0  ;;  %v1281_v37 = vadd.f32 %v1279_v4, %v1275_v8 }
 0x135   : > { %v1282_v31 = vadd.f32 %v1280_v63, %v1276_v19  ;;  %v1297_v15 = vmul.f32 %v1296_v62, %v6442_v54  ;;  %v1298_v38 = vmul.f32 %v1296_v62, %v6447_v0  ;;  %v1302_v28 = vstv %s6430_s7  ;;  %s6534_s7 = sld [smem:[#allocation2 + $0xcc]] }
 0x136   : > { %9330 = vst [vmem:[#allocation14_spill] sm:$0xff] %v6484_v27  ;;  %9331 = vst [vmem:[#allocation15_spill] sm:$0xff] %v6486_v36  ;;  %v1308_v49 = vstv %s6444_s18  ;;  %v1287_v32 = vadd.f32 %v1285_v13, %v1281_v37  ;;  %v1303_v23 = vmul.f32 %v1302_v28, %v6450_v44  ;;  %v1304_v24 = vmul.f32 %v1302_v28, %v6455_v47  ;;  %s6542_s18 = sld [smem:[#allocation2 + $0xcd]] }
 0x137   : > { %v1288_v34 = vadd.f32 %v1286_v16, %v1282_v31  ;;  %v1309_v26 = vmul.f32 %v1308_v49, %v6457_v48  ;;  %v1310_v17 = vmul.f32 %v1308_v49, %v6459_v45  ;;  %v1314_v33 = vstv %s6452_s15  ;;  %s6544_s15 = sld [smem:[#allocation2 + $0xce]] }
 0x138   : > { %v1320_v41 = vstv %s6462_s16  ;;  %v1293_v42 = vadd.f32 %v1291_v6, %v1287_v32  ;;  %v1315_v40 = vmul.f32 %v1314_v33, %v6484_v27  ;;  %v1316_v18 = vmul.f32 %v1314_v33, %v6486_v36  ;;  %s6552_s16 = sld [smem:[#allocation2 + $0xcf]] }
 0x139   : > { %v1294_v30 = vadd.f32 %v1292_v25, %v1288_v34  ;;  %v1324_v29 = vstv %s6466_s5  ;;  %v1328_v51 = vstv %s6468_s19  ;;  %v1334_v39 = vstv %s6474_s17  ;;  %s6554_s5 = sld [smem:[#allocation2 + $0xfa]]  ;;  %s6564_s19 = sld [smem:[#allocation2 + $0xd0]] }
 0x13a   : > { %v1340_v52 = vstv %s6476_s23  ;;  %v1299_v20 = vadd.f32 %v1297_v15, %v1293_v42  ;;  %v1325_v56 = vmul.f32 %v1324_v29, %v6416_v60  ;;  %v1326_v58 = vmul.f32 %v1324_v29, %v6419_v12  ;;  %s6566_s17 = sld [smem:[#allocation2 + $0xd1]]  ;;  %s6572_s23 = sld [smem:[#allocation2 + $0xd2]] }
 0x13b   : > { %v1300_v21 = vadd.f32 %v1298_v38, %v1294_v30  ;;  %v1329_v53 = vmul.f32 %v1328_v51, %v6422_v22  ;;  %v1330_v50 = vmul.f32 %v1328_v51, %v6425_v7  ;;  %v1335_v57 = vmul.f32 %v1334_v39, %v6428_v59 }
 0x13c   : > { %v1336_v55 = vmul.f32 %v1334_v39, %v6433_v10  ;;  %v1305_v46 = vadd.f32 %v1303_v23, %v1299_v20  ;;  %v1341_v1 = vmul.f32 %v1340_v52, %v6436_v2  ;;  %v1342_v5 = vmul.f32 %v1340_v52, %v6439_v3 }
 0x13d   : > { %v1306_v11 = vadd.f32 %v1304_v24, %v1300_v21  ;;  %v1331_v8 = vadd.f32 %v1329_v53, %v1325_v56  ;;  %v1332_v19 = vadd.f32 %v1330_v50, %v1326_v58  ;;  %v1346_v43 = vstv %s6492_s6  ;;  %s6574_s6 = sld [smem:[#allocation2 + $0xd3]] }
 0x13e   : > { %v1352_v35 = vstv %s6494_s25  ;;  %v1311_v61 = vadd.f32 %v1309_v26, %v1305_v46  ;;  %v1347_v9 = vmul.f32 %v1346_v43, %v6442_v54  ;;  %v1348_v14 = vmul.f32 %v1346_v43, %v6447_v0  ;;  %s6584_s25 = sld [smem:[#allocation2 + $0xd4]] }
 0x13f   : > { %v1312_v62 = vadd.f32 %v1310_v17, %v1306_v11  ;;  %v1337_v4 = vadd.f32 %v1335_v57, %v1331_v8  ;;  %v1338_v63 = vadd.f32 %v1336_v55, %v1332_v19  ;;  %v1353_v13 = vmul.f32 %v1352_v35, %v6450_v44 }
 0x140   : > { %v1354_v16 = vmul.f32 %v1352_v35, %v6455_v47  ;;  %v1317_v6 = vadd.f32 %v1315_v40, %v1311_v61  ;;  %v1358_v37 = vstv %s6504_s8  ;;  %v1364_v31 = vstv %s6506_s29  ;;  %s6586_s8 = sld [smem:[#allocation2 + $0xd5]]  ;;  %s6598_s29 = sld [smem:[#allocation2 + $0xd6]] }
 0x141   : > { %v1318_v25 = vadd.f32 %v1316_v18, %v1312_v62  ;;  %v1343_v15 = vadd.f32 %v1341_v1, %v1337_v4  ;;  %v1344_v38 = vadd.f32 %v1342_v5, %v1338_v63  ;;  %v1359_v28 = vmul.f32 %v1358_v37, %v6457_v48 }
 0x142   : > { %v1360_v49 = vmul.f32 %v1358_v37, %v6459_v45  ;;  %v6546_v32 = vadd.f32 %v1320_v41, %v1317_v6  ;;  %v1365_v23 = vmul.f32 %v1364_v31, %v6484_v27  ;;  %v1366_v24 = vmul.f32 %v1364_v31, %v6486_v36 }
 0x143   : > { %v6548_v34 = vadd.f32 %v1320_v41, %v1318_v25  ;;  %v1349_v26 = vadd.f32 %v1347_v9, %v1343_v15  ;;  %v1350_v17 = vadd.f32 %v1348_v14, %v1344_v38  ;;  %v1370_v33 = vstv %s6518_s4  ;;  %s6600_s4 = sld [smem:[#allocation2 + $0xd7]] }
 0x144   : > { %v1374_v42 = vstv %s6520_s27  ;;  %v1378_v41 = vstv %s6524_s3  ;;  %v1384_v18 = vstv %s6526_s22  ;;  %v1390_v56 = vstv %s6532_s24  ;;  %s6608_s27 = sld [smem:[#allocation2 + $0xfb]]  ;;  %s6610_s3 = sld [smem:[#allocation2 + $0xd8]] }
 0x145   : > { %v1375_v30 = vmul.f32 %v1374_v42, %v6416_v60  ;;  %v1376_v40 = vmul.f32 %v1374_v42, %v6419_v12  ;;  %v1355_v29 = vadd.f32 %v1353_v13, %v1349_v26  ;;  %v1356_v51 = vadd.f32 %v1354_v16, %v1350_v17  ;;  %s6616_s22 = sld [smem:[#allocation2 + $0xd9]]  ;;  %s6618_s24 = sld [smem:[#allocation2 + $0xda]] }
 0x146   : > { %v1379_v39 = vmul.f32 %v1378_v41, %v6422_v22  ;;  %v1380_v52 = vmul.f32 %v1378_v41, %v6425_v7  ;;  %v1385_v20 = vmul.f32 %v1384_v18, %v6428_v59  ;;  %v1386_v21 = vmul.f32 %v1384_v18, %v6433_v10 }
 0x147   : > { %v1396_v58 = vstv %s6534_s7  ;;  %v1361_v53 = vadd.f32 %v1359_v28, %v1355_v29  ;;  %v1362_v50 = vadd.f32 %v1360_v49, %v1356_v51  ;;  %v1391_v46 = vmul.f32 %v1390_v56, %v6436_v2  ;;  %s6622_s7 = sld [smem:[#allocation2 + $0xdb]] }
 0x148   : > { %v1381_v57 = vadd.f32 %v1379_v39, %v1375_v30  ;;  %v1382_v55 = vadd.f32 %v1380_v52, %v1376_v40  ;;  %v1392_v11 = vmul.f32 %v1390_v56, %v6439_v3  ;;  %v1397_v1 = vmul.f32 %v1396_v58, %v6442_v54 }
 0x149   : > { %v1398_v5 = vmul.f32 %v1396_v58, %v6447_v0  ;;  %v1367_v8 = vadd.f32 %v1365_v23, %v1361_v53  ;;  %v1368_v19 = vadd.f32 %v1366_v24, %v1362_v50  ;;  %v1402_v61 = vstv %s6542_s18  ;;  %s6624_s18 = sld [smem:[#allocation2 + $0xdc]] }
 0x14a   : > { %v1387_v43 = vadd.f32 %v1385_v20, %v1381_v57  ;;  %v1388_v35 = vadd.f32 %v1386_v21, %v1382_v55  ;;  %v1408_v62 = vstv %s6544_s15  ;;  %v1414_v9 = vstv %s6552_s16  ;;  %s6638_s15 = sld [smem:[#allocation2 + $0xdd]]  ;;  %s6640_s16 = sld [smem:[#allocation2 + $0xde]] }
 0x14b   : > { %v1420_v14 = vstv %s6554_s5  ;;  %v6588_v4 = vadd.f32 %v1370_v33, %v1367_v8  ;;  %v6590_v63 = vadd.f32 %v1370_v33, %v1368_v19  ;;  %v1403_v6 = vmul.f32 %v1402_v61, %v6450_v44  ;;  %s6650_s5 = sld [smem:[#allocation2 + $0xe0]] }
 0x14c   : > { %v1393_v13 = vadd.f32 %v1391_v46, %v1387_v43  ;;  %v1394_v16 = vadd.f32 %v1392_v11, %v1388_v35  ;;  %v1404_v25 = vmul.f32 %v1402_v61, %v6455_v47  ;;  %v1409_v37 = vmul.f32 %v1408_v62, %v6457_v48 }
 0x14d   : > { %v1410_v31 = vmul.f32 %v1408_v62, %v6459_v45  ;;  %v1415_v28 = vmul.f32 %v1414_v9, %v6484_v27  ;;  %v1416_v49 = vmul.f32 %v1414_v9, %v6486_v36  ;;  %v1424_v23 = vstv %s6564_s19  ;;  %s6652_s19 = sld [smem:[#allocation2 + $0xe1]] }
 0x14e   : > { %v1399_v15 = vadd.f32 %v1397_v1, %v1393_v13  ;;  %v1400_v38 = vadd.f32 %v1398_v5, %v1394_v16  ;;  %v1428_v24 = vstv %s6566_s17  ;;  %v1434_v26 = vstv %s6572_s23  ;;  %s6658_s17 = sld [smem:[#allocation2 + $0xdf]]  ;;  %s6660_s23 = sld [smem:[#allocation2 + $0xfc]] }
 0x14f   : > { %v1440_v17 = vstv %s6574_s6  ;;  %v1425_v30 = vmul.f32 %v1424_v23, %v6416_v60  ;;  %v1426_v40 = vmul.f32 %v1424_v23, %v6419_v12  ;;  %v1429_v41 = vmul.f32 %v1428_v24, %v6422_v22  ;;  %s6668_s6 = sld [smem:[#allocation2 + $0xe2]] }
 0x150   : > { %v1405_v33 = vadd.f32 %v1403_v6, %v1399_v15  ;;  %v1406_v42 = vadd.f32 %v1404_v25, %v1400_v38  ;;  %v1430_v18 = vmul.f32 %v1428_v24, %v6425_v7  ;;  %v1435_v29 = vmul.f32 %v1434_v26, %v6428_v59 }
 0x151   : > { %v1436_v51 = vmul.f32 %v1434_v26, %v6433_v10  ;;  %v1441_v20 = vmul.f32 %v1440_v17, %v6436_v2  ;;  %v1442_v21 = vmul.f32 %v1440_v17, %v6439_v3  ;;  %v1431_v56 = vadd.f32 %v1429_v41, %v1425_v30 }
 0x152   : > { %v1411_v39 = vadd.f32 %v1409_v37, %v1405_v33  ;;  %v1412_v52 = vadd.f32 %v1410_v31, %v1406_v42  ;;  %v1432_v58 = vadd.f32 %v1430_v18, %v1426_v40  ;;  %v1446_v53 = vstv %s6584_s25  ;;  %s6670_s25 = sld [smem:[#allocation2 + $0xe3]] }
 0x153   : > { %v1452_v50 = vstv %s6586_s8  ;;  %v1447_v46 = vmul.f32 %v1446_v53, %v6442_v54  ;;  %v1448_v11 = vmul.f32 %v1446_v53, %v6447_v0  ;;  %v1437_v1 = vadd.f32 %v1435_v29, %v1431_v56  ;;  %s6680_s8 = sld [smem:[#allocation2 + $0xe4]] }
 0x154   : > { %v1417_v57 = vadd.f32 %v1415_v28, %v1411_v39  ;;  %v1418_v55 = vadd.f32 %v1416_v49, %v1412_v52  ;;  %v1438_v5 = vadd.f32 %v1436_v51, %v1432_v58  ;;  %v1453_v8 = vmul.f32 %v1452_v50, %v6450_v44 }
 0x155   : > { %v1454_v19 = vmul.f32 %v1452_v50, %v6455_v47  ;;  %v1458_v61 = vstv %s6598_s29  ;;  %v1464_v62 = vstv %s6600_s4  ;;  %v1443_v9 = vadd.f32 %v1441_v20, %v1437_v1  ;;  %s6682_s29 = sld [smem:[#allocation2 + $0xe5]]  ;;  %s6694_s4 = sld [smem:[#allocation2 + $0xe6]] }
 0x156   : > { %v6632_v43 = vadd.f32 %v1420_v14, %v1417_v57  ;;  %v6634_v35 = vadd.f32 %v1420_v14, %v1418_v55  ;;  %v1444_v13 = vadd.f32 %v1442_v21, %v1438_v5  ;;  %v1459_v16 = vmul.f32 %v1458_v61, %v6457_v48 }
 0x157   : > { %v1460_v6 = vmul.f32 %v1458_v61, %v6459_v45  ;;  %v1465_v25 = vmul.f32 %v1464_v62, %v6484_v27  ;;  %v1466_v14 = vmul.f32 %v1464_v62, %v6486_v36  ;;  %v1470_v37 = vstv %s6608_s27  ;;  %s6696_s27 = sld [smem:[#allocation2 + $0xe7]] }
 0x158   : > { %v1474_v31 = vstv %s6610_s3  ;;  %v1449_v15 = vadd.f32 %v1447_v46, %v1443_v9  ;;  %v1450_v38 = vadd.f32 %v1448_v11, %v1444_v13  ;;  %v1478_v23 = vstv %s6616_s22  ;;  %s6704_s3 = sld [smem:[#allocation2 + $0xfd]]  ;;  %s6706_s22 = sld [smem:[#allocation2 + $0xe8]] }
 0x159   : > { %v1475_v28 = vmul.f32 %v1474_v31, %v6416_v60  ;;  %v1476_v49 = vmul.f32 %v1474_v31, %v6419_v12  ;;  %v1484_v24 = vstv %s6618_s24  ;;  %v1490_v26 = vstv %s6622_s7  ;;  %s6710_s24 = sld [smem:[#allocation2 + $0xe9]]  ;;  %s6712_s7 = sld [smem:[#allocation2 + $0xea]] }
 0x15a   : > { %v1496_v17 = vstv %s6624_s18  ;;  %v1455_v33 = vadd.f32 %v1453_v8, %v1449_v15  ;;  %v1456_v42 = vadd.f32 %v1454_v19, %v1450_v38  ;;  %v1479_v30 = vmul.f32 %v1478_v23, %v6422_v22  ;;  %s6716_s18 = sld [smem:[#allocation2 + $0xeb]] }
 0x15b   : > { %v1480_v40 = vmul.f32 %v1478_v23, %v6425_v7  ;;  %v1485_v41 = vmul.f32 %v1484_v24, %v6428_v59  ;;  %v1486_v18 = vmul.f32 %v1484_v24, %v6433_v10  ;;  %v1491_v29 = vmul.f32 %v1490_v26, %v6436_v2 }
 0x15c   : > { %v1492_v51 = vmul.f32 %v1490_v26, %v6439_v3  ;;  %v1461_v39 = vadd.f32 %v1459_v16, %v1455_v33  ;;  %v1462_v52 = vadd.f32 %v1460_v6, %v1456_v42  ;;  %v1481_v20 = vadd.f32 %v1479_v30, %v1475_v28 }
 0x15d   : > { %v1482_v21 = vadd.f32 %v1480_v40, %v1476_v49  ;;  %v1497_v56 = vmul.f32 %v1496_v17, %v6442_v54  ;;  %v1498_v58 = vmul.f32 %v1496_v17, %v6447_v0  ;;  %v1502_v53 = vstv %s6638_s15  ;;  %s6718_s15 = sld [smem:[#allocation2 + $0xec]] }
 0x15e   : > { %v1508_v50 = vstv %s6640_s16  ;;  %v1467_v57 = vadd.f32 %v1465_v25, %v1461_v39  ;;  %v1468_v55 = vadd.f32 %v1466_v14, %v1462_v52  ;;  %v1487_v46 = vadd.f32 %v1485_v41, %v1481_v20  ;;  %s6732_s16 = sld [smem:[#allocation2 + $0xed]] }
 0x15f   : > { %v1488_v11 = vadd.f32 %v1486_v18, %v1482_v21  ;;  %v1503_v1 = vmul.f32 %v1502_v53, %v6450_v44  ;;  %v1504_v5 = vmul.f32 %v1502_v53, %v6455_v47  ;;  %v1509_v8 = vmul.f32 %v1508_v50, %v6457_v48 }
 0x160   : > { %v1510_v19 = vmul.f32 %v1508_v50, %v6459_v45  ;;  %v6684_v61 = vadd.f32 %v1470_v37, %v1467_v57  ;;  %v6686_v62 = vadd.f32 %v1470_v37, %v1468_v55  ;;  %v1493_v9 = vadd.f32 %v1491_v29, %v1487_v46 }
 0x161   : > { %v1494_v13 = vadd.f32 %v1492_v51, %v1488_v11  ;;  %v1514_v16 = vstv %s6658_s17  ;;  %v1520_v6 = vstv %s6660_s23  ;;  %v1524_v25 = vstv %s6650_s5  ;;  %s6734_s5 = sld [smem:[#allocation2 + $0xee]]  ;;  %s6752_s23 = sld [smem:[#allocation2 + $0xf0]] }
 0x162   : > { %v1528_v14 = vstv %s6652_s19  ;;  %v1499_v31 = vadd.f32 %v1497_v56, %v1493_v9  ;;  %v1515_v38 = vmul.f32 %v1514_v16, %v6484_v27  ;;  %v1516_v28 = vmul.f32 %v1514_v16, %v6486_v36  ;;  %s6744_s19 = sld [smem:[#allocation2 + $0xef]]  ;;  %s6746_s17 = sld [smem:[#allocation2 + $0xfe]] }
 0x163   : > { %v1500_v15 = vadd.f32 %v1498_v58, %v1494_v13  ;;  %v1525_v37 = vmul.f32 %v1524_v25, %v6416_v60  ;;  %v1526_v49 = vmul.f32 %v1524_v25, %v6419_v12  ;;  %v1529_v23 = vmul.f32 %v1528_v14, %v6422_v22 }
 0x164   : > { %v1530_v24 = vmul.f32 %v1528_v14, %v6425_v7  ;;  %v1505_v26 = vadd.f32 %v1503_v1, %v1499_v31  ;;  %v1534_v33 = vstv %s6668_s6  ;;  %v1540_v42 = vstv %s6670_s25  ;;  %s6754_s6 = sld [smem:[#allocation2 + $0xf1]]  ;;  %s6762_s25 = sld [smem:[#allocation2 + $0xf2]] }
 0x165   : > { %v1506_v17 = vadd.f32 %v1504_v5, %v1500_v15  ;;  %v1531_v30 = vadd.f32 %v1529_v23, %v1525_v37  ;;  %v1535_v41 = vmul.f32 %v1534_v33, %v6428_v59  ;;  %v1536_v18 = vmul.f32 %v1534_v33, %v6433_v10 }
 0x166   : > { %v1532_v40 = vadd.f32 %v1530_v24, %v1526_v49  ;;  %v1511_v29 = vadd.f32 %v1509_v8, %v1505_v26  ;;  %v1541_v39 = vmul.f32 %v1540_v42, %v6436_v2  ;;  %v1542_v52 = vmul.f32 %v1540_v42, %v6439_v3 }
 0x167   : > { %v1512_v51 = vadd.f32 %v1510_v19, %v1506_v17  ;;  %v1537_v20 = vadd.f32 %v1535_v41, %v1531_v30  ;;  %v1546_v56 = vstv %s6680_s8  ;;  %v1552_v58 = vstv %s6682_s29  ;;  %s6764_s8 = sld [smem:[#allocation2 + $0xf3]]  ;;  %s6774_s29 = sld [smem:[#allocation2 + $0xf4]] }
 0x168   : > { %v1538_v21 = vadd.f32 %v1536_v18, %v1532_v40  ;;  %v1517_v53 = vadd.f32 %v1515_v38, %v1511_v29  ;;  %v1547_v57 = vmul.f32 %v1546_v56, %v6442_v54  ;;  %v1548_v55 = vmul.f32 %v1546_v56, %v6447_v0 }
 0x169   : > { %v1518_v50 = vadd.f32 %v1516_v28, %v1512_v51  ;;  %v1543_v46 = vadd.f32 %v1541_v39, %v1537_v20  ;;  %v1553_v1 = vmul.f32 %v1552_v58, %v6450_v44  ;;  %v1554_v5 = vmul.f32 %v1552_v58, %v6455_v47 }
 0x16a   : > { %v1544_v11 = vadd.f32 %v1542_v52, %v1538_v21  ;;  %v6726_v8 = vadd.f32 %v1520_v6, %v1517_v53  ;;  %v1558_v9 = vstv %s6694_s4  ;;  %v1564_v13 = vstv %s6696_s27  ;;  %s6776_s4 = sld [smem:[#allocation2 + $0xf5]]  ;;  %s6788_s27 = sld [smem:[#allocation2 + $0xf6]] }
 0x16b   : > { %v6728_v19 = vadd.f32 %v1520_v6, %v1518_v50  ;;  %v1549_v16 = vadd.f32 %v1547_v57, %v1543_v46  ;;  %v1559_v14 = vmul.f32 %v1558_v9, %v6457_v48  ;;  %v1560_v31 = vmul.f32 %v1558_v9, %v6459_v45 }
 0x16c   : > { %v1550_v25 = vadd.f32 %v1548_v55, %v1544_v11  ;;  %v1565_v15 = vmul.f32 %v1564_v13, %v6484_v27  ;;  %v1566_v6 = vmul.f32 %v1564_v13, %v6486_v36  ;;  %v1570_v38 = vstv %s6704_s3  ;;  %s6790_s3 = sld [smem:[#allocation2 + $0xf7]] }
 0x16d   : > { %v1574_v28 = vstv %s6706_s22  ;;  %v1555_v37 = vadd.f32 %v1553_v1, %v1549_v16  ;;  %v1578_v26 = vstv %s6710_s24  ;;  %v1584_v17 = vstv %s6712_s7  ;;  %s6800_s22 = sld [smem:[#allocation2 + $0xff]]  ;;  %s6810_s24 = sld [smem:[#allocation2 + $0x100]] }
 0x16e   : > { %v1556_v49 = vadd.f32 %v1554_v5, %v1550_v25  ;;  %v1575_v23 = vmul.f32 %v1574_v28, %v6416_v60  ;;  %v1576_v24 = vmul.f32 %v1574_v28, %v6419_v12  ;;  %v1590_v33 = vstv %s6716_s18  ;;  %s6814_s7 = sld [smem:[#allocation2 + $0x101]]  ;;  %s6816_s18 = sld [smem:[#allocation2 + $0x102]] }
 0x16f   : > { %v1596_v42 = vstv %s6718_s15  ;;  %v1561_v30 = vadd.f32 %v1559_v14, %v1555_v37  ;;  %v1579_v41 = vmul.f32 %v1578_v26, %v6422_v22  ;;  %v1580_v18 = vmul.f32 %v1578_v26, %v6425_v7  ;;  %s6820_s15 = sld [smem:[#allocation2 + $0x103]] }
 0x170   : > { %v1562_v40 = vadd.f32 %v1560_v31, %v1556_v49  ;;  %v1585_v29 = vmul.f32 %v1584_v17, %v6428_v59  ;;  %v1586_v51 = vmul.f32 %v1584_v17, %v6433_v10  ;;  %v1591_v39 = vmul.f32 %v1590_v33, %v6436_v2 }
 0x171   : > { %v1592_v52 = vmul.f32 %v1590_v33, %v6439_v3  ;;  %v1567_v20 = vadd.f32 %v1565_v15, %v1561_v30  ;;  %v1581_v56 = vadd.f32 %v1579_v41, %v1575_v23  ;;  %v1582_v58 = vadd.f32 %v1580_v18, %v1576_v24 }
 0x172   : > { %v1568_v21 = vadd.f32 %v1566_v6, %v1562_v40  ;;  %v1597_v53 = vmul.f32 %v1596_v42, %v6442_v54  ;;  %v1598_v50 = vmul.f32 %v1596_v42, %v6447_v0  ;;  %v1602_v57 = vstv %s6732_s16  ;;  %s6822_s16 = sld [smem:[#allocation2 + $0x104]] }
 0x173   : > { %v1608_v55 = vstv %s6734_s5  ;;  %v6770_v46 = vadd.f32 %v1570_v38, %v1567_v20  ;;  %v1587_v1 = vadd.f32 %v1585_v29, %v1581_v56  ;;  %v1588_v5 = vadd.f32 %v1586_v51, %v1582_v58  ;;  %s6842_s5 = sld [smem:[#allocation2 + $0x105]] }
 0x174   : > { %v6772_v11 = vadd.f32 %v1570_v38, %v1568_v21  ;;  %v1603_v9 = vmul.f32 %v1602_v57, %v6450_v44  ;;  %v1604_v13 = vmul.f32 %v1602_v57, %v6455_v47  ;;  %v1609_v16 = vmul.f32 %v1608_v55, %v6457_v48 }
 0x175   : > { %v1610_v25 = vmul.f32 %v1608_v55, %v6459_v45  ;;  %v1593_v14 = vadd.f32 %v1591_v39, %v1587_v1  ;;  %v1594_v31 = vadd.f32 %v1592_v52, %v1588_v5  ;;  %v1614_v15 = vstv %s6744_s19  ;;  %s6856_s19 = sld [smem:[#allocation2 + $0x106]] }
 0x176   : > { %v1620_v6 = vstv %s6746_s17  ;;  %v1615_v38 = vmul.f32 %v1614_v15, %v6484_v27  ;;  %v1616_v28 = vmul.f32 %v1614_v15, %v6486_v36  ;;  %v1624_v37 = vstv %s6752_s23  ;;  %s6864_s17 = sld [smem:[#allocation2 + $0x107]]  ;;  %s6874_s23 = sld [smem:[#allocation2 + $0x140]] }
 0x177   : > { %v1628_v49 = vstv %s6754_s6  ;;  %v1599_v23 = vadd.f32 %v1597_v53, %v1593_v14  ;;  %v1600_v24 = vadd.f32 %v1598_v50, %v1594_v31  ;;  %v1625_v26 = vmul.f32 %v1624_v37, %v6416_v60  ;;  %s6878_s6 = sld [smem:[#allocation2 + $0x108]] }
 0x178   : > { %v1626_v17 = vmul.f32 %v1624_v37, %v6419_v12  ;;  %v1629_v33 = vmul.f32 %v1628_v49, %v6422_v22  ;;  %v1630_v42 = vmul.f32 %v1628_v49, %v6425_v7  ;;  %v1634_v30 = vstv %s6762_s25  ;;  %s6880_s25 = sld [smem:[#allocation2 + $0x109]] }
 0x179   : > { %v1640_v40 = vstv %s6764_s8  ;;  %v1605_v41 = vadd.f32 %v1603_v9, %v1599_v23  ;;  %v1606_v18 = vadd.f32 %v1604_v13, %v1600_v24  ;;  %v1635_v29 = vmul.f32 %v1634_v30, %v6428_v59  ;;  %s6886_s8 = sld [smem:[#allocation2 + $0x10a]] }
 0x17a   : > { %v1636_v51 = vmul.f32 %v1634_v30, %v6433_v10  ;;  %v1631_v39 = vadd.f32 %v1629_v33, %v1625_v26  ;;  %v1632_v52 = vadd.f32 %v1630_v42, %v1626_v17  ;;  %v1641_v20 = vmul.f32 %v1640_v40, %v6436_v2 }
 0x17b   : > { %v1642_v21 = vmul.f32 %v1640_v40, %v6439_v3  ;;  %v1611_v56 = vadd.f32 %v1609_v16, %v1605_v41  ;;  %v1612_v58 = vadd.f32 %v1610_v25, %v1606_v18  ;;  %v1646_v53 = vstv %s6774_s29  ;;  %s6888_s29 = sld [smem:[#allocation2 + $0x10b]] }
 0x17c   : > { %v1652_v50 = vstv %s6776_s4  ;;  %v1637_v57 = vadd.f32 %v1635_v29, %v1631_v39  ;;  %v1638_v55 = vadd.f32 %v1636_v51, %v1632_v52  ;;  %v1647_v1 = vmul.f32 %v1646_v53, %v6442_v54  ;;  %s6904_s4 = sld [smem:[#allocation2 + $0x10c]] }
 0x17d   : > { %v1648_v5 = vmul.f32 %v1646_v53, %v6447_v0  ;;  %v1617_v9 = vadd.f32 %v1615_v38, %v1611_v56  ;;  %v1618_v13 = vadd.f32 %v1616_v28, %v1612_v58  ;;  %v1653_v14 = vmul.f32 %v1652_v50, %v6450_v44 }
 0x17e   : > { %v1654_v31 = vmul.f32 %v1652_v50, %v6455_v47  ;;  %v1643_v15 = vadd.f32 %v1641_v20, %v1637_v57  ;;  %v1644_v16 = vadd.f32 %v1642_v21, %v1638_v55  ;;  %v1658_v25 = vstv %s6788_s27  ;;  %s6906_s27 = sld [smem:[#allocation2 + $0x10d]] }
 0x17f   : > { %v1664_v37 = vstv %s6790_s3  ;;  %v1621_v49 = vadd.f32 %v1620_v6, %v1617_v9  ;;  %v1622_v23 = vadd.f32 %v1620_v6, %v1618_v13  ;;  %v1659_v38 = vmul.f32 %v1658_v25, %v6457_v48  ;;  %s6916_s3 = sld [smem:[#allocation2 + $0x10e]] }
 0x180   : > { %v1660_v28 = vmul.f32 %v1658_v25, %v6459_v45  ;;  %v1649_v24 = vadd.f32 %v1647_v1, %v1643_v15  ;;  %v1650_v26 = vadd.f32 %v1648_v5, %v1644_v16  ;;  %v1665_v17 = vmul.f32 %v1664_v37, %v6484_v27 }
 0x181   : > { %v1666_v33 = vmul.f32 %v1664_v37, %v6486_v36  ;;  %v1670_v42 = vstv %s6800_s22  ;;  %v6828_v30 = vmax.f32 %v6546_v32, 0.0  ;;  %v6831_v6 = vmax.f32 %v6548_v34, 0.0  ;;  %s6918_s22 = sld [smem:[#allocation2 + $0x10f]] }
 0x182   : > { %v6834_v40 = vmax.f32 %v6588_v4, 0.0  ;;  %v1655_v41 = vadd.f32 %v1653_v14, %v1649_v24  ;;  %v1656_v18 = vadd.f32 %v1654_v31, %v1650_v26  ;;  %v6837_v29 = vmax.f32 %v6590_v63, 0.0 }
 0x183   : > { %v6840_v51 = vmax.f32 %v6632_v43, 0.0  ;;  %v6845_v32 = vmax.f32 %v6634_v35, 0.0  ;;  %v6848_v34 = vmax.f32 %v6684_v61, 0.0  ;;  %v6851_v4 = vmax.f32 %v6686_v62, 0.0 }
 0x184   : > { %v6854_v39 = vmax.f32 %v6726_v8, 0.0  ;;  %v1661_v63 = vadd.f32 %v1659_v38, %v1655_v41  ;;  %v1662_v43 = vadd.f32 %v1660_v28, %v1656_v18  ;;  %v6859_v52 = vmax.f32 %v6728_v19, 0.0 }
 0x185   : > { %v6862_v35 = vmax.f32 %v6770_v46, 0.0  ;;  %v6867_v61 = vmax.f32 %v6772_v11, 0.0  ;;  %v6869_v62 = vmax.f32 %v1621_v49, 0.0  ;;  %v6871_v8 = vmax.f32 %v1622_v23, 0.0 }
 0x186   : > { %v1690_v20 = vstv %s6810_s24  ;;  %v1667_v21 = vadd.f32 %v1665_v17, %v1661_v63  ;;  %v1668_v19 = vadd.f32 %v1666_v33, %v1662_v43  ;;  %v1694_v58 = vstv %s6814_s7  ;;  %s6930_s24 = sld [smem:[#allocation2 + $0x141]]  ;;  %s6932_s7 = sld [smem:[#allocation2 + $0x110]] }
 0x187   : > { %v1691_v56 = vmul.f32 %v1690_v20, %v6828_v30  ;;  %v1692_v46 = vmul.f32 %v1690_v20, %v6831_v6  ;;  %v1700_v11 = vstv %s6816_s18  ;;  %v1706_v53 = vstv %s6820_s15  ;;  %s6936_s18 = sld [smem:[#allocation2 + $0x111]]  ;;  %s6938_s15 = sld [smem:[#allocation2 + $0x112]] }
 0x188   : > { %v1712_v50 = vstv %s6822_s16  ;;  %v1671_v57 = vadd.f32 %v1670_v42, %v1667_v21  ;;  %v1672_v55 = vadd.f32 %v1670_v42, %v1668_v19  ;;  %v1695_v1 = vmul.f32 %v1694_v58, %v6834_v40  ;;  %s6944_s16 = sld [smem:[#allocation2 + $0x113]] }
 0x189   : > { %v1696_v5 = vmul.f32 %v1694_v58, %v6837_v29  ;;  %v1701_v9 = vmul.f32 %v1700_v11, %v6840_v51  ;;  %v1702_v13 = vmul.f32 %v1700_v11, %v6845_v32  ;;  %v1707_v14 = vmul.f32 %v1706_v53, %v6848_v34 }
 0x18a   : > { %v1708_v31 = vmul.f32 %v1706_v53, %v6851_v4  ;;  %v6896_v15 = vmax.f32 %v1671_v57, 0.0  ;;  %v6898_v16 = vmax.f32 %v1672_v55, 0.0  ;;  %v1697_v25 = vadd.f32 %v1695_v1, %v1691_v56 }
 0x18b   : > { %v1698_v37 = vadd.f32 %v1696_v5, %v1692_v46  ;;  %v1713_v49 = vmul.f32 %v1712_v50, %v6854_v39  ;;  %v1714_v23 = vmul.f32 %v1712_v50, %v6859_v52  ;;  %v1718_v38 = vstv %s6842_s5  ;;  %s6946_s5 = sld [smem:[#allocation2 + $0x114]] }
 0x18c   : > { %v1724_v28 = vstv %s6856_s19  ;;  %v1703_v24 = vadd.f32 %v1701_v9, %v1697_v25  ;;  %v1719_v17 = vmul.f32 %v1718_v38, %v6862_v35  ;;  %v1720_v33 = vmul.f32 %v1718_v38, %v6867_v61  ;;  %s6954_s19 = sld [smem:[#allocation2 + $0x115]] }
 0x18d   : > { %v1704_v26 = vadd.f32 %v1702_v13, %v1698_v37  ;;  %v1725_v42 = vmul.f32 %v1724_v28, %v6869_v62  ;;  %v1726_v41 = vmul.f32 %v1724_v28, %v6871_v8  ;;  %v1730_v18 = vstv %s6864_s17  ;;  %s6956_s17 = sld [smem:[#allocation2 + $0x116]] }
 0x18e   : > { %v1736_v63 = vstv %s6874_s23  ;;  %v1709_v43 = vadd.f32 %v1707_v14, %v1703_v24  ;;  %v1731_v21 = vmul.f32 %v1730_v18, %v6896_v15  ;;  %v1732_v19 = vmul.f32 %v1730_v18, %v6898_v16  ;;  %s6964_s23 = sld [smem:[#allocation2 + $0x117]] }
 0x18f   : > { %v1710_v20 = vadd.f32 %v1708_v31, %v1704_v26  ;;  %v1740_v56 = vstv %s6878_s6  ;;  %v1744_v46 = vstv %s6880_s25  ;;  %v1750_v58 = vstv %s6886_s8  ;;  %s6966_s6 = sld [smem:[#allocation2 + $0x142]]  ;;  %s6976_s25 = sld [smem:[#allocation2 + $0x118]] }
 0x190   : > { %v1756_v11 = vstv %s6888_s29  ;;  %v1715_v53 = vadd.f32 %v1713_v49, %v1709_v43  ;;  %v1741_v57 = vmul.f32 %v1740_v56, %v6828_v30  ;;  %v1742_v55 = vmul.f32 %v1740_v56, %v6831_v6  ;;  %s6978_s8 = sld [smem:[#allocation2 + $0x119]]  ;;  %s6984_s29 = sld [smem:[#allocation2 + $0x11a]] }
 0x191   : > { %v1716_v50 = vadd.f32 %v1714_v23, %v1710_v20  ;;  %v1745_v1 = vmul.f32 %v1744_v46, %v6834_v40  ;;  %v1746_v5 = vmul.f32 %v1744_v46, %v6837_v29  ;;  %v1751_v9 = vmul.f32 %v1750_v58, %v6840_v51 }
 0x192   : > { %v1752_v13 = vmul.f32 %v1750_v58, %v6845_v32  ;;  %v1721_v14 = vadd.f32 %v1719_v17, %v1715_v53  ;;  %v1757_v25 = vmul.f32 %v1756_v11, %v6848_v34  ;;  %v1758_v37 = vmul.f32 %v1756_v11, %v6851_v4 }
 0x193   : > { %v1722_v31 = vadd.f32 %v1720_v33, %v1716_v50  ;;  %v1747_v49 = vadd.f32 %v1745_v1, %v1741_v57  ;;  %v1748_v23 = vadd.f32 %v1746_v5, %v1742_v55  ;;  %v1762_v38 = vstv %s6904_s4  ;;  %s6986_s4 = sld [smem:[#allocation2 + $0x11b]] }
 0x194   : > { %v1768_v28 = vstv %s6906_s27  ;;  %v1727_v24 = vadd.f32 %v1725_v42, %v1721_v14  ;;  %v1763_v18 = vmul.f32 %v1762_v38, %v6854_v39  ;;  %v1764_v17 = vmul.f32 %v1762_v38, %v6859_v52  ;;  %s6996_s27 = sld [smem:[#allocation2 + $0x11c]] }
 0x195   : > { %v1728_v26 = vadd.f32 %v1726_v41, %v1722_v31  ;;  %v1753_v33 = vadd.f32 %v1751_v9, %v1747_v49  ;;  %v1754_v43 = vadd.f32 %v1752_v13, %v1748_v23  ;;  %v1769_v20 = vmul.f32 %v1768_v28, %v6862_v35 }
 0x196   : > { %v1770_v56 = vmul.f32 %v1768_v28, %v6867_v61  ;;  %v1733_v46 = vadd.f32 %v1731_v21, %v1727_v24  ;;  %v1774_v11 = vstv %s6916_s3  ;;  %v1780_v42 = vstv %s6918_s22  ;;  %s6998_s3 = sld [smem:[#allocation2 + $0x11d]]  ;;  %s7010_s22 = sld [smem:[#allocation2 + $0x11e]] }
 0x197   : > { %v1734_v58 = vadd.f32 %v1732_v19, %v1728_v26  ;;  %v1759_v41 = vadd.f32 %v1757_v25, %v1753_v33  ;;  %v1760_v53 = vadd.f32 %v1758_v37, %v1754_v43  ;;  %v1775_v50 = vmul.f32 %v1774_v11, %v6869_v62 }
 0x198   : > { %v1776_v57 = vmul.f32 %v1774_v11, %v6871_v8  ;;  %v6958_v55 = vadd.f32 %v1736_v63, %v1733_v46  ;;  %v1781_v19 = vmul.f32 %v1780_v42, %v6896_v15  ;;  %v1782_v1 = vmul.f32 %v1780_v42, %v6898_v16 }
 0x199   : > { %v6960_v21 = vadd.f32 %v1736_v63, %v1734_v58  ;;  %v1765_v5 = vadd.f32 %v1763_v18, %v1759_v41  ;;  %v1766_v9 = vadd.f32 %v1764_v17, %v1760_v53  ;;  %v1786_v13 = vstv %s6930_s24  ;;  %s7012_s24 = sld [smem:[#allocation2 + $0x11f]] }
 0x19a   : > { %v1790_v14 = vstv %s6932_s7  ;;  %v1794_v63 = vstv %s6936_s18  ;;  %v1800_v37 = vstv %s6938_s15  ;;  %v1806_v18 = vstv %s6944_s16  ;;  %s7020_s7 = sld [smem:[#allocation2 + $0x143]]  ;;  %s7022_s18 = sld [smem:[#allocation2 + $0x120]] }
 0x19b   : > { %v1791_v31 = vmul.f32 %v1790_v14, %v6828_v30  ;;  %v1792_v25 = vmul.f32 %v1790_v14, %v6831_v6  ;;  %v1771_v49 = vadd.f32 %v1769_v20, %v1765_v5  ;;  %v1772_v23 = vadd.f32 %v1770_v56, %v1766_v9  ;;  %s7028_s15 = sld [smem:[#allocation2 + $0x121]]  ;;  %s7030_s16 = sld [smem:[#allocation2 + $0x122]] }
 0x19c   : > { %v1795_v38 = vmul.f32 %v1794_v63, %v6834_v40  ;;  %v1796_v28 = vmul.f32 %v1794_v63, %v6837_v29  ;;  %v1801_v24 = vmul.f32 %v1800_v37, %v6840_v51  ;;  %v1802_v26 = vmul.f32 %v1800_v37, %v6845_v32 }
 0x19d   : > { %v1812_v17 = vstv %s6946_s5  ;;  %v1777_v33 = vadd.f32 %v1775_v50, %v1771_v49  ;;  %v1778_v43 = vadd.f32 %v1776_v57, %v1772_v23  ;;  %v1807_v46 = vmul.f32 %v1806_v18, %v6848_v34  ;;  %s7034_s5 = sld [smem:[#allocation2 + $0x123]] }
 0x19e   : > { %v1797_v20 = vadd.f32 %v1795_v38, %v1791_v31  ;;  %v1798_v56 = vadd.f32 %v1796_v28, %v1792_v25  ;;  %v1808_v58 = vmul.f32 %v1806_v18, %v6851_v4  ;;  %v1813_v11 = vmul.f32 %v1812_v17, %v6854_v39 }
 0x19f   : > { %v1814_v42 = vmul.f32 %v1812_v17, %v6859_v52  ;;  %v1783_v41 = vadd.f32 %v1781_v19, %v1777_v33  ;;  %v1784_v53 = vadd.f32 %v1782_v1, %v1778_v43  ;;  %v1818_v14 = vstv %s6954_s19  ;;  %s7036_s19 = sld [smem:[#allocation2 + $0x124]] }
 0x1a0   : > { %v1803_v5 = vadd.f32 %v1801_v24, %v1797_v20  ;;  %v1804_v9 = vadd.f32 %v1802_v26, %v1798_v56  ;;  %v1824_v63 = vstv %s6956_s17  ;;  %v1830_v37 = vstv %s6964_s23  ;;  %s7050_s17 = sld [smem:[#allocation2 + $0x125]]  ;;  %s7052_s23 = sld [smem:[#allocation2 + $0x126]] }
 0x1a1   : > { %v1836_v36 = vstv %s6966_s6  ;;  %v7000_v50 = vadd.f32 %v1786_v13, %v1783_v41  ;;  %v7002_v57 = vadd.f32 %v1786_v13, %v1784_v53  ;;  %v1819_v31 = vmul.f32 %v1818_v14, %v6862_v35  ;;  %s7062_s6 = sld [smem:[#allocation2 + $0x128]] }
 0x1a2   : > { %v1809_v19 = vadd.f32 %v1807_v46, %v1803_v5  ;;  %v1810_v1 = vadd.f32 %v1808_v58, %v1804_v9  ;;  %v1820_v25 = vmul.f32 %v1818_v14, %v6867_v61  ;;  %v1825_v49 = vmul.f32 %v1824_v63, %v6869_v62 }
 0x1a3   : > { %v1826_v23 = vmul.f32 %v1824_v63, %v6871_v8  ;;  %v1831_v24 = vmul.f32 %v1830_v37, %v6896_v15  ;;  %v1832_v26 = vmul.f32 %v1830_v37, %v6898_v16  ;;  %v1840_v13 = vstv %s6976_s25  ;;  %s7064_s25 = sld [smem:[#allocation2 + $0x129]] }
 0x1a4   : > { %v1815_v38 = vadd.f32 %v1813_v11, %v1809_v19  ;;  %v1816_v28 = vadd.f32 %v1814_v42, %v1810_v1  ;;  %v1844_v18 = vstv %s6978_s8  ;;  %v1850_v17 = vstv %s6984_s29  ;;  %s7070_s8 = sld [smem:[#allocation2 + $0x127]]  ;;  %s7072_s29 = sld [smem:[#allocation2 + $0x144]] }
 0x1a5   : > { %v1856_v33 = vstv %s6986_s4  ;;  %v1841_v56 = vmul.f32 %v1840_v13, %v6828_v30  ;;  %v1842_v46 = vmul.f32 %v1840_v13, %v6831_v6  ;;  %v1845_v58 = vmul.f32 %v1844_v18, %v6834_v40  ;;  %s7080_s4 = sld [smem:[#allocation2 + $0x12a]] }
 0x1a6   : > { %v1821_v43 = vadd.f32 %v1819_v31, %v1815_v38  ;;  %v1822_v20 = vadd.f32 %v1820_v25, %v1816_v28  ;;  %v1846_v11 = vmul.f32 %v1844_v18, %v6837_v29  ;;  %v1851_v42 = vmul.f32 %v1850_v17, %v6840_v51 }
 0x1a7   : > { %v1852_v41 = vmul.f32 %v1850_v17, %v6845_v32  ;;  %v1857_v9 = vmul.f32 %v1856_v33, %v6848_v34  ;;  %v1858_v14 = vmul.f32 %v1856_v33, %v6851_v4  ;;  %v1847_v63 = vadd.f32 %v1845_v58, %v1841_v56 }
 0x1a8   : > { %v1827_v53 = vadd.f32 %v1825_v49, %v1821_v43  ;;  %v1828_v5 = vadd.f32 %v1826_v23, %v1822_v20  ;;  %v1848_v37 = vadd.f32 %v1846_v11, %v1842_v46  ;;  %v1862_v19 = vstv %s6996_s27  ;;  %s7082_s27 = sld [smem:[#allocation2 + $0x12b]] }
 0x1a9   : > { %v1868_v1 = vstv %s6998_s3  ;;  %v1863_v38 = vmul.f32 %v1862_v19, %v6854_v39  ;;  %v1864_v49 = vmul.f32 %v1862_v19, %v6859_v52  ;;  %v1853_v23 = vadd.f32 %v1851_v42, %v1847_v63  ;;  %s7092_s3 = sld [smem:[#allocation2 + $0x12c]] }
 0x1aa   : > { %v1833_v31 = vadd.f32 %v1831_v24, %v1827_v53  ;;  %v1834_v25 = vadd.f32 %v1832_v26, %v1828_v5  ;;  %v1854_v28 = vadd.f32 %v1852_v41, %v1848_v37  ;;  %v1869_v13 = vmul.f32 %v1868_v1, %v6862_v35 }
 0x1ab   : > { %v1870_v18 = vmul.f32 %v1868_v1, %v6867_v61  ;;  %v1874_v43 = vstv %s7010_s22  ;;  %v1880_v20 = vstv %s7012_s24  ;;  %v1859_v24 = vadd.f32 %v1857_v9, %v1853_v23  ;;  %s7094_s22 = sld [smem:[#allocation2 + $0x12d]]  ;;  %s7106_s24 = sld [smem:[#allocation2 + $0x12e]] }
 0x1ac   : > { %v7044_v17 = vadd.f32 %v1836_v36, %v1833_v31  ;;  %v7046_v33 = vadd.f32 %v1836_v36, %v1834_v25  ;;  %v1860_v26 = vadd.f32 %v1858_v14, %v1854_v28  ;;  %v1875_v56 = vmul.f32 %v1874_v43, %v6869_v62 }
 0x1ad   : > { %v1876_v46 = vmul.f32 %v1874_v43, %v6871_v8  ;;  %v1881_v58 = vmul.f32 %v1880_v20, %v6896_v15  ;;  %v1882_v36 = vmul.f32 %v1880_v20, %v6898_v16  ;;  %v1886_v11 = vstv %s7020_s7  ;;  %s7108_s7 = sld [smem:[#allocation2 + $0x12f]] }
 0x1ae   : > { %v1890_v42 = vstv %s7022_s18  ;;  %v1865_v41 = vadd.f32 %v1863_v38, %v1859_v24  ;;  %v1866_v53 = vadd.f32 %v1864_v49, %v1860_v26  ;;  %v1894_v9 = vstv %s7028_s15  ;;  %s7116_s18 = sld [smem:[#allocation2 + $0x145]]  ;;  %s7118_s15 = sld [smem:[#allocation2 + $0x130]] }
 0x1af   : > { %v1891_v5 = vmul.f32 %v1890_v42, %v6828_v30  ;;  %v1892_v63 = vmul.f32 %v1890_v42, %v6831_v6  ;;  %v1900_v14 = vstv %s7030_s16  ;;  %v1906_v37 = vstv %s7034_s5  ;;  %s7122_s16 = sld [smem:[#allocation2 + $0x131]]  ;;  %s7124_s5 = sld [smem:[#allocation2 + $0x132]] }
 0x1b0   : > { %v1912_v19 = vstv %s7036_s19  ;;  %v1871_v1 = vadd.f32 %v1869_v13, %v1865_v41  ;;  %v1872_v31 = vadd.f32 %v1870_v18, %v1866_v53  ;;  %v1895_v25 = vmul.f32 %v1894_v9, %v6834_v40  ;;  %s7128_s19 = sld [smem:[#allocation2 + $0x133]] }
 0x1b1   : > { %v1896_v38 = vmul.f32 %v1894_v9, %v6837_v29  ;;  %v1901_v49 = vmul.f32 %v1900_v14, %v6840_v51  ;;  %v1902_v23 = vmul.f32 %v1900_v14, %v6845_v32  ;;  %v1907_v28 = vmul.f32 %v1906_v37, %v6848_v34 }
 0x1b2   : > { %v1908_v43 = vmul.f32 %v1906_v37, %v6851_v4  ;;  %v1877_v20 = vadd.f32 %v1875_v56, %v1871_v1  ;;  %v1878_v24 = vadd.f32 %v1876_v46, %v1872_v31  ;;  %v1897_v26 = vadd.f32 %v1895_v25, %v1891_v5 }
 0x1b3   : > { %v1898_v42 = vadd.f32 %v1896_v38, %v1892_v63  ;;  %v1913_v13 = vmul.f32 %v1912_v19, %v6854_v39  ;;  %v1914_v18 = vmul.f32 %v1912_v19, %v6859_v52  ;;  %v1918_v41 = vstv %s7050_s17  ;;  %s7130_s17 = sld [smem:[#allocation2 + $0x134]] }
 0x1b4   : > { %v1924_v53 = vstv %s7052_s23  ;;  %v1883_v9 = vadd.f32 %v1881_v58, %v1877_v20  ;;  %v1884_v14 = vadd.f32 %v1882_v36, %v1878_v24  ;;  %v1903_v56 = vadd.f32 %v1901_v49, %v1897_v26  ;;  %s7144_s23 = sld [smem:[#allocation2 + $0x135]] }
 0x1b5   : > { %v1904_v46 = vadd.f32 %v1902_v23, %v1898_v42  ;;  %v1919_v5 = vmul.f32 %v1918_v41, %v6862_v35  ;;  %v1920_v63 = vmul.f32 %v1918_v41, %v6867_v61  ;;  %v1925_v37 = vmul.f32 %v1924_v53, %v6869_v62 }
 0x1b6   : > { %v1926_v1 = vmul.f32 %v1924_v53, %v6871_v8  ;;  %v7096_v19 = vadd.f32 %v1886_v11, %v1883_v9  ;;  %v7098_v58 = vadd.f32 %v1886_v11, %v1884_v14  ;;  %v1909_v36 = vadd.f32 %v1907_v28, %v1903_v56 }
 0x1b7   : > { %v1910_v31 = vadd.f32 %v1908_v43, %v1904_v46  ;;  %v1930_v25 = vstv %s7070_s8  ;;  %v1936_v38 = vstv %s7072_s29  ;;  %v1940_v49 = vstv %s7062_s6  ;;  %s7146_s6 = sld [smem:[#allocation2 + $0x136]]  ;;  %s7164_s29 = sld [smem:[#allocation2 + $0x138]] }
 0x1b8   : > { %v1944_v23 = vstv %s7064_s25  ;;  %v1915_v20 = vadd.f32 %v1913_v13, %v1909_v36  ;;  %v1931_v26 = vmul.f32 %v1930_v25, %v6896_v15  ;;  %v1932_v42 = vmul.f32 %v1930_v25, %v6898_v16  ;;  %s7156_s25 = sld [smem:[#allocation2 + $0x137]]  ;;  %s7158_s8 = sld [smem:[#allocation2 + $0x146]] }
 0x1b9   : > { %v1916_v24 = vadd.f32 %v1914_v18, %v1910_v31  ;;  %v1941_v11 = vmul.f32 %v1940_v49, %v6828_v30  ;;  %v1942_v28 = vmul.f32 %v1940_v49, %v6831_v6  ;;  %v1945_v43 = vmul.f32 %v1944_v23, %v6834_v40 }
 0x1ba   : > { %v1946_v41 = vmul.f32 %v1944_v23, %v6837_v29  ;;  %v1921_v53 = vadd.f32 %v1919_v5, %v1915_v20  ;;  %v1950_v13 = vstv %s7080_s4  ;;  %v1956_v18 = vstv %s7082_s27  ;;  %s7166_s4 = sld [smem:[#allocation2 + $0x139]]  ;;  %s7174_s27 = sld [smem:[#allocation2 + $0x13a]] }
 0x1bb   : > { %v1922_v9 = vadd.f32 %v1920_v63, %v1916_v24  ;;  %v1947_v14 = vadd.f32 %v1945_v43, %v1941_v11  ;;  %v1951_v46 = vmul.f32 %v1950_v13, %v6840_v51  ;;  %v1952_v36 = vmul.f32 %v1950_v13, %v6845_v32 }
 0x1bc   : > { %v1948_v56 = vadd.f32 %v1946_v41, %v1942_v28  ;;  %v1927_v5 = vadd.f32 %v1925_v37, %v1921_v53  ;;  %v1957_v31 = vmul.f32 %v1956_v18, %v6848_v34  ;;  %v1958_v25 = vmul.f32 %v1956_v18, %v6851_v4 }
 0x1bd   : > { %v1928_v63 = vadd.f32 %v1926_v1, %v1922_v9  ;;  %v1953_v49 = vadd.f32 %v1951_v46, %v1947_v14  ;;  %v1962_v20 = vstv %s7092_s3  ;;  %v1968_v24 = vstv %s7094_s22  ;;  %s7176_s3 = sld [smem:[#allocation2 + $0x13b]]  ;;  %s7186_s22 = sld [smem:[#allocation2 + $0x13c]] }
 0x1be   : > { %v1954_v23 = vadd.f32 %v1952_v36, %v1948_v56  ;;  %v1933_v11 = vadd.f32 %v1931_v26, %v1927_v5  ;;  %v1963_v43 = vmul.f32 %v1962_v20, %v6854_v39  ;;  %v1964_v37 = vmul.f32 %v1962_v20, %v6859_v52 }
 0x1bf   : > { %v1934_v28 = vadd.f32 %v1932_v42, %v1928_v63  ;;  %v1959_v1 = vadd.f32 %v1957_v31, %v1953_v49  ;;  %v1969_v53 = vmul.f32 %v1968_v24, %v6862_v35  ;;  %v1970_v9 = vmul.f32 %v1968_v24, %v6867_v61 }
 0x1c0   : > { %v1960_v41 = vadd.f32 %v1958_v25, %v1954_v23  ;;  %v7138_v13 = vadd.f32 %v1936_v38, %v1933_v11  ;;  %v1974_v14 = vstv %s7106_s24  ;;  %v1980_v56 = vstv %s7108_s7  ;;  %s7188_s24 = sld [smem:[#allocation2 + $0x13d]]  ;;  %s7200_s7 = sld [smem:[#allocation2 + $0x13e]] }
 0x1c1   : > { %v7140_v18 = vadd.f32 %v1936_v38, %v1934_v28  ;;  %v1965_v26 = vadd.f32 %v1963_v43, %v1959_v1  ;;  %v1975_v46 = vmul.f32 %v1974_v14, %v6869_v62  ;;  %v1976_v36 = vmul.f32 %v1974_v14, %v6871_v8 }
 0x1c2   : > { %v1966_v42 = vadd.f32 %v1964_v37, %v1960_v41  ;;  %v1981_v5 = vmul.f32 %v1980_v56, %v6896_v15  ;;  %v1982_v38 = vmul.f32 %v1980_v56, %v6898_v16  ;;  %v1986_v63 = vstv %s7116_s18  ;;  %s7202_s18 = sld [smem:[#allocation2 + $0x13f]] }
 0x1c3   : > { %v1990_v31 = vstv %s7118_s15  ;;  %v1971_v25 = vadd.f32 %v1969_v53, %v1965_v26  ;;  %v1994_v24 = vstv %s7122_s16  ;;  %v2000_v11 = vstv %s7124_s5  ;;  %s7212_s15 = sld [smem:[#allocation2 + $0x147]]  ;;  %s7222_s16 = sld [smem:[#allocation2 + $0x148]] }
 0x1c4   : > { %v1972_v49 = vadd.f32 %v1970_v9, %v1966_v42  ;;  %v1991_v23 = vmul.f32 %v1990_v31, %v6828_v30  ;;  %v1992_v20 = vmul.f32 %v1990_v31, %v6831_v6  ;;  %v2006_v28 = vstv %s7128_s19  ;;  %s7226_s5 = sld [smem:[#allocation2 + $0x149]]  ;;  %s7228_s19 = sld [smem:[#allocation2 + $0x14a]] }
 0x1c5   : > { %v2012_v43 = vstv %s7130_s17  ;;  %v1977_v37 = vadd.f32 %v1975_v46, %v1971_v25  ;;  %v1995_v41 = vmul.f32 %v1994_v24, %v6834_v40  ;;  %v1996_v53 = vmul.f32 %v1994_v24, %v6837_v29  ;;  %s7232_s17 = sld [smem:[#allocation2 + $0x14b]] }
 0x1c6   : > { %v1978_v1 = vadd.f32 %v1976_v36, %v1972_v49  ;;  %v2001_v9 = vmul.f32 %v2000_v11, %v6840_v51  ;;  %v2002_v14 = vmul.f32 %v2000_v11, %v6845_v32  ;;  %v2007_v56 = vmul.f32 %v2006_v28, %v6848_v34 }
 0x1c7   : > { %v2008_v26 = vmul.f32 %v2006_v28, %v6851_v4  ;;  %v1983_v42 = vadd.f32 %v1981_v5, %v1977_v37  ;;  %v1997_v36 = vadd.f32 %v1995_v41, %v1991_v23  ;;  %v1998_v31 = vadd.f32 %v1996_v53, %v1992_v20 }
 0x1c8   : > { %v1984_v46 = vadd.f32 %v1982_v38, %v1978_v1  ;;  %v2013_v25 = vmul.f32 %v2012_v43, %v6854_v39  ;;  %v2014_v49 = vmul.f32 %v2012_v43, %v6859_v52  ;;  %v2018_v24 = vstv %s7144_s23  ;;  %s7234_s23 = sld [smem:[#allocation2 + $0x14c]] }
 0x1c9   : > { %v2024_v11 = vstv %s7146_s6  ;;  %v7182_v27 = vadd.f32 %v1986_v63, %v1983_v42  ;;  %v2003_v45 = vadd.f32 %v2001_v9, %v1997_v36  ;;  %v2004_v48 = vadd.f32 %v2002_v14, %v1998_v31  ;;  %s7254_s6 = sld [smem:[#allocation2 + $0x14d]] }
 0x1ca   : > { %v7184_v28 = vadd.f32 %v1986_v63, %v1984_v46  ;;  %v2019_v5 = vmul.f32 %v2018_v24, %v6862_v35  ;;  %v2020_v38 = vmul.f32 %v2018_v24, %v6867_v61  ;;  %v2025_v23 = vmul.f32 %v2024_v11, %v6869_v62 }
 0x1cb   : > { %v2026_v20 = vmul.f32 %v2024_v11, %v6871_v8  ;;  %v2009_v43 = vadd.f32 %v2007_v56, %v2003_v45  ;;  %v2010_v37 = vadd.f32 %v2008_v26, %v2004_v48  ;;  %v2030_v63 = vstv %s7156_s25  ;;  %s7268_s25 = sld [smem:[#allocation2 + $0x14e]] }
 0x1cc   : > { %v2036_v1 = vstv %s7158_s8  ;;  %v2031_v41 = vmul.f32 %v2030_v63, %v6896_v15  ;;  %v2032_v53 = vmul.f32 %v2030_v63, %v6898_v16  ;;  %v2040_v9 = vstv %s7164_s29  ;;  %s7276_s8 = sld [smem:[#allocation2 + $0x14f]]  ;;  %s7286_s29 = sld [smem:[#allocation2 + $0x188]] }
 0x1cd   : > { %v2044_v14 = vstv %s7166_s4  ;;  %v2015_v42 = vadd.f32 %v2013_v25, %v2009_v43  ;;  %v2016_v46 = vadd.f32 %v2014_v49, %v2010_v37  ;;  %v2041_v36 = vmul.f32 %v2040_v9, %v6828_v30  ;;  %s7290_s4 = sld [smem:[#allocation2 + $0x150]] }
 0x1ce   : > { %v2042_v45 = vmul.f32 %v2040_v9, %v6831_v6  ;;  %v2045_v48 = vmul.f32 %v2044_v14, %v6834_v40  ;;  %v2046_v56 = vmul.f32 %v2044_v14, %v6837_v29  ;;  %v2050_v26 = vstv %s7174_s27  ;;  %s7292_s27 = sld [smem:[#allocation2 + $0x151]] }
 0x1cf   : > { %v2056_v31 = vstv %s7176_s3  ;;  %v2021_v24 = vadd.f32 %v2019_v5, %v2015_v42  ;;  %v2022_v11 = vadd.f32 %v2020_v38, %v2016_v46  ;;  %v2051_v63 = vmul.f32 %v2050_v26, %v6840_v51  ;;  %s7298_s3 = sld [smem:[#allocation2 + $0x152]] }
 0x1d0   : > { %v2052_v47 = vmul.f32 %v2050_v26, %v6845_v32  ;;  %v2047_v25 = vadd.f32 %v2045_v48, %v2041_v36  ;;  %v2048_v30 = vadd.f32 %v2046_v56, %v2042_v45  ;;  %v2057_v6 = vmul.f32 %v2056_v31, %v6848_v34 }
 0x1d1   : > { %v2058_v49 = vmul.f32 %v2056_v31, %v6851_v4  ;;  %v2027_v40 = vadd.f32 %v2025_v23, %v2021_v24  ;;  %v2028_v29 = vadd.f32 %v2026_v20, %v2022_v11  ;;  %v2062_v43 = vstv %s7186_s22  ;;  %s7300_s22 = sld [smem:[#allocation2 + $0x153]] }
 0x1d2   : > { %v2068_v37 = vstv %s7188_s24  ;;  %v2053_v5 = vadd.f32 %v2051_v63, %v2047_v25  ;;  %v2054_v38 = vadd.f32 %v2052_v47, %v2048_v30  ;;  %v2063_v51 = vmul.f32 %v2062_v43, %v6854_v39  ;;  %s7316_s24 = sld [smem:[#allocation2 + $0x154]] }
 0x1d3   : > { %v2064_v32 = vmul.f32 %v2062_v43, %v6859_v52  ;;  %v2033_v9 = vadd.f32 %v2031_v41, %v2027_v40  ;;  %v2034_v14 = vadd.f32 %v2032_v53, %v2028_v29  ;;  %v2069_v42 = vmul.f32 %v2068_v37, %v6862_v35 }
 0x1d4   : > { %v2070_v34 = vmul.f32 %v2068_v37, %v6867_v61  ;;  %v2059_v4 = vadd.f32 %v2057_v6, %v2053_v5  ;;  %v2060_v23 = vadd.f32 %v2058_v49, %v2054_v38  ;;  %v2074_v20 = vstv %s7200_s7  ;;  %s7318_s7 = sld [smem:[#allocation2 + $0x155]] }
 0x1d5   : > { %v2080_v46 = vstv %s7202_s18  ;;  %v2037_v47 = vadd.f32 %v2036_v1, %v2033_v9  ;;  %v2038_v39 = vadd.f32 %v2036_v1, %v2034_v14  ;;  %v2075_v52 = vmul.f32 %v2074_v20, %v6869_v62  ;;  %s7328_s18 = sld [smem:[#allocation2 + $0x156]] }
 0x1d6   : > { %v2076_v41 = vmul.f32 %v2074_v20, %v6871_v8  ;;  %v2065_v35 = vadd.f32 %v2063_v51, %v2059_v4  ;;  %v2066_v61 = vadd.f32 %v2064_v32, %v2060_v23  ;;  %v2081_v53 = vmul.f32 %v2080_v46, %v6896_v15 }
 0x1d7   : > { %v2082_v36 = vmul.f32 %v2080_v46, %v6898_v16  ;;  %v2086_v45 = vstv %s7212_s15  ;;  %v7240_v48 = vmax.f32 %v6958_v55, 0.0  ;;  %v7243_v1 = vmax.f32 %v6960_v21, 0.0  ;;  %s7330_s15 = sld [smem:[#allocation2 + $0x157]] }
 0x1d8   : > { %v7246_v62 = vmax.f32 %v7000_v50, 0.0  ;;  %v2071_v8 = vadd.f32 %v2069_v42, %v2065_v35  ;;  %v2072_v56 = vadd.f32 %v2070_v34, %v2066_v61  ;;  %v7249_v26 = vmax.f32 %v7002_v57, 0.0 }
 0x1d9   : > { %v7252_v15 = vmax.f32 %v7044_v17, 0.0  ;;  %v7257_v16 = vmax.f32 %v7046_v33, 0.0  ;;  %v7260_v55 = vmax.f32 %v7096_v19, 0.0  ;;  %v7263_v21 = vmax.f32 %v7098_v58, 0.0 }
 0x1da   : > { %v7266_v50 = vmax.f32 %v7138_v13, 0.0  ;;  %v2077_v57 = vadd.f32 %v2075_v52, %v2071_v8  ;;  %v2078_v17 = vadd.f32 %v2076_v41, %v2072_v56  ;;  %v7271_v31 = vmax.f32 %v7140_v18, 0.0 }
 0x1db   : > { %v7274_v33 = vmax.f32 %v7182_v27, 0.0  ;;  %v7279_v19 = vmax.f32 %v7184_v28, 0.0  ;;  %v7281_v58 = vmax.f32 %v2037_v47, 0.0  ;;  %v7283_v13 = vmax.f32 %v2038_v39, 0.0 }
 0x1dc   : > { %v2106_v24 = vstv %s7222_s16  ;;  %v2083_v11 = vadd.f32 %v2081_v53, %v2077_v57  ;;  %v2084_v18 = vadd.f32 %v2082_v36, %v2078_v17  ;;  %v2110_v25 = vstv %s7226_s5  ;;  %s7342_s16 = sld [smem:[#allocation2 + $0x189]]  ;;  %s7344_s5 = sld [smem:[#allocation2 + $0x158]] }
 0x1dd   : > { %v2107_v63 = vmul.f32 %v2106_v24, %v7240_v48  ;;  %v2108_v27 = vmul.f32 %v2106_v24, %v7243_v1  ;;  %v2116_v28 = vstv %s7228_s19  ;;  %v2122_v30 = vstv %s7232_s17  ;;  %s7348_s19 = sld [smem:[#allocation2 + $0x159]]  ;;  %s7350_s17 = sld [smem:[#allocation2 + $0x15a]] }
 0x1de   : > { %v2128_v6 = vstv %s7234_s23  ;;  %v2087_v49 = vadd.f32 %v2086_v45, %v2083_v11  ;;  %v2088_v40 = vadd.f32 %v2086_v45, %v2084_v18  ;;  %v2111_v29 = vmul.f32 %v2110_v25, %v7246_v62  ;;  %s7356_s23 = sld [smem:[#allocation2 + $0x15b]] }
 0x1df   : > { %v2112_v43 = vmul.f32 %v2110_v25, %v7249_v26  ;;  %v2117_v37 = vmul.f32 %v2116_v28, %v7252_v15  ;;  %v2118_v5 = vmul.f32 %v2116_v28, %v7257_v16  ;;  %v2123_v38 = vmul.f32 %v2122_v30, %v7260_v55 }
 0x1e0   : > { %v2124_v51 = vmul.f32 %v2122_v30, %v7263_v21  ;;  %v7308_v32 = vmax.f32 %v2087_v49, 0.0  ;;  %v7310_v9 = vmax.f32 %v2088_v40, 0.0  ;;  %v2113_v14 = vadd.f32 %v2111_v29, %v2107_v63 }
 0x1e1   : > { %v2114_v42 = vadd.f32 %v2112_v43, %v2108_v27  ;;  %v2129_v34 = vmul.f32 %v2128_v6, %v7266_v50  ;;  %v2130_v4 = vmul.f32 %v2128_v6, %v7271_v31  ;;  %v2134_v23 = vstv %s7254_s6  ;;  %s7358_s6 = sld [smem:[#allocation2 + $0x15c]] }
 0x1e2   : > { %v2140_v20 = vstv %s7268_s25  ;;  %v2119_v46 = vadd.f32 %v2117_v37, %v2113_v14  ;;  %v2135_v39 = vmul.f32 %v2134_v23, %v7274_v33  ;;  %v2136_v52 = vmul.f32 %v2134_v23, %v7279_v19  ;;  %s7366_s25 = sld [smem:[#allocation2 + $0x15d]] }
 0x1e3   : > { %v2120_v47 = vadd.f32 %v2118_v5, %v2114_v42  ;;  %v2141_v41 = vmul.f32 %v2140_v20, %v7281_v58  ;;  %v2142_v35 = vmul.f32 %v2140_v20, %v7283_v13  ;;  %v2146_v61 = vstv %s7276_s8  ;;  %s7368_s8 = sld [smem:[#allocation2 + $0x15e]] }
 0x1e4   : > { %v2152_v53 = vstv %s7286_s29  ;;  %v2125_v36 = vadd.f32 %v2123_v38, %v2119_v46  ;;  %v2147_v8 = vmul.f32 %v2146_v61, %v7308_v32  ;;  %v2148_v56 = vmul.f32 %v2146_v61, %v7310_v9  ;;  %s7376_s29 = sld [smem:[#allocation2 + $0x15f]] }
 0x1e5   : > { %v2126_v45 = vadd.f32 %v2124_v51, %v2120_v47  ;;  %v2156_v57 = vstv %s7290_s4  ;;  %v2160_v17 = vstv %s7292_s27  ;;  %v2166_v24 = vstv %s7298_s3  ;;  %s7378_s4 = sld [smem:[#allocation2 + $0x18a]]  ;;  %s7388_s27 = sld [smem:[#allocation2 + $0x160]] }
 0x1e6   : > { %v2172_v11 = vstv %s7300_s22  ;;  %v2131_v18 = vadd.f32 %v2129_v34, %v2125_v36  ;;  %v2157_v27 = vmul.f32 %v2156_v57, %v7240_v48  ;;  %v2158_v25 = vmul.f32 %v2156_v57, %v7243_v1  ;;  %s7390_s3 = sld [smem:[#allocation2 + $0x161]]  ;;  %s7396_s22 = sld [smem:[#allocation2 + $0x162]] }
 0x1e7   : > { %v2132_v63 = vadd.f32 %v2130_v4, %v2126_v45  ;;  %v2161_v28 = vmul.f32 %v2160_v17, %v7246_v62  ;;  %v2162_v30 = vmul.f32 %v2160_v17, %v7249_v26  ;;  %v2167_v6 = vmul.f32 %v2166_v24, %v7252_v15 }
 0x1e8   : > { %v2168_v49 = vmul.f32 %v2166_v24, %v7257_v16  ;;  %v2137_v40 = vadd.f32 %v2135_v39, %v2131_v18  ;;  %v2173_v43 = vmul.f32 %v2172_v11, %v7260_v55  ;;  %v2174_v37 = vmul.f32 %v2172_v11, %v7263_v21 }
 0x1e9   : > { %v2138_v29 = vadd.f32 %v2136_v52, %v2132_v63  ;;  %v2163_v5 = vadd.f32 %v2161_v28, %v2157_v27  ;;  %v2164_v38 = vadd.f32 %v2162_v30, %v2158_v25  ;;  %v2178_v51 = vstv %s7316_s24  ;;  %s7398_s24 = sld [smem:[#allocation2 + $0x163]] }
 0x1ea   : > { %v2184_v14 = vstv %s7318_s7  ;;  %v2143_v42 = vadd.f32 %v2141_v41, %v2137_v40  ;;  %v2179_v4 = vmul.f32 %v2178_v51, %v7266_v50  ;;  %v2180_v23 = vmul.f32 %v2178_v51, %v7271_v31  ;;  %s7408_s7 = sld [smem:[#allocation2 + $0x164]] }
 0x1eb   : > { %v2144_v34 = vadd.f32 %v2142_v35, %v2138_v29  ;;  %v2169_v20 = vadd.f32 %v2167_v6, %v2163_v5  ;;  %v2170_v46 = vadd.f32 %v2168_v49, %v2164_v38  ;;  %v2185_v47 = vmul.f32 %v2184_v14, %v7274_v33 }
 0x1ec   : > { %v2186_v39 = vmul.f32 %v2184_v14, %v7279_v19  ;;  %v2149_v52 = vadd.f32 %v2147_v8, %v2143_v42  ;;  %v2190_v36 = vstv %s7328_s18  ;;  %v2196_v41 = vstv %s7330_s15  ;;  %s7410_s18 = sld [smem:[#allocation2 + $0x165]]  ;;  %s7422_s15 = sld [smem:[#allocation2 + $0x166]] }
 0x1ed   : > { %v2150_v61 = vadd.f32 %v2148_v56, %v2144_v34  ;;  %v2175_v35 = vadd.f32 %v2173_v43, %v2169_v20  ;;  %v2176_v45 = vadd.f32 %v2174_v37, %v2170_v46  ;;  %v2191_v57 = vmul.f32 %v2190_v36, %v7281_v58 }
 0x1ee   : > { %v2192_v17 = vmul.f32 %v2190_v36, %v7283_v13  ;;  %v7370_v24 = vadd.f32 %v2152_v53, %v2149_v52  ;;  %v2197_v56 = vmul.f32 %v2196_v41, %v7308_v32  ;;  %v2198_v11 = vmul.f32 %v2196_v41, %v7310_v9 }
 0x1ef   : > { %v7372_v8 = vadd.f32 %v2152_v53, %v2150_v61  ;;  %v2181_v18 = vadd.f32 %v2179_v4, %v2175_v35  ;;  %v2182_v63 = vadd.f32 %v2180_v23, %v2176_v45  ;;  %v2202_v27 = vstv %s7342_s16  ;;  %s7424_s16 = sld [smem:[#allocation2 + $0x167]] }
 0x1f0   : > { %v2206_v25 = vstv %s7344_s5  ;;  %v2210_v53 = vstv %s7348_s19  ;;  %v2216_v6 = vstv %s7350_s17  ;;  %v2222_v38 = vstv %s7356_s23  ;;  %s7432_s5 = sld [smem:[#allocation2 + $0x18b]]  ;;  %s7434_s19 = sld [smem:[#allocation2 + $0x168]] }
 0x1f1   : > { %v2207_v28 = vmul.f32 %v2206_v25, %v7240_v48  ;;  %v2208_v30 = vmul.f32 %v2206_v25, %v7243_v1  ;;  %v2187_v49 = vadd.f32 %v2185_v47, %v2181_v18  ;;  %v2188_v40 = vadd.f32 %v2186_v39, %v2182_v63  ;;  %s7440_s17 = sld [smem:[#allocation2 + $0x169]]  ;;  %s7442_s23 = sld [smem:[#allocation2 + $0x16a]] }
 0x1f2   : > { %v2211_v29 = vmul.f32 %v2210_v53, %v7246_v62  ;;  %v2212_v43 = vmul.f32 %v2210_v53, %v7249_v26  ;;  %v2217_v37 = vmul.f32 %v2216_v6, %v7252_v15  ;;  %v2218_v5 = vmul.f32 %v2216_v6, %v7257_v16 }
 0x1f3   : > { %v2228_v51 = vstv %s7358_s6  ;;  %v2193_v14 = vadd.f32 %v2191_v57, %v2187_v49  ;;  %v2194_v42 = vadd.f32 %v2192_v17, %v2188_v40  ;;  %v2223_v23 = vmul.f32 %v2222_v38, %v7260_v55  ;;  %s7446_s6 = sld [smem:[#allocation2 + $0x16b]] }
 0x1f4   : > { %v2213_v34 = vadd.f32 %v2211_v29, %v2207_v28  ;;  %v2214_v4 = vadd.f32 %v2212_v43, %v2208_v30  ;;  %v2224_v20 = vmul.f32 %v2222_v38, %v7263_v21  ;;  %v2229_v46 = vmul.f32 %v2228_v51, %v7266_v50 }
 0x1f5   : > { %v2230_v47 = vmul.f32 %v2228_v51, %v7271_v31  ;;  %v2199_v39 = vadd.f32 %v2197_v56, %v2193_v14  ;;  %v2200_v52 = vadd.f32 %v2198_v11, %v2194_v42  ;;  %v2234_v41 = vstv %s7366_s25  ;;  %s7448_s25 = sld [smem:[#allocation2 + $0x16c]] }
 0x1f6   : > { %v2219_v61 = vadd.f32 %v2217_v37, %v2213_v34  ;;  %v2220_v36 = vadd.f32 %v2218_v5, %v2214_v4  ;;  %v2240_v35 = vstv %s7368_s8  ;;  %v2246_v45 = vstv %s7376_s29  ;;  %s7462_s8 = sld [smem:[#allocation2 + $0x16d]]  ;;  %s7464_s29 = sld [smem:[#allocation2 + $0x16e]] }
 0x1f7   : > { %v2252_v18 = vstv %s7378_s4  ;;  %v7412_v57 = vadd.f32 %v2202_v27, %v2199_v39  ;;  %v7414_v17 = vadd.f32 %v2202_v27, %v2200_v52  ;;  %v2235_v63 = vmul.f32 %v2234_v41, %v7274_v33  ;;  %s7474_s4 = sld [smem:[#allocation2 + $0x170]] }
 0x1f8   : > { %v2225_v56 = vadd.f32 %v2223_v23, %v2219_v61  ;;  %v2226_v11 = vadd.f32 %v2224_v20, %v2220_v36  ;;  %v2236_v25 = vmul.f32 %v2234_v41, %v7279_v19  ;;  %v2241_v28 = vmul.f32 %v2240_v35, %v7281_v58 }
 0x1f9   : > { %v2242_v30 = vmul.f32 %v2240_v35, %v7283_v13  ;;  %v2247_v49 = vmul.f32 %v2246_v45, %v7308_v32  ;;  %v2248_v40 = vmul.f32 %v2246_v45, %v7310_v9  ;;  %v2256_v27 = vstv %s7388_s27  ;;  %s7476_s27 = sld [smem:[#allocation2 + $0x171]] }
 0x1fa   : > { %v2231_v53 = vadd.f32 %v2229_v46, %v2225_v56  ;;  %v2232_v6 = vadd.f32 %v2230_v47, %v2226_v11  ;;  %v2260_v29 = vstv %s7390_s3  ;;  %v2266_v43 = vstv %s7396_s22  ;;  %s7482_s3 = sld [smem:[#allocation2 + $0x16f]]  ;;  %s7484_s22 = sld [smem:[#allocation2 + $0x18c]] }
 0x1fb   : > { %v2272_v37 = vstv %s7398_s24  ;;  %v2257_v51 = vmul.f32 %v2256_v27, %v7240_v48  ;;  %v2258_v14 = vmul.f32 %v2256_v27, %v7243_v1  ;;  %v2261_v42 = vmul.f32 %v2260_v29, %v7246_v62  ;;  %s7492_s24 = sld [smem:[#allocation2 + $0x172]] }
 0x1fc   : > { %v2237_v5 = vadd.f32 %v2235_v63, %v2231_v53  ;;  %v2238_v38 = vadd.f32 %v2236_v25, %v2232_v6  ;;  %v2262_v34 = vmul.f32 %v2260_v29, %v7249_v26  ;;  %v2267_v4 = vmul.f32 %v2266_v43, %v7252_v15 }
 0x1fd   : > { %v2268_v23 = vmul.f32 %v2266_v43, %v7257_v16  ;;  %v2273_v47 = vmul.f32 %v2272_v37, %v7260_v55  ;;  %v2274_v39 = vmul.f32 %v2272_v37, %v7263_v21  ;;  %v2263_v52 = vadd.f32 %v2261_v42, %v2257_v51 }
 0x1fe   : > { %v2243_v20 = vadd.f32 %v2241_v28, %v2237_v5  ;;  %v2244_v46 = vadd.f32 %v2242_v30, %v2238_v38  ;;  %v2264_v61 = vadd.f32 %v2262_v34, %v2258_v14  ;;  %v2278_v36 = vstv %s7408_s7  ;;  %s7494_s7 = sld [smem:[#allocation2 + $0x173]] }
 0x1ff   : > { %v2284_v41 = vstv %s7410_s18  ;;  %v2279_v56 = vmul.f32 %v2278_v36, %v7266_v50  ;;  %v2280_v11 = vmul.f32 %v2278_v36, %v7271_v31  ;;  %v2269_v63 = vadd.f32 %v2267_v4, %v2263_v52  ;;  %s7504_s18 = sld [smem:[#allocation2 + $0x174]] }
 0x200   : > { %v2249_v35 = vadd.f32 %v2247_v49, %v2243_v20  ;;  %v2250_v45 = vadd.f32 %v2248_v40, %v2244_v46  ;;  %v2270_v25 = vadd.f32 %v2268_v23, %v2264_v61  ;;  %v2285_v28 = vmul.f32 %v2284_v41, %v7274_v33 }
 0x201   : > { %v2286_v30 = vmul.f32 %v2284_v41, %v7279_v19  ;;  %v2290_v27 = vstv %s7422_s15  ;;  %v2296_v29 = vstv %s7424_s16  ;;  %v2275_v49 = vadd.f32 %v2273_v47, %v2269_v63  ;;  %s7506_s15 = sld [smem:[#allocation2 + $0x175]]  ;;  %s7518_s16 = sld [smem:[#allocation2 + $0x176]] }
 0x202   : > { %v7456_v53 = vadd.f32 %v2252_v18, %v2249_v35  ;;  %v7458_v6 = vadd.f32 %v2252_v18, %v2250_v45  ;;  %v2276_v40 = vadd.f32 %v2274_v39, %v2270_v25  ;;  %v2291_v43 = vmul.f32 %v2290_v27, %v7281_v58 }
 0x203   : > { %v2292_v37 = vmul.f32 %v2290_v27, %v7283_v13  ;;  %v2297_v5 = vmul.f32 %v2296_v29, %v7308_v32  ;;  %v2298_v18 = vmul.f32 %v2296_v29, %v7310_v9  ;;  %v2302_v38 = vstv %s7432_s5  ;;  %s7520_s5 = sld [smem:[#allocation2 + $0x177]] }
 0x204   : > { %v2306_v51 = vstv %s7434_s19  ;;  %v2281_v14 = vadd.f32 %v2279_v56, %v2275_v49  ;;  %v2282_v42 = vadd.f32 %v2280_v11, %v2276_v40  ;;  %v2310_v23 = vstv %s7440_s17  ;;  %s7528_s19 = sld [smem:[#allocation2 + $0x18d]]  ;;  %s7530_s17 = sld [smem:[#allocation2 + $0x178]] }
 0x205   : > { %v2307_v34 = vmul.f32 %v2306_v51, %v7240_v48  ;;  %v2308_v4 = vmul.f32 %v2306_v51, %v7243_v1  ;;  %v2316_v20 = vstv %s7442_s23  ;;  %v2322_v46 = vstv %s7446_s6  ;;  %s7534_s23 = sld [smem:[#allocation2 + $0x179]]  ;;  %s7536_s6 = sld [smem:[#allocation2 + $0x17a]] }
 0x206   : > { %v2328_v47 = vstv %s7448_s25  ;;  %v2287_v39 = vadd.f32 %v2285_v28, %v2281_v14  ;;  %v2288_v52 = vadd.f32 %v2286_v30, %v2282_v42  ;;  %v2311_v61 = vmul.f32 %v2310_v23, %v7246_v62  ;;  %s7540_s25 = sld [smem:[#allocation2 + $0x17b]] }
 0x207   : > { %v2312_v36 = vmul.f32 %v2310_v23, %v7249_v26  ;;  %v2317_v41 = vmul.f32 %v2316_v20, %v7252_v15  ;;  %v2318_v35 = vmul.f32 %v2316_v20, %v7257_v16  ;;  %v2323_v45 = vmul.f32 %v2322_v46, %v7260_v55 }
 0x208   : > { %v2324_v56 = vmul.f32 %v2322_v46, %v7263_v21  ;;  %v2293_v11 = vadd.f32 %v2291_v43, %v2287_v39  ;;  %v2294_v63 = vadd.f32 %v2292_v37, %v2288_v52  ;;  %v2313_v25 = vadd.f32 %v2311_v61, %v2307_v34 }
 0x209   : > { %v2314_v27 = vadd.f32 %v2312_v36, %v2308_v4  ;;  %v2329_v28 = vmul.f32 %v2328_v47, %v7266_v50  ;;  %v2330_v30 = vmul.f32 %v2328_v47, %v7271_v31  ;;  %v2334_v29 = vstv %s7462_s8  ;;  %s7542_s8 = sld [smem:[#allocation2 + $0x17c]] }
 0x20a   : > { %v2340_v49 = vstv %s7464_s29  ;;  %v2299_v40 = vadd.f32 %v2297_v5, %v2293_v11  ;;  %v2300_v51 = vadd.f32 %v2298_v18, %v2294_v63  ;;  %v2319_v43 = vadd.f32 %v2317_v41, %v2313_v25  ;;  %s7556_s29 = sld [smem:[#allocation2 + $0x17d]] }
 0x20b   : > { %v2320_v37 = vadd.f32 %v2318_v35, %v2314_v27  ;;  %v2335_v14 = vmul.f32 %v2334_v29, %v7274_v33  ;;  %v2336_v42 = vmul.f32 %v2334_v29, %v7279_v19  ;;  %v2341_v34 = vmul.f32 %v2340_v49, %v7281_v58 }
 0x20c   : > { %v2342_v4 = vmul.f32 %v2340_v49, %v7283_v13  ;;  %v7508_v23 = vadd.f32 %v2302_v38, %v2299_v40  ;;  %v7510_v5 = vadd.f32 %v2302_v38, %v2300_v51  ;;  %v2325_v18 = vadd.f32 %v2323_v45, %v2319_v43 }
 0x20d   : > { %v2326_v20 = vadd.f32 %v2324_v56, %v2320_v37  ;;  %v2346_v46 = vstv %s7482_s3  ;;  %v2352_v47 = vstv %s7484_s22  ;;  %v2356_v39 = vstv %s7474_s4  ;;  %s7558_s4 = sld [smem:[#allocation2 + $0x17e]]  ;;  %s7576_s22 = sld [smem:[#allocation2 + $0x180]] }
 0x20e   : > { %v2360_v52 = vstv %s7476_s27  ;;  %v2331_v61 = vadd.f32 %v2329_v28, %v2325_v18  ;;  %v2347_v41 = vmul.f32 %v2346_v46, %v7308_v32  ;;  %v2348_v35 = vmul.f32 %v2346_v46, %v7310_v9  ;;  %s7568_s27 = sld [smem:[#allocation2 + $0x17f]]  ;;  %s7570_s3 = sld [smem:[#allocation2 + $0x18e]] }
 0x20f   : > { %v2332_v36 = vadd.f32 %v2330_v30, %v2326_v20  ;;  %v2357_v38 = vmul.f32 %v2356_v39, %v7240_v48  ;;  %v2358_v45 = vmul.f32 %v2356_v39, %v7243_v1  ;;  %v2361_v56 = vmul.f32 %v2360_v52, %v7246_v62 }
 0x210   : > { %v2362_v11 = vmul.f32 %v2360_v52, %v7249_v26  ;;  %v2337_v63 = vadd.f32 %v2335_v14, %v2331_v61  ;;  %v2366_v27 = vstv %s7492_s24  ;;  %v2372_v28 = vstv %s7494_s7  ;;  %s7578_s24 = sld [smem:[#allocation2 + $0x181]]  ;;  %s7586_s7 = sld [smem:[#allocation2 + $0x182]] }
 0x211   : > { %v2338_v25 = vadd.f32 %v2336_v42, %v2332_v36  ;;  %v2363_v30 = vadd.f32 %v2361_v56, %v2357_v38  ;;  %v2367_v49 = vmul.f32 %v2366_v27, %v7252_v15  ;;  %v2368_v40 = vmul.f32 %v2366_v27, %v7257_v16 }
 0x212   : > { %v2364_v29 = vadd.f32 %v2362_v11, %v2358_v45  ;;  %v2343_v51 = vadd.f32 %v2341_v34, %v2337_v63  ;;  %v2373_v37 = vmul.f32 %v2372_v28, %v7260_v55  ;;  %v2374_v14 = vmul.f32 %v2372_v28, %v7263_v21 }
 0x213   : > { %v2344_v43 = vadd.f32 %v2342_v4, %v2338_v25  ;;  %v2369_v42 = vadd.f32 %v2367_v49, %v2363_v30  ;;  %v2378_v20 = vstv %s7504_s18  ;;  %v2384_v46 = vstv %s7506_s15  ;;  %s7588_s18 = sld [smem:[#allocation2 + $0x183]]  ;;  %s7598_s15 = sld [smem:[#allocation2 + $0x184]] }
 0x214   : > { %v2370_v18 = vadd.f32 %v2368_v40, %v2364_v29  ;;  %v2349_v39 = vadd.f32 %v2347_v41, %v2343_v51  ;;  %v2379_v61 = vmul.f32 %v2378_v20, %v7266_v50  ;;  %v2380_v34 = vmul.f32 %v2378_v20, %v7271_v31 }
 0x215   : > { %v2350_v52 = vadd.f32 %v2348_v35, %v2344_v43  ;;  %v2375_v4 = vadd.f32 %v2373_v37, %v2369_v42  ;;  %v2385_v38 = vmul.f32 %v2384_v46, %v7274_v33  ;;  %v2386_v45 = vmul.f32 %v2384_v46, %v7279_v19 }
 0x216   : > { %v2376_v36 = vadd.f32 %v2374_v14, %v2370_v18  ;;  %v7550_v56 = vadd.f32 %v2352_v47, %v2349_v39  ;;  %v2390_v63 = vstv %s7518_s16  ;;  %v2396_v25 = vstv %s7520_s5  ;;  %s7600_s16 = sld [smem:[#allocation2 + $0x185]]  ;;  %s7612_s5 = sld [smem:[#allocation2 + $0x186]] }
 0x217   : > { %v7552_v11 = vadd.f32 %v2352_v47, %v2350_v52  ;;  %v2381_v41 = vadd.f32 %v2379_v61, %v2375_v4  ;;  %v2391_v27 = vmul.f32 %v2390_v63, %v7281_v58  ;;  %v2392_v28 = vmul.f32 %v2390_v63, %v7283_v13 }
 0x218   : > { %v2382_v35 = vadd.f32 %v2380_v34, %v2376_v36  ;;  %v2397_v30 = vmul.f32 %v2396_v25, %v7308_v32  ;;  %v2398_v47 = vmul.f32 %v2396_v25, %v7310_v9  ;;  %v2402_v29 = vstv %s7528_s19  ;;  %s7614_s19 = sld [smem:[#allocation2 + $0x187]] }
 0x219   : > { %v2406_v49 = vstv %s7530_s17  ;;  %v2387_v40 = vadd.f32 %v2385_v38, %v2381_v41  ;;  %v2410_v14 = vstv %s7534_s23  ;;  %v2416_v42 = vstv %s7536_s6  ;;  %s7624_s17 = sld [smem:[#allocation2 + $0x18f]]  ;;  %s7646_s23 = sld [smem:[#allocation2 + $0x190]] }
 0x21a   : > { %v2388_v51 = vadd.f32 %v2386_v45, %v2382_v35  ;;  %v2407_v43 = vmul.f32 %v2406_v49, %v7240_v48  ;;  %v2408_v37 = vmul.f32 %v2406_v49, %v7243_v1  ;;  %v2422_v18 = vstv %s7540_s25  ;;  %s7648_s6 = sld [smem:[#allocation2 + $0x191]]  ;;  %s7654_s25 = sld [smem:[#allocation2 + $0x192]] }
 0x21b   : > { %v2428_v20 = vstv %s7542_s8  ;;  %v2393_v46 = vadd.f32 %v2391_v27, %v2387_v40  ;;  %v2411_v52 = vmul.f32 %v2410_v14, %v7246_v62  ;;  %v2412_v61 = vmul.f32 %v2410_v14, %v7249_v26  ;;  %s7658_s8 = sld [smem:[#allocation2 + $0x193]] }
 0x21c   : > { %v2394_v39 = vadd.f32 %v2392_v28, %v2388_v51  ;;  %v2417_v34 = vmul.f32 %v2416_v42, %v7252_v15  ;;  %v2418_v4 = vmul.f32 %v2416_v42, %v7257_v16  ;;  %v2423_v36 = vmul.f32 %v2422_v18, %v7260_v55 }
 0x21d   : > { %v2424_v38 = vmul.f32 %v2422_v18, %v7263_v21  ;;  %v2399_v45 = vadd.f32 %v2397_v30, %v2393_v46  ;;  %v2413_v25 = vadd.f32 %v2411_v52, %v2407_v43  ;;  %v2414_v41 = vadd.f32 %v2412_v61, %v2408_v37 }
 0x21e   : > { %v2400_v63 = vadd.f32 %v2398_v47, %v2394_v39  ;;  %v2429_v35 = vmul.f32 %v2428_v20, %v7266_v50  ;;  %v2430_v27 = vmul.f32 %v2428_v20, %v7271_v31  ;;  %v2434_v28 = vstv %s7556_s29  ;;  %s7664_s29 = sld [smem:[#allocation2 + $0x194]] }
 0x21f   : > { %v2440_v49 = vstv %s7558_s4  ;;  %v7594_v40 = vadd.f32 %v2402_v29, %v2399_v45  ;;  %v2419_v14 = vadd.f32 %v2417_v34, %v2413_v25  ;;  %v2420_v42 = vadd.f32 %v2418_v4, %v2414_v41  ;;  %s7684_s4 = sld [smem:[#allocation2 + $0x195]] }
 0x220   : > { %v7596_v51 = vadd.f32 %v2402_v29, %v2400_v63  ;;  %v2435_v30 = vmul.f32 %v2434_v28, %v7274_v33  ;;  %v2436_v47 = vmul.f32 %v2434_v28, %v7279_v19  ;;  %v2441_v43 = vmul.f32 %v2440_v49, %v7281_v58 }
 0x221   : > { %v2442_v37 = vmul.f32 %v2440_v49, %v7283_v13  ;;  %v2425_v18 = vadd.f32 %v2423_v36, %v2419_v14  ;;  %v2426_v20 = vadd.f32 %v2424_v38, %v2420_v42  ;;  %v2446_v29 = vstv %s7568_s27  ;;  %s7686_s27 = sld [smem:[#allocation2 + $0x196]] }
 0x222   : > { %v2452_v46 = vstv %s7570_s3  ;;  %v2447_v39 = vmul.f32 %v2446_v29, %v7308_v32  ;;  %v2448_v52 = vmul.f32 %v2446_v29, %v7310_v9  ;;  %v2456_v61 = vstv %s7576_s22  ;;  %s7706_s3 = sld [smem:[#allocation2 + $0x197]]  ;;  %s7708_s22 = sld [smem:[#allocation2 + $0x1a8]] }
 0x223   : > { %v2460_v34 = vstv %s7578_s24  ;;  %v2431_v4 = vadd.f32 %v2429_v35, %v2425_v18  ;;  %v2432_v45 = vadd.f32 %v2430_v27, %v2426_v20  ;;  %v2457_v63 = vmul.f32 %v2456_v61, %v7240_v48  ;;  %s7714_s24 = sld [smem:[#allocation2 + $0x198]] }
 0x224   : > { %v2458_v36 = vmul.f32 %v2456_v61, %v7243_v1  ;;  %v2461_v38 = vmul.f32 %v2460_v34, %v7246_v62  ;;  %v2462_v25 = vmul.f32 %v2460_v34, %v7249_v26  ;;  %v2466_v41 = vstv %s7586_s7  ;;  %s7716_s7 = sld [smem:[#allocation2 + $0x199]] }
 0x225   : > { %v2472_v28 = vstv %s7588_s18  ;;  %v2437_v49 = vadd.f32 %v2435_v30, %v2431_v4  ;;  %v2438_v14 = vadd.f32 %v2436_v47, %v2432_v45  ;;  %v2467_v42 = vmul.f32 %v2466_v41, %v7252_v15  ;;  %s7722_s18 = sld [smem:[#allocation2 + $0x19a]] }
 0x226   : > { %v2468_v29 = vmul.f32 %v2466_v41, %v7257_v16  ;;  %v2463_v35 = vadd.f32 %v2461_v38, %v2457_v63  ;;  %v2464_v48 = vadd.f32 %v2462_v25, %v2458_v36  ;;  %v2473_v1 = vmul.f32 %v2472_v28, %v7260_v55 }
 0x227   : > { %v2474_v62 = vmul.f32 %v2472_v28, %v7263_v21  ;;  %v2443_v27 = vadd.f32 %v2441_v43, %v2437_v49  ;;  %v2444_v26 = vadd.f32 %v2442_v37, %v2438_v14  ;;  %v2478_v18 = vstv %s7598_s15  ;;  %s7724_s15 = sld [smem:[#allocation2 + $0x19b]] }
 0x228   : > { %v2484_v20 = vstv %s7600_s16  ;;  %v2469_v30 = vadd.f32 %v2467_v42, %v2463_v35  ;;  %v2470_v47 = vadd.f32 %v2468_v29, %v2464_v48  ;;  %v2479_v15 = vmul.f32 %v2478_v18, %v7266_v50  ;;  %s7744_s16 = sld [smem:[#allocation2 + $0x19c]] }
 0x229   : > { %v2480_v16 = vmul.f32 %v2478_v18, %v7271_v31  ;;  %v2449_v61 = vadd.f32 %v2447_v39, %v2443_v27  ;;  %v2450_v34 = vadd.f32 %v2448_v52, %v2444_v26  ;;  %v2485_v4 = vmul.f32 %v2484_v20, %v7274_v33 }
 0x22a   : > { %v2486_v55 = vmul.f32 %v2484_v20, %v7279_v19  ;;  %v2475_v45 = vadd.f32 %v2473_v1, %v2469_v30  ;;  %v2476_v21 = vadd.f32 %v2474_v62, %v2470_v47  ;;  %v2490_v63 = vstv %s7612_s5  ;;  %v9332_v47 = vld [vmem:[#allocation11_spill] sm:$0xff]  ;;  %s7746_s5 = sld [smem:[#allocation2 + $0x19d]] }
 0x22b   : > { %v2496_v43 = vstv %s7614_s19  ;;  %v2453_v37 = vadd.f32 %v2452_v46, %v2449_v61  ;;  %v2454_v36 = vadd.f32 %v2452_v46, %v2450_v34  ;;  %v2491_v38 = vmul.f32 %v2490_v63, %v7281_v58  ;;  %s7756_s19 = sld [smem:[#allocation2 + $0x19e]] }
 0x22c   : > { %v2492_v25 = vmul.f32 %v2490_v63, %v7283_v13  ;;  %v2481_v50 = vadd.f32 %v2479_v15, %v2475_v45  ;;  %v2482_v41 = vadd.f32 %v2480_v16, %v2476_v21  ;;  %v2497_v31 = vmul.f32 %v2496_v43, %v7308_v32  ;;  %v9333_v16 = vld [vmem:[#allocation12_spill] sm:$0xff] }
 0x22d   : > { %v2498_v39 = vmul.f32 %v2496_v43, %v7310_v9  ;;  %v2502_v52 = vstv %s7624_s17  ;;  %v2505_v33 = vmax.f32 %v7370_v24, 0.0  ;;  %v2506_v19 = vmax.f32 %v7372_v8, 0.0  ;;  %s7758_s17 = sld [smem:[#allocation2 + $0x19f]] }
 0x22e   : > { %v2507_v28 = vmax.f32 %v7412_v57, 0.0  ;;  %v2487_v49 = vadd.f32 %v2485_v4, %v2481_v50  ;;  %v2488_v14 = vadd.f32 %v2486_v55, %v2482_v41  ;;  %v2508_v46 = vmax.f32 %v7414_v17, 0.0  ;;  %v9334_v55 = vld [vmem:[#allocation13_spill] sm:$0xff]  ;;  %v9336_v50 = vld [vmem:[#allocation15_spill] sm:$0xff] }
 0x22f   : > { %v2509_v58 = vmax.f32 %v7456_v53, 0.0  ;;  %v2510_v13 = vmax.f32 %v7458_v6, 0.0  ;;  %v2511_v32 = vmax.f32 %v7508_v23, 0.0  ;;  %v2512_v9 = vmax.f32 %v7510_v5, 0.0 }
 0x230   : > { %v2513_v24 = vmax.f32 %v7550_v56, 0.0  ;;  %v2493_v8 = vadd.f32 %v2491_v38, %v2487_v49  ;;  %v2494_v57 = vadd.f32 %v2492_v25, %v2488_v14  ;;  %v2514_v17 = vmax.f32 %v7552_v11, 0.0  ;;  %v9335_v38 = vld [vmem:[#allocation14_spill] sm:$0xff] }
 0x231   : > { %v2515_v53 = vmax.f32 %v7594_v40, 0.0  ;;  %v2516_v42 = vmax.f32 %v7596_v51, 0.0  ;;  %v2517_v29 = vmax.f32 %v2453_v37, 0.0  ;;  %v2518_v6 = vmax.f32 %v2454_v36, 0.0 }
 0x232   : > { %v7662_v23 = vadd.f32 %v2505_v33, %v6416_v60  ;;  %v2499_v5 = vadd.f32 %v2497_v31, %v2493_v8  ;;  %v2500_v56 = vadd.f32 %v2498_v39, %v2494_v57  ;;  %v7667_v35 = vadd.f32 %v2506_v19, %v6419_v12 }
 0x233   : > { %v7670_v11 = vadd.f32 %v2507_v28, %v6422_v22  ;;  %v7673_v40 = vadd.f32 %v2508_v46, %v6425_v7  ;;  %v7676_v51 = vadd.f32 %v2509_v58, %v6428_v59  ;;  %v7679_v48 = vadd.f32 %v2510_v13, %v6433_v10 }
 0x234   : > { %v7682_v1 = vadd.f32 %v2511_v32, %v6436_v2  ;;  %v2503_v62 = vadd.f32 %v2502_v52, %v2499_v5  ;;  %v2504_v27 = vadd.f32 %v2502_v52, %v2500_v56  ;;  %v7689_v26 = vadd.f32 %v2512_v9, %v6439_v3 }
 0x235   : > { %v7692_v18 = vadd.f32 %v2513_v24, %v6442_v54  ;;  %v7695_v20 = vadd.f32 %v2514_v17, %v6447_v0  ;;  %v7698_v30 = vadd.f32 %v2515_v53, %v6450_v44  ;;  %v7701_v15 = vadd.f32 %v2516_v42, %v9332_v47 }
 0x236   : > { %v7704_v61 = vadd.f32 %v2517_v29, %v9333_v16  ;;  %v2519_v34 = vmax.f32 %v2503_v62, 0.0  ;;  %v2520_v4 = vmax.f32 %v2504_v27, 0.0  ;;  %v7711_v45 = vadd.f32 %v2518_v6, %v9334_v55 }
 0x237   : > { %v2538_v21 = vstv %s7646_s23  ;;  %v2542_v37 = vstv %s7648_s6  ;;  %v2548_v36 = vstv %s7654_s25  ;;  %v2554_v19 = vstv %s7658_s8  ;;  %s7770_s23 = sld [smem:[#allocation2 + $0x1a9]]  ;;  %s7772_s6 = sld [smem:[#allocation2 + $0x1a0]] }
 0x238   : > { %v2539_v63 = vmul.f32 %v2538_v21, %v7662_v23  ;;  %v2540_v43 = vmul.f32 %v2538_v21, %v7667_v35  ;;  %v7727_v25 = vadd.f32 %v2519_v34, %v9335_v38  ;;  %v7730_v41 = vadd.f32 %v2520_v4, %v9336_v50  ;;  %s7776_s25 = sld [smem:[#allocation2 + $0x1a1]]  ;;  %s7778_s8 = sld [smem:[#allocation2 + $0x1a2]] }
 0x239   : > { %v2543_v31 = vmul.f32 %v2542_v37, %v7670_v11  ;;  %v2544_v39 = vmul.f32 %v2542_v37, %v7673_v40  ;;  %v2549_v52 = vmul.f32 %v2548_v36, %v7676_v51  ;;  %v2550_v33 = vmul.f32 %v2548_v36, %v7679_v48 }
 0x23a   : > { %v2560_v28 = vstv %s7664_s29  ;;  %v2555_v46 = vmul.f32 %v2554_v19, %v7682_v1  ;;  %v2556_v58 = vmul.f32 %v2554_v19, %v7689_v26  ;;  %v2566_v9 = vstv %s7684_s4  ;;  %s7784_s29 = sld [smem:[#allocation2 + $0x1a3]]  ;;  %s7786_s4 = sld [smem:[#allocation2 + $0x1a4]] }
 0x23b   : > { %v2545_v49 = vadd.f32 %v2543_v31, %v2539_v63  ;;  %v2546_v14 = vadd.f32 %v2544_v39, %v2540_v43  ;;  %v2561_v13 = vmul.f32 %v2560_v28, %v7692_v18  ;;  %v2562_v32 = vmul.f32 %v2560_v28, %v7695_v20 }
 0x23c   : > { %v2572_v24 = vstv %s7686_s27  ;;  %v2567_v17 = vmul.f32 %v2566_v9, %v7698_v30  ;;  %v2568_v53 = vmul.f32 %v2566_v9, %v7701_v15  ;;  %v2578_v6 = vstv %s7706_s3  ;;  %s7794_s27 = sld [smem:[#allocation2 + $0x1a5]]  ;;  %s7796_s3 = sld [smem:[#allocation2 + $0x1a6]] }
 0x23d   : > { %v2551_v8 = vadd.f32 %v2549_v52, %v2545_v49  ;;  %v2552_v57 = vadd.f32 %v2550_v33, %v2546_v14  ;;  %v2573_v42 = vmul.f32 %v2572_v24, %v7704_v61  ;;  %v2574_v29 = vmul.f32 %v2572_v24, %v7711_v45 }
 0x23e   : > { %v2584_v5 = vstv %s7708_s22  ;;  %v2579_v27 = vmul.f32 %v2578_v6, %v7727_v25  ;;  %v2580_v34 = vmul.f32 %v2578_v6, %v7730_v41  ;;  %v2588_v4 = vstv %s7714_s24  ;;  %s7800_s22 = sld [smem:[#allocation2 + $0x1a7]]  ;;  %s7802_s24 = sld [smem:[#allocation2 + $0x1aa]] }
 0x23f   : > { %v2557_v56 = vadd.f32 %v2555_v46, %v2551_v8  ;;  %v2558_v62 = vadd.f32 %v2556_v58, %v2552_v57  ;;  %v2592_v21 = vstv %s7716_s7  ;;  %v2598_v63 = vstv %s7722_s18  ;;  %s7816_s7 = sld [smem:[#allocation2 + $0x1ab]]  ;;  %s7818_s18 = sld [smem:[#allocation2 + $0x1ac]] }
 0x240   : > { %v2604_v43 = vstv %s7724_s15  ;;  %v2589_v31 = vmul.f32 %v2588_v4, %v7662_v23  ;;  %v2590_v39 = vmul.f32 %v2588_v4, %v7667_v35  ;;  %v2593_v52 = vmul.f32 %v2592_v21, %v7670_v11  ;;  %s7824_s15 = sld [smem:[#allocation2 + $0x1ad]] }
 0x241   : > { %v2563_v37 = vadd.f32 %v2561_v13, %v2557_v56  ;;  %v2564_v36 = vadd.f32 %v2562_v32, %v2558_v62  ;;  %v2594_v33 = vmul.f32 %v2592_v21, %v7673_v40  ;;  %v2599_v19 = vmul.f32 %v2598_v63, %v7676_v51 }
 0x242   : > { %v2600_v28 = vmul.f32 %v2598_v63, %v7679_v48  ;;  %v2605_v46 = vmul.f32 %v2604_v43, %v7682_v1  ;;  %v2606_v58 = vmul.f32 %v2604_v43, %v7689_v26  ;;  %v2595_v13 = vadd.f32 %v2593_v52, %v2589_v31 }
 0x243   : > { %v2569_v49 = vadd.f32 %v2567_v17, %v2563_v37  ;;  %v2570_v14 = vadd.f32 %v2568_v53, %v2564_v36  ;;  %v2596_v32 = vadd.f32 %v2594_v33, %v2590_v39  ;;  %v2610_v9 = vstv %s7744_s16  ;;  %s7830_s16 = sld [smem:[#allocation2 + $0x1ae]] }
 0x244   : > { %v2616_v24 = vstv %s7746_s5  ;;  %v2611_v6 = vmul.f32 %v2610_v9, %v7692_v18  ;;  %v2612_v17 = vmul.f32 %v2610_v9, %v7695_v20  ;;  %v2601_v53 = vadd.f32 %v2599_v19, %v2595_v13  ;;  %s7832_s5 = sld [smem:[#allocation2 + $0x1af]] }
 0x245   : > { %v2575_v8 = vadd.f32 %v2573_v42, %v2569_v49  ;;  %v2576_v57 = vadd.f32 %v2574_v29, %v2570_v14  ;;  %v2602_v56 = vadd.f32 %v2600_v28, %v2596_v32  ;;  %v2617_v62 = vmul.f32 %v2616_v24, %v7698_v30 }
 0x246   : > { %v2618_v4 = vmul.f32 %v2616_v24, %v7701_v15  ;;  %v2622_v43 = vstv %s7756_s19  ;;  %v2628_v42 = vstv %s7758_s17  ;;  %v2607_v29 = vadd.f32 %v2605_v46, %v2601_v53  ;;  %s7842_s19 = sld [smem:[#allocation2 + $0x1b0]]  ;;  %s7844_s17 = sld [smem:[#allocation2 + $0x1b1]] }
 0x247   : > { %v2581_v21 = vadd.f32 %v2579_v27, %v2575_v8  ;;  %v2582_v63 = vadd.f32 %v2580_v34, %v2576_v57  ;;  %v2608_v37 = vadd.f32 %v2606_v58, %v2602_v56  ;;  %v2623_v36 = vmul.f32 %v2622_v43, %v7704_v61 }
 0x248   : > { %v2624_v31 = vmul.f32 %v2622_v43, %v7711_v45  ;;  %v2629_v27 = vmul.f32 %v2628_v42, %v7727_v25  ;;  %v2630_v34 = vmul.f32 %v2628_v42, %v7730_v41  ;;  %v2613_v33 = vadd.f32 %v2611_v6, %v2607_v29 }
 0x249   : > { %v2585_v39 = vadd.f32 %v2584_v5, %v2581_v21  ;;  %v2586_v52 = vadd.f32 %v2584_v5, %v2582_v63  ;;  %v2614_v19 = vadd.f32 %v2612_v17, %v2608_v37  ;;  %v2634_v28 = vstv %s7770_s23  ;;  %s7850_s23 = sld [smem:[#allocation2 + $0x1b3]] }
 0x24a   : > { %v2638_v49 = vstv %s7772_s6  ;;  %v2642_v58 = vstv %s7776_s25  ;;  %v2648_v5 = vstv %s7778_s8  ;;  %v2619_v13 = vadd.f32 %v2617_v62, %v2613_v33  ;;  %s7852_s6 = sld [smem:[#allocation2 + $0x1b4]]  ;;  %s7855_s25 = sld [smem:[#allocation2 + $0x1b2]] }
 0x24b   : > { %v2639_v14 = vmul.f32 %v2638_v49, %v7662_v23  ;;  %v2640_v46 = vmul.f32 %v2638_v49, %v7667_v35  ;;  %v2620_v32 = vadd.f32 %v2618_v4, %v2614_v19  ;;  %v2643_v9 = vmul.f32 %v2642_v58, %v7670_v11  ;;  %s7857_s8 = sld [smem:[#allocation2 + $0x1eb]] }
 0x24c   : > { %v2644_v24 = vmul.f32 %v2642_v58, %v7673_v40  ;;  %v2649_v8 = vmul.f32 %v2648_v5, %v7676_v51  ;;  %v2650_v57 = vmul.f32 %v2648_v5, %v7679_v48  ;;  %v2654_v6 = vstv %s7784_s29  ;;  %s4952_s29 = smul.u32 96, %s5367_s30 }
 0x24d   : > { %v2660_v17 = vstv %s7786_s4  ;;  %v2625_v23 = vadd.f32 %v2623_v36, %v2619_v13  ;;  %v2626_v35 = vadd.f32 %v2624_v31, %v2620_v32  ;;  %v2645_v53 = vadd.f32 %v2643_v9, %v2639_v14  ;;  %s7866_s4 = sld [smem:[#allocation2 + $0x1b5]] }
 0x24e   : > { %v2646_v11 = vadd.f32 %v2644_v24, %v2640_v46  ;;  %v2655_v40 = vmul.f32 %v2654_v6, %v7682_v1  ;;  %v2656_v51 = vmul.f32 %v2654_v6, %v7689_v26  ;;  %v2661_v48 = vmul.f32 %v2660_v17, %v7692_v18 }
 0x24f   : > { %v2662_v56 = vmul.f32 %v2660_v17, %v7695_v20  ;;  %v2631_v62 = vadd.f32 %v2629_v27, %v2625_v23  ;;  %v2632_v4 = vadd.f32 %v2630_v34, %v2626_v35  ;;  %v2651_v21 = vadd.f32 %v2649_v8, %v2645_v53 }
 0x250   : > { %v2652_v63 = vadd.f32 %v2650_v57, %v2646_v11  ;;  %v2666_v43 = vstv %s7794_s27  ;;  %v2672_v42 = vstv %s7796_s3  ;;  %v2678_v29 = vstv %s7800_s22  ;;  %s7868_s27 = sld [smem:[#allocation2 + $0x1b6]]  ;;  %s7877_s3 = sld [smem:[#allocation2 + $0x1b7]] }
 0x251   : > { %v2684_v37 = vstv %s7802_s24  ;;  %v2635_v36 = vadd.f32 %v2634_v28, %v2631_v62  ;;  %v2636_v31 = vadd.f32 %v2634_v28, %v2632_v4  ;;  %v2657_v1 = vadd.f32 %v2655_v40, %v2651_v21  ;;  %s7879_s22 = sld [smem:[#allocation2 + $0x1b8]]  ;;  %s7884_s24 = scalar_lea.vmem [#allocation7], %s4952_s29 }
 0x252   : > { %v2658_v26 = vadd.f32 %v2656_v51, %v2652_v63  ;;  %v2667_v18 = vmul.f32 %v2666_v43, %v7698_v30  ;;  %v2668_v20 = vmul.f32 %v2666_v43, %v7701_v15  ;;  %v2673_v27 = vmul.f32 %v2672_v42, %v7704_v61  ;;  %s7956_s29 = sld [smem:[#allocation2 + $0x1c4]] }
 0x253   : > { %v2674_v34 = vmul.f32 %v2672_v42, %v7711_v45  ;;  %v2663_v33 = vadd.f32 %v2661_v48, %v2657_v1  ;;  %v2679_v49 = vmul.f32 %v2678_v29, %v7727_v25  ;;  %v2680_v28 = vmul.f32 %v2678_v29, %v7730_v41 }
 0x254   : > { %v2664_v19 = vadd.f32 %v2662_v56, %v2658_v26  ;;  %5031 = vtanh.f32 %v2585_v39  ;;  %v2703_v14 = vstv %s7816_s7  ;;  %v2707_v46 = vstv %s7818_s18  ;;  %s7892_s7 = sld [smem:[#allocation2 + $0x1b9]]  ;;  %s7894_s18 = sld [smem:[#allocation2 + $0x1bb]] }
 0x255   : > { %v2669_v30 = vadd.f32 %v2667_v18, %v2663_v33  ;;  %5033 = vtanh.f32 %v2586_v52  ;;  %v2704_v61 = vmul.f32 %v2703_v14, %v6416_v60  ;;  %v2705_v45 = vmul.f32 %v2703_v14, %v6419_v12 }
 0x256   : > { %v2670_v15 = vadd.f32 %v2668_v20, %v2664_v19  ;;  %5035 = vtanh.f32 %v2635_v36  ;;  %v2708_v25 = vmul.f32 %v2707_v46, %v6422_v22  ;;  %v2709_v41 = vmul.f32 %v2707_v46, %v6425_v7 }
 0x257   : > { %v2675_v39 = vadd.f32 %v2673_v27, %v2669_v30  ;;  %5037 = vtanh.f32 %v2636_v31  ;;  %v2713_v5 = vstv %s7824_s15  ;;  %v2719_v57 = vstv %s7830_s16  ;;  %s7900_s15 = sld [smem:[#allocation2 + $0x1ba]]  ;;  %s7902_s16 = sld [smem:[#allocation2 + $0x1ec]] }
 0x258   : > { %v2676_v58 = vadd.f32 %v2674_v34, %v2670_v15  ;;  %v2710_v52 = vadd.f32 %v2708_v25, %v2704_v61  ;;  %v2711_v13 = vadd.f32 %v2709_v41, %v2705_v45  ;;  %v2714_v32 = vmul.f32 %v2713_v5, %v6428_v59 }
 0x259   : > { %v2715_v9 = vmul.f32 %v2713_v5, %v6433_v10  ;;  %v2681_v24 = vadd.f32 %v2679_v49, %v2675_v39  ;;  %v2725_v6 = vstv %s7832_s5  ;;  %v2720_v35 = vmul.f32 %v2719_v57, %v6436_v2  ;;  %s7916_s5 = sld [smem:[#allocation2 + $0x1bc]] }
 0x25a   : > { %v2682_v8 = vadd.f32 %v2680_v28, %v2676_v58  ;;  %v2716_v17 = vadd.f32 %v2714_v32, %v2710_v52  ;;  %v2721_v53 = vmul.f32 %v2719_v57, %v6439_v3  ;;  %v2726_v51 = vmul.f32 %v2725_v6, %v6442_v54 }
 0x25b   : > { %v2717_v23 = vadd.f32 %v2715_v9, %v2711_v13  ;;  %v2685_v11 = vadd.f32 %v2684_v37, %v2681_v24  ;;  %v2727_v48 = vmul.f32 %v2725_v6, %v6447_v0  ;;  %v2731_v4 = vstv %s7842_s19  ;;  %s7918_s19 = sld [smem:[#allocation2 + $0x1bd]] }
 0x25c   : > { %v2686_v40 = vadd.f32 %v2684_v37, %v2682_v8  ;;  %v2722_v56 = vadd.f32 %v2720_v35, %v2716_v17  ;;  %v2737_v21 = vstv %s7844_s17  ;;  %v2732_v63 = vmul.f32 %v2731_v4, %v6450_v44  ;;  %s7924_s17 = sld [smem:[#allocation2 + $0x1be]] }
 0x25d   : > { %v2723_v62 = vadd.f32 %v2721_v53, %v2717_v23  ;;  %5039 = vtanh.f32 %v2685_v11  ;;  %v2733_v43 = vmul.f32 %v2731_v4, %v9332_v47  ;;  %v2738_v42 = vmul.f32 %v2737_v21, %v9333_v16 }
 0x25e   : > { %v5032_v29 = vpop.eup %5031  ;;  %5041 = vtanh.f32 %v2686_v40  ;;  %v2728_v37 = vadd.f32 %v2726_v51, %v2722_v56  ;;  %v2739_v31 = vmul.f32 %v2737_v21, %v9334_v55  ;;  %v2743_v26 = vstv %s7855_s25  ;;  %s7944_s25 = sld [smem:[#allocation2 + $0x1c1]] }
 0x25f   : > { %v2729_v36 = vadd.f32 %v2727_v48, %v2723_v62  ;;  %v5034_v1 = vpop.eup %5033  ;;  %2694 = vst.msk [vmem:[%s7884_s24] sm:$0xff] %vm2693_vm0, %v5032_v29  ;;  %v2749_v18 = vstv %s7857_s8  ;;  %v2753_v20 = vstv %s7850_s23  ;;  %v2757_v27 = vstv %s7852_s6  ;;  %s7926_s23 = sld [smem:[#allocation2 + $0x1bf]]  ;;  %s7942_s6 = sld [smem:[#allocation2 + $0x1c0]] }
 0x260   : > { %v5036_v34 = vpop.eup %5035  ;;  %2695 = vst.msk [vmem:[%s7884_s24 + $0x8] sm:$0xff] %vm2693_vm0, %v5034_v1  ;;  %v2734_v33 = vadd.f32 %v2732_v63, %v2728_v37  ;;  %v2744_v49 = vmul.f32 %v2743_v26, %v9335_v38  ;;  %v2745_v28 = vmul.f32 %v2743_v26, %v9336_v50  ;;  %v2754_v46 = vmul.f32 %v2753_v20, %v6416_v60  ;;  %s7954_s8 = sld [smem:[#allocation2 + $0x1c3]] }
 0x261   : > { %v2735_v19 = vadd.f32 %v2733_v43, %v2729_v36  ;;  %v5038_v14 = vpop.eup %5037  ;;  %4695 = vst.msk [vmem:[%s7884_s24 + $0x10] sm:$0xff] %vm2693_vm0, %v5036_v34  ;;  %v2755_v30 = vmul.f32 %v2753_v20, %v6419_v12  ;;  %v2758_v15 = vmul.f32 %v2757_v27, %v6422_v22  ;;  %v2759_v61 = vmul.f32 %v2757_v27, %v6425_v7 }
 0x262   : > { %4696 = vst.msk [vmem:[%s7884_s24 + $0x18] sm:$0xff] %vm2693_vm0, %v5038_v14  ;;  %v2740_v45 = vadd.f32 %v2738_v42, %v2734_v33  ;;  %v2763_v41 = vstv %s7866_s4  ;;  %v2769_v39 = vstv %s7868_s27  ;;  %v2775_v17 = vstv %s7877_s3  ;;  %s7960_s4 = sld [smem:[#allocation2 + $0x1c2]]  ;;  %s7962_s27 = sld [smem:[#allocation2 + $0x1ed]] }
 0x263   : > { %v2741_v25 = vadd.f32 %v2739_v31, %v2735_v19  ;;  %v2760_v58 = vadd.f32 %v2758_v15, %v2754_v46  ;;  %v2761_v5 = vadd.f32 %v2759_v61, %v2755_v30  ;;  %v2764_v52 = vmul.f32 %v2763_v41, %v6428_v59  ;;  %s7972_s3 = sld [smem:[#allocation2 + $0x1c5]] }
 0x264   : > { %v2765_v13 = vmul.f32 %v2763_v41, %v6433_v10  ;;  %v2746_v32 = vadd.f32 %v2744_v49, %v2740_v45  ;;  %v2770_v24 = vmul.f32 %v2769_v39, %v6436_v2  ;;  %v2771_v8 = vmul.f32 %v2769_v39, %v6439_v3 }
 0x265   : > { %v2747_v9 = vadd.f32 %v2745_v28, %v2741_v25  ;;  %v2766_v57 = vadd.f32 %v2764_v52, %v2760_v58  ;;  %v2781_v23 = vstv %s7879_s22  ;;  %v2776_v11 = vmul.f32 %v2775_v17, %v6442_v54  ;;  %s7974_s22 = sld [smem:[#allocation2 + $0x1c6]] }
 0x266   : > { %v2767_v6 = vadd.f32 %v2765_v13, %v2761_v5  ;;  %v7928_v35 = vadd.f32 %v2749_v18, %v2746_v32  ;;  %v2777_v40 = vmul.f32 %v2775_v17, %v6447_v0  ;;  %v2782_v62 = vmul.f32 %v2781_v23, %v6450_v44 }
 0x267   : > { %v7930_v53 = vadd.f32 %v2749_v18, %v2747_v9  ;;  %v5040_v51 = vpop.eup %5039  ;;  %v2772_v48 = vadd.f32 %v2770_v24, %v2766_v57  ;;  %v2783_v4 = vmul.f32 %v2781_v23, %v9332_v47  ;;  %v2787_v63 = vstv %s7892_s7  ;;  %s7986_s7 = sld [smem:[#allocation2 + $0x1c7]] }
 0x268   : > { %v2773_v56 = vadd.f32 %v2771_v8, %v2767_v6  ;;  %v5042_v21 = vpop.eup %5041  ;;  %4697 = vst.msk [vmem:[%s7884_s24 + $0x20] sm:$0xff] %vm2693_vm0, %v5040_v51  ;;  %v2793_v43 = vstv %s7900_s15  ;;  %v2799_v42 = vstv %s7902_s16  ;;  %v2803_v29 = vstv %s7894_s18  ;;  %s7988_s18 = sld [smem:[#allocation2 + $0x1c8]]  ;;  %s7998_s15 = sld [smem:[#allocation2 + $0x1c9]] }
 0x269   : > { %4698 = vst.msk [vmem:[%s7884_s24 + $0x28] sm:$0xff] %vm2693_vm0, %v5042_v21  ;;  %v2778_v37 = vadd.f32 %v2776_v11, %v2772_v48  ;;  %v2788_v31 = vmul.f32 %v2787_v63, %v9333_v16  ;;  %v2789_v1 = vmul.f32 %v2787_v63, %v9334_v55  ;;  %v2794_v26 = vmul.f32 %v2793_v43, %v9335_v38  ;;  %s8000_s16 = sld [smem:[#allocation2 + $0x1ca]] }
 0x26a   : > { %v2779_v36 = vadd.f32 %v2777_v40, %v2773_v56  ;;  %v2795_v18 = vmul.f32 %v2793_v43, %v9336_v50  ;;  %v2804_v20 = vmul.f32 %v2803_v29, %v6416_v60  ;;  %v2805_v27 = vmul.f32 %v2803_v29, %v6419_v12 }
 0x26b   : > { %v2784_v34 = vadd.f32 %v2782_v62, %v2778_v37  ;;  %v2807_v19 = vstv %s7916_s5  ;;  %v2813_v49 = vstv %s7918_s19  ;;  %v2819_v45 = vstv %s7924_s17  ;;  %s8008_s5 = sld [smem:[#allocation2 + $0x1ee]]  ;;  %s8010_s19 = sld [smem:[#allocation2 + $0x1cb]] }
 0x26c   : > { %v2785_v33 = vadd.f32 %v2783_v4, %v2779_v36  ;;  %v2808_v28 = vmul.f32 %v2807_v19, %v6422_v22  ;;  %v2809_v14 = vmul.f32 %v2807_v19, %v6425_v7  ;;  %v2814_v46 = vmul.f32 %v2813_v49, %v6428_v59  ;;  %s8014_s17 = sld [smem:[#allocation2 + $0x1cc]] }
 0x26d   : > { %v2815_v30 = vmul.f32 %v2813_v49, %v6433_v10  ;;  %v2790_v15 = vadd.f32 %v2788_v31, %v2784_v34  ;;  %v2825_v25 = vstv %s7926_s23  ;;  %v2820_v58 = vmul.f32 %v2819_v45, %v6436_v2  ;;  %s8016_s23 = sld [smem:[#allocation2 + $0x1cd]] }
 0x26e   : > { %v2791_v61 = vadd.f32 %v2789_v1, %v2785_v33  ;;  %v2810_v41 = vadd.f32 %v2808_v28, %v2804_v20  ;;  %v2811_v39 = vadd.f32 %v2809_v14, %v2805_v27  ;;  %v2821_v5 = vmul.f32 %v2819_v45, %v6439_v3 }
 0x26f   : > { %v2796_v52 = vadd.f32 %v2794_v26, %v2790_v15  ;;  %v2826_v32 = vmul.f32 %v2825_v25, %v6442_v54  ;;  %v2827_v9 = vmul.f32 %v2825_v25, %v6447_v0  ;;  %v2831_v57 = vstv %s7942_s6  ;;  %s8020_s6 = sld [smem:[#allocation2 + $0x1ce]] }
 0x270   : > { %v2797_v13 = vadd.f32 %v2795_v18, %v2791_v61  ;;  %v2816_v24 = vadd.f32 %v2814_v46, %v2810_v41  ;;  %v2817_v8 = vadd.f32 %v2815_v30, %v2811_v39  ;;  %v2837_v6 = vstv %s7944_s25  ;;  %s8022_s25 = sld [smem:[#allocation2 + $0x1cf]] }
 0x271   : > { %v7980_v17 = vadd.f32 %v2799_v42, %v2796_v52  ;;  %v2832_v11 = vmul.f32 %v2831_v57, %v6450_v44  ;;  %v2833_v40 = vmul.f32 %v2831_v57, %v9332_v47  ;;  %v2838_v56 = vmul.f32 %v2837_v6, %v9333_v16 }
 0x272   : > { %v7982_v23 = vadd.f32 %v2799_v42, %v2797_v13  ;;  %v2822_v51 = vadd.f32 %v2820_v58, %v2816_v24  ;;  %v2823_v48 = vadd.f32 %v2821_v5, %v2817_v8  ;;  %v2839_v62 = vmul.f32 %v2837_v6, %v9334_v55 }
 0x273   : > { %v2843_v4 = vstv %s7960_s4  ;;  %v2849_v21 = vstv %s7962_s27  ;;  %v2853_v63 = vstv %s7954_s8  ;;  %v2857_v43 = vstv %s7956_s29  ;;  %s8036_s8 = sld [smem:[#allocation2 + $0x1d0]]  ;;  %s8038_s29 = sld [smem:[#allocation2 + $0x1d1]] }
 0x274   : > { %v2828_v42 = vadd.f32 %v2826_v32, %v2822_v51  ;;  %v2829_v29 = vadd.f32 %v2827_v9, %v2823_v48  ;;  %v2844_v37 = vmul.f32 %v2843_v4, %v9335_v38  ;;  %v2845_v36 = vmul.f32 %v2843_v4, %v9336_v50  ;;  %s8048_s4 = sld [smem:[#allocation2 + $0x1d2]]  ;;  %s8050_s27 = sld [smem:[#allocation2 + $0x1ef]] }
 0x275   : > { %v2854_v31 = vmul.f32 %v2853_v63, %v6416_v60  ;;  %v2855_v1 = vmul.f32 %v2853_v63, %v6419_v12  ;;  %v2858_v26 = vmul.f32 %v2857_v43, %v6422_v22  ;;  %v2859_v18 = vmul.f32 %v2857_v43, %v6425_v7 }
 0x276   : > { %v2834_v20 = vadd.f32 %v2832_v11, %v2828_v42  ;;  %v2835_v27 = vadd.f32 %v2833_v40, %v2829_v29  ;;  %v2863_v34 = vstv %s7972_s3  ;;  %v2869_v33 = vstv %s7974_s22  ;;  %s8056_s3 = sld [smem:[#allocation2 + $0x1d3]]  ;;  %s8058_s22 = sld [smem:[#allocation2 + $0x1d4]] }
 0x277   : > { %v2860_v19 = vadd.f32 %v2858_v26, %v2854_v31  ;;  %v2861_v49 = vadd.f32 %v2859_v18, %v2855_v1  ;;  %v2864_v28 = vmul.f32 %v2863_v34, %v6428_v59  ;;  %v2865_v14 = vmul.f32 %v2863_v34, %v6433_v10 }
 0x278   : > { %v2840_v46 = vadd.f32 %v2838_v56, %v2834_v20  ;;  %v2841_v30 = vadd.f32 %v2839_v62, %v2835_v27  ;;  %v2870_v15 = vmul.f32 %v2869_v33, %v6436_v2  ;;  %v2871_v61 = vmul.f32 %v2869_v33, %v6439_v3 }
 0x279   : > { %v2866_v45 = vadd.f32 %v2864_v28, %v2860_v19  ;;  %v2867_v25 = vadd.f32 %v2865_v14, %v2861_v49  ;;  %v2875_v41 = vstv %s7986_s7  ;;  %v2881_v39 = vstv %s7988_s18  ;;  %s8066_s7 = sld [smem:[#allocation2 + $0x1d5]]  ;;  %s8068_s18 = sld [smem:[#allocation2 + $0x1d6]] }
 0x27a   : > { %v2846_v58 = vadd.f32 %v2844_v37, %v2840_v46  ;;  %v2847_v5 = vadd.f32 %v2845_v36, %v2841_v30  ;;  %v2876_v52 = vmul.f32 %v2875_v41, %v6442_v54  ;;  %v2877_v13 = vmul.f32 %v2875_v41, %v6447_v0 }
 0x27b   : > { %v2872_v32 = vadd.f32 %v2870_v15, %v2866_v45  ;;  %v2873_v9 = vadd.f32 %v2871_v61, %v2867_v25  ;;  %v2882_v24 = vmul.f32 %v2881_v39, %v6450_v44  ;;  %v2883_v8 = vmul.f32 %v2881_v39, %v9332_v47 }
 0x27c   : > { %v8030_v57 = vadd.f32 %v2849_v21, %v2846_v58  ;;  %v8032_v6 = vadd.f32 %v2849_v21, %v2847_v5  ;;  %v2887_v11 = vstv %s7998_s15  ;;  %v2893_v40 = vstv %s8000_s16  ;;  %s8078_s15 = sld [smem:[#allocation2 + $0x1d7]]  ;;  %s8080_s16 = sld [smem:[#allocation2 + $0x1d8]] }
 0x27d   : > { %v2878_v51 = vadd.f32 %v2876_v52, %v2872_v32  ;;  %v2879_v48 = vadd.f32 %v2877_v13, %v2873_v9  ;;  %v2888_v56 = vmul.f32 %v2887_v11, %v9333_v16  ;;  %v2889_v62 = vmul.f32 %v2887_v11, %v9334_v55 }
 0x27e   : > { %v2894_v4 = vmul.f32 %v2893_v40, %v9335_v38  ;;  %v2895_v21 = vmul.f32 %v2893_v40, %v9336_v50  ;;  %v2899_v63 = vstv %s8008_s5  ;;  %v2903_v43 = vstv %s8010_s19  ;;  %s8092_s5 = sld [smem:[#allocation2 + $0x1d9]]  ;;  %s8094_s19 = sld [smem:[#allocation2 + $0x1da]] }
 0x27f   : > { %v2884_v42 = vadd.f32 %v2882_v24, %v2878_v51  ;;  %v2885_v29 = vadd.f32 %v2883_v8, %v2879_v48  ;;  %v2904_v37 = vmul.f32 %v2903_v43, %v6416_v60  ;;  %v2905_v36 = vmul.f32 %v2903_v43, %v6419_v12 }
 0x280   : > { %v2907_v31 = vstv %s8014_s17  ;;  %v2913_v1 = vstv %s8016_s23  ;;  %v2919_v26 = vstv %s8020_s6  ;;  %v2925_v18 = vstv %s8022_s25  ;;  %s8102_s17 = sld [smem:[#allocation2 + $0x1db]]  ;;  %s8104_s23 = sld [smem:[#allocation2 + $0x1dc]] }
 0x281   : > { %v2890_v20 = vadd.f32 %v2888_v56, %v2884_v42  ;;  %v2891_v27 = vadd.f32 %v2889_v62, %v2885_v29  ;;  %v2908_v34 = vmul.f32 %v2907_v31, %v6422_v22  ;;  %v2909_v33 = vmul.f32 %v2907_v31, %v6425_v7  ;;  %s8108_s6 = sld [smem:[#allocation2 + $0x1f0]]  ;;  %s8110_s25 = sld [smem:[#allocation2 + $0x1dd]] }
 0x282   : > { %v2914_v19 = vmul.f32 %v2913_v1, %v6428_v59  ;;  %v2915_v49 = vmul.f32 %v2913_v1, %v6433_v10  ;;  %v2920_v28 = vmul.f32 %v2919_v26, %v6436_v2  ;;  %v2921_v14 = vmul.f32 %v2919_v26, %v6439_v3 }
 0x283   : > { %v2896_v46 = vadd.f32 %v2894_v4, %v2890_v20  ;;  %v2897_v30 = vadd.f32 %v2895_v21, %v2891_v27  ;;  %v2910_v15 = vadd.f32 %v2908_v34, %v2904_v37  ;;  %v2911_v61 = vadd.f32 %v2909_v33, %v2905_v36 }
 0x284   : > { %v2926_v45 = vmul.f32 %v2925_v18, %v6442_v54  ;;  %v2927_v25 = vmul.f32 %v2925_v18, %v6447_v0  ;;  %v2931_v41 = vstv %s8036_s8  ;;  %v2937_v39 = vstv %s8038_s29  ;;  %s8118_s8 = sld [smem:[#allocation2 + $0x1de]]  ;;  %s8120_s29 = sld [smem:[#allocation2 + $0x1df]] }
 0x285   : > { %v8074_v58 = vadd.f32 %v2899_v63, %v2896_v46  ;;  %v8076_v5 = vadd.f32 %v2899_v63, %v2897_v30  ;;  %v2916_v52 = vadd.f32 %v2914_v19, %v2910_v15  ;;  %v2917_v13 = vadd.f32 %v2915_v49, %v2911_v61 }
 0x286   : > { %v2932_v32 = vmul.f32 %v2931_v41, %v6450_v44  ;;  %v2933_v9 = vmul.f32 %v2931_v41, %v9332_v47  ;;  %v2938_v24 = vmul.f32 %v2937_v39, %v9333_v16  ;;  %v2939_v8 = vmul.f32 %v2937_v39, %v9334_v55 }
 0x287   : > { %v2922_v11 = vadd.f32 %v2920_v28, %v2916_v52  ;;  %v2923_v40 = vadd.f32 %v2921_v14, %v2917_v13  ;;  %v2943_v51 = vstv %s8048_s4  ;;  %v2949_v48 = vstv %s8050_s27  ;;  %s8132_s4 = sld [smem:[#allocation2 + $0x1e0]]  ;;  %s8134_s27 = sld [smem:[#allocation2 + $0x1e1]] }
 0x288   : > { %v2944_v56 = vmul.f32 %v2943_v51, %v9335_v38  ;;  %v2945_v62 = vmul.f32 %v2943_v51, %v9336_v50  ;;  %v2953_v4 = vstv %s8056_s3  ;;  %v2957_v21 = vstv %s8058_s22  ;;  %s8142_s3 = sld [smem:[#allocation2 + $0x1e3]]  ;;  %s8144_s22 = sld [smem:[#allocation2 + $0x1e4]] }
 0x289   : > { %v2928_v63 = vadd.f32 %v2926_v45, %v2922_v11  ;;  %v2929_v43 = vadd.f32 %v2927_v25, %v2923_v40  ;;  %v2954_v42 = vmul.f32 %v2953_v4, %v6416_v60  ;;  %v2955_v29 = vmul.f32 %v2953_v4, %v6419_v12 }
 0x28a   : > { %v2958_v37 = vmul.f32 %v2957_v21, %v6422_v22  ;;  %v2959_v36 = vmul.f32 %v2957_v21, %v6425_v7  ;;  %v2963_v31 = vstv %s8066_s7  ;;  %v2969_v1 = vstv %s8068_s18  ;;  %s8148_s7 = sld [smem:[#allocation2 + $0x1e2]]  ;;  %s8150_s18 = sld [smem:[#allocation2 + $0x1f1]] }
 0x28b   : > { %v2934_v26 = vadd.f32 %v2932_v32, %v2928_v63  ;;  %v2935_v18 = vadd.f32 %v2933_v9, %v2929_v43  ;;  %v2964_v20 = vmul.f32 %v2963_v31, %v6428_v59  ;;  %v2965_v27 = vmul.f32 %v2963_v31, %v6433_v10 }
 0x28c   : > { %v2960_v34 = vadd.f32 %v2958_v37, %v2954_v42  ;;  %v2961_v33 = vadd.f32 %v2959_v36, %v2955_v29  ;;  %v2970_v19 = vmul.f32 %v2969_v1, %v6436_v2  ;;  %v2971_v49 = vmul.f32 %v2969_v1, %v6439_v3 }
 0x28d   : > { %v2940_v28 = vadd.f32 %v2938_v24, %v2934_v26  ;;  %v2941_v14 = vadd.f32 %v2939_v8, %v2935_v18  ;;  %v2975_v46 = vstv %s8078_s15  ;;  %v2981_v30 = vstv %s8080_s16  ;;  %s8160_s15 = sld [smem:[#allocation2 + $0x1e5]]  ;;  %s8162_s16 = sld [smem:[#allocation2 + $0x1e6]] }
 0x28e   : > { %v2966_v15 = vadd.f32 %v2964_v20, %v2960_v34  ;;  %v2967_v61 = vadd.f32 %v2965_v27, %v2961_v33  ;;  %v2976_v45 = vmul.f32 %v2975_v46, %v6442_v54  ;;  %v2977_v25 = vmul.f32 %v2975_v46, %v6447_v0 }
 0x28f   : > { %v2946_v41 = vadd.f32 %v2944_v56, %v2940_v28  ;;  %v2947_v39 = vadd.f32 %v2945_v62, %v2941_v14  ;;  %v2982_v52 = vmul.f32 %v2981_v30, %v6450_v44  ;;  %v2983_v13 = vmul.f32 %v2981_v30, %v9332_v47 }
 0x290   : > { %v2972_v32 = vadd.f32 %v2970_v19, %v2966_v15  ;;  %v2973_v9 = vadd.f32 %v2971_v49, %v2967_v61  ;;  %v2987_v24 = vstv %s8092_s5  ;;  %v2993_v8 = vstv %s8094_s19  ;;  %s8174_s5 = sld [smem:[#allocation2 + $0x1e7]]  ;;  %s8176_s19 = sld [smem:[#allocation2 + $0x1e8]] }
 0x291   : > { %v8126_v11 = vadd.f32 %v2949_v48, %v2946_v41  ;;  %v8128_v40 = vadd.f32 %v2949_v48, %v2947_v39  ;;  %v2988_v51 = vmul.f32 %v2987_v24, %v9333_v16  ;;  %v2989_v56 = vmul.f32 %v2987_v24, %v9334_v55 }
 0x292   : > { %v2978_v62 = vadd.f32 %v2976_v45, %v2972_v32  ;;  %v2979_v4 = vadd.f32 %v2977_v25, %v2973_v9  ;;  %v2994_v21 = vmul.f32 %v2993_v8, %v9335_v38  ;;  %v2995_v63 = vmul.f32 %v2993_v8, %v9336_v50 }
 0x293   : > { %v2999_v43 = vstv %s8108_s6  ;;  %v3003_v42 = vstv %s8102_s17  ;;  %v3007_v29 = vstv %s8104_s23  ;;  %v3013_v48 = vstv %s8110_s25  ;;  %s8186_s17 = sld [smem:[#allocation2 + $0x1e9]]  ;;  %s8188_s23 = sld [smem:[#allocation2 + $0x1ea]] }
 0x294   : > { %v2984_v37 = vadd.f32 %v2982_v52, %v2978_v62  ;;  %v2985_v36 = vadd.f32 %v2983_v13, %v2979_v4  ;;  %v3004_v31 = vmul.f32 %v3003_v42, %v6416_v60  ;;  %v3005_v1 = vmul.f32 %v3003_v42, %v6419_v12  ;;  %s8196_s6 = sld [smem:[#allocation2 + $0x1f2]]  ;;  %s8208_s25 = sld [smem:[#allocation2 + $0x1f3]] }
 0x295   : > { %v3008_v26 = vmul.f32 %v3007_v29, %v6422_v22  ;;  %v3009_v18 = vmul.f32 %v3007_v29, %v6425_v7  ;;  %v3014_v20 = vmul.f32 %v3013_v48, %v6428_v59  ;;  %v3015_v27 = vmul.f32 %v3013_v48, %v6433_v10 }
 0x296   : > { %v2990_v34 = vadd.f32 %v2988_v51, %v2984_v37  ;;  %v2991_v33 = vadd.f32 %v2989_v56, %v2985_v36  ;;  %v3019_v19 = vstv %s8118_s8  ;;  %v3025_v49 = vstv %s8120_s29  ;;  %s8212_s8 = sld [smem:[#allocation2 + $0x1f4]]  ;;  %s8214_s29 = sld [smem:[#allocation2 + $0x1f5]] }
 0x297   : > { %v3010_v28 = vadd.f32 %v3008_v26, %v3004_v31  ;;  %v3011_v14 = vadd.f32 %v3009_v18, %v3005_v1  ;;  %v3020_v46 = vmul.f32 %v3019_v19, %v6436_v2  ;;  %v3021_v30 = vmul.f32 %v3019_v19, %v6439_v3 }
 0x298   : > { %v2996_v15 = vadd.f32 %v2994_v21, %v2990_v34  ;;  %v2997_v61 = vadd.f32 %v2995_v63, %v2991_v33  ;;  %v3026_v45 = vmul.f32 %v3025_v49, %v6442_v54  ;;  %v3027_v25 = vmul.f32 %v3025_v49, %v6447_v0 }
 0x299   : > { %v3016_v41 = vadd.f32 %v3014_v20, %v3010_v28  ;;  %v3017_v39 = vadd.f32 %v3015_v27, %v3011_v14  ;;  %v3031_v52 = vstv %s8132_s4  ;;  %v3037_v13 = vstv %s8134_s27  ;;  %s8224_s4 = sld [smem:[#allocation2 + $0x1f6]]  ;;  %s8226_s27 = sld [smem:[#allocation2 + $0x1f7]] }
 0x29a   : > { %v8168_v32 = vadd.f32 %v2999_v43, %v2996_v15  ;;  %v8170_v9 = vadd.f32 %v2999_v43, %v2997_v61  ;;  %v3032_v24 = vmul.f32 %v3031_v52, %v6450_v44  ;;  %v3033_v8 = vmul.f32 %v3031_v52, %v9332_v47 }
 0x29b   : > { %v3022_v51 = vadd.f32 %v3020_v46, %v3016_v41  ;;  %v3023_v56 = vadd.f32 %v3021_v30, %v3017_v39  ;;  %v3038_v62 = vmul.f32 %v3037_v13, %v9333_v16  ;;  %v3039_v4 = vmul.f32 %v3037_v13, %v9334_v55 }
 0x29c   : > { %v3043_v21 = vstv %s8148_s7  ;;  %v3049_v63 = vstv %s8150_s18  ;;  %v3053_v43 = vstv %s8142_s3  ;;  %v3057_v42 = vstv %s8144_s22  ;;  %s8252_s3 = sld [smem:[#allocation2 + $0x1f8]]  ;;  %s8254_s22 = sld [smem:[#allocation2 + $0x1f9]] }
 0x29d   : > { %v3028_v29 = vadd.f32 %v3026_v45, %v3022_v51  ;;  %v3029_v48 = vadd.f32 %v3027_v25, %v3023_v56  ;;  %v3044_v37 = vmul.f32 %v3043_v21, %v9335_v38  ;;  %v3045_v36 = vmul.f32 %v3043_v21, %v9336_v50  ;;  %s8270_s7 = sld [smem:[#allocation2 + $0x1fa]]  ;;  %s8272_s18 = sld [smem:[#allocation2 + $0x233]] }
 0x29e   : > { %v3054_v31 = vmul.f32 %v3053_v43, %v6416_v60  ;;  %v3055_v1 = vmul.f32 %v3053_v43, %v6419_v12  ;;  %v3058_v26 = vmul.f32 %v3057_v42, %v6422_v22  ;;  %v3059_v18 = vmul.f32 %v3057_v42, %v6425_v7 }
 0x29f   : > { %v3034_v20 = vadd.f32 %v3032_v24, %v3028_v29  ;;  %v3035_v27 = vadd.f32 %v3033_v8, %v3029_v48  ;;  %v3063_v34 = vstv %s8160_s15  ;;  %v3069_v33 = vstv %s8162_s16  ;;  %s8278_s15 = sld [smem:[#allocation2 + $0x1fb]]  ;;  %s8280_s16 = sld [smem:[#allocation2 + $0x1fc]] }
 0x2a0   : > { %v3060_v19 = vadd.f32 %v3058_v26, %v3054_v31  ;;  %v3061_v49 = vadd.f32 %v3059_v18, %v3055_v1  ;;  %v3064_v28 = vmul.f32 %v3063_v34, %v6428_v59  ;;  %v3065_v14 = vmul.f32 %v3063_v34, %v6433_v10 }
 0x2a1   : > { %v3040_v46 = vadd.f32 %v3038_v62, %v3034_v20  ;;  %v3041_v30 = vadd.f32 %v3039_v4, %v3035_v27  ;;  %v3070_v15 = vmul.f32 %v3069_v33, %v6436_v2  ;;  %v3071_v61 = vmul.f32 %v3069_v33, %v6439_v3 }
 0x2a2   : > { %v3066_v45 = vadd.f32 %v3064_v28, %v3060_v19  ;;  %v3067_v25 = vadd.f32 %v3065_v14, %v3061_v49  ;;  %v3075_v41 = vstv %s8174_s5  ;;  %v3081_v39 = vstv %s8176_s19  ;;  %s8288_s5 = sld [smem:[#allocation2 + $0x1fd]]  ;;  %s8290_s19 = sld [smem:[#allocation2 + $0x1fe]] }
 0x2a3   : > { %v3046_v52 = vadd.f32 %v3044_v37, %v3040_v46  ;;  %v3047_v13 = vadd.f32 %v3045_v36, %v3041_v30  ;;  %v3076_v24 = vmul.f32 %v3075_v41, %v6442_v54  ;;  %v3077_v8 = vmul.f32 %v3075_v41, %v6447_v0 }
 0x2a4   : > { %v3072_v51 = vadd.f32 %v3070_v15, %v3066_v45  ;;  %v3073_v56 = vadd.f32 %v3071_v61, %v3067_v25  ;;  %v3082_v62 = vmul.f32 %v3081_v39, %v6450_v44  ;;  %v3083_v4 = vmul.f32 %v3081_v39, %v9332_v47 }
 0x2a5   : > { %v3050_v21 = vadd.f32 %v3049_v63, %v3046_v52  ;;  %v3051_v43 = vadd.f32 %v3049_v63, %v3047_v13  ;;  %v3087_v42 = vstv %s8186_s17  ;;  %v3093_v29 = vstv %s8188_s23  ;;  %s8302_s17 = sld [smem:[#allocation2 + $0x1ff]]  ;;  %s8304_s23 = sld [smem:[#allocation2 + $0x200]] }
 0x2a6   : > { %v3078_v48 = vadd.f32 %v3076_v24, %v3072_v51  ;;  %v3079_v37 = vadd.f32 %v3077_v8, %v3073_v56  ;;  %v3088_v36 = vmul.f32 %v3087_v42, %v9333_v16  ;;  %v3089_v31 = vmul.f32 %v3087_v42, %v9334_v55 }
 0x2a7   : > { %v3094_v1 = vmul.f32 %v3093_v29, %v9335_v38  ;;  %v3095_v26 = vmul.f32 %v3093_v29, %v9336_v50  ;;  %v3099_v18 = vstv %s8196_s6  ;;  %v8222_v20 = vmax.f32 %v7928_v35, 0.0  ;;  %s8316_s6 = sld [smem:[#allocation2 + $0x201]] }
 0x2a8   : > { %v3084_v63 = vadd.f32 %v3082_v62, %v3078_v48  ;;  %v3085_v27 = vadd.f32 %v3083_v4, %v3079_v37  ;;  %v8229_v34 = vmax.f32 %v7930_v53, 0.0  ;;  %v8232_v33 = vmax.f32 %v7980_v17, 0.0 }
 0x2a9   : > { %v8235_v19 = vmax.f32 %v7982_v23, 0.0  ;;  %v8238_v49 = vmax.f32 %v8030_v57, 0.0  ;;  %v8241_v35 = vmax.f32 %v8032_v6, 0.0  ;;  %v8244_v28 = vmax.f32 %v8074_v58, 0.0 }
 0x2aa   : > { %v3090_v14 = vadd.f32 %v3088_v36, %v3084_v63  ;;  %v3091_v46 = vadd.f32 %v3089_v31, %v3085_v27  ;;  %v8247_v53 = vmax.f32 %v8076_v5, 0.0  ;;  %v8250_v17 = vmax.f32 %v8126_v11, 0.0 }
 0x2ab   : > { %v8257_v23 = vmax.f32 %v8128_v40, 0.0  ;;  %v8260_v57 = vmax.f32 %v8168_v32, 0.0  ;;  %v8263_v6 = vmax.f32 %v8170_v9, 0.0  ;;  %v8265_v58 = vmax.f32 %v3050_v21, 0.0 }
 0x2ac   : > { %v3096_v5 = vadd.f32 %v3094_v1, %v3090_v14  ;;  %v3097_v30 = vadd.f32 %v3095_v26, %v3091_v46  ;;  %v8267_v11 = vmax.f32 %v3051_v43, 0.0  ;;  %v3119_v15 = vstv %s8208_s25  ;;  %s8318_s25 = sld [smem:[#allocation2 + $0x202]] }
 0x2ad   : > { %v3120_v40 = vmul.f32 %v3119_v15, %v8222_v20  ;;  %v3121_v32 = vmul.f32 %v3119_v15, %v8229_v34  ;;  %v3123_v61 = vstv %s8212_s8  ;;  %v3129_v9 = vstv %s8214_s29  ;;  %s8326_s8 = sld [smem:[#allocation2 + $0x203]]  ;;  %s8328_s29 = sld [smem:[#allocation2 + $0x204]] }
 0x2ae   : > { %v3100_v45 = vadd.f32 %v3099_v18, %v3096_v5  ;;  %v3101_v25 = vadd.f32 %v3099_v18, %v3097_v30  ;;  %v3124_v41 = vmul.f32 %v3123_v61, %v8232_v33  ;;  %v3125_v39 = vmul.f32 %v3123_v61, %v8235_v19 }
 0x2af   : > { %v3130_v52 = vmul.f32 %v3129_v9, %v8238_v49  ;;  %v3131_v13 = vmul.f32 %v3129_v9, %v8241_v35  ;;  %v3135_v24 = vstv %s8224_s4  ;;  %v3141_v8 = vstv %s8226_s27  ;;  %s8332_s4 = sld [smem:[#allocation2 + $0x234]]  ;;  %s8334_s27 = sld [smem:[#allocation2 + $0x205]] }
 0x2b0   : > { %v8292_v51 = vmax.f32 %v3100_v45, 0.0  ;;  %v8294_v56 = vmax.f32 %v3101_v25, 0.0  ;;  %v3126_v62 = vadd.f32 %v3124_v41, %v3120_v40  ;;  %v3127_v4 = vadd.f32 %v3125_v39, %v3121_v32 }
 0x2b1   : > { %v3136_v21 = vmul.f32 %v3135_v24, %v8244_v28  ;;  %v3137_v43 = vmul.f32 %v3135_v24, %v8247_v53  ;;  %v3142_v42 = vmul.f32 %v3141_v8, %v8250_v17  ;;  %v3143_v29 = vmul.f32 %v3141_v8, %v8257_v23 }
 0x2b2   : > { %v3132_v48 = vadd.f32 %v3130_v52, %v3126_v62  ;;  %v3133_v37 = vadd.f32 %v3131_v13, %v3127_v4  ;;  %v3147_v36 = vstv %s8252_s3  ;;  %v3153_v31 = vstv %s8254_s22  ;;  %s8342_s3 = sld [smem:[#allocation2 + $0x206]]  ;;  %s8344_s22 = sld [smem:[#allocation2 + $0x207]] }
 0x2b3   : > { %v3148_v1 = vmul.f32 %v3147_v36, %v8260_v57  ;;  %v3149_v26 = vmul.f32 %v3147_v36, %v8263_v6  ;;  %v3154_v18 = vmul.f32 %v3153_v31, %v8265_v58  ;;  %v3155_v63 = vmul.f32 %v3153_v31, %v8267_v11 }
 0x2b4   : > { %v3138_v27 = vadd.f32 %v3136_v21, %v3132_v48  ;;  %v3139_v14 = vadd.f32 %v3137_v43, %v3133_v37  ;;  %v3159_v46 = vstv %s8270_s7  ;;  %v3165_v5 = vstv %s8272_s18  ;;  %s8356_s7 = sld [smem:[#allocation2 + $0x208]]  ;;  %s8358_s18 = sld [smem:[#allocation2 + $0x209]] }
 0x2b5   : > { %v3160_v30 = vmul.f32 %v3159_v46, %v8292_v51  ;;  %v3161_v15 = vmul.f32 %v3159_v46, %v8294_v56  ;;  %v3169_v40 = vstv %s8278_s15  ;;  %v3173_v32 = vstv %s8280_s16  ;;  %s8366_s15 = sld [smem:[#allocation2 + $0x20b]]  ;;  %s8368_s16 = sld [smem:[#allocation2 + $0x20c]] }
 0x2b6   : > { %v3144_v61 = vadd.f32 %v3142_v42, %v3138_v27  ;;  %v3145_v9 = vadd.f32 %v3143_v29, %v3139_v14  ;;  %v3170_v45 = vmul.f32 %v3169_v40, %v8222_v20  ;;  %v3171_v25 = vmul.f32 %v3169_v40, %v8229_v34 }
 0x2b7   : > { %v3174_v41 = vmul.f32 %v3173_v32, %v8232_v33  ;;  %v3175_v39 = vmul.f32 %v3173_v32, %v8235_v19  ;;  %v3179_v52 = vstv %s8288_s5  ;;  %v3185_v13 = vstv %s8290_s19  ;;  %s8372_s5 = sld [smem:[#allocation2 + $0x20a]]  ;;  %s8374_s19 = sld [smem:[#allocation2 + $0x235]] }
 0x2b8   : > { %v3150_v24 = vadd.f32 %v3148_v1, %v3144_v61  ;;  %v3151_v8 = vadd.f32 %v3149_v26, %v3145_v9  ;;  %v3180_v62 = vmul.f32 %v3179_v52, %v8238_v49  ;;  %v3181_v4 = vmul.f32 %v3179_v52, %v8241_v35 }
 0x2b9   : > { %v3176_v21 = vadd.f32 %v3174_v41, %v3170_v45  ;;  %v3177_v43 = vadd.f32 %v3175_v39, %v3171_v25  ;;  %v3186_v42 = vmul.f32 %v3185_v13, %v8244_v28  ;;  %v3187_v29 = vmul.f32 %v3185_v13, %v8247_v53 }
 0x2ba   : > { %v3156_v48 = vadd.f32 %v3154_v18, %v3150_v24  ;;  %v3157_v37 = vadd.f32 %v3155_v63, %v3151_v8  ;;  %v3191_v36 = vstv %s8302_s17  ;;  %v3197_v31 = vstv %s8304_s23  ;;  %s8384_s17 = sld [smem:[#allocation2 + $0x20d]]  ;;  %s8386_s23 = sld [smem:[#allocation2 + $0x20e]] }
 0x2bb   : > { %v3182_v1 = vadd.f32 %v3180_v62, %v3176_v21  ;;  %v3183_v26 = vadd.f32 %v3181_v4, %v3177_v43  ;;  %v3192_v27 = vmul.f32 %v3191_v36, %v8250_v17  ;;  %v3193_v14 = vmul.f32 %v3191_v36, %v8257_v23 }
 0x2bc   : > { %v3162_v46 = vadd.f32 %v3160_v30, %v3156_v48  ;;  %v3163_v40 = vadd.f32 %v3161_v15, %v3157_v37  ;;  %v3198_v32 = vmul.f32 %v3197_v31, %v8260_v57  ;;  %v3199_v18 = vmul.f32 %v3197_v31, %v8263_v6 }
 0x2bd   : > { %v3188_v63 = vadd.f32 %v3186_v42, %v3182_v1  ;;  %v3189_v61 = vadd.f32 %v3187_v29, %v3183_v26  ;;  %v3203_v9 = vstv %s8316_s6  ;;  %v3209_v45 = vstv %s8318_s25  ;;  %s8398_s6 = sld [smem:[#allocation2 + $0x20f]]  ;;  %s8400_s25 = sld [smem:[#allocation2 + $0x210]] }
 0x2be   : > { %v8350_v25 = vadd.f32 %v3165_v5, %v3162_v46  ;;  %v8352_v41 = vadd.f32 %v3165_v5, %v3163_v40  ;;  %v3204_v39 = vmul.f32 %v3203_v9, %v8265_v58  ;;  %v3205_v30 = vmul.f32 %v3203_v9, %v8267_v11 }
 0x2bf   : > { %v3194_v15 = vadd.f32 %v3192_v27, %v3188_v63  ;;  %v3195_v52 = vadd.f32 %v3193_v14, %v3189_v61  ;;  %v3210_v13 = vmul.f32 %v3209_v45, %v8292_v51  ;;  %v3211_v24 = vmul.f32 %v3209_v45, %v8294_v56 }
 0x2c0   : > { %v3215_v8 = vstv %s8332_s4  ;;  %v3219_v62 = vstv %s8326_s8  ;;  %v3223_v4 = vstv %s8328_s29  ;;  %v3229_v5 = vstv %s8334_s27  ;;  %s8410_s8 = sld [smem:[#allocation2 + $0x211]]  ;;  %s8412_s29 = sld [smem:[#allocation2 + $0x212]] }
 0x2c1   : > { %v3200_v21 = vadd.f32 %v3198_v32, %v3194_v15  ;;  %v3201_v43 = vadd.f32 %v3199_v18, %v3195_v52  ;;  %v3220_v42 = vmul.f32 %v3219_v62, %v8222_v20  ;;  %v3221_v29 = vmul.f32 %v3219_v62, %v8229_v34  ;;  %s8420_s4 = sld [smem:[#allocation2 + $0x236]]  ;;  %s8422_s27 = sld [smem:[#allocation2 + $0x213]] }
 0x2c2   : > { %v3224_v48 = vmul.f32 %v3223_v4, %v8232_v33  ;;  %v3225_v37 = vmul.f32 %v3223_v4, %v8235_v19  ;;  %v3230_v36 = vmul.f32 %v3229_v5, %v8238_v49  ;;  %v3231_v31 = vmul.f32 %v3229_v5, %v8241_v35 }
 0x2c3   : > { %v3206_v1 = vadd.f32 %v3204_v39, %v3200_v21  ;;  %v3207_v26 = vadd.f32 %v3205_v30, %v3201_v43  ;;  %v3235_v27 = vstv %s8342_s3  ;;  %v3241_v14 = vstv %s8344_s22  ;;  %s8426_s3 = sld [smem:[#allocation2 + $0x214]]  ;;  %s8428_s22 = sld [smem:[#allocation2 + $0x215]] }
 0x2c4   : > { %v3226_v46 = vadd.f32 %v3224_v48, %v3220_v42  ;;  %v3227_v40 = vadd.f32 %v3225_v37, %v3221_v29  ;;  %v3236_v32 = vmul.f32 %v3235_v27, %v8244_v28  ;;  %v3237_v18 = vmul.f32 %v3235_v27, %v8247_v53 }
 0x2c5   : > { %v3212_v63 = vadd.f32 %v3210_v13, %v3206_v1  ;;  %v3213_v61 = vadd.f32 %v3211_v24, %v3207_v26  ;;  %v3242_v9 = vmul.f32 %v3241_v14, %v8250_v17  ;;  %v3243_v45 = vmul.f32 %v3241_v14, %v8257_v23 }
 0x2c6   : > { %v3232_v39 = vadd.f32 %v3230_v36, %v3226_v46  ;;  %v3233_v30 = vadd.f32 %v3231_v31, %v3227_v40  ;;  %v3247_v15 = vstv %s8356_s7  ;;  %v3253_v52 = vstv %s8358_s18  ;;  %s8432_s7 = sld [smem:[#allocation2 + $0x216]]  ;;  %s8434_s18 = sld [smem:[#allocation2 + $0x217]] }
 0x2c7   : > { %v8392_v62 = vadd.f32 %v3215_v8, %v3212_v63  ;;  %v8394_v4 = vadd.f32 %v3215_v8, %v3213_v61  ;;  %v3248_v5 = vmul.f32 %v3247_v15, %v8260_v57  ;;  %v3249_v13 = vmul.f32 %v3247_v15, %v8263_v6 }
 0x2c8   : > { %v3238_v24 = vadd.f32 %v3236_v32, %v3232_v39  ;;  %v3239_v21 = vadd.f32 %v3237_v18, %v3233_v30  ;;  %v3254_v43 = vmul.f32 %v3253_v52, %v8265_v58  ;;  %v3255_v42 = vmul.f32 %v3253_v52, %v8267_v11 }
 0x2c9   : > { %v3259_v29 = vstv %s8372_s5  ;;  %v3265_v48 = vstv %s8374_s19  ;;  %v3269_v8 = vstv %s8366_s15  ;;  %v3273_v37 = vstv %s8368_s16  ;;  %s8448_s15 = sld [smem:[#allocation2 + $0x218]]  ;;  %s8450_s16 = sld [smem:[#allocation2 + $0x219]] }
 0x2ca   : > { %v3244_v36 = vadd.f32 %v3242_v9, %v3238_v24  ;;  %v3245_v31 = vadd.f32 %v3243_v45, %v3239_v21  ;;  %v3260_v1 = vmul.f32 %v3259_v29, %v8292_v51  ;;  %v3261_v26 = vmul.f32 %v3259_v29, %v8294_v56  ;;  %s8460_s5 = sld [smem:[#allocation2 + $0x21a]]  ;;  %s8462_s19 = sld [smem:[#allocation2 + $0x237]] }
 0x2cb   : > { %v3270_v27 = vmul.f32 %v3269_v8, %v8222_v20  ;;  %v3271_v14 = vmul.f32 %v3269_v8, %v8229_v34  ;;  %v3274_v46 = vmul.f32 %v3273_v37, %v8232_v33  ;;  %v3275_v40 = vmul.f32 %v3273_v37, %v8235_v19 }
 0x2cc   : > { %v3250_v32 = vadd.f32 %v3248_v5, %v3244_v36  ;;  %v3251_v18 = vadd.f32 %v3249_v13, %v3245_v31  ;;  %v3279_v63 = vstv %s8384_s17  ;;  %v3285_v61 = vstv %s8386_s23  ;;  %s8468_s17 = sld [smem:[#allocation2 + $0x21b]]  ;;  %s8470_s23 = sld [smem:[#allocation2 + $0x21c]] }
 0x2cd   : > { %v3276_v9 = vadd.f32 %v3274_v46, %v3270_v27  ;;  %v3277_v45 = vadd.f32 %v3275_v40, %v3271_v14  ;;  %v3280_v39 = vmul.f32 %v3279_v63, %v8238_v49  ;;  %v3281_v30 = vmul.f32 %v3279_v63, %v8241_v35 }
 0x2ce   : > { %v3256_v15 = vadd.f32 %v3254_v43, %v3250_v32  ;;  %v3257_v52 = vadd.f32 %v3255_v42, %v3251_v18  ;;  %v3286_v5 = vmul.f32 %v3285_v61, %v8244_v28  ;;  %v3287_v13 = vmul.f32 %v3285_v61, %v8247_v53 }
 0x2cf   : > { %v3282_v24 = vadd.f32 %v3280_v39, %v3276_v9  ;;  %v3283_v21 = vadd.f32 %v3281_v30, %v3277_v45  ;;  %v3291_v29 = vstv %s8398_s6  ;;  %v3297_v8 = vstv %s8400_s25  ;;  %s8478_s6 = sld [smem:[#allocation2 + $0x21d]]  ;;  %s8480_s25 = sld [smem:[#allocation2 + $0x21e]] }
 0x2d0   : > { %v3262_v37 = vadd.f32 %v3260_v1, %v3256_v15  ;;  %v3263_v36 = vadd.f32 %v3261_v26, %v3257_v52  ;;  %v3292_v31 = vmul.f32 %v3291_v29, %v8250_v17  ;;  %v3293_v43 = vmul.f32 %v3291_v29, %v8257_v23 }
 0x2d1   : > { %v3288_v42 = vadd.f32 %v3286_v5, %v3282_v24  ;;  %v3289_v27 = vadd.f32 %v3287_v13, %v3283_v21  ;;  %v3298_v14 = vmul.f32 %v3297_v8, %v8260_v57  ;;  %v3299_v46 = vmul.f32 %v3297_v8, %v8263_v6 }
 0x2d2   : > { %v8442_v40 = vadd.f32 %v3265_v48, %v3262_v37  ;;  %v8444_v32 = vadd.f32 %v3265_v48, %v3263_v36  ;;  %v3303_v18 = vstv %s8410_s8  ;;  %v3309_v63 = vstv %s8412_s29  ;;  %s8490_s8 = sld [smem:[#allocation2 + $0x21f]]  ;;  %s8492_s29 = sld [smem:[#allocation2 + $0x220]] }
 0x2d3   : > { %v3294_v1 = vadd.f32 %v3292_v31, %v3288_v42  ;;  %v3295_v26 = vadd.f32 %v3293_v43, %v3289_v27  ;;  %v3304_v61 = vmul.f32 %v3303_v18, %v8265_v58  ;;  %v3305_v9 = vmul.f32 %v3303_v18, %v8267_v11 }
 0x2d4   : > { %v3310_v45 = vmul.f32 %v3309_v63, %v8292_v51  ;;  %v3311_v48 = vmul.f32 %v3309_v63, %v8294_v56  ;;  %v3315_v39 = vstv %s8420_s4  ;;  %v3319_v30 = vstv %s8422_s27  ;;  %s8504_s4 = sld [smem:[#allocation2 + $0x221]]  ;;  %s8506_s27 = sld [smem:[#allocation2 + $0x222]] }
 0x2d5   : > { %v3300_v15 = vadd.f32 %v3298_v14, %v3294_v1  ;;  %v3301_v52 = vadd.f32 %v3299_v46, %v3295_v26  ;;  %v3320_v5 = vmul.f32 %v3319_v30, %v8222_v20  ;;  %v3321_v13 = vmul.f32 %v3319_v30, %v8229_v34 }
 0x2d6   : > { %v3323_v24 = vstv %s8426_s3  ;;  %v3329_v21 = vstv %s8428_s22  ;;  %v3335_v29 = vstv %s8432_s7  ;;  %v3341_v8 = vstv %s8434_s18  ;;  %s8514_s3 = sld [smem:[#allocation2 + $0x223]]  ;;  %s8516_s22 = sld [smem:[#allocation2 + $0x224]] }
 0x2d7   : > { %v3306_v37 = vadd.f32 %v3304_v61, %v3300_v15  ;;  %v3307_v36 = vadd.f32 %v3305_v9, %v3301_v52  ;;  %v3324_v31 = vmul.f32 %v3323_v24, %v8232_v33  ;;  %v3325_v43 = vmul.f32 %v3323_v24, %v8235_v19  ;;  %s8520_s7 = sld [smem:[#allocation2 + $0x238]]  ;;  %s8522_s18 = sld [smem:[#allocation2 + $0x225]] }
 0x2d8   : > { %v3330_v42 = vmul.f32 %v3329_v21, %v8238_v49  ;;  %v3331_v27 = vmul.f32 %v3329_v21, %v8241_v35  ;;  %v3336_v14 = vmul.f32 %v3335_v29, %v8244_v28  ;;  %v3337_v46 = vmul.f32 %v3335_v29, %v8247_v53 }
 0x2d9   : > { %v3312_v18 = vadd.f32 %v3310_v45, %v3306_v37  ;;  %v3313_v63 = vadd.f32 %v3311_v48, %v3307_v36  ;;  %v3326_v1 = vadd.f32 %v3324_v31, %v3320_v5  ;;  %v3327_v26 = vadd.f32 %v3325_v43, %v3321_v13 }
 0x2da   : > { %v3342_v61 = vmul.f32 %v3341_v8, %v8250_v17  ;;  %v3343_v9 = vmul.f32 %v3341_v8, %v8257_v23  ;;  %v3347_v30 = vstv %s8448_s15  ;;  %v3353_v15 = vstv %s8450_s16  ;;  %s8530_s15 = sld [smem:[#allocation2 + $0x226]]  ;;  %s8532_s16 = sld [smem:[#allocation2 + $0x227]] }
 0x2db   : > { %v8486_v52 = vadd.f32 %v3315_v39, %v3312_v18  ;;  %v8488_v24 = vadd.f32 %v3315_v39, %v3313_v63  ;;  %v3332_v21 = vadd.f32 %v3330_v42, %v3326_v1  ;;  %v3333_v29 = vadd.f32 %v3331_v27, %v3327_v26 }
 0x2dc   : > { %v3348_v45 = vmul.f32 %v3347_v30, %v8260_v57  ;;  %v3349_v48 = vmul.f32 %v3347_v30, %v8263_v6  ;;  %v3354_v5 = vmul.f32 %v3353_v15, %v8265_v58  ;;  %v3355_v13 = vmul.f32 %v3353_v15, %v8267_v11 }
 0x2dd   : > { %v3338_v8 = vadd.f32 %v3336_v14, %v3332_v21  ;;  %v3339_v37 = vadd.f32 %v3337_v46, %v3333_v29  ;;  %v3359_v39 = vstv %s8460_s5  ;;  %v3365_v36 = vstv %s8462_s19  ;;  %s8544_s5 = sld [smem:[#allocation2 + $0x228]]  ;;  %s8546_s19 = sld [smem:[#allocation2 + $0x229]] }
 0x2de   : > { %v3360_v31 = vmul.f32 %v3359_v39, %v8292_v51  ;;  %v3361_v43 = vmul.f32 %v3359_v39, %v8294_v56  ;;  %v3369_v42 = vstv %s8468_s17  ;;  %v3373_v27 = vstv %s8470_s23  ;;  %s8554_s17 = sld [smem:[#allocation2 + $0x22b]]  ;;  %s8556_s23 = sld [smem:[#allocation2 + $0x22c]] }
 0x2df   : > { %v3344_v18 = vadd.f32 %v3342_v61, %v3338_v8  ;;  %v3345_v63 = vadd.f32 %v3343_v9, %v3339_v37  ;;  %v3370_v1 = vmul.f32 %v3369_v42, %v8222_v20  ;;  %v3371_v14 = vmul.f32 %v3369_v42, %v8229_v34 }
 0x2e0   : > { %v3374_v46 = vmul.f32 %v3373_v27, %v8232_v33  ;;  %v3375_v26 = vmul.f32 %v3373_v27, %v8235_v19  ;;  %v3379_v30 = vstv %s8478_s6  ;;  %v3385_v15 = vstv %s8480_s25  ;;  %s8560_s6 = sld [smem:[#allocation2 + $0x22a]]  ;;  %s8562_s25 = sld [smem:[#allocation2 + $0x239]] }
 0x2e1   : > { %v3350_v21 = vadd.f32 %v3348_v45, %v3344_v18  ;;  %v3351_v29 = vadd.f32 %v3349_v48, %v3345_v63  ;;  %v3380_v61 = vmul.f32 %v3379_v30, %v8238_v49  ;;  %v3381_v9 = vmul.f32 %v3379_v30, %v8241_v35 }
 0x2e2   : > { %v3376_v8 = vadd.f32 %v3374_v46, %v3370_v1  ;;  %v3377_v37 = vadd.f32 %v3375_v26, %v3371_v14  ;;  %v3386_v39 = vmul.f32 %v3385_v15, %v8244_v28  ;;  %v3387_v42 = vmul.f32 %v3385_v15, %v8247_v53 }
 0x2e3   : > { %v3356_v27 = vadd.f32 %v3354_v5, %v3350_v21  ;;  %v3357_v50 = vadd.f32 %v3355_v13, %v3351_v29  ;;  %v3391_v45 = vstv %s8490_s8  ;;  %v3397_v48 = vstv %s8492_s29  ;;  %s8572_s8 = sld [smem:[#allocation2 + $0x22d]]  ;;  %s8574_s29 = sld [smem:[#allocation2 + $0x22e]] }
 0x2e4   : > { %v3382_v18 = vadd.f32 %v3380_v61, %v3376_v8  ;;  %v3383_v63 = vadd.f32 %v3381_v9, %v3377_v37  ;;  %v3392_v30 = vmul.f32 %v3391_v45, %v8250_v17  ;;  %v3393_v38 = vmul.f32 %v3391_v45, %v8257_v23 }
 0x2e5   : > { %v3362_v1 = vadd.f32 %v3360_v31, %v3356_v27  ;;  %v3363_v14 = vadd.f32 %v3361_v43, %v3357_v50  ;;  %v3398_v46 = vmul.f32 %v3397_v48, %v8260_v57  ;;  %v3399_v5 = vmul.f32 %v3397_v48, %v8263_v6 }
 0x2e6   : > { %v3388_v13 = vadd.f32 %v3386_v39, %v3382_v18  ;;  %v3389_v26 = vadd.f32 %v3387_v42, %v3383_v63  ;;  %v3403_v15 = vstv %s8504_s4  ;;  %v3409_v21 = vstv %s8506_s27  ;;  %s8586_s4 = sld [smem:[#allocation2 + $0x22f]]  ;;  %s8588_s27 = sld [smem:[#allocation2 + $0x230]] }
 0x2e7   : > { %v8538_v29 = vadd.f32 %v3365_v36, %v3362_v1  ;;  %v8540_v61 = vadd.f32 %v3365_v36, %v3363_v14  ;;  %v3404_v9 = vmul.f32 %v3403_v15, %v8265_v58  ;;  %v3405_v50 = vmul.f32 %v3403_v15, %v8267_v11 }
 0x2e8   : > { %v3394_v31 = vadd.f32 %v3392_v30, %v3388_v13  ;;  %v3395_v43 = vadd.f32 %v3393_v38, %v3389_v26  ;;  %v3410_v8 = vmul.f32 %v3409_v21, %v8292_v51  ;;  %v3411_v37 = vmul.f32 %v3409_v21, %v8294_v56 }
 0x2e9   : > { %v3415_v39 = vstv %s8520_s7  ;;  %v3419_v42 = vstv %s8514_s3  ;;  %v3423_v27 = vstv %s8516_s22  ;;  %v3429_v36 = vstv %s8522_s18  ;;  %s8598_s3 = sld [smem:[#allocation2 + $0x231]]  ;;  %s8600_s22 = sld [smem:[#allocation2 + $0x232]] }
 0x2ea   : > { %v3400_v45 = vadd.f32 %v3398_v46, %v3394_v31  ;;  %v3401_v48 = vadd.f32 %v3399_v5, %v3395_v43  ;;  %v3420_v18 = vmul.f32 %v3419_v42, %v8222_v20  ;;  %v3421_v38 = vmul.f32 %v3419_v42, %v8229_v34  ;;  %s8608_s7 = sld [smem:[#allocation2 + $0x23a]]  ;;  %s8620_s18 = sld [smem:[#allocation2 + $0x23b]] }
 0x2eb   : > { %v3424_v63 = vmul.f32 %v3423_v27, %v8232_v33  ;;  %v3425_v30 = vmul.f32 %v3423_v27, %v8235_v19  ;;  %v3430_v1 = vmul.f32 %v3429_v36, %v8238_v49  ;;  %v3431_v14 = vmul.f32 %v3429_v36, %v8241_v35 }
 0x2ec   : > { %v3406_v13 = vadd.f32 %v3404_v9, %v3400_v45  ;;  %v3407_v46 = vadd.f32 %v3405_v50, %v3401_v48  ;;  %v3435_v5 = vstv %s8530_s15  ;;  %v3441_v26 = vstv %s8532_s16  ;;  %s8624_s15 = sld [smem:[#allocation2 + $0x23c]]  ;;  %s8626_s16 = sld [smem:[#allocation2 + $0x23d]] }
 0x2ed   : > { %v3426_v15 = vadd.f32 %v3424_v63, %v3420_v18  ;;  %v3427_v21 = vadd.f32 %v3425_v30, %v3421_v38  ;;  %v3436_v31 = vmul.f32 %v3435_v5, %v8244_v28  ;;  %v3437_v43 = vmul.f32 %v3435_v5, %v8247_v53 }
 0x2ee   : > { %v3412_v42 = vadd.f32 %v3410_v8, %v3406_v13  ;;  %v3413_v27 = vadd.f32 %v3411_v37, %v3407_v46  ;;  %v3442_v36 = vmul.f32 %v3441_v26, %v8250_v17  ;;  %v3443_v9 = vmul.f32 %v3441_v26, %v8257_v23 }
 0x2ef   : > { %v3432_v50 = vadd.f32 %v3430_v1, %v3426_v15  ;;  %v3433_v45 = vadd.f32 %v3431_v14, %v3427_v21  ;;  %v3447_v48 = vstv %s8544_s5  ;;  %v3453_v18 = vstv %s8546_s19  ;;  %s8636_s5 = sld [smem:[#allocation2 + $0x23e]]  ;;  %s8638_s19 = sld [smem:[#allocation2 + $0x23f]] }
 0x2f0   : > { %v8580_v38 = vadd.f32 %v3415_v39, %v3412_v42  ;;  %v8582_v63 = vadd.f32 %v3415_v39, %v3413_v27  ;;  %v3448_v30 = vmul.f32 %v3447_v48, %v8260_v57  ;;  %v3449_v8 = vmul.f32 %v3447_v48, %v8263_v6 }
 0x2f1   : > { %v3438_v37 = vadd.f32 %v3436_v31, %v3432_v50  ;;  %v3439_v13 = vadd.f32 %v3437_v43, %v3433_v45  ;;  %v3454_v1 = vmul.f32 %v3453_v18, %v8265_v58  ;;  %v3455_v14 = vmul.f32 %v3453_v18, %v8267_v11 }
 0x2f2   : > { %v3459_v46 = vstv %s8560_s6  ;;  %v3465_v5 = vstv %s8562_s25  ;;  %v3469_v39 = vstv %s8554_s17  ;;  %v3473_v26 = vstv %s8556_s23  ;;  %s8664_s17 = sld [smem:[#allocation2 + $0x240]]  ;;  %s8666_s23 = sld [smem:[#allocation2 + $0x241]] }
 0x2f3   : > { %v3444_v15 = vadd.f32 %v3442_v36, %v3438_v37  ;;  %v3445_v21 = vadd.f32 %v3443_v9, %v3439_v13  ;;  %v3460_v42 = vmul.f32 %v3459_v46, %v8292_v51  ;;  %v3461_v27 = vmul.f32 %v3459_v46, %v8294_v56  ;;  %s8682_s6 = sld [smem:[#allocation2 + $0x242]]  ;;  %s8684_s25 = sld [smem:[#allocation2 + $0x27b]] }
 0x2f4   : > { %v3470_v31 = vmul.f32 %v3469_v39, %v8222_v20  ;;  %v3471_v43 = vmul.f32 %v3469_v39, %v8229_v34  ;;  %v3474_v50 = vmul.f32 %v3473_v26, %v8232_v33  ;;  %v3475_v45 = vmul.f32 %v3473_v26, %v8235_v19 }
 0x2f5   : > { %v3450_v48 = vadd.f32 %v3448_v30, %v3444_v15  ;;  %v3451_v36 = vadd.f32 %v3449_v8, %v3445_v21  ;;  %v3479_v9 = vstv %s8572_s8  ;;  %v3485_v18 = vstv %s8574_s29  ;;  %s8690_s8 = sld [smem:[#allocation2 + $0x243]]  ;;  %s8692_s29 = sld [smem:[#allocation2 + $0x244]] }
 0x2f6   : > { %v3476_v37 = vadd.f32 %v3474_v50, %v3470_v31  ;;  %v3477_v13 = vadd.f32 %v3475_v45, %v3471_v43  ;;  %v3480_v46 = vmul.f32 %v3479_v9, %v8238_v49  ;;  %v3481_v20 = vmul.f32 %v3479_v9, %v8241_v35 }
 0x2f7   : > { %v3456_v55 = vadd.f32 %v3454_v1, %v3450_v48  ;;  %v3457_v34 = vadd.f32 %v3455_v14, %v3451_v36  ;;  %v3486_v33 = vmul.f32 %v3485_v18, %v8244_v28  ;;  %v3487_v19 = vmul.f32 %v3485_v18, %v8247_v53 }
 0x2f8   : > { %v3482_v30 = vadd.f32 %v3480_v46, %v3476_v37  ;;  %v3483_v8 = vadd.f32 %v3481_v20, %v3477_v13  ;;  %v3491_v39 = vstv %s8586_s4  ;;  %v3497_v26 = vstv %s8588_s27  ;;  %s8700_s4 = sld [smem:[#allocation2 + $0x245]]  ;;  %s8702_s27 = sld [smem:[#allocation2 + $0x246]] }
 0x2f9   : > { %v3462_v15 = vadd.f32 %v3460_v42, %v3456_v55  ;;  %v3463_v21 = vadd.f32 %v3461_v27, %v3457_v34  ;;  %v3492_v31 = vmul.f32 %v3491_v39, %v8250_v17  ;;  %v3493_v49 = vmul.f32 %v3491_v39, %v8257_v23 }
 0x2fa   : > { %v3488_v43 = vadd.f32 %v3486_v33, %v3482_v30  ;;  %v3489_v35 = vadd.f32 %v3487_v19, %v3483_v8  ;;  %v3498_v1 = vmul.f32 %v3497_v26, %v8260_v57  ;;  %v3499_v28 = vmul.f32 %v3497_v26, %v8263_v6 }
 0x2fb   : > { %v3466_v53 = vadd.f32 %v3465_v5, %v3462_v15  ;;  %v3467_v14 = vadd.f32 %v3465_v5, %v3463_v21  ;;  %v3503_v50 = vstv %s8598_s3  ;;  %v3509_v45 = vstv %s8600_s22  ;;  %s8714_s3 = sld [smem:[#allocation2 + $0x247]]  ;;  %s8716_s22 = sld [smem:[#allocation2 + $0x248]] }
 0x2fc   : > { %v3494_v55 = vadd.f32 %v3492_v31, %v3488_v43  ;;  %v3495_v17 = vadd.f32 %v3493_v49, %v3489_v35  ;;  %v3504_v23 = vmul.f32 %v3503_v50, %v8265_v58  ;;  %v3505_v42 = vmul.f32 %v3503_v50, %v8267_v11 }
 0x2fd   : > { %v3510_v57 = vmul.f32 %v3509_v45, %v8292_v51  ;;  %v3511_v6 = vmul.f32 %v3509_v45, %v8294_v56  ;;  %v3515_v27 = vstv %s8608_s7  ;;  %v8634_v48 = vmax.f32 %v8350_v25, 0.0  ;;  %s8728_s7 = sld [smem:[#allocation2 + $0x249]] }
 0x2fe   : > { %v3500_v5 = vadd.f32 %v3498_v1, %v3494_v55  ;;  %v3501_v36 = vadd.f32 %v3499_v28, %v3495_v17  ;;  %v8641_v9 = vmax.f32 %v8352_v41, 0.0  ;;  %v8644_v58 = vmax.f32 %v8392_v62, 0.0 }
 0x2ff   : > { %v8647_v11 = vmax.f32 %v8394_v4, 0.0  ;;  %v8650_v51 = vmax.f32 %v8442_v40, 0.0  ;;  %v8653_v56 = vmax.f32 %v8444_v32, 0.0  ;;  %v8656_v25 = vmax.f32 %v8486_v52, 0.0 }
 0x300   : > { %v3506_v18 = vadd.f32 %v3504_v23, %v3500_v5  ;;  %v3507_v37 = vadd.f32 %v3505_v42, %v3501_v36  ;;  %v8659_v41 = vmax.f32 %v8488_v24, 0.0  ;;  %v8662_v62 = vmax.f32 %v8538_v29, 0.0 }
 0x301   : > { %v8669_v4 = vmax.f32 %v8540_v61, 0.0  ;;  %v8672_v40 = vmax.f32 %v8580_v38, 0.0  ;;  %v8675_v32 = vmax.f32 %v8582_v63, 0.0  ;;  %v8677_v52 = vmax.f32 %v3466_v53, 0.0 }
 0x302   : > { %v3512_v24 = vadd.f32 %v3510_v57, %v3506_v18  ;;  %v3513_v13 = vadd.f32 %v3511_v6, %v3507_v37  ;;  %v8679_v29 = vmax.f32 %v3467_v14, 0.0  ;;  %v3535_v46 = vstv %s8620_s18  ;;  %s8730_s18 = sld [smem:[#allocation2 + $0x24a]] }
 0x303   : > { %v3536_v61 = vmul.f32 %v3535_v46, %v8634_v48  ;;  %v3537_v38 = vmul.f32 %v3535_v46, %v8641_v9  ;;  %v3539_v20 = vstv %s8624_s15  ;;  %v3545_v63 = vstv %s8626_s16  ;;  %s8738_s15 = sld [smem:[#allocation2 + $0x24b]]  ;;  %s8740_s16 = sld [smem:[#allocation2 + $0x24c]] }
 0x304   : > { %v3516_v34 = vadd.f32 %v3515_v27, %v3512_v24  ;;  %v3517_v33 = vadd.f32 %v3515_v27, %v3513_v13  ;;  %v3540_v19 = vmul.f32 %v3539_v20, %v8644_v58  ;;  %v3541_v30 = vmul.f32 %v3539_v20, %v8647_v11 }
 0x305   : > { %v3546_v8 = vmul.f32 %v3545_v63, %v8650_v51  ;;  %v3547_v39 = vmul.f32 %v3545_v63, %v8653_v56  ;;  %v3551_v26 = vstv %s8636_s5  ;;  %v3557_v15 = vstv %s8638_s19  ;;  %s8744_s5 = sld [smem:[#allocation2 + $0x27c]]  ;;  %s8746_s19 = sld [smem:[#allocation2 + $0x24d]] }
 0x306   : > { %v8704_v21 = vmax.f32 %v3516_v34, 0.0  ;;  %v8706_v31 = vmax.f32 %v3517_v33, 0.0  ;;  %v3542_v49 = vadd.f32 %v3540_v19, %v3536_v61  ;;  %v3543_v43 = vadd.f32 %v3541_v30, %v3537_v38 }
 0x307   : > { %v3552_v35 = vmul.f32 %v3551_v26, %v8656_v25  ;;  %v3553_v1 = vmul.f32 %v3551_v26, %v8659_v41  ;;  %v3558_v28 = vmul.f32 %v3557_v15, %v8662_v62  ;;  %v3559_v53 = vmul.f32 %v3557_v15, %v8669_v4 }
 0x308   : > { %v3548_v14 = vadd.f32 %v3546_v8, %v3542_v49  ;;  %v3549_v50 = vadd.f32 %v3547_v39, %v3543_v43  ;;  %v3563_v45 = vstv %s8664_s17  ;;  %v3569_v55 = vstv %s8666_s23  ;;  %s8754_s17 = sld [smem:[#allocation2 + $0x24e]]  ;;  %s8756_s23 = sld [smem:[#allocation2 + $0x24f]] }
 0x309   : > { %v3564_v17 = vmul.f32 %v3563_v45, %v8672_v40  ;;  %v3565_v23 = vmul.f32 %v3563_v45, %v8675_v32  ;;  %v3570_v42 = vmul.f32 %v3569_v55, %v8677_v52  ;;  %v3571_v57 = vmul.f32 %v3569_v55, %v8679_v29 }
 0x30a   : > { %v3554_v6 = vadd.f32 %v3552_v35, %v3548_v14  ;;  %v3555_v27 = vadd.f32 %v3553_v1, %v3549_v50  ;;  %v3575_v5 = vstv %s8682_s6  ;;  %v3581_v36 = vstv %s8684_s25  ;;  %s8768_s6 = sld [smem:[#allocation2 + $0x250]]  ;;  %s8770_s25 = sld [smem:[#allocation2 + $0x251]] }
 0x30b   : > { %v3576_v18 = vmul.f32 %v3575_v5, %v8704_v21  ;;  %v3577_v37 = vmul.f32 %v3575_v5, %v8706_v31  ;;  %v3585_v24 = vstv %s8690_s8  ;;  %v3589_v13 = vstv %s8692_s29  ;;  %s8778_s8 = sld [smem:[#allocation2 + $0x253]]  ;;  %s8780_s29 = sld [smem:[#allocation2 + $0x254]] }
 0x30c   : > { %v3560_v46 = vadd.f32 %v3558_v28, %v3554_v6  ;;  %v3561_v61 = vadd.f32 %v3559_v53, %v3555_v27  ;;  %v3586_v38 = vmul.f32 %v3585_v24, %v8634_v48  ;;  %v3587_v20 = vmul.f32 %v3585_v24, %v8641_v9 }
 0x30d   : > { %v3590_v63 = vmul.f32 %v3589_v13, %v8644_v58  ;;  %v3591_v34 = vmul.f32 %v3589_v13, %v8647_v11  ;;  %v3595_v33 = vstv %s8700_s4  ;;  %v3601_v19 = vstv %s8702_s27  ;;  %s8784_s4 = sld [smem:[#allocation2 + $0x252]]  ;;  %s8786_s27 = sld [smem:[#allocation2 + $0x27d]] }
 0x30e   : > { %v3566_v30 = vadd.f32 %v3564_v17, %v3560_v46  ;;  %v3567_v8 = vadd.f32 %v3565_v23, %v3561_v61  ;;  %v3596_v39 = vmul.f32 %v3595_v33, %v8650_v51  ;;  %v3597_v26 = vmul.f32 %v3595_v33, %v8653_v56 }
 0x30f   : > { %v3592_v15 = vadd.f32 %v3590_v63, %v3586_v38  ;;  %v3593_v49 = vadd.f32 %v3591_v34, %v3587_v20  ;;  %v3602_v43 = vmul.f32 %v3601_v19, %v8656_v25  ;;  %v3603_v35 = vmul.f32 %v3601_v19, %v8659_v41 }
 0x310   : > { %v3572_v1 = vadd.f32 %v3570_v42, %v3566_v30  ;;  %v3573_v28 = vadd.f32 %v3571_v57, %v3567_v8  ;;  %v3607_v53 = vstv %s8714_s3  ;;  %v3613_v14 = vstv %s8716_s22  ;;  %s8796_s3 = sld [smem:[#allocation2 + $0x255]]  ;;  %s8798_s22 = sld [smem:[#allocation2 + $0x256]] }
 0x311   : > { %v3598_v50 = vadd.f32 %v3596_v39, %v3592_v15  ;;  %v3599_v45 = vadd.f32 %v3597_v26, %v3593_v49  ;;  %v3608_v55 = vmul.f32 %v3607_v53, %v8662_v62  ;;  %v3609_v17 = vmul.f32 %v3607_v53, %v8669_v4 }
 0x312   : > { %v3578_v23 = vadd.f32 %v3576_v18, %v3572_v1  ;;  %v3579_v6 = vadd.f32 %v3577_v37, %v3573_v28  ;;  %v3614_v27 = vmul.f32 %v3613_v14, %v8672_v40  ;;  %v3615_v42 = vmul.f32 %v3613_v14, %v8675_v32 }
 0x313   : > { %v3604_v57 = vadd.f32 %v3602_v43, %v3598_v50  ;;  %v3605_v5 = vadd.f32 %v3603_v35, %v3599_v45  ;;  %v3619_v24 = vstv %s8728_s7  ;;  %v3625_v13 = vstv %s8730_s18  ;;  %s8810_s7 = sld [smem:[#allocation2 + $0x257]]  ;;  %s8812_s18 = sld [smem:[#allocation2 + $0x258]] }
 0x314   : > { %v8762_v46 = vadd.f32 %v3581_v36, %v3578_v23  ;;  %v8764_v61 = vadd.f32 %v3581_v36, %v3579_v6  ;;  %v3620_v38 = vmul.f32 %v3619_v24, %v8677_v52  ;;  %v3621_v18 = vmul.f32 %v3619_v24, %v8679_v29 }
 0x315   : > { %v3610_v37 = vadd.f32 %v3608_v55, %v3604_v57  ;;  %v3611_v20 = vadd.f32 %v3609_v17, %v3605_v5  ;;  %v3626_v63 = vmul.f32 %v3625_v13, %v8704_v21  ;;  %v3627_v34 = vmul.f32 %v3625_v13, %v8706_v31 }
 0x316   : > { %v3631_v33 = vstv %s8744_s5  ;;  %v3635_v19 = vstv %s8738_s15  ;;  %v3639_v30 = vstv %s8740_s16  ;;  %v3645_v36 = vstv %s8746_s19  ;;  %s8822_s15 = sld [smem:[#allocation2 + $0x259]]  ;;  %s8824_s16 = sld [smem:[#allocation2 + $0x25a]] }
 0x317   : > { %v3616_v8 = vadd.f32 %v3614_v27, %v3610_v37  ;;  %v3617_v39 = vadd.f32 %v3615_v42, %v3611_v20  ;;  %v3636_v26 = vmul.f32 %v3635_v19, %v8634_v48  ;;  %v3637_v15 = vmul.f32 %v3635_v19, %v8641_v9  ;;  %s8832_s5 = sld [smem:[#allocation2 + $0x27e]]  ;;  %s8834_s19 = sld [smem:[#allocation2 + $0x25b]] }
 0x318   : > { %v3640_v49 = vmul.f32 %v3639_v30, %v8644_v58  ;;  %v3641_v43 = vmul.f32 %v3639_v30, %v8647_v11  ;;  %v3646_v35 = vmul.f32 %v3645_v36, %v8650_v51  ;;  %v3647_v1 = vmul.f32 %v3645_v36, %v8653_v56 }
 0x319   : > { %v3622_v28 = vadd.f32 %v3620_v38, %v3616_v8  ;;  %v3623_v53 = vadd.f32 %v3621_v18, %v3617_v39  ;;  %v3651_v14 = vstv %s8754_s17  ;;  %v3657_v50 = vstv %s8756_s23  ;;  %s8838_s17 = sld [smem:[#allocation2 + $0x25c]]  ;;  %s8840_s23 = sld [smem:[#allocation2 + $0x25d]] }
 0x31a   : > { %v3642_v45 = vadd.f32 %v3640_v49, %v3636_v26  ;;  %v3643_v55 = vadd.f32 %v3641_v43, %v3637_v15  ;;  %v3652_v17 = vmul.f32 %v3651_v14, %v8656_v25  ;;  %v3653_v23 = vmul.f32 %v3651_v14, %v8659_v41 }
 0x31b   : > { %v3628_v6 = vadd.f32 %v3626_v63, %v3622_v28  ;;  %v3629_v27 = vadd.f32 %v3627_v34, %v3623_v53  ;;  %v3658_v42 = vmul.f32 %v3657_v50, %v8662_v62  ;;  %v3659_v57 = vmul.f32 %v3657_v50, %v8669_v4 }
 0x31c   : > { %v3648_v5 = vadd.f32 %v3646_v35, %v3642_v45  ;;  %v3649_v24 = vadd.f32 %v3647_v1, %v3643_v55  ;;  %v3663_v13 = vstv %s8768_s6  ;;  %v3669_v38 = vstv %s8770_s25  ;;  %s8844_s6 = sld [smem:[#allocation2 + $0x25e]]  ;;  %s8846_s25 = sld [smem:[#allocation2 + $0x25f]] }
 0x31d   : > { %v8804_v18 = vadd.f32 %v3631_v33, %v3628_v6  ;;  %v8806_v37 = vadd.f32 %v3631_v33, %v3629_v27  ;;  %v3664_v20 = vmul.f32 %v3663_v13, %v8672_v40  ;;  %v3665_v63 = vmul.f32 %v3663_v13, %v8675_v32 }
 0x31e   : > { %v3654_v34 = vadd.f32 %v3652_v17, %v3648_v5  ;;  %v3655_v19 = vadd.f32 %v3653_v23, %v3649_v24  ;;  %v3670_v30 = vmul.f32 %v3669_v38, %v8677_v52  ;;  %v3671_v36 = vmul.f32 %v3669_v38, %v8679_v29 }
 0x31f   : > { %v3675_v8 = vstv %s8784_s4  ;;  %v3681_v39 = vstv %s8786_s27  ;;  %v3685_v33 = vstv %s8778_s8  ;;  %v3689_v26 = vstv %s8780_s29  ;;  %s8860_s8 = sld [smem:[#allocation2 + $0x260]]  ;;  %s8862_s29 = sld [smem:[#allocation2 + $0x261]] }
 0x320   : > { %v3660_v15 = vadd.f32 %v3658_v42, %v3654_v34  ;;  %v3661_v49 = vadd.f32 %v3659_v57, %v3655_v19  ;;  %v3676_v43 = vmul.f32 %v3675_v8, %v8704_v21  ;;  %v3677_v35 = vmul.f32 %v3675_v8, %v8706_v31  ;;  %s8872_s4 = sld [smem:[#allocation2 + $0x262]]  ;;  %s8874_s27 = sld [smem:[#allocation2 + $0x27f]] }
 0x321   : > { %v3686_v1 = vmul.f32 %v3685_v33, %v8634_v48  ;;  %v3687_v28 = vmul.f32 %v3685_v33, %v8641_v9  ;;  %v3690_v53 = vmul.f32 %v3689_v26, %v8644_v58  ;;  %v3691_v14 = vmul.f32 %v3689_v26, %v8647_v11 }
 0x322   : > { %v3666_v50 = vadd.f32 %v3664_v20, %v3660_v15  ;;  %v3667_v45 = vadd.f32 %v3665_v63, %v3661_v49  ;;  %v3695_v55 = vstv %s8796_s3  ;;  %v3701_v17 = vstv %s8798_s22  ;;  %s8880_s3 = sld [smem:[#allocation2 + $0x263]]  ;;  %s8882_s22 = sld [smem:[#allocation2 + $0x264]] }
 0x323   : > { %v3692_v23 = vadd.f32 %v3690_v53, %v3686_v1  ;;  %v3693_v6 = vadd.f32 %v3691_v14, %v3687_v28  ;;  %v3696_v27 = vmul.f32 %v3695_v55, %v8650_v51  ;;  %v3697_v42 = vmul.f32 %v3695_v55, %v8653_v56 }
 0x324   : > { %v3672_v57 = vadd.f32 %v3670_v30, %v3666_v50  ;;  %v3673_v5 = vadd.f32 %v3671_v36, %v3667_v45  ;;  %v3702_v24 = vmul.f32 %v3701_v17, %v8656_v25  ;;  %v3703_v13 = vmul.f32 %v3701_v17, %v8659_v41 }
 0x325   : > { %v3698_v38 = vadd.f32 %v3696_v27, %v3692_v23  ;;  %v3699_v20 = vadd.f32 %v3697_v42, %v3693_v6  ;;  %v3707_v63 = vstv %s8810_s7  ;;  %v3713_v34 = vstv %s8812_s18  ;;  %s8890_s7 = sld [smem:[#allocation2 + $0x265]]  ;;  %s8892_s18 = sld [smem:[#allocation2 + $0x266]] }
 0x326   : > { %v3678_v19 = vadd.f32 %v3676_v43, %v3672_v57  ;;  %v3679_v8 = vadd.f32 %v3677_v35, %v3673_v5  ;;  %v3708_v33 = vmul.f32 %v3707_v63, %v8662_v62  ;;  %v3709_v30 = vmul.f32 %v3707_v63, %v8669_v4 }
 0x327   : > { %v3704_v36 = vadd.f32 %v3702_v24, %v3698_v38  ;;  %v3705_v26 = vadd.f32 %v3703_v13, %v3699_v20  ;;  %v3714_v15 = vmul.f32 %v3713_v34, %v8672_v40  ;;  %v3715_v49 = vmul.f32 %v3713_v34, %v8675_v32 }
 0x328   : > { %v8854_v1 = vadd.f32 %v3681_v39, %v3678_v19  ;;  %v8856_v28 = vadd.f32 %v3681_v39, %v3679_v8  ;;  %v3719_v53 = vstv %s8822_s15  ;;  %v3725_v14 = vstv %s8824_s16  ;;  %s8902_s15 = sld [smem:[#allocation2 + $0x267]]  ;;  %s8904_s16 = sld [smem:[#allocation2 + $0x268]] }
 0x329   : > { %v3710_v43 = vadd.f32 %v3708_v33, %v3704_v36  ;;  %v3711_v35 = vadd.f32 %v3709_v30, %v3705_v26  ;;  %v3720_v50 = vmul.f32 %v3719_v53, %v8677_v52  ;;  %v3721_v45 = vmul.f32 %v3719_v53, %v8679_v29 }
 0x32a   : > { %v3726_v55 = vmul.f32 %v3725_v14, %v8704_v21  ;;  %v3727_v39 = vmul.f32 %v3725_v14, %v8706_v31  ;;  %v3731_v17 = vstv %s8832_s5  ;;  %v3735_v23 = vstv %s8834_s19  ;;  %s8916_s5 = sld [smem:[#allocation2 + $0x269]]  ;;  %s8918_s19 = sld [smem:[#allocation2 + $0x26a]] }
 0x32b   : > { %v3716_v6 = vadd.f32 %v3714_v15, %v3710_v43  ;;  %v3717_v27 = vadd.f32 %v3715_v49, %v3711_v35  ;;  %v3736_v42 = vmul.f32 %v3735_v23, %v8634_v48  ;;  %v3737_v57 = vmul.f32 %v3735_v23, %v8641_v9 }
 0x32c   : > { %v3739_v5 = vstv %s8838_s17  ;;  %v3745_v24 = vstv %s8840_s23  ;;  %v3751_v13 = vstv %s8844_s6  ;;  %v3757_v38 = vstv %s8846_s25  ;;  %s8926_s17 = sld [smem:[#allocation2 + $0x26b]]  ;;  %s8928_s23 = sld [smem:[#allocation2 + $0x26c]] }
 0x32d   : > { %v3722_v20 = vadd.f32 %v3720_v50, %v3716_v6  ;;  %v3723_v63 = vadd.f32 %v3721_v45, %v3717_v27  ;;  %v3740_v34 = vmul.f32 %v3739_v5, %v8644_v58  ;;  %v3741_v19 = vmul.f32 %v3739_v5, %v8647_v11  ;;  %s8932_s6 = sld [smem:[#allocation2 + $0x280]]  ;;  %s8934_s25 = sld [smem:[#allocation2 + $0x26d]] }
 0x32e   : > { %v3746_v8 = vmul.f32 %v3745_v24, %v8650_v51  ;;  %v3747_v33 = vmul.f32 %v3745_v24, %v8653_v56  ;;  %v3752_v30 = vmul.f32 %v3751_v13, %v8656_v25  ;;  %v3753_v36 = vmul.f32 %v3751_v13, %v8659_v41 }
 0x32f   : > { %v3728_v26 = vadd.f32 %v3726_v55, %v3722_v20  ;;  %v3729_v15 = vadd.f32 %v3727_v39, %v3723_v63  ;;  %v3742_v49 = vadd.f32 %v3740_v34, %v3736_v42  ;;  %v3743_v53 = vadd.f32 %v3741_v19, %v3737_v57 }
 0x330   : > { %v3758_v14 = vmul.f32 %v3757_v38, %v8662_v62  ;;  %v3759_v43 = vmul.f32 %v3757_v38, %v8669_v4  ;;  %v3763_v35 = vstv %s8860_s8  ;;  %v3769_v50 = vstv %s8862_s29  ;;  %s8942_s8 = sld [smem:[#allocation2 + $0x26e]]  ;;  %s8944_s29 = sld [smem:[#allocation2 + $0x26f]] }
 0x331   : > { %v8898_v45 = vadd.f32 %v3731_v17, %v3728_v26  ;;  %v8900_v23 = vadd.f32 %v3731_v17, %v3729_v15  ;;  %v3748_v6 = vadd.f32 %v3746_v8, %v3742_v49  ;;  %v3749_v27 = vadd.f32 %v3747_v33, %v3743_v53 }
 0x332   : > { %v3764_v55 = vmul.f32 %v3763_v35, %v8672_v40  ;;  %v3765_v39 = vmul.f32 %v3763_v35, %v8675_v32  ;;  %v3770_v42 = vmul.f32 %v3769_v50, %v8677_v52  ;;  %v3771_v57 = vmul.f32 %v3769_v50, %v8679_v29 }
 0x333   : > { %v3754_v5 = vadd.f32 %v3752_v30, %v3748_v6  ;;  %v3755_v24 = vadd.f32 %v3753_v36, %v3749_v27  ;;  %v3775_v17 = vstv %s8872_s4  ;;  %v3781_v13 = vstv %s8874_s27  ;;  %s8956_s4 = sld [smem:[#allocation2 + $0x270]]  ;;  %s8958_s27 = sld [smem:[#allocation2 + $0x271]] }
 0x334   : > { %v3776_v38 = vmul.f32 %v3775_v17, %v8704_v21  ;;  %v3777_v20 = vmul.f32 %v3775_v17, %v8706_v31  ;;  %v3785_v63 = vstv %s8880_s3  ;;  %v3789_v34 = vstv %s8882_s22  ;;  %s8966_s3 = sld [smem:[#allocation2 + $0x273]]  ;;  %s8968_s22 = sld [smem:[#allocation2 + $0x274]] }
 0x335   : > { %v3760_v19 = vadd.f32 %v3758_v14, %v3754_v5  ;;  %v3761_v8 = vadd.f32 %v3759_v43, %v3755_v24  ;;  %v3786_v33 = vmul.f32 %v3785_v63, %v8634_v48  ;;  %v3787_v30 = vmul.f32 %v3785_v63, %v8641_v9 }
 0x336   : > { %v3790_v36 = vmul.f32 %v3789_v34, %v8644_v58  ;;  %v3791_v26 = vmul.f32 %v3789_v34, %v8647_v11  ;;  %v3795_v15 = vstv %s8890_s7  ;;  %v3801_v49 = vstv %s8892_s18  ;;  %s8972_s7 = sld [smem:[#allocation2 + $0x272]]  ;;  %s8974_s18 = sld [smem:[#allocation2 + $0x281]] }
 0x337   : > { %v3766_v53 = vadd.f32 %v3764_v55, %v3760_v19  ;;  %v3767_v35 = vadd.f32 %v3765_v39, %v3761_v8  ;;  %v3796_v14 = vmul.f32 %v3795_v15, %v8650_v51  ;;  %v3797_v43 = vmul.f32 %v3795_v15, %v8653_v56 }
 0x338   : > { %v3792_v50 = vadd.f32 %v3790_v36, %v3786_v33  ;;  %v3793_v6 = vadd.f32 %v3791_v26, %v3787_v30  ;;  %v3802_v27 = vmul.f32 %v3801_v49, %v8656_v25  ;;  %v3803_v5 = vmul.f32 %v3801_v49, %v8659_v41 }
 0x339   : > { %v3772_v24 = vadd.f32 %v3770_v42, %v3766_v53  ;;  %v3773_v17 = vadd.f32 %v3771_v57, %v3767_v35  ;;  %v3807_v55 = vstv %s8902_s15  ;;  %v3813_v39 = vstv %s8904_s16  ;;  %s8984_s15 = sld [smem:[#allocation2 + $0x275]]  ;;  %s8986_s16 = sld [smem:[#allocation2 + $0x276]] }
 0x33a   : > { %v3798_v63 = vadd.f32 %v3796_v14, %v3792_v50  ;;  %v3799_v34 = vadd.f32 %v3797_v43, %v3793_v6  ;;  %v3808_v19 = vmul.f32 %v3807_v55, %v8662_v62  ;;  %v3809_v8 = vmul.f32 %v3807_v55, %v8669_v4 }
 0x33b   : > { %v3778_v33 = vadd.f32 %v3776_v38, %v3772_v24  ;;  %v3779_v30 = vadd.f32 %v3777_v20, %v3773_v17  ;;  %v3814_v36 = vmul.f32 %v3813_v39, %v8672_v40  ;;  %v3815_v42 = vmul.f32 %v3813_v39, %v8675_v32 }
 0x33c   : > { %v3804_v57 = vadd.f32 %v3802_v27, %v3798_v63  ;;  %v3805_v26 = vadd.f32 %v3803_v5, %v3799_v34  ;;  %v3819_v15 = vstv %s8916_s5  ;;  %v3825_v49 = vstv %s8918_s19  ;;  %s8998_s5 = sld [smem:[#allocation2 + $0x277]]  ;;  %s9000_s19 = sld [smem:[#allocation2 + $0x278]] }
 0x33d   : > { %v8950_v53 = vadd.f32 %v3781_v13, %v3778_v33  ;;  %v8952_v35 = vadd.f32 %v3781_v13, %v3779_v30  ;;  %v3820_v14 = vmul.f32 %v3819_v15, %v8677_v52  ;;  %v3821_v38 = vmul.f32 %v3819_v15, %v8679_v29 }
 0x33e   : > { %v3810_v20 = vadd.f32 %v3808_v19, %v3804_v57  ;;  %v3811_v43 = vadd.f32 %v3809_v8, %v3805_v26  ;;  %v3826_v50 = vmul.f32 %v3825_v49, %v8704_v21  ;;  %v3827_v6 = vmul.f32 %v3825_v49, %v8706_v31 }
 0x33f   : > { %v3831_v27 = vstv %s8932_s6  ;;  %v3835_v5 = vstv %s8926_s17  ;;  %v3839_v24 = vstv %s8928_s23  ;;  %v3845_v13 = vstv %s8934_s25  ;;  %s9010_s17 = sld [smem:[#allocation2 + $0x279]]  ;;  %s9012_s23 = sld [smem:[#allocation2 + $0x27a]] }
 0x340   : > { %v3816_v17 = vadd.f32 %v3814_v36, %v3810_v20  ;;  %v3817_v55 = vadd.f32 %v3815_v42, %v3811_v43  ;;  %v3836_v39 = vmul.f32 %v3835_v5, %v8634_v48  ;;  %v3837_v63 = vmul.f32 %v3835_v5, %v8641_v9  ;;  %s9020_s6 = sld [smem:[#allocation2 + $0x282]]  ;;  %s9042_s25 = sld [smem:[#allocation2 + $0x283]] }
 0x341   : > { %v3840_v34 = vmul.f32 %v3839_v24, %v8644_v58  ;;  %v3841_v19 = vmul.f32 %v3839_v24, %v8647_v11  ;;  %v3846_v8 = vmul.f32 %v3845_v13, %v8650_v51  ;;  %v3847_v33 = vmul.f32 %v3845_v13, %v8653_v56 }
 0x342   : > { %v3822_v30 = vadd.f32 %v3820_v14, %v3816_v17  ;;  %v3823_v36 = vadd.f32 %v3821_v38, %v3817_v55  ;;  %v3851_v42 = vstv %s8942_s8  ;;  %v3857_v57 = vstv %s8944_s29  ;;  %s9044_s8 = sld [smem:[#allocation2 + $0x284]]  ;;  %s9050_s29 = sld [smem:[#allocation2 + $0x285]] }
 0x343   : > { %v3842_v26 = vadd.f32 %v3840_v34, %v3836_v39  ;;  %v3843_v15 = vadd.f32 %v3841_v19, %v3837_v63  ;;  %v3852_v49 = vmul.f32 %v3851_v42, %v8656_v25  ;;  %v3853_v20 = vmul.f32 %v3851_v42, %v8659_v41 }
 0x344   : > { %v3828_v43 = vadd.f32 %v3826_v50, %v3822_v30  ;;  %v3829_v5 = vadd.f32 %v3827_v6, %v3823_v36  ;;  %v3858_v24 = vmul.f32 %v3857_v57, %v8662_v62  ;;  %v3859_v14 = vmul.f32 %v3857_v57, %v8669_v4 }
 0x345   : > { %v3848_v38 = vadd.f32 %v3846_v8, %v3842_v26  ;;  %v3849_v13 = vadd.f32 %v3847_v33, %v3843_v15  ;;  %v3863_v17 = vstv %s8956_s4  ;;  %v3869_v55 = vstv %s8958_s27  ;;  %s9054_s4 = sld [smem:[#allocation2 + $0x286]]  ;;  %s9059_s27 = sld [smem:[#allocation2 + $0x287]] }
 0x346   : > { %v8992_v39 = vadd.f32 %v3831_v27, %v3828_v43  ;;  %v8994_v63 = vadd.f32 %v3831_v27, %v3829_v5  ;;  %v3864_v34 = vmul.f32 %v3863_v17, %v8672_v40  ;;  %v3865_v50 = vmul.f32 %v3863_v17, %v8675_v32 }
 0x347   : > { %v3854_v6 = vadd.f32 %v3852_v49, %v3848_v38  ;;  %v3855_v19 = vadd.f32 %v3853_v20, %v3849_v13  ;;  %v3870_v8 = vmul.f32 %v3869_v55, %v8677_v52  ;;  %v3871_v33 = vmul.f32 %v3869_v55, %v8679_v29 }
 0x348   : > { %v3875_v30 = vstv %s8972_s7  ;;  %v3881_v36 = vstv %s8974_s18  ;;  %v3885_v27 = vstv %s8966_s3  ;;  %v3889_v42 = vstv %s8968_s22  ;;  %s9064_s3 = sld [smem:[#allocation2 + $0x288]]  ;;  %s9066_s22 = sld [smem:[#allocation2 + $0x289]] }
 0x349   : > { %v3860_v57 = vadd.f32 %v3858_v24, %v3854_v6  ;;  %v3861_v26 = vadd.f32 %v3859_v14, %v3855_v19  ;;  %v3876_v15 = vmul.f32 %v3875_v30, %v8704_v21  ;;  %v3877_v43 = vmul.f32 %v3875_v30, %v8706_v31  ;;  %s9098_s7 = sld [smem:[#allocation2 + $0x28b]]  ;;  %s9100_s18 = sld [smem:[#allocation2 + $0x28c]] }
 0x34a   : > { %v3886_v49 = vmul.f32 %v3885_v27, %v8634_v48  ;;  %v3887_v20 = vmul.f32 %v3885_v27, %v8641_v9  ;;  %v3890_v5 = vmul.f32 %v3889_v42, %v8644_v58  ;;  %v3891_v38 = vmul.f32 %v3889_v42, %v8647_v11 }
 0x34b   : > { %v3866_v13 = vadd.f32 %v3864_v34, %v3860_v57  ;;  %v3867_v24 = vadd.f32 %v3865_v50, %v3861_v26  ;;  %v3895_v14 = vstv %s8984_s15  ;;  %v3901_v17 = vstv %s8986_s16  ;;  %s9108_s15 = sld [smem:[#allocation2 + $0x28a]]  ;;  %s9110_s16 = sld [smem:[#allocation2 + $0x29b]] }
 0x34c   : > { %v3892_v55 = vadd.f32 %v3890_v5, %v3886_v49  ;;  %v3893_v6 = vadd.f32 %v3891_v38, %v3887_v20  ;;  %v3896_v19 = vmul.f32 %v3895_v14, %v8650_v51  ;;  %v3897_v48 = vmul.f32 %v3895_v14, %v8653_v56 }
 0x34d   : > { %v3872_v30 = vadd.f32 %v3870_v8, %v3866_v13  ;;  %v3873_v9 = vadd.f32 %v3871_v33, %v3867_v24  ;;  %v3902_v58 = vmul.f32 %v3901_v17, %v8656_v25  ;;  %v3903_v11 = vmul.f32 %v3901_v17, %v8659_v41 }
 0x34e   : > { %v3898_v34 = vadd.f32 %v3896_v19, %v3892_v55  ;;  %v3899_v50 = vadd.f32 %v3897_v48, %v3893_v6  ;;  %v3907_v27 = vstv %s8998_s5  ;;  %v3913_v42 = vstv %s9000_s19  ;;  %s9130_s5 = sld [smem:[#allocation2 + $0x28d]]  ;;  %s9132_s19 = sld [smem:[#allocation2 + $0x28e]] }
 0x34f   : > { %v3878_v57 = vadd.f32 %v3876_v15, %v3872_v30  ;;  %v3879_v26 = vadd.f32 %v3877_v43, %v3873_v9  ;;  %v3908_v49 = vmul.f32 %v3907_v27, %v8662_v62  ;;  %v3909_v51 = vmul.f32 %v3907_v27, %v8669_v4 }
 0x350   : > { %v3904_v56 = vadd.f32 %v3902_v58, %v3898_v34  ;;  %v3905_v8 = vadd.f32 %v3903_v11, %v3899_v50  ;;  %v3914_v33 = vmul.f32 %v3913_v42, %v8672_v40  ;;  %v3915_v25 = vmul.f32 %v3913_v42, %v8675_v32  ;;  %v9338_v42 = vld [vmem:[#allocation14_spill] sm:$0xff] }
 0x351   : > { %v3882_v20 = vadd.f32 %v3881_v36, %v3878_v57  ;;  %v3883_v41 = vadd.f32 %v3881_v36, %v3879_v26  ;;  %v3919_v5 = vstv %s9010_s17  ;;  %v3925_v38 = vstv %s9012_s23  ;;  %v9339_v57 = vld [vmem:[#allocation15_spill] sm:$0xff]  ;;  %s9144_s17 = sld [smem:[#allocation2 + $0x28f]]  ;;  %s9146_s23 = sld [smem:[#allocation2 + $0x290]] }
 0x352   : > { %v3910_v13 = vadd.f32 %v3908_v49, %v3904_v56  ;;  %v3911_v24 = vadd.f32 %v3909_v51, %v3905_v8  ;;  %v3920_v15 = vmul.f32 %v3919_v5, %v8677_v52  ;;  %v3921_v43 = vmul.f32 %v3919_v5, %v8679_v29 }
 0x353   : > { %v3926_v62 = vmul.f32 %v3925_v38, %v8704_v21  ;;  %v3927_v4 = vmul.f32 %v3925_v38, %v8706_v31  ;;  %v3931_v14 = vstv %s9020_s6  ;;  %v3934_v17 = vmax.f32 %v8762_v46, 0.0  ;;  %s9156_s6 = sld [smem:[#allocation2 + $0x291]] }
 0x354   : > { %v3916_v40 = vadd.f32 %v3914_v33, %v3910_v13  ;;  %v3917_v55 = vadd.f32 %v3915_v25, %v3911_v24  ;;  %v3935_v32 = vmax.f32 %v8764_v61, 0.0  ;;  %v3936_v36 = vmax.f32 %v8804_v18, 0.0 }
 0x355   : > { %v3937_v52 = vmax.f32 %v8806_v37, 0.0  ;;  %v3938_v29 = vmax.f32 %v8854_v1, 0.0  ;;  %v3939_v21 = vmax.f32 %v8856_v28, 0.0  ;;  %v3940_v31 = vmax.f32 %v8898_v45, 0.0 }
 0x356   : > { %v3922_v46 = vadd.f32 %v3920_v15, %v3916_v40  ;;  %v3923_v6 = vadd.f32 %v3921_v43, %v3917_v55  ;;  %v3941_v61 = vmax.f32 %v8900_v23, 0.0  ;;  %v3942_v18 = vmax.f32 %v8950_v53, 0.0 }
 0x357   : > { %v3943_v19 = vmax.f32 %v8952_v35, 0.0  ;;  %v3944_v37 = vmax.f32 %v8992_v39, 0.0  ;;  %v3945_v1 = vmax.f32 %v8994_v63, 0.0  ;;  %v3946_v48 = vmax.f32 %v3882_v20, 0.0 }
 0x358   : > { %v3928_v28 = vadd.f32 %v3926_v62, %v3922_v46  ;;  %v3929_v45 = vadd.f32 %v3927_v4, %v3923_v6  ;;  %v3947_v30 = vmax.f32 %v3883_v41, 0.0  ;;  %v9062_v9 = vadd.f32 %v3934_v17, %v6416_v60 }
 0x359   : > { %v9069_v23 = vadd.f32 %v3935_v32, %v6419_v12  ;;  %v9072_v53 = vadd.f32 %v3936_v36, %v6422_v22  ;;  %v9075_v35 = vadd.f32 %v3937_v52, %v6425_v7  ;;  %v9078_v39 = vadd.f32 %v3938_v29, %v6428_v59 }
 0x35a   : > { %v3932_v63 = vadd.f32 %v3931_v14, %v3928_v28  ;;  %v3933_v58 = vadd.f32 %v3931_v14, %v3929_v45  ;;  %v9081_v60 = vadd.f32 %v3939_v21, %v6433_v10  ;;  %v9084_v11 = vadd.f32 %v3940_v31, %v6436_v2 }
 0x35b   : > { %v9087_v12 = vadd.f32 %v3941_v61, %v6439_v3  ;;  %v9090_v22 = vadd.f32 %v3942_v18, %v6442_v54  ;;  %v9093_v7 = vadd.f32 %v3943_v19, %v6447_v0  ;;  %v9096_v59 = vadd.f32 %v3944_v37, %v6450_v44  ;;  %v9337_v54 = vld [vmem:[#allocation13_spill] sm:$0xff] }
 0x35c   : > { %v3948_v10 = vmax.f32 %v3932_v63, 0.0  ;;  %v3949_v2 = vmax.f32 %v3933_v58, 0.0  ;;  %v9103_v34 = vadd.f32 %v3945_v1, %v9332_v47  ;;  %v9106_v3 = vadd.f32 %v3946_v48, %v9333_v16 }
 0x35d   : > { %v9113_v0 = vadd.f32 %v3947_v30, %v9337_v54  ;;  %v3967_v44 = vstv %s9042_s25  ;;  %v3971_v50 = vstv %s9044_s8  ;;  %v3977_v27 = vstv %s9050_s29  ;;  %s9158_s25 = sld [smem:[#allocation2 + $0x292]]  ;;  %s9168_s8 = sld [smem:[#allocation2 + $0x293]] }
 0x35e   : > { %v9119_v47 = vadd.f32 %v3948_v10, %v9338_v42  ;;  %v9122_v16 = vadd.f32 %v3949_v2, %v9339_v57  ;;  %v3968_v26 = vmul.f32 %v3967_v44, %v9062_v9  ;;  %v3969_v49 = vmul.f32 %v3967_v44, %v9069_v23  ;;  %s9172_s29 = sld [smem:[#allocation2 + $0x294]] }
 0x35f   : > { %v3972_v51 = vmul.f32 %v3971_v50, %v9072_v53  ;;  %v3973_v56 = vmul.f32 %v3971_v50, %v9075_v35  ;;  %v3978_v8 = vmul.f32 %v3977_v27, %v9078_v39  ;;  %v3979_v33 = vmul.f32 %v3977_v27, %v9081_v60 }
 0x360   : > { %v3983_v25 = vstv %s9054_s4  ;;  %v3989_v20 = vstv %s9059_s27  ;;  %v3995_v41 = vstv %s9064_s3  ;;  %v4001_v5 = vstv %s9066_s22  ;;  %s9174_s4 = sld [smem:[#allocation2 + $0x295]]  ;;  %s9180_s27 = sld [smem:[#allocation2 + $0x296]] }
 0x361   : > { %v3974_v38 = vadd.f32 %v3972_v51, %v3968_v26  ;;  %v3975_v13 = vadd.f32 %v3973_v56, %v3969_v49  ;;  %v3984_v24 = vmul.f32 %v3983_v25, %v9084_v11  ;;  %v3985_v15 = vmul.f32 %v3983_v25, %v9087_v12  ;;  %s9182_s3 = sld [smem:[#allocation2 + $0x297]]  ;;  %s9186_s22 = sld [smem:[#allocation2 + $0x29c]] }
 0x362   : > { %v3990_v43 = vmul.f32 %v3989_v20, %v9090_v22  ;;  %v3991_v62 = vmul.f32 %v3989_v20, %v9093_v7  ;;  %v3996_v4 = vmul.f32 %v3995_v41, %v9096_v59  ;;  %v3997_v14 = vmul.f32 %v3995_v41, %v9103_v34 }
 0x363   : > { %v3980_v17 = vadd.f32 %v3978_v8, %v3974_v38  ;;  %v3981_v40 = vadd.f32 %v3979_v33, %v3975_v13  ;;  %v4002_v55 = vmul.f32 %v4001_v5, %v9106_v3  ;;  %v4003_v32 = vmul.f32 %v4001_v5, %v9113_v0 }
 0x364   : > { %v4007_v36 = vstv %s9108_s15  ;;  %v4013_v52 = vstv %s9110_s16  ;;  %v4017_v29 = vstv %s9098_s7  ;;  %v4021_v21 = vstv %s9100_s18  ;;  %s9192_s7 = sld [smem:[#allocation2 + $0x298]]  ;;  %s9197_s18 = sld [smem:[#allocation2 + $0x299]] }
 0x365   : > { %v3986_v31 = vadd.f32 %v3984_v24, %v3980_v17  ;;  %v3987_v46 = vadd.f32 %v3985_v15, %v3981_v40  ;;  %v4008_v6 = vmul.f32 %v4007_v36, %v9119_v47  ;;  %v4009_v61 = vmul.f32 %v4007_v36, %v9122_v16  ;;  %s9199_s15 = sld [smem:[#allocation2 + $0x29a]]  ;;  %s4953_s16 = smul.u32 1536, %s5176_s12 }
 0x366   : > { %v4018_v18 = vmul.f32 %v4017_v29, %v9062_v9  ;;  %v4019_v19 = vmul.f32 %v4017_v29, %v9069_v23  ;;  %v4022_v37 = vmul.f32 %v4021_v21, %v9072_v53  ;;  %v4023_v1 = vmul.f32 %v4021_v21, %v9075_v35  ;;  %s5190_s12 = smov [#allocation7]  }
 0x367   : > { %v3992_v48 = vadd.f32 %v3990_v43, %v3986_v31  ;;  %v3993_v28 = vadd.f32 %v3991_v62, %v3987_v46  ;;  %v4027_v45 = vstv %s9130_s5  ;;  %v4033_v30 = vstv %s9132_s19  ;;  %s4941_s5 = sld [smem:[#allocation2 + $0x29d]]  ;;  %s4148_s19 = sshll.u32 %s7884_s24, 4  ;;  %s9244_s19 = int_to_ptr.vmem [resolvable:$true] %s4148_s19 }
 0x368   : > { %v4024_v63 = vadd.f32 %v4022_v37, %v4018_v18  ;;  %v4025_v58 = vadd.f32 %v4023_v1, %v4019_v19  ;;  %v4028_v10 = vmul.f32 %v4027_v45, %v9078_v39  ;;  %v4029_v2 = vmul.f32 %v4027_v45, %v9081_v60 }
 0x369   : > { %v3998_v54 = vadd.f32 %v3996_v4, %v3992_v48  ;;  %v3999_v44 = vadd.f32 %v3997_v14, %v3993_v28  ;;  %v4034_v50 = vmul.f32 %v4033_v30, %v9084_v11  ;;  %v4035_v27 = vmul.f32 %v4033_v30, %v9087_v12 }
 0x36a   : > { %v4030_v42 = vadd.f32 %v4028_v10, %v4024_v63  ;;  %v4031_v57 = vadd.f32 %v4029_v2, %v4025_v58  ;;  %v4039_v26 = vstv %s9144_s17  ;;  %v4045_v49 = vstv %s9146_s23 }
 0x36b   : > { %v4004_v51 = vadd.f32 %v4002_v55, %v3998_v54  ;;  %v4005_v56 = vadd.f32 %v4003_v32, %v3999_v44  ;;  %v4040_v8 = vmul.f32 %v4039_v26, %v9090_v22  ;;  %v4041_v33 = vmul.f32 %v4039_v26, %v9093_v7 }
 0x36c   : > { %v4036_v25 = vadd.f32 %v4034_v50, %v4030_v42  ;;  %v4037_v20 = vadd.f32 %v4035_v27, %v4031_v57  ;;  %v4046_v41 = vmul.f32 %v4045_v49, %v9096_v59  ;;  %v4047_v5 = vmul.f32 %v4045_v49, %v9103_v34 }
 0x36d   : > { %v4010_v38 = vadd.f32 %v4008_v6, %v4004_v51  ;;  %v4051_v13 = vstv %s9156_s6  ;;  %v4057_v24 = vstv %s9158_s25  ;;  %v4011_v14 = vadd.f32 %v4009_v61, %v4005_v56  ;;  %s9242_s6 = scalar_lea.hbm %s9299_s2, %s4953_s16  ;;  %s4132_s25 = scalar_lea.sflag [#allocation4], %s5367_s30 }
 0x36e   : > { %v4042_v15 = vadd.f32 %v4040_v8, %v4036_v25  ;;  %v4043_v43 = vadd.f32 %v4041_v33, %v4037_v20  ;;  %v4052_v62 = vmul.f32 %v4051_v13, %v9106_v3  ;;  %v4053_v4 = vmul.f32 %v4051_v13, %v9113_v0 }
 0x36f   : > { %v4014_v17 = vadd.f32 %v4013_v52, %v4010_v38  ;;  %v4058_v40 = vmul.f32 %v4057_v24, %v9119_v47  ;;  %v4059_v36 = vmul.f32 %v4057_v24, %v9122_v16  ;;  %v4067_v29 = vstv %s9168_s8  ;;  %s5098_s8 = scalar_lea.vmem %s9244_s19, 1536 }
 0x370   : > { %v4048_v55 = vadd.f32 %v4046_v41, %v4042_v15  ;;  %v4049_v32 = vadd.f32 %v4047_v5, %v4043_v43  ;;  %v4068_v21 = vmul.f32 %v4067_v29, %v9062_v9  ;;  %v4069_v31 = vmul.f32 %v4067_v29, %v9069_v23  ;;  %p5099_p8 = scmp.ne.s32.totalorder %s9244_s19, %s5098_s8 }
 0x371   : > { %v4071_v46 = vstv %s9172_s29  ;;  %v4077_v6 = vstv %s9174_s4  ;;  %v4083_v28 = vstv %s9180_s27  ;;  %v4089_v45 = vstv %s9182_s3  ;;  %s5102_s29 = sshll.u32 %s5190_s12, 4  ;;  %s5103_s29 = int_to_ptr.vmem [resolvable:$false] %s5102_s29 }
 0x372   : > { %v4054_v61 = vadd.f32 %v4052_v62, %v4048_v55  ;;  %v4055_v18 = vadd.f32 %v4053_v4, %v4049_v32  ;;  %v4072_v19 = vmul.f32 %v4071_v46, %v9072_v53  ;;  %v4073_v37 = vmul.f32 %v4071_v46, %v9075_v35  ;;  %p5100_p0 = pnand %p5099_p8, %p9340_p13  ;;  %s5104_s4 = scalar_lea.vmem %s5103_s29, 3072 }
 0x373   : > { %v4078_v1 = vmul.f32 %v4077_v6, %v9078_v39  ;;  %v4079_v48 = vmul.f32 %v4077_v6, %v9081_v60  ;;  %v4063_v30 = vstv %s9186_s22  ;;  %v4015_v58 = vadd.f32 %v4013_v52, %v4011_v14  ;;  %p5105_p11 = scmp.lt.s32.totalorder %s9244_s19, %s5103_s29  ;;  %p5106_p1 = scmp.lt.s32.totalorder %s5104_s4, %s5098_s8 }
 0x374   : > { %v4060_v9 = vadd.f32 %v4058_v40, %v4054_v61  ;;  %v4074_v23 = vadd.f32 %v4072_v19, %v4068_v21  ;;  %v4075_v63 = vadd.f32 %v4073_v37, %v4069_v31  ;;  %v4061_v10 = vadd.f32 %v4059_v36, %v4055_v18  ;;  %p5101_p5 = pneg %p5100_p0 }
 0x375   : > { %v4084_v53 = vmul.f32 %v4083_v28, %v9084_v11  ;;  %v4085_v35 = vmul.f32 %v4083_v28, %v9087_v12  ;;  %v4090_v60 = vmul.f32 %v4089_v45, %v9090_v22  ;;  %v4091_v54 = vmul.f32 %v4089_v45, %v9093_v7  ;;  %p5107_p9 = por %p5106_p1, %p5105_p11 }
 0x376   : > { %v4080_v2 = vadd.f32 %v4078_v1, %v4074_v23  ;;  %v4081_v39 = vadd.f32 %v4079_v48, %v4075_v63  ;;  %v4064_v44 = vadd.f32 %v4063_v30, %v4060_v9  ;;  %v4095_v50 = vstv %s9192_s7 }
 0x377   : > { %v4101_v27 = vstv %s9197_s18  ;;  %v4107_v42 = vstv %s9199_s15  ;;  %v4096_v52 = vmul.f32 %v4095_v50, %v9096_v59  ;;  %v4097_v49 = vmul.f32 %v4095_v50, %v9103_v34  ;;  %p5108_p12 = pnand %p5107_p9, %p5101_p5 }
 0x378   : > { %v4086_v57 = vadd.f32 %v4084_v53, %v4080_v2  ;;  %v4087_v26 = vadd.f32 %v4085_v35, %v4081_v39  ;;  %v4065_v11 = vadd.f32 %v4063_v30, %v4061_v10  ;;  %v4102_v12 = vmul.f32 %v4101_v27, %v9106_v3 }
 0x379   : > { %v4103_v22 = vmul.f32 %v4101_v27, %v9113_v0  ;;  %5043 = vtanh.f32 %v4014_v17  ;;  %v4108_v7 = vmul.f32 %v4107_v42, %v9119_v47  ;;  %v4109_v25 = vmul.f32 %v4107_v42, %v9122_v16 }
 0x37a   : > { %v4092_v51 = vadd.f32 %v4090_v60, %v4086_v57  ;;  %v4093_v56 = vadd.f32 %v4091_v54, %v4087_v26  ;;  %5045 = vtanh.f32 %v4015_v58  ;;  %v4113_v3 = vstv %s4941_s5 }
 0x37b   : > { %5047 = vtanh.f32 %v4064_v44 }
 0x37c   : > { %v4098_v8 = vadd.f32 %v4096_v52, %v4092_v51  ;;  %v4099_v33 = vadd.f32 %v4097_v49, %v4093_v56  ;;  %5049 = vtanh.f32 %v4065_v11 }
 0x37e   : > { %v4104_v59 = vadd.f32 %v4102_v12, %v4098_v8  ;;  %v4105_v34 = vadd.f32 %v4103_v22, %v4099_v33 }
 0x380   : > { %v4110_v0 = vadd.f32 %v4108_v7, %v4104_v59  ;;  %v4111_v20 = vadd.f32 %v4109_v25, %v4105_v34 }
 0x382   : > { %v4114_v41 = vadd.f32 %v4113_v3, %v4110_v0  ;;  %v4115_v47 = vadd.f32 %v4113_v3, %v4111_v20 }
 0x383   : > { %v5044_v5 = vpop.eup %5043 }
 0x384   : > { %5051 = vtanh.f32 %v4114_v41  ;;  %v5046_v38 = vpop.eup %5045  ;;  %4942 = vst.msk [vmem:[%s7884_s24 + $0x30] sm:$0xff] %vm2693_vm0, %v5044_v5 }
 0x385   : > { %5053 = vtanh.f32 %v4115_v47  ;;  %v5048_v16 = vpop.eup %5047  ;;  %4943 = vst.msk [vmem:[%s7884_s24 + $0x38] sm:$0xff] %vm2693_vm0, %v5046_v38 }
 0x386   : > { %v5050_v13 = vpop.eup %5049  ;;  %4944 = vst.msk [vmem:[%s7884_s24 + $0x40] sm:$0xff] %vm2693_vm0, %v5048_v16 }
 0x387   : > { %4945 = vst.msk [vmem:[%s7884_s24 + $0x48] sm:$0xff] %vm2693_vm0, %v5050_v13 }
 0x38e   : > { %v5052_v24 = vpop.eup %5051 }
 0x38f   : > { %v5054_v15 = vpop.eup %5053  ;;  %4946 = vst.msk [vmem:[%s7884_s24 + $0x50] sm:$0xff] %vm2693_vm0, %v5052_v24 }
 0x390   : > { %4947 = vst.msk [vmem:[%s7884_s24 + $0x58] sm:$0xff] %vm2693_vm0, %v5054_v15 }
 0x391   : > { %5111 = shalt.err (!%p5108_p12)
}
 0x392   : > { %s5112_s24 = scalar_lea.hbm %s9242_s6, 1536  ;;  %s5116_s22 = scalar_lea.hbm %s9299_s2, 3072 }
 0x393   : > { %p5113_p4 = scmp.ne.s32.totalorder %s9242_s6, %s5112_s24  ;;  %p5117_p10 = scmp.lt.u32.totalorder %s9242_s6, %s9299_s2 }
 0x394   : > { %p5118_p2 = scmp.lt.u32.totalorder %s5116_s22, %s5112_s24  ;;  %p5120_p8 = scmp.lt.u32.totalorder %s5112_s24, %s9242_s6 }
 0x395   : > { %p5114_p6 = pnand %p5113_p4, %p9340_p13 }
 0x396   : > { %p5119_p3 = por %p5118_p2, %p5117_p10 }
 0x397   : > { %p5115_p7 = pneg %p5114_p6 }
 0x398   : > { %p5121_p0 = por %p5120_p8, %p5119_p3 }
 0x39a   : > { %p5122_p5 = pnand %p5121_p0, %p5115_p7 }
 0x39c   : > { %5125 = shalt.err (!%p5122_p5)
}
 0x39d   : > { %s5191_s15 = smov 128   ;;  %s5192_s5 = smov 8  }
 0x39e   : > { %4960 = dma.vmem_to_hbm [thread:$0]  (%p9340_p13), %s9244_s19, 1536, %s9242_s6, %s4132_s25, %s5191_s15, %s5191_s15, %s5192_s5  }
 0x39f PF: > { %s4163_s16 = sand.u32 1, %s5164_s9   ;;  %p9341_p11 = scmp.ne.s32.totalorder %s9320_s21, 0 }
 0x3a0   : > { %p9342_p1 = scmp.ge.s32.totalorder %s5184_s14, 2  ;;  %s4164_s17 = scalar_lea.sflag [#allocation4], %s4163_s16 }
 0x3a2   : > { %p4971_p9 = pnand %p9342_p1, %p9341_p11 }
 0x3a4   : > { %5159 = dma.done.wait (!%p4971_p9), %s4164_s17, 1536  }
 0x3a5   : > { %5161 = vsyncadd (!%p4971_p9), %s4164_s17, 4294965760  ;;  %s19_s14 = sadd.s32 1, %s5184_s14   ;;  %s9343_s9 = smov %s5168_s10 }
 0x3a6   : > { %p16_p12 = scmp.ge.s32.totalorder %s19_s14, 4   ;;  %s9344_s10 = smov %s5172_s11 }
 0x3a7   : > { %s9345_s11 = smov %s5328_s28  ;;  %s9346_s12 = smov %s5180_s13 }
 0x3a8   : > { %s9347_s13 = smov %s9349_s26  ;;  %18 = sbr.rel (!%p16_p12) target bundleno = 7 (0x7), region = 86 }
 0x3af   :  { %4169 = vsyncpa [#allocation3], 1 }
 0x3b0   :  { %4171 = vsyncpa [#allocation3 + $0x1], 1 }
 0x3b1   :  { %4172 = vsyncpa [#allocation4], 1 }
 0x3b2   :  { %4174 = vsyncpa [#allocation4 + $0x1], 1 }
 0x3b3   :  { %4175 = vsyncpa [#allocation5], 1 }
 0x3b4   :  { %4177 = vsyncpa [#allocation5 + $0x1], 1 }

</bundles_post_ra>
